<compile_context>
chip_gen: v7x
topology: tpu7x:2x2x1
jax: 0.10.0
libtpu: 0.0.40
codegen_flags: <defaults>
</compile_context>

<pallas_src>
import jax
import jax.numpy as jnp
from jax.experimental import pallas as pl
from jax.experimental.pallas import tpu as pltpu


# ------------------------------ fused kernel -------------------------------

def _gfe_kernel(p1_ref, w1_ref, s1_ref, b1_ref, w2_ref, s2_ref, b2_ref,
                wf_ref, bf_ref, out_ref, p1_scr, y2_scr):
    BT = p1_ref.shape[0]

    # ---- stage 1: conv(1->32,k5) as im2col matmul + folded BN + ReLU + 2x2 pool ----
    # p1_ref rows (per image): po*64 + wq*16 + pw   (wq = 2x2 window element,
    # pw padded 12->16, K padded 25->32).
    p1 = p1_ref[...].reshape(BT * 768, 32)
    y1 = jnp.dot(p1, w1_ref[...], preferred_element_type=jnp.float32)   # [BT*768, 32]
    y1 = jnp.maximum(y1 * s1_ref[...] + b1_ref[...], 0.0)
    y1 = y1.reshape(BT * 12, 4, 16, 32)                 # (b*po, wq, pw, c)
    pooled1 = jnp.maximum(jnp.maximum(y1[:, 0], y1[:, 1]),
                          jnp.maximum(y1[:, 2], y1[:, 3]))              # [BT*12, 16, 32]
    p1_scr[...] = pooled1.reshape(BT, 12, 16, 32)       # NHWC 12x12 map (w padded to 16)

    # ---- stage 2: conv(32->64,k5) via 25 shifted-window matmuls (in-kernel im2col) ----
    acc2 = jnp.zeros((BT * 64, 64), jnp.float32)        # rows: b*64 + oh*8 + ow
    for dh in range(5):
        for dw in range(5):
            win = p1_scr[:, dh:dh + 8, dw:dw + 8, :]                    # [BT, 8, 8, 32]
            lhs = win.reshape(BT * 64, 32).astype(jnp.bfloat16)
            acc2 = acc2 + jnp.dot(lhs, w2_ref[dh * 5 + dw],
                                  preferred_element_type=jnp.float32)
    y2 = jnp.maximum(acc2 * s2_ref[...] + b2_ref[...], 0.0)             # [BT*64, 64]
    y2_scr[...] = y2.reshape(BT, 64, 64)

    # ---- 2x2 max-pool fused into Linear(1024->512): 16 pooled positions ----
    acc = jnp.zeros((BT, 512), jnp.float32)
    for h in range(4):
        for w in range(4):
            r = h * 16 + 2 * w
            a = jnp.maximum(jnp.maximum(y2_scr[:, r, :], y2_scr[:, r + 1, :]),
                            jnp.maximum(y2_scr[:, r + 8, :], y2_scr[:, r + 9, :]))
            acc = acc + jnp.dot(a.astype(jnp.bfloat16), wf_ref[h * 4 + w],
                                preferred_element_type=jnp.float32)
    out_ref[...] = acc + bf_ref[...]


def _fused_gfe(patches, prep, bt):
    Bp = patches.shape[0]
    grid = (Bp // bt,)
    return pl.pallas_call(
        _gfe_kernel,
        out_shape=jax.ShapeDtypeStruct((Bp, 512), jnp.float32),
        grid_spec=pltpu.PrefetchScalarGridSpec(
            num_scalar_prefetch=0,
            grid=grid,
            in_specs=[
                pl.BlockSpec((bt, 768, 32), lambda i: (i, 0, 0)),       # stage-1 patches
                pl.BlockSpec((32, 32), lambda i: (0, 0)),               # W1 (K-padded)
                pl.BlockSpec((1, 32), lambda i: (0, 0)),                # BN1 scale
                pl.BlockSpec((1, 32), lambda i: (0, 0)),                # BN1 bias
                pl.BlockSpec((25, 32, 64), lambda i: (0, 0, 0)),        # W2 per-offset
                pl.BlockSpec((1, 64), lambda i: (0, 0)),                # BN2 scale
                pl.BlockSpec((1, 64), lambda i: (0, 0)),                # BN2 bias
                pl.BlockSpec((16, 64, 512), lambda i: (0, 0, 0)),       # FC weight (perm.)
                pl.BlockSpec((1, 512), lambda i: (0, 0)),               # FC bias
            ],
            out_specs=pl.BlockSpec((bt, 512), lambda i: (i, 0)),
            scratch_shapes=[
                pltpu.VMEM((bt, 12, 16, 32), jnp.float32),              # pooled stage-1 map
                pltpu.VMEM((bt, 64, 64), jnp.float32),                  # stage-2 conv output
            ],
        ),
        compiler_params=pltpu.CompilerParams(dimension_semantics=("parallel",)),
    )(patches, prep["w1"], prep["s1"], prep["b1"],
      prep["w2"], prep["s2"], prep["b2"], prep["wf"], prep["bf"])


# ------------------------------- JAX glue ----------------------------------

def _stage1_patches(x2d):
    # x2d: [B, 28, 28] f32 -> im2col patches [B, 768, 32]
    # row = po*64 + (dh2*2 + dw2)*16 + pw  (conv out (oh,ow) = (2po+dh2, 2pw+dw2)),
    # pw padded 12 -> 16, K padded 25 -> 32.
    B = x2d.shape[0]
    cols = [x2d[:, kh:kh + 24, kw:kw + 24] for kh in range(5) for kw in range(5)]
    p = jnp.stack(cols, axis=-1)                                   # [B, 24, 24, 25]
    p = jnp.pad(p, ((0, 0), (0, 0), (0, 0), (0, 7)))               # K -> 32
    p = p.reshape(B, 12, 2, 12, 2, 32)                             # (b, po, dh2, pw, dw2, k)
    p = p.transpose(0, 1, 2, 4, 3, 5)                              # (b, po, dh2, dw2, pw, k)
    p = jnp.pad(p, ((0, 0), (0, 0), (0, 0), (0, 0), (0, 4), (0, 0)))  # pw -> 16
    return p.reshape(B, 768, 32)


def prepare_params(p, eps=1e-5):
    """One-time weight preprocessing (hoisted out of the forward)."""
    s1 = p["g1"] / jnp.sqrt(p["v1"] + eps)
    c1 = p["be1"] + s1 * (p["b1"] - p["m1"])
    s2 = p["g2"] / jnp.sqrt(p["v2"] + eps)
    c2 = p["be2"] + s2 * (p["b2"] - p["m2"])
    w1 = jnp.transpose(p["W1"], (2, 3, 1, 0)).reshape(25, 32)      # [k, cout]
    w1 = jnp.pad(w1, ((0, 7), (0, 0)))                             # K 25 -> 32
    w2 = jnp.transpose(p["W2"], (2, 3, 1, 0)).reshape(25, 32, 64)  # [k, cin, cout]
    # FC weight permuted so it consumes the NHWC-flattened pooled map directly:
    # wf[h*4+w, c, e] = Wf[e, c*16 + h*4 + w]
    wf = jnp.transpose(p["Wf"].reshape(512, 64, 16), (2, 1, 0))    # [hw, c, e]
    return dict(
        w1=w1.astype(jnp.bfloat16),
        w2=w2.astype(jnp.bfloat16),
        wf=wf.astype(jnp.bfloat16),
        s1=s1.reshape(1, 32).astype(jnp.float32),
        b1=c1.reshape(1, 32).astype(jnp.float32),
        s2=s2.reshape(1, 64).astype(jnp.float32),
        b2=c2.reshape(1, 64).astype(jnp.float32),
        bf=p["bf"].reshape(1, 512).astype(jnp.float32),
    )


def gfe_forward(x_nchw, prep, *, batch_tile=8):
    B = x_nchw.shape[0]
    bt = B if B <= batch_tile else batch_tile
    Bp = ((B + bt - 1) // bt) * bt
    x2d = x_nchw[:, 0].astype(jnp.float32)                         # [B, 28, 28]
    patches = _stage1_patches(x2d).astype(jnp.bfloat16)            # [B, 768, 32]
    if Bp != B:
        patches = jnp.pad(patches, ((0, Bp - B), (0, 0), (0, 0)))
    out = _fused_gfe(patches, prep, bt)
    return out[:B]


# --------------------------- pure-JAX reference ----------------------------

def reference(x_nchw, p, eps=1e-5):
    x = jnp.transpose(x_nchw, (0, 2, 3, 1)).astype(jnp.float32)

    def conv(x, w_oihw, b):
        w = jnp.transpose(w_oihw, (2, 3, 1, 0))                    # HWIO
        y = jax.lax.conv_general_dilated(
            x, w, (1, 1), "VALID", dimension_numbers=("NHWC", "HWIO", "NHWC"))
        return y + b

    def bn(y, g, be, m, v):
        return (y - m) / jnp.sqrt(v + eps) * g + be

    def pool(y):
        return jax.lax.reduce_window(y, -jnp.inf, jax.lax.max,
                                     (1, 2, 2, 1), (1, 2, 2, 1), "VALID")

    y = pool(jnp.maximum(bn(conv(x, p["W1"], p["b1"]),
                            p["g1"], p["be1"], p["m1"], p["v1"]), 0.0))
    y = pool(jnp.maximum(bn(conv(y, p["W2"], p["b2"]),
                            p["g2"], p["be2"], p["m2"], p["v2"]), 0.0))
    z = jnp.transpose(y, (0, 3, 1, 2)).reshape(x.shape[0], -1)
    return z @ p["Wf"].T + p["bf"]


# ------------------------------- params ------------------------------------

def init_params(key):
    ks = jax.random.split(key, 14)

    def n(k, shape, s=0.1):
        return s * jax.random.normal(k, shape, jnp.float32)

    return dict(
        W1=n(ks[0], (32, 1, 5, 5)), b1=n(ks[1], (32,)),
        g1=1.0 + n(ks[2], (32,)), be1=n(ks[3], (32,)),
        m1=n(ks[4], (32,)),
        v1=jax.random.uniform(ks[5], (32,), jnp.float32, 0.5, 1.5),
        W2=n(ks[6], (64, 32, 5, 5), 0.05), b2=n(ks[7], (64,)),
        g2=1.0 + n(ks[8], (64,)), be2=n(ks[9], (64,)),
        m2=n(ks[10], (64,)),
        v2=jax.random.uniform(ks[11], (64,), jnp.float32, 0.5, 1.5),
        Wf=0.02 * jax.random.normal(ks[12], (512, 1024), jnp.float32),
        bf=0.02 * jax.random.normal(ks[13], (512,), jnp.float32),
    )


if __name__ == "__main__":
    key = jax.random.PRNGKey(0)
    kx, kp = jax.random.split(key)
    # Input consistent with hidden_size=1024: 28x28 single-channel images (NCHW).
    x = jax.random.normal(kx, (2, 1, 28, 28), jnp.float32)
    params = init_params(kp)
    prep = jax.tree_util.tree_map(jax.block_until_ready, prepare_params(params))

    fwd = jax.jit(gfe_forward)
    out = jax.block_until_ready(fwd(x, prep))
    ref = jax.block_until_ready(reference(x, params))

    assert out.shape == (2, 512), out.shape
    err = float(jnp.max(jnp.abs(out - ref)))
    # bf16 MXU inputs with f32 accumulation -> looser tolerance than pure f32.
    assert err < 6e-2, f"max abs error {err}"
    print("KERNEL_OK")
</pallas_src>

<mosaic_0001>
module attributes {stable_mosaic.version = 11 : i64} {
  func.func @_gfe_kernel(%arg0: i32, %arg1: memref<2x768x32xbf16, #tpu.memory_space<vmem>>, %arg2: memref<32x32xbf16, #tpu.memory_space<vmem>>, %arg3: memref<1x32xf32, #tpu.memory_space<vmem>>, %arg4: memref<1x32xf32, #tpu.memory_space<vmem>>, %arg5: memref<25x32x64xbf16, #tpu.memory_space<vmem>>, %arg6: memref<1x64xf32, #tpu.memory_space<vmem>>, %arg7: memref<1x64xf32, #tpu.memory_space<vmem>>, %arg8: memref<16x64x512xbf16, #tpu.memory_space<vmem>>, %arg9: memref<1x512xf32, #tpu.memory_space<vmem>>, %arg10: memref<2x512xf32, #tpu.memory_space<vmem>>, %arg11: memref<2x12x16x32xf32, #tpu.memory_space<vmem>>, %arg12: memref<2x64x64xf32, #tpu.memory_space<vmem>>) attributes {dimension_semantics = [#tpu.dimension_semantics<parallel>], iteration_bounds = array<i64: 1>, scalar_prefetch = 0 : i64, scratch_operands = 2 : i64, tpu.core_type = #tpu.core_type<tc>, window_params = [{transform_indices = @transform_0, window_bounds = array<i64: 2, 768, 32>}, {pipeline_mode = #tpu.pipeline_mode<synchronous>, transform_indices = @transform_1, window_bounds = array<i64: 32, 32>}, {pipeline_mode = #tpu.pipeline_mode<synchronous>, transform_indices = @transform_2, window_bounds = array<i64: 1, 32>}, {pipeline_mode = #tpu.pipeline_mode<synchronous>, transform_indices = @transform_3, window_bounds = array<i64: 1, 32>}, {pipeline_mode = #tpu.pipeline_mode<synchronous>, transform_indices = @transform_4, window_bounds = array<i64: 25, 32, 64>}, {pipeline_mode = #tpu.pipeline_mode<synchronous>, transform_indices = @transform_5, window_bounds = array<i64: 1, 64>}, {pipeline_mode = #tpu.pipeline_mode<synchronous>, transform_indices = @transform_6, window_bounds = array<i64: 1, 64>}, {pipeline_mode = #tpu.pipeline_mode<synchronous>, transform_indices = @transform_7, window_bounds = array<i64: 16, 64, 512>}, {pipeline_mode = #tpu.pipeline_mode<synchronous>, transform_indices = @transform_8, window_bounds = array<i64: 1, 512>}, {transform_indices = @transform_9, window_bounds = array<i64: 2, 512>}]} {
    %c0 = arith.constant 0 : index
    %c0_0 = arith.constant 0 : index
    %c0_1 = arith.constant 0 : index
    %0 = vector.load %arg1[%c0, %c0_0, %c0_1] : memref<2x768x32xbf16, #tpu.memory_space<vmem>>, vector<2x768x32xbf16>
    %1 = vector.shape_cast %0 : vector<2x768x32xbf16> to vector<1536x32xbf16>
    %c0_2 = arith.constant 0 : index
    %c0_3 = arith.constant 0 : index
    %2 = vector.load %arg2[%c0_2, %c0_3] : memref<32x32xbf16, #tpu.memory_space<vmem>>, vector<32x32xbf16>
    %cst = arith.constant dense<0.000000e+00> : vector<1536x32xf32>
    %3 = tpu.matmul %1, %2, %cst {dimension_numbers = #tpu.dot_dimension_numbers<[1], [0], [0], [1], [0, 0, 1, 1], [], []>} : vector<1536x32xbf16>, vector<32x32xbf16>, vector<1536x32xf32> -> vector<1536x32xf32>
    %c0_4 = arith.constant 0 : index
    %c0_5 = arith.constant 0 : index
    %4 = vector.load %arg3[%c0_4, %c0_5] : memref<1x32xf32, #tpu.memory_space<vmem>>, vector<1x32xf32>
    %5 = vector.broadcast %4 : vector<1x32xf32> to vector<1536x32xf32>
    %6 = arith.mulf %3, %5 : vector<1536x32xf32>
    %c0_6 = arith.constant 0 : index
    %c0_7 = arith.constant 0 : index
    %7 = vector.load %arg4[%c0_6, %c0_7] : memref<1x32xf32, #tpu.memory_space<vmem>>, vector<1x32xf32>
    %8 = vector.broadcast %7 : vector<1x32xf32> to vector<1536x32xf32>
    %9 = arith.addf %6, %8 : vector<1536x32xf32>
    %cst_8 = arith.constant 0.000000e+00 : f32
    %10 = vector.broadcast %cst_8 : f32 to vector<1536x32xf32>
    %11 = arith.maximumf %9, %10 : vector<1536x32xf32>
    %12 = vector.shape_cast %11 : vector<1536x32xf32> to vector<24x4x16x32xf32>
    %13 = vector.extract_strided_slice %12 {offsets = [0, 0, 0, 0], sizes = [24, 1, 16, 32], strides = [1, 1, 1, 1]} : vector<24x4x16x32xf32> to vector<24x1x16x32xf32>
    %14 = vector.shape_cast %13 : vector<24x1x16x32xf32> to vector<24x16x32xf32>
    %15 = vector.extract_strided_slice %12 {offsets = [0, 1, 0, 0], sizes = [24, 1, 16, 32], strides = [1, 1, 1, 1]} : vector<24x4x16x32xf32> to vector<24x1x16x32xf32>
    %16 = vector.shape_cast %15 : vector<24x1x16x32xf32> to vector<24x16x32xf32>
    %17 = arith.maximumf %14, %16 : vector<24x16x32xf32>
    %18 = vector.extract_strided_slice %12 {offsets = [0, 2, 0, 0], sizes = [24, 1, 16, 32], strides = [1, 1, 1, 1]} : vector<24x4x16x32xf32> to vector<24x1x16x32xf32>
    %19 = vector.shape_cast %18 : vector<24x1x16x32xf32> to vector<24x16x32xf32>
    %20 = vector.extract_strided_slice %12 {offsets = [0, 3, 0, 0], sizes = [24, 1, 16, 32], strides = [1, 1, 1, 1]} : vector<24x4x16x32xf32> to vector<24x1x16x32xf32>
    %21 = vector.shape_cast %20 : vector<24x1x16x32xf32> to vector<24x16x32xf32>
    %22 = arith.maximumf %19, %21 : vector<24x16x32xf32>
    %23 = arith.maximumf %17, %22 : vector<24x16x32xf32>
    %24 = vector.shape_cast %23 : vector<24x16x32xf32> to vector<2x12x16x32xf32>
    %c0_9 = arith.constant 0 : index
    %c0_10 = arith.constant 0 : index
    %c0_11 = arith.constant 0 : index
    %c0_12 = arith.constant 0 : index
    %25 = vector.load %arg11[%c0_9, %c0_10, %c0_11, %c0_12] : memref<2x12x16x32xf32, #tpu.memory_space<vmem>>, vector<2x12x16x32xf32>
    tpu.vector_store %arg11[%c0_9, %c0_10, %c0_11, %c0_12], %24 {strides = array<i32>} : memref<2x12x16x32xf32, #tpu.memory_space<vmem>>, vector<2x12x16x32xf32>,
    %cst_13 = arith.constant 0.000000e+00 : f32
    %26 = vector.broadcast %cst_13 : f32 to vector<128x64xf32>
    %c0_14 = arith.constant 0 : index
    %c0_15 = arith.constant 0 : index
    %c0_16 = arith.constant 0 : index
    %c0_17 = arith.constant 0 : index
    %27 = vector.load %arg11[%c0_14, %c0_15, %c0_16, %c0_17] : memref<2x12x16x32xf32, #tpu.memory_space<vmem>>, vector<2x8x8x32xf32>
    %28 = vector.shape_cast %27 : vector<2x8x8x32xf32> to vector<128x32xf32>
    %29 = arith.truncf %28 : vector<128x32xf32> to vector<128x32xbf16>
    %c0_18 = arith.constant 0 : index
    %c0_19 = arith.constant 0 : index
    %c0_20 = arith.constant 0 : index
    %30 = vector.load %arg5[%c0_18, %c0_19, %c0_20] : memref<25x32x64xbf16, #tpu.memory_space<vmem>>, vector<1x32x64xbf16>
    %31 = vector.shape_cast %30 : vector<1x32x64xbf16> to vector<32x64xbf16>
    %cst_21 = arith.constant dense<0.000000e+00> : vector<128x64xf32>
    %32 = tpu.matmul %29, %31, %cst_21 {dimension_numbers = #tpu.dot_dimension_numbers<[1], [0], [0], [1], [0, 0, 1, 1], [], []>} : vector<128x32xbf16>, vector<32x64xbf16>, vector<128x64xf32> -> vector<128x64xf32>
    %33 = arith.addf %26, %32 : vector<128x64xf32>
    %c0_22 = arith.constant 0 : index
    %c0_23 = arith.constant 0 : index
    %c1 = arith.constant 1 : index
    %c0_24 = arith.constant 0 : index
    %34 = vector.load %arg11[%c0_22, %c0_23, %c1, %c0_24] : memref<2x12x16x32xf32, #tpu.memory_space<vmem>>, vector<2x8x8x32xf32>
    %35 = vector.shape_cast %34 : vector<2x8x8x32xf32> to vector<128x32xf32>
    %36 = arith.truncf %35 : vector<128x32xf32> to vector<128x32xbf16>
    %c1_25 = arith.constant 1 : index
    %c0_26 = arith.constant 0 : index
    %c0_27 = arith.constant 0 : index
    %37 = vector.load %arg5[%c1_25, %c0_26, %c0_27] : memref<25x32x64xbf16, #tpu.memory_space<vmem>>, vector<1x32x64xbf16>
    %38 = vector.shape_cast %37 : vector<1x32x64xbf16> to vector<32x64xbf16>
    %cst_28 = arith.constant dense<0.000000e+00> : vector<128x64xf32>
    %39 = tpu.matmul %36, %38, %cst_28 {dimension_numbers = #tpu.dot_dimension_numbers<[1], [0], [0], [1], [0, 0, 1, 1], [], []>} : vector<128x32xbf16>, vector<32x64xbf16>, vector<128x64xf32> -> vector<128x64xf32>
    %40 = arith.addf %33, %39 : vector<128x64xf32>
    %c0_29 = arith.constant 0 : index
    %c0_30 = arith.constant 0 : index
    %c2 = arith.constant 2 : index
    %c0_31 = arith.constant 0 : index
    %41 = vector.load %arg11[%c0_29, %c0_30, %c2, %c0_31] : memref<2x12x16x32xf32, #tpu.memory_space<vmem>>, vector<2x8x8x32xf32>
    %42 = vector.shape_cast %41 : vector<2x8x8x32xf32> to vector<128x32xf32>
    %43 = arith.truncf %42 : vector<128x32xf32> to vector<128x32xbf16>
    %c2_32 = arith.constant 2 : index
    %c0_33 = arith.constant 0 : index
    %c0_34 = arith.constant 0 : index
    %44 = vector.load %arg5[%c2_32, %c0_33, %c0_34] : memref<25x32x64xbf16, #tpu.memory_space<vmem>>, vector<1x32x64xbf16>
    %45 = vector.shape_cast %44 : vector<1x32x64xbf16> to vector<32x64xbf16>
    %cst_35 = arith.constant dense<0.000000e+00> : vector<128x64xf32>
    %46 = tpu.matmul %43, %45, %cst_35 {dimension_numbers = #tpu.dot_dimension_numbers<[1], [0], [0], [1], [0, 0, 1, 1], [], []>} : vector<128x32xbf16>, vector<32x64xbf16>, vector<128x64xf32> -> vector<128x64xf32>
    %47 = arith.addf %40, %46 : vector<128x64xf32>
    %c0_36 = arith.constant 0 : index
    %c0_37 = arith.constant 0 : index
    %c3 = arith.constant 3 : index
    %c0_38 = arith.constant 0 : index
    %48 = vector.load %arg11[%c0_36, %c0_37, %c3, %c0_38] : memref<2x12x16x32xf32, #tpu.memory_space<vmem>>, vector<2x8x8x32xf32>
    %49 = vector.shape_cast %48 : vector<2x8x8x32xf32> to vector<128x32xf32>
    %50 = arith.truncf %49 : vector<128x32xf32> to vector<128x32xbf16>
    %c3_39 = arith.constant 3 : index
    %c0_40 = arith.constant 0 : index
    %c0_41 = arith.constant 0 : index
    %51 = vector.load %arg5[%c3_39, %c0_40, %c0_41] : memref<25x32x64xbf16, #tpu.memory_space<vmem>>, vector<1x32x64xbf16>
    %52 = vector.shape_cast %51 : vector<1x32x64xbf16> to vector<32x64xbf16>
    %cst_42 = arith.constant dense<0.000000e+00> : vector<128x64xf32>
    %53 = tpu.matmul %50, %52, %cst_42 {dimension_numbers = #tpu.dot_dimension_numbers<[1], [0], [0], [1], [0, 0, 1, 1], [], []>} : vector<128x32xbf16>, vector<32x64xbf16>, vector<128x64xf32> -> vector<128x64xf32>
    %54 = arith.addf %47, %53 : vector<128x64xf32>
    %c0_43 = arith.constant 0 : index
    %c0_44 = arith.constant 0 : index
    %c4 = arith.constant 4 : index
    %c0_45 = arith.constant 0 : index
    %55 = vector.load %arg11[%c0_43, %c0_44, %c4, %c0_45] : memref<2x12x16x32xf32, #tpu.memory_space<vmem>>, vector<2x8x8x32xf32>
    %56 = vector.shape_cast %55 : vector<2x8x8x32xf32> to vector<128x32xf32>
    %57 = arith.truncf %56 : vector<128x32xf32> to vector<128x32xbf16>
    %c4_46 = arith.constant 4 : index
    %c0_47 = arith.constant 0 : index
    %c0_48 = arith.constant 0 : index
    %58 = vector.load %arg5[%c4_46, %c0_47, %c0_48] : memref<25x32x64xbf16, #tpu.memory_space<vmem>>, vector<1x32x64xbf16>
    %59 = vector.shape_cast %58 : vector<1x32x64xbf16> to vector<32x64xbf16>
    %cst_49 = arith.constant dense<0.000000e+00> : vector<128x64xf32>
    %60 = tpu.matmul %57, %59, %cst_49 {dimension_numbers = #tpu.dot_dimension_numbers<[1], [0], [0], [1], [0, 0, 1, 1], [], []>} : vector<128x32xbf16>, vector<32x64xbf16>, vector<128x64xf32> -> vector<128x64xf32>
    %61 = arith.addf %54, %60 : vector<128x64xf32>
    %c0_50 = arith.constant 0 : index
    %c1_51 = arith.constant 1 : index
    %c0_52 = arith.constant 0 : index
    %c0_53 = arith.constant 0 : index
    %62 = vector.load %arg11[%c0_50, %c1_51, %c0_52, %c0_53] : memref<2x12x16x32xf32, #tpu.memory_space<vmem>>, vector<2x8x8x32xf32>
    %63 = vector.shape_cast %62 : vector<2x8x8x32xf32> to vector<128x32xf32>
    %64 = arith.truncf %63 : vector<128x32xf32> to vector<128x32xbf16>
    %c5 = arith.constant 5 : index
    %c0_54 = arith.constant 0 : index
    %c0_55 = arith.constant 0 : index
    %65 = vector.load %arg5[%c5, %c0_54, %c0_55] : memref<25x32x64xbf16, #tpu.memory_space<vmem>>, vector<1x32x64xbf16>
    %66 = vector.shape_cast %65 : vector<1x32x64xbf16> to vector<32x64xbf16>
    %cst_56 = arith.constant dense<0.000000e+00> : vector<128x64xf32>
    %67 = tpu.matmul %64, %66, %cst_56 {dimension_numbers = #tpu.dot_dimension_numbers<[1], [0], [0], [1], [0, 0, 1, 1], [], []>} : vector<128x32xbf16>, vector<32x64xbf16>, vector<128x64xf32> -> vector<128x64xf32>
    %68 = arith.addf %61, %67 : vector<128x64xf32>
    %c0_57 = arith.constant 0 : index
    %c1_58 = arith.constant 1 : index
    %c1_59 = arith.constant 1 : index
    %c0_60 = arith.constant 0 : index
    %69 = vector.load %arg11[%c0_57, %c1_58, %c1_59, %c0_60] : memref<2x12x16x32xf32, #tpu.memory_space<vmem>>, vector<2x8x8x32xf32>
    %70 = vector.shape_cast %69 : vector<2x8x8x32xf32> to vector<128x32xf32>
    %71 = arith.truncf %70 : vector<128x32xf32> to vector<128x32xbf16>
    %c6 = arith.constant 6 : index
    %c0_61 = arith.constant 0 : index
    %c0_62 = arith.constant 0 : index
    %72 = vector.load %arg5[%c6, %c0_61, %c0_62] : memref<25x32x64xbf16, #tpu.memory_space<vmem>>, vector<1x32x64xbf16>
    %73 = vector.shape_cast %72 : vector<1x32x64xbf16> to vector<32x64xbf16>
    %cst_63 = arith.constant dense<0.000000e+00> : vector<128x64xf32>
    %74 = tpu.matmul %71, %73, %cst_63 {dimension_numbers = #tpu.dot_dimension_numbers<[1], [0], [0], [1], [0, 0, 1, 1], [], []>} : vector<128x32xbf16>, vector<32x64xbf16>, vector<128x64xf32> -> vector<128x64xf32>
    %75 = arith.addf %68, %74 : vector<128x64xf32>
    %c0_64 = arith.constant 0 : index
    %c1_65 = arith.constant 1 : index
    %c2_66 = arith.constant 2 : index
    %c0_67 = arith.constant 0 : index
    %76 = vector.load %arg11[%c0_64, %c1_65, %c2_66, %c0_67] : memref<2x12x16x32xf32, #tpu.memory_space<vmem>>, vector<2x8x8x32xf32>
    %77 = vector.shape_cast %76 : vector<2x8x8x32xf32> to vector<128x32xf32>
    %78 = arith.truncf %77 : vector<128x32xf32> to vector<128x32xbf16>
    %c7 = arith.constant 7 : index
    %c0_68 = arith.constant 0 : index
    %c0_69 = arith.constant 0 : index
    %79 = vector.load %arg5[%c7, %c0_68, %c0_69] : memref<25x32x64xbf16, #tpu.memory_space<vmem>>, vector<1x32x64xbf16>
    %80 = vector.shape_cast %79 : vector<1x32x64xbf16> to vector<32x64xbf16>
    %cst_70 = arith.constant dense<0.000000e+00> : vector<128x64xf32>
    %81 = tpu.matmul %78, %80, %cst_70 {dimension_numbers = #tpu.dot_dimension_numbers<[1], [0], [0], [1], [0, 0, 1, 1], [], []>} : vector<128x32xbf16>, vector<32x64xbf16>, vector<128x64xf32> -> vector<128x64xf32>
    %82 = arith.addf %75, %81 : vector<128x64xf32>
    %c0_71 = arith.constant 0 : index
    %c1_72 = arith.constant 1 : index
    %c3_73 = arith.constant 3 : index
    %c0_74 = arith.constant 0 : index
    %83 = vector.load %arg11[%c0_71, %c1_72, %c3_73, %c0_74] : memref<2x12x16x32xf32, #tpu.memory_space<vmem>>, vector<2x8x8x32xf32>
    %84 = vector.shape_cast %83 : vector<2x8x8x32xf32> to vector<128x32xf32>
    %85 = arith.truncf %84 : vector<128x32xf32> to vector<128x32xbf16>
    %c8 = arith.constant 8 : index
    %c0_75 = arith.constant 0 : index
    %c0_76 = arith.constant 0 : index
    %86 = vector.load %arg5[%c8, %c0_75, %c0_76] : memref<25x32x64xbf16, #tpu.memory_space<vmem>>, vector<1x32x64xbf16>
    %87 = vector.shape_cast %86 : vector<1x32x64xbf16> to vector<32x64xbf16>
    %cst_77 = arith.constant dense<0.000000e+00> : vector<128x64xf32>
    %88 = tpu.matmul %85, %87, %cst_77 {dimension_numbers = #tpu.dot_dimension_numbers<[1], [0], [0], [1], [0, 0, 1, 1], [], []>} : vector<128x32xbf16>, vector<32x64xbf16>, vector<128x64xf32> -> vector<128x64xf32>
    %89 = arith.addf %82, %88 : vector<128x64xf32>
    %c0_78 = arith.constant 0 : index
    %c1_79 = arith.constant 1 : index
    %c4_80 = arith.constant 4 : index
    %c0_81 = arith.constant 0 : index
    %90 = vector.load %arg11[%c0_78, %c1_79, %c4_80, %c0_81] : memref<2x12x16x32xf32, #tpu.memory_space<vmem>>, vector<2x8x8x32xf32>
    %91 = vector.shape_cast %90 : vector<2x8x8x32xf32> to vector<128x32xf32>
    %92 = arith.truncf %91 : vector<128x32xf32> to vector<128x32xbf16>
    %c9 = arith.constant 9 : index
    %c0_82 = arith.constant 0 : index
    %c0_83 = arith.constant 0 : index
    %93 = vector.load %arg5[%c9, %c0_82, %c0_83] : memref<25x32x64xbf16, #tpu.memory_space<vmem>>, vector<1x32x64xbf16>
    %94 = vector.shape_cast %93 : vector<1x32x64xbf16> to vector<32x64xbf16>
    %cst_84 = arith.constant dense<0.000000e+00> : vector<128x64xf32>
    %95 = tpu.matmul %92, %94, %cst_84 {dimension_numbers = #tpu.dot_dimension_numbers<[1], [0], [0], [1], [0, 0, 1, 1], [], []>} : vector<128x32xbf16>, vector<32x64xbf16>, vector<128x64xf32> -> vector<128x64xf32>
    %96 = arith.addf %89, %95 : vector<128x64xf32>
    %c0_85 = arith.constant 0 : index
    %c2_86 = arith.constant 2 : index
    %c0_87 = arith.constant 0 : index
    %c0_88 = arith.constant 0 : index
    %97 = vector.load %arg11[%c0_85, %c2_86, %c0_87, %c0_88] : memref<2x12x16x32xf32, #tpu.memory_space<vmem>>, vector<2x8x8x32xf32>
    %98 = vector.shape_cast %97 : vector<2x8x8x32xf32> to vector<128x32xf32>
    %99 = arith.truncf %98 : vector<128x32xf32> to vector<128x32xbf16>
    %c10 = arith.constant 10 : index
    %c0_89 = arith.constant 0 : index
    %c0_90 = arith.constant 0 : index
    %100 = vector.load %arg5[%c10, %c0_89, %c0_90] : memref<25x32x64xbf16, #tpu.memory_space<vmem>>, vector<1x32x64xbf16>
    %101 = vector.shape_cast %100 : vector<1x32x64xbf16> to vector<32x64xbf16>
    %cst_91 = arith.constant dense<0.000000e+00> : vector<128x64xf32>
    %102 = tpu.matmul %99, %101, %cst_91 {dimension_numbers = #tpu.dot_dimension_numbers<[1], [0], [0], [1], [0, 0, 1, 1], [], []>} : vector<128x32xbf16>, vector<32x64xbf16>, vector<128x64xf32> -> vector<128x64xf32>
    %103 = arith.addf %96, %102 : vector<128x64xf32>
    %c0_92 = arith.constant 0 : index
    %c2_93 = arith.constant 2 : index
    %c1_94 = arith.constant 1 : index
    %c0_95 = arith.constant 0 : index
    %104 = vector.load %arg11[%c0_92, %c2_93, %c1_94, %c0_95] : memref<2x12x16x32xf32, #tpu.memory_space<vmem>>, vector<2x8x8x32xf32>
    %105 = vector.shape_cast %104 : vector<2x8x8x32xf32> to vector<128x32xf32>
    %106 = arith.truncf %105 : vector<128x32xf32> to vector<128x32xbf16>
    %c11 = arith.constant 11 : index
    %c0_96 = arith.constant 0 : index
    %c0_97 = arith.constant 0 : index
    %107 = vector.load %arg5[%c11, %c0_96, %c0_97] : memref<25x32x64xbf16, #tpu.memory_space<vmem>>, vector<1x32x64xbf16>
    %108 = vector.shape_cast %107 : vector<1x32x64xbf16> to vector<32x64xbf16>
    %cst_98 = arith.constant dense<0.000000e+00> : vector<128x64xf32>
    %109 = tpu.matmul %106, %108, %cst_98 {dimension_numbers = #tpu.dot_dimension_numbers<[1], [0], [0], [1], [0, 0, 1, 1], [], []>} : vector<128x32xbf16>, vector<32x64xbf16>, vector<128x64xf32> -> vector<128x64xf32>
    %110 = arith.addf %103, %109 : vector<128x64xf32>
    %c0_99 = arith.constant 0 : index
    %c2_100 = arith.constant 2 : index
    %c2_101 = arith.constant 2 : index
    %c0_102 = arith.constant 0 : index
    %111 = vector.load %arg11[%c0_99, %c2_100, %c2_101, %c0_102] : memref<2x12x16x32xf32, #tpu.memory_space<vmem>>, vector<2x8x8x32xf32>
    %112 = vector.shape_cast %111 : vector<2x8x8x32xf32> to vector<128x32xf32>
    %113 = arith.truncf %112 : vector<128x32xf32> to vector<128x32xbf16>
    %c12 = arith.constant 12 : index
    %c0_103 = arith.constant 0 : index
    %c0_104 = arith.constant 0 : index
    %114 = vector.load %arg5[%c12, %c0_103, %c0_104] : memref<25x32x64xbf16, #tpu.memory_space<vmem>>, vector<1x32x64xbf16>
    %115 = vector.shape_cast %114 : vector<1x32x64xbf16> to vector<32x64xbf16>
    %cst_105 = arith.constant dense<0.000000e+00> : vector<128x64xf32>
    %116 = tpu.matmul %113, %115, %cst_105 {dimension_numbers = #tpu.dot_dimension_numbers<[1], [0], [0], [1], [0, 0, 1, 1], [], []>} : vector<128x32xbf16>, vector<32x64xbf16>, vector<128x64xf32> -> vector<128x64xf32>
    %117 = arith.addf %110, %116 : vector<128x64xf32>
    %c0_106 = arith.constant 0 : index
    %c2_107 = arith.constant 2 : index
    %c3_108 = arith.constant 3 : index
    %c0_109 = arith.constant 0 : index
    %118 = vector.load %arg11[%c0_106, %c2_107, %c3_108, %c0_109] : memref<2x12x16x32xf32, #tpu.memory_space<vmem>>, vector<2x8x8x32xf32>
    %119 = vector.shape_cast %118 : vector<2x8x8x32xf32> to vector<128x32xf32>
    %120 = arith.truncf %119 : vector<128x32xf32> to vector<128x32xbf16>
    %c13 = arith.constant 13 : index
    %c0_110 = arith.constant 0 : index
    %c0_111 = arith.constant 0 : index
    %121 = vector.load %arg5[%c13, %c0_110, %c0_111] : memref<25x32x64xbf16, #tpu.memory_space<vmem>>, vector<1x32x64xbf16>
    %122 = vector.shape_cast %121 : vector<1x32x64xbf16> to vector<32x64xbf16>
    %cst_112 = arith.constant dense<0.000000e+00> : vector<128x64xf32>
    %123 = tpu.matmul %120, %122, %cst_112 {dimension_numbers = #tpu.dot_dimension_numbers<[1], [0], [0], [1], [0, 0, 1, 1], [], []>} : vector<128x32xbf16>, vector<32x64xbf16>, vector<128x64xf32> -> vector<128x64xf32>
    %124 = arith.addf %117, %123 : vector<128x64xf32>
    %c0_113 = arith.constant 0 : index
    %c2_114 = arith.constant 2 : index
    %c4_115 = arith.constant 4 : index
    %c0_116 = arith.constant 0 : index
    %125 = vector.load %arg11[%c0_113, %c2_114, %c4_115, %c0_116] : memref<2x12x16x32xf32, #tpu.memory_space<vmem>>, vector<2x8x8x32xf32>
    %126 = vector.shape_cast %125 : vector<2x8x8x32xf32> to vector<128x32xf32>
    %127 = arith.truncf %126 : vector<128x32xf32> to vector<128x32xbf16>
    %c14 = arith.constant 14 : index
    %c0_117 = arith.constant 0 : index
    %c0_118 = arith.constant 0 : index
    %128 = vector.load %arg5[%c14, %c0_117, %c0_118] : memref<25x32x64xbf16, #tpu.memory_space<vmem>>, vector<1x32x64xbf16>
    %129 = vector.shape_cast %128 : vector<1x32x64xbf16> to vector<32x64xbf16>
    %cst_119 = arith.constant dense<0.000000e+00> : vector<128x64xf32>
    %130 = tpu.matmul %127, %129, %cst_119 {dimension_numbers = #tpu.dot_dimension_numbers<[1], [0], [0], [1], [0, 0, 1, 1], [], []>} : vector<128x32xbf16>, vector<32x64xbf16>, vector<128x64xf32> -> vector<128x64xf32>
    %131 = arith.addf %124, %130 : vector<128x64xf32>
    %c0_120 = arith.constant 0 : index
    %c3_121 = arith.constant 3 : index
    %c0_122 = arith.constant 0 : index
    %c0_123 = arith.constant 0 : index
    %132 = vector.load %arg11[%c0_120, %c3_121, %c0_122, %c0_123] : memref<2x12x16x32xf32, #tpu.memory_space<vmem>>, vector<2x8x8x32xf32>
    %133 = vector.shape_cast %132 : vector<2x8x8x32xf32> to vector<128x32xf32>
    %134 = arith.truncf %133 : vector<128x32xf32> to vector<128x32xbf16>
    %c15 = arith.constant 15 : index
    %c0_124 = arith.constant 0 : index
    %c0_125 = arith.constant 0 : index
    %135 = vector.load %arg5[%c15, %c0_124, %c0_125] : memref<25x32x64xbf16, #tpu.memory_space<vmem>>, vector<1x32x64xbf16>
    %136 = vector.shape_cast %135 : vector<1x32x64xbf16> to vector<32x64xbf16>
    %cst_126 = arith.constant dense<0.000000e+00> : vector<128x64xf32>
    %137 = tpu.matmul %134, %136, %cst_126 {dimension_numbers = #tpu.dot_dimension_numbers<[1], [0], [0], [1], [0, 0, 1, 1], [], []>} : vector<128x32xbf16>, vector<32x64xbf16>, vector<128x64xf32> -> vector<128x64xf32>
    %138 = arith.addf %131, %137 : vector<128x64xf32>
    %c0_127 = arith.constant 0 : index
    %c3_128 = arith.constant 3 : index
    %c1_129 = arith.constant 1 : index
    %c0_130 = arith.constant 0 : index
    %139 = vector.load %arg11[%c0_127, %c3_128, %c1_129, %c0_130] : memref<2x12x16x32xf32, #tpu.memory_space<vmem>>, vector<2x8x8x32xf32>
    %140 = vector.shape_cast %139 : vector<2x8x8x32xf32> to vector<128x32xf32>
    %141 = arith.truncf %140 : vector<128x32xf32> to vector<128x32xbf16>
    %c16 = arith.constant 16 : index
    %c0_131 = arith.constant 0 : index
    %c0_132 = arith.constant 0 : index
    %142 = vector.load %arg5[%c16, %c0_131, %c0_132] : memref<25x32x64xbf16, #tpu.memory_space<vmem>>, vector<1x32x64xbf16>
    %143 = vector.shape_cast %142 : vector<1x32x64xbf16> to vector<32x64xbf16>
    %cst_133 = arith.constant dense<0.000000e+00> : vector<128x64xf32>
    %144 = tpu.matmul %141, %143, %cst_133 {dimension_numbers = #tpu.dot_dimension_numbers<[1], [0], [0], [1], [0, 0, 1, 1], [], []>} : vector<128x32xbf16>, vector<32x64xbf16>, vector<128x64xf32> -> vector<128x64xf32>
    %145 = arith.addf %138, %144 : vector<128x64xf32>
    %c0_134 = arith.constant 0 : index
    %c3_135 = arith.constant 3 : index
    %c2_136 = arith.constant 2 : index
    %c0_137 = arith.constant 0 : index
    %146 = vector.load %arg11[%c0_134, %c3_135, %c2_136, %c0_137] : memref<2x12x16x32xf32, #tpu.memory_space<vmem>>, vector<2x8x8x32xf32>
    %147 = vector.shape_cast %146 : vector<2x8x8x32xf32> to vector<128x32xf32>
    %148 = arith.truncf %147 : vector<128x32xf32> to vector<128x32xbf16>
    %c17 = arith.constant 17 : index
    %c0_138 = arith.constant 0 : index
    %c0_139 = arith.constant 0 : index
    %149 = vector.load %arg5[%c17, %c0_138, %c0_139] : memref<25x32x64xbf16, #tpu.memory_space<vmem>>, vector<1x32x64xbf16>
    %150 = vector.shape_cast %149 : vector<1x32x64xbf16> to vector<32x64xbf16>
    %cst_140 = arith.constant dense<0.000000e+00> : vector<128x64xf32>
    %151 = tpu.matmul %148, %150, %cst_140 {dimension_numbers = #tpu.dot_dimension_numbers<[1], [0], [0], [1], [0, 0, 1, 1], [], []>} : vector<128x32xbf16>, vector<32x64xbf16>, vector<128x64xf32> -> vector<128x64xf32>
    %152 = arith.addf %145, %151 : vector<128x64xf32>
    %c0_141 = arith.constant 0 : index
    %c3_142 = arith.constant 3 : index
    %c3_143 = arith.constant 3 : index
    %c0_144 = arith.constant 0 : index
    %153 = vector.load %arg11[%c0_141, %c3_142, %c3_143, %c0_144] : memref<2x12x16x32xf32, #tpu.memory_space<vmem>>, vector<2x8x8x32xf32>
    %154 = vector.shape_cast %153 : vector<2x8x8x32xf32> to vector<128x32xf32>
    %155 = arith.truncf %154 : vector<128x32xf32> to vector<128x32xbf16>
    %c18 = arith.constant 18 : index
    %c0_145 = arith.constant 0 : index
    %c0_146 = arith.constant 0 : index
    %156 = vector.load %arg5[%c18, %c0_145, %c0_146] : memref<25x32x64xbf16, #tpu.memory_space<vmem>>, vector<1x32x64xbf16>
    %157 = vector.shape_cast %156 : vector<1x32x64xbf16> to vector<32x64xbf16>
    %cst_147 = arith.constant dense<0.000000e+00> : vector<128x64xf32>
    %158 = tpu.matmul %155, %157, %cst_147 {dimension_numbers = #tpu.dot_dimension_numbers<[1], [0], [0], [1], [0, 0, 1, 1], [], []>} : vector<128x32xbf16>, vector<32x64xbf16>, vector<128x64xf32> -> vector<128x64xf32>
    %159 = arith.addf %152, %158 : vector<128x64xf32>
    %c0_148 = arith.constant 0 : index
    %c3_149 = arith.constant 3 : index
    %c4_150 = arith.constant 4 : index
    %c0_151 = arith.constant 0 : index
    %160 = vector.load %arg11[%c0_148, %c3_149, %c4_150, %c0_151] : memref<2x12x16x32xf32, #tpu.memory_space<vmem>>, vector<2x8x8x32xf32>
    %161 = vector.shape_cast %160 : vector<2x8x8x32xf32> to vector<128x32xf32>
    %162 = arith.truncf %161 : vector<128x32xf32> to vector<128x32xbf16>
    %c19 = arith.constant 19 : index
    %c0_152 = arith.constant 0 : index
    %c0_153 = arith.constant 0 : index
    %163 = vector.load %arg5[%c19, %c0_152, %c0_153] : memref<25x32x64xbf16, #tpu.memory_space<vmem>>, vector<1x32x64xbf16>
    %164 = vector.shape_cast %163 : vector<1x32x64xbf16> to vector<32x64xbf16>
    %cst_154 = arith.constant dense<0.000000e+00> : vector<128x64xf32>
    %165 = tpu.matmul %162, %164, %cst_154 {dimension_numbers = #tpu.dot_dimension_numbers<[1], [0], [0], [1], [0, 0, 1, 1], [], []>} : vector<128x32xbf16>, vector<32x64xbf16>, vector<128x64xf32> -> vector<128x64xf32>
    %166 = arith.addf %159, %165 : vector<128x64xf32>
    %c0_155 = arith.constant 0 : index
    %c4_156 = arith.constant 4 : index
    %c0_157 = arith.constant 0 : index
    %c0_158 = arith.constant 0 : index
    %167 = vector.load %arg11[%c0_155, %c4_156, %c0_157, %c0_158] : memref<2x12x16x32xf32, #tpu.memory_space<vmem>>, vector<2x8x8x32xf32>
    %168 = vector.shape_cast %167 : vector<2x8x8x32xf32> to vector<128x32xf32>
    %169 = arith.truncf %168 : vector<128x32xf32> to vector<128x32xbf16>
    %c20 = arith.constant 20 : index
    %c0_159 = arith.constant 0 : index
    %c0_160 = arith.constant 0 : index
    %170 = vector.load %arg5[%c20, %c0_159, %c0_160] : memref<25x32x64xbf16, #tpu.memory_space<vmem>>, vector<1x32x64xbf16>
    %171 = vector.shape_cast %170 : vector<1x32x64xbf16> to vector<32x64xbf16>
    %cst_161 = arith.constant dense<0.000000e+00> : vector<128x64xf32>
    %172 = tpu.matmul %169, %171, %cst_161 {dimension_numbers = #tpu.dot_dimension_numbers<[1], [0], [0], [1], [0, 0, 1, 1], [], []>} : vector<128x32xbf16>, vector<32x64xbf16>, vector<128x64xf32> -> vector<128x64xf32>
    %173 = arith.addf %166, %172 : vector<128x64xf32>
    %c0_162 = arith.constant 0 : index
    %c4_163 = arith.constant 4 : index
    %c1_164 = arith.constant 1 : index
    %c0_165 = arith.constant 0 : index
    %174 = vector.load %arg11[%c0_162, %c4_163, %c1_164, %c0_165] : memref<2x12x16x32xf32, #tpu.memory_space<vmem>>, vector<2x8x8x32xf32>
    %175 = vector.shape_cast %174 : vector<2x8x8x32xf32> to vector<128x32xf32>
    %176 = arith.truncf %175 : vector<128x32xf32> to vector<128x32xbf16>
    %c21 = arith.constant 21 : index
    %c0_166 = arith.constant 0 : index
    %c0_167 = arith.constant 0 : index
    %177 = vector.load %arg5[%c21, %c0_166, %c0_167] : memref<25x32x64xbf16, #tpu.memory_space<vmem>>, vector<1x32x64xbf16>
    %178 = vector.shape_cast %177 : vector<1x32x64xbf16> to vector<32x64xbf16>
    %cst_168 = arith.constant dense<0.000000e+00> : vector<128x64xf32>
    %179 = tpu.matmul %176, %178, %cst_168 {dimension_numbers = #tpu.dot_dimension_numbers<[1], [0], [0], [1], [0, 0, 1, 1], [], []>} : vector<128x32xbf16>, vector<32x64xbf16>, vector<128x64xf32> -> vector<128x64xf32>
    %180 = arith.addf %173, %179 : vector<128x64xf32>
    %c0_169 = arith.constant 0 : index
    %c4_170 = arith.constant 4 : index
    %c2_171 = arith.constant 2 : index
    %c0_172 = arith.constant 0 : index
    %181 = vector.load %arg11[%c0_169, %c4_170, %c2_171, %c0_172] : memref<2x12x16x32xf32, #tpu.memory_space<vmem>>, vector<2x8x8x32xf32>
    %182 = vector.shape_cast %181 : vector<2x8x8x32xf32> to vector<128x32xf32>
    %183 = arith.truncf %182 : vector<128x32xf32> to vector<128x32xbf16>
    %c22 = arith.constant 22 : index
    %c0_173 = arith.constant 0 : index
    %c0_174 = arith.constant 0 : index
    %184 = vector.load %arg5[%c22, %c0_173, %c0_174] : memref<25x32x64xbf16, #tpu.memory_space<vmem>>, vector<1x32x64xbf16>
    %185 = vector.shape_cast %184 : vector<1x32x64xbf16> to vector<32x64xbf16>
    %cst_175 = arith.constant dense<0.000000e+00> : vector<128x64xf32>
    %186 = tpu.matmul %183, %185, %cst_175 {dimension_numbers = #tpu.dot_dimension_numbers<[1], [0], [0], [1], [0, 0, 1, 1], [], []>} : vector<128x32xbf16>, vector<32x64xbf16>, vector<128x64xf32> -> vector<128x64xf32>
    %187 = arith.addf %180, %186 : vector<128x64xf32>
    %c0_176 = arith.constant 0 : index
    %c4_177 = arith.constant 4 : index
    %c3_178 = arith.constant 3 : index
    %c0_179 = arith.constant 0 : index
    %188 = vector.load %arg11[%c0_176, %c4_177, %c3_178, %c0_179] : memref<2x12x16x32xf32, #tpu.memory_space<vmem>>, vector<2x8x8x32xf32>
    %189 = vector.shape_cast %188 : vector<2x8x8x32xf32> to vector<128x32xf32>
    %190 = arith.truncf %189 : vector<128x32xf32> to vector<128x32xbf16>
    %c23 = arith.constant 23 : index
    %c0_180 = arith.constant 0 : index
    %c0_181 = arith.constant 0 : index
    %191 = vector.load %arg5[%c23, %c0_180, %c0_181] : memref<25x32x64xbf16, #tpu.memory_space<vmem>>, vector<1x32x64xbf16>
    %192 = vector.shape_cast %191 : vector<1x32x64xbf16> to vector<32x64xbf16>
    %cst_182 = arith.constant dense<0.000000e+00> : vector<128x64xf32>
    %193 = tpu.matmul %190, %192, %cst_182 {dimension_numbers = #tpu.dot_dimension_numbers<[1], [0], [0], [1], [0, 0, 1, 1], [], []>} : vector<128x32xbf16>, vector<32x64xbf16>, vector<128x64xf32> -> vector<128x64xf32>
    %194 = arith.addf %187, %193 : vector<128x64xf32>
    %c0_183 = arith.constant 0 : index
    %c4_184 = arith.constant 4 : index
    %c4_185 = arith.constant 4 : index
    %c0_186 = arith.constant 0 : index
    %195 = vector.load %arg11[%c0_183, %c4_184, %c4_185, %c0_186] : memref<2x12x16x32xf32, #tpu.memory_space<vmem>>, vector<2x8x8x32xf32>
    %196 = vector.shape_cast %195 : vector<2x8x8x32xf32> to vector<128x32xf32>
    %197 = arith.truncf %196 : vector<128x32xf32> to vector<128x32xbf16>
    %c24 = arith.constant 24 : index
    %c0_187 = arith.constant 0 : index
    %c0_188 = arith.constant 0 : index
    %198 = vector.load %arg5[%c24, %c0_187, %c0_188] : memref<25x32x64xbf16, #tpu.memory_space<vmem>>, vector<1x32x64xbf16>
    %199 = vector.shape_cast %198 : vector<1x32x64xbf16> to vector<32x64xbf16>
    %cst_189 = arith.constant dense<0.000000e+00> : vector<128x64xf32>
    %200 = tpu.matmul %197, %199, %cst_189 {dimension_numbers = #tpu.dot_dimension_numbers<[1], [0], [0], [1], [0, 0, 1, 1], [], []>} : vector<128x32xbf16>, vector<32x64xbf16>, vector<128x64xf32> -> vector<128x64xf32>
    %201 = arith.addf %194, %200 : vector<128x64xf32>
    %c0_190 = arith.constant 0 : index
    %c0_191 = arith.constant 0 : index
    %202 = vector.load %arg6[%c0_190, %c0_191] : memref<1x64xf32, #tpu.memory_space<vmem>>, vector<1x64xf32>
    %203 = vector.broadcast %202 : vector<1x64xf32> to vector<128x64xf32>
    %204 = arith.mulf %201, %203 : vector<128x64xf32>
    %c0_192 = arith.constant 0 : index
    %c0_193 = arith.constant 0 : index
    %205 = vector.load %arg7[%c0_192, %c0_193] : memref<1x64xf32, #tpu.memory_space<vmem>>, vector<1x64xf32>
    %206 = vector.broadcast %205 : vector<1x64xf32> to vector<128x64xf32>
    %207 = arith.addf %204, %206 : vector<128x64xf32>
    %cst_194 = arith.constant 0.000000e+00 : f32
    %208 = vector.broadcast %cst_194 : f32 to vector<128x64xf32>
    %209 = arith.maximumf %207, %208 : vector<128x64xf32>
    %210 = vector.shape_cast %209 : vector<128x64xf32> to vector<2x64x64xf32>
    %c0_195 = arith.constant 0 : index
    %c0_196 = arith.constant 0 : index
    %c0_197 = arith.constant 0 : index
    %211 = vector.load %arg12[%c0_195, %c0_196, %c0_197] : memref<2x64x64xf32, #tpu.memory_space<vmem>>, vector<2x64x64xf32>
    tpu.vector_store %arg12[%c0_195, %c0_196, %c0_197], %210 {strides = array<i32>} : memref<2x64x64xf32, #tpu.memory_space<vmem>>, vector<2x64x64xf32>,
    %cst_198 = arith.constant 0.000000e+00 : f32
    %212 = vector.broadcast %cst_198 : f32 to vector<2x512xf32>
    %c0_199 = arith.constant 0 : index
    %c0_200 = arith.constant 0 : index
    %c0_201 = arith.constant 0 : index
    %213 = vector.load %arg12[%c0_199, %c0_200, %c0_201] : memref<2x64x64xf32, #tpu.memory_space<vmem>>, vector<2x1x64xf32>
    %214 = vector.shape_cast %213 : vector<2x1x64xf32> to vector<2x64xf32>
    %c0_202 = arith.constant 0 : index
    %c1_203 = arith.constant 1 : index
    %c0_204 = arith.constant 0 : index
    %215 = vector.load %arg12[%c0_202, %c1_203, %c0_204] : memref<2x64x64xf32, #tpu.memory_space<vmem>>, vector<2x1x64xf32>
    %216 = vector.shape_cast %215 : vector<2x1x64xf32> to vector<2x64xf32>
    %217 = arith.maximumf %214, %216 : vector<2x64xf32>
    %c0_205 = arith.constant 0 : index
    %c8_206 = arith.constant 8 : index
    %c0_207 = arith.constant 0 : index
    %218 = vector.load %arg12[%c0_205, %c8_206, %c0_207] : memref<2x64x64xf32, #tpu.memory_space<vmem>>, vector<2x1x64xf32>
    %219 = vector.shape_cast %218 : vector<2x1x64xf32> to vector<2x64xf32>
    %c0_208 = arith.constant 0 : index
    %c9_209 = arith.constant 9 : index
    %c0_210 = arith.constant 0 : index
    %220 = vector.load %arg12[%c0_208, %c9_209, %c0_210] : memref<2x64x64xf32, #tpu.memory_space<vmem>>, vector<2x1x64xf32>
    %221 = vector.shape_cast %220 : vector<2x1x64xf32> to vector<2x64xf32>
    %222 = arith.maximumf %219, %221 : vector<2x64xf32>
    %223 = arith.maximumf %217, %222 : vector<2x64xf32>
    %224 = arith.truncf %223 : vector<2x64xf32> to vector<2x64xbf16>
    %c0_211 = arith.constant 0 : index
    %c0_212 = arith.constant 0 : index
    %c0_213 = arith.constant 0 : index
    %225 = vector.load %arg8[%c0_211, %c0_212, %c0_213] : memref<16x64x512xbf16, #tpu.memory_space<vmem>>, vector<1x64x512xbf16>
    %226 = vector.shape_cast %225 : vector<1x64x512xbf16> to vector<64x512xbf16>
    %cst_214 = arith.constant dense<0.000000e+00> : vector<2x512xf32>
    %227 = tpu.matmul %224, %226, %cst_214 {dimension_numbers = #tpu.dot_dimension_numbers<[1], [0], [0], [1], [0, 0, 1, 1], [], []>} : vector<2x64xbf16>, vector<64x512xbf16>, vector<2x512xf32> -> vector<2x512xf32>
    %228 = arith.addf %212, %227 : vector<2x512xf32>
    %c0_215 = arith.constant 0 : index
    %c2_216 = arith.constant 2 : index
    %c0_217 = arith.constant 0 : index
    %229 = vector.load %arg12[%c0_215, %c2_216, %c0_217] : memref<2x64x64xf32, #tpu.memory_space<vmem>>, vector<2x1x64xf32>
    %230 = vector.shape_cast %229 : vector<2x1x64xf32> to vector<2x64xf32>
    %c0_218 = arith.constant 0 : index
    %c3_219 = arith.constant 3 : index
    %c0_220 = arith.constant 0 : index
    %231 = vector.load %arg12[%c0_218, %c3_219, %c0_220] : memref<2x64x64xf32, #tpu.memory_space<vmem>>, vector<2x1x64xf32>
    %232 = vector.shape_cast %231 : vector<2x1x64xf32> to vector<2x64xf32>
    %233 = arith.maximumf %230, %232 : vector<2x64xf32>
    %c0_221 = arith.constant 0 : index
    %c10_222 = arith.constant 10 : index
    %c0_223 = arith.constant 0 : index
    %234 = vector.load %arg12[%c0_221, %c10_222, %c0_223] : memref<2x64x64xf32, #tpu.memory_space<vmem>>, vector<2x1x64xf32>
    %235 = vector.shape_cast %234 : vector<2x1x64xf32> to vector<2x64xf32>
    %c0_224 = arith.constant 0 : index
    %c11_225 = arith.constant 11 : index
    %c0_226 = arith.constant 0 : index
    %236 = vector.load %arg12[%c0_224, %c11_225, %c0_226] : memref<2x64x64xf32, #tpu.memory_space<vmem>>, vector<2x1x64xf32>
    %237 = vector.shape_cast %236 : vector<2x1x64xf32> to vector<2x64xf32>
    %238 = arith.maximumf %235, %237 : vector<2x64xf32>
    %239 = arith.maximumf %233, %238 : vector<2x64xf32>
    %240 = arith.truncf %239 : vector<2x64xf32> to vector<2x64xbf16>
    %c1_227 = arith.constant 1 : index
    %c0_228 = arith.constant 0 : index
    %c0_229 = arith.constant 0 : index
    %241 = vector.load %arg8[%c1_227, %c0_228, %c0_229] : memref<16x64x512xbf16, #tpu.memory_space<vmem>>, vector<1x64x512xbf16>
    %242 = vector.shape_cast %241 : vector<1x64x512xbf16> to vector<64x512xbf16>
    %cst_230 = arith.constant dense<0.000000e+00> : vector<2x512xf32>
    %243 = tpu.matmul %240, %242, %cst_230 {dimension_numbers = #tpu.dot_dimension_numbers<[1], [0], [0], [1], [0, 0, 1, 1], [], []>} : vector<2x64xbf16>, vector<64x512xbf16>, vector<2x512xf32> -> vector<2x512xf32>
    %244 = arith.addf %228, %243 : vector<2x512xf32>
    %c0_231 = arith.constant 0 : index
    %c4_232 = arith.constant 4 : index
    %c0_233 = arith.constant 0 : index
    %245 = vector.load %arg12[%c0_231, %c4_232, %c0_233] : memref<2x64x64xf32, #tpu.memory_space<vmem>>, vector<2x1x64xf32>
    %246 = vector.shape_cast %245 : vector<2x1x64xf32> to vector<2x64xf32>
    %c0_234 = arith.constant 0 : index
    %c5_235 = arith.constant 5 : index
    %c0_236 = arith.constant 0 : index
    %247 = vector.load %arg12[%c0_234, %c5_235, %c0_236] : memref<2x64x64xf32, #tpu.memory_space<vmem>>, vector<2x1x64xf32>
    %248 = vector.shape_cast %247 : vector<2x1x64xf32> to vector<2x64xf32>
    %249 = arith.maximumf %246, %248 : vector<2x64xf32>
    %c0_237 = arith.constant 0 : index
    %c12_238 = arith.constant 12 : index
    %c0_239 = arith.constant 0 : index
    %250 = vector.load %arg12[%c0_237, %c12_238, %c0_239] : memref<2x64x64xf32, #tpu.memory_space<vmem>>, vector<2x1x64xf32>
    %251 = vector.shape_cast %250 : vector<2x1x64xf32> to vector<2x64xf32>
    %c0_240 = arith.constant 0 : index
    %c13_241 = arith.constant 13 : index
    %c0_242 = arith.constant 0 : index
    %252 = vector.load %arg12[%c0_240, %c13_241, %c0_242] : memref<2x64x64xf32, #tpu.memory_space<vmem>>, vector<2x1x64xf32>
    %253 = vector.shape_cast %252 : vector<2x1x64xf32> to vector<2x64xf32>
    %254 = arith.maximumf %251, %253 : vector<2x64xf32>
    %255 = arith.maximumf %249, %254 : vector<2x64xf32>
    %256 = arith.truncf %255 : vector<2x64xf32> to vector<2x64xbf16>
    %c2_243 = arith.constant 2 : index
    %c0_244 = arith.constant 0 : index
    %c0_245 = arith.constant 0 : index
    %257 = vector.load %arg8[%c2_243, %c0_244, %c0_245] : memref<16x64x512xbf16, #tpu.memory_space<vmem>>, vector<1x64x512xbf16>
    %258 = vector.shape_cast %257 : vector<1x64x512xbf16> to vector<64x512xbf16>
    %cst_246 = arith.constant dense<0.000000e+00> : vector<2x512xf32>
    %259 = tpu.matmul %256, %258, %cst_246 {dimension_numbers = #tpu.dot_dimension_numbers<[1], [0], [0], [1], [0, 0, 1, 1], [], []>} : vector<2x64xbf16>, vector<64x512xbf16>, vector<2x512xf32> -> vector<2x512xf32>
    %260 = arith.addf %244, %259 : vector<2x512xf32>
    %c0_247 = arith.constant 0 : index
    %c6_248 = arith.constant 6 : index
    %c0_249 = arith.constant 0 : index
    %261 = vector.load %arg12[%c0_247, %c6_248, %c0_249] : memref<2x64x64xf32, #tpu.memory_space<vmem>>, vector<2x1x64xf32>
    %262 = vector.shape_cast %261 : vector<2x1x64xf32> to vector<2x64xf32>
    %c0_250 = arith.constant 0 : index
    %c7_251 = arith.constant 7 : index
    %c0_252 = arith.constant 0 : index
    %263 = vector.load %arg12[%c0_250, %c7_251, %c0_252] : memref<2x64x64xf32, #tpu.memory_space<vmem>>, vector<2x1x64xf32>
    %264 = vector.shape_cast %263 : vector<2x1x64xf32> to vector<2x64xf32>
    %265 = arith.maximumf %262, %264 : vector<2x64xf32>
    %c0_253 = arith.constant 0 : index
    %c14_254 = arith.constant 14 : index
    %c0_255 = arith.constant 0 : index
    %266 = vector.load %arg12[%c0_253, %c14_254, %c0_255] : memref<2x64x64xf32, #tpu.memory_space<vmem>>, vector<2x1x64xf32>
    %267 = vector.shape_cast %266 : vector<2x1x64xf32> to vector<2x64xf32>
    %c0_256 = arith.constant 0 : index
    %c15_257 = arith.constant 15 : index
    %c0_258 = arith.constant 0 : index
    %268 = vector.load %arg12[%c0_256, %c15_257, %c0_258] : memref<2x64x64xf32, #tpu.memory_space<vmem>>, vector<2x1x64xf32>
    %269 = vector.shape_cast %268 : vector<2x1x64xf32> to vector<2x64xf32>
    %270 = arith.maximumf %267, %269 : vector<2x64xf32>
    %271 = arith.maximumf %265, %270 : vector<2x64xf32>
    %272 = arith.truncf %271 : vector<2x64xf32> to vector<2x64xbf16>
    %c3_259 = arith.constant 3 : index
    %c0_260 = arith.constant 0 : index
    %c0_261 = arith.constant 0 : index
    %273 = vector.load %arg8[%c3_259, %c0_260, %c0_261] : memref<16x64x512xbf16, #tpu.memory_space<vmem>>, vector<1x64x512xbf16>
    %274 = vector.shape_cast %273 : vector<1x64x512xbf16> to vector<64x512xbf16>
    %cst_262 = arith.constant dense<0.000000e+00> : vector<2x512xf32>
    %275 = tpu.matmul %272, %274, %cst_262 {dimension_numbers = #tpu.dot_dimension_numbers<[1], [0], [0], [1], [0, 0, 1, 1], [], []>} : vector<2x64xbf16>, vector<64x512xbf16>, vector<2x512xf32> -> vector<2x512xf32>
    %276 = arith.addf %260, %275 : vector<2x512xf32>
    %c0_263 = arith.constant 0 : index
    %c16_264 = arith.constant 16 : index
    %c0_265 = arith.constant 0 : index
    %277 = vector.load %arg12[%c0_263, %c16_264, %c0_265] : memref<2x64x64xf32, #tpu.memory_space<vmem>>, vector<2x1x64xf32>
    %278 = vector.shape_cast %277 : vector<2x1x64xf32> to vector<2x64xf32>
    %c0_266 = arith.constant 0 : index
    %c17_267 = arith.constant 17 : index
    %c0_268 = arith.constant 0 : index
    %279 = vector.load %arg12[%c0_266, %c17_267, %c0_268] : memref<2x64x64xf32, #tpu.memory_space<vmem>>, vector<2x1x64xf32>
    %280 = vector.shape_cast %279 : vector<2x1x64xf32> to vector<2x64xf32>
    %281 = arith.maximumf %278, %280 : vector<2x64xf32>
    %c0_269 = arith.constant 0 : index
    %c24_270 = arith.constant 24 : index
    %c0_271 = arith.constant 0 : index
    %282 = vector.load %arg12[%c0_269, %c24_270, %c0_271] : memref<2x64x64xf32, #tpu.memory_space<vmem>>, vector<2x1x64xf32>
    %283 = vector.shape_cast %282 : vector<2x1x64xf32> to vector<2x64xf32>
    %c0_272 = arith.constant 0 : index
    %c25 = arith.constant 25 : index
    %c0_273 = arith.constant 0 : index
    %284 = vector.load %arg12[%c0_272, %c25, %c0_273] : memref<2x64x64xf32, #tpu.memory_space<vmem>>, vector<2x1x64xf32>
    %285 = vector.shape_cast %284 : vector<2x1x64xf32> to vector<2x64xf32>
    %286 = arith.maximumf %283, %285 : vector<2x64xf32>
    %287 = arith.maximumf %281, %286 : vector<2x64xf32>
    %288 = arith.truncf %287 : vector<2x64xf32> to vector<2x64xbf16>
    %c4_274 = arith.constant 4 : index
    %c0_275 = arith.constant 0 : index
    %c0_276 = arith.constant 0 : index
    %289 = vector.load %arg8[%c4_274, %c0_275, %c0_276] : memref<16x64x512xbf16, #tpu.memory_space<vmem>>, vector<1x64x512xbf16>
    %290 = vector.shape_cast %289 : vector<1x64x512xbf16> to vector<64x512xbf16>
    %cst_277 = arith.constant dense<0.000000e+00> : vector<2x512xf32>
    %291 = tpu.matmul %288, %290, %cst_277 {dimension_numbers = #tpu.dot_dimension_numbers<[1], [0], [0], [1], [0, 0, 1, 1], [], []>} : vector<2x64xbf16>, vector<64x512xbf16>, vector<2x512xf32> -> vector<2x512xf32>
    %292 = arith.addf %276, %291 : vector<2x512xf32>
    %c0_278 = arith.constant 0 : index
    %c18_279 = arith.constant 18 : index
    %c0_280 = arith.constant 0 : index
    %293 = vector.load %arg12[%c0_278, %c18_279, %c0_280] : memref<2x64x64xf32, #tpu.memory_space<vmem>>, vector<2x1x64xf32>
    %294 = vector.shape_cast %293 : vector<2x1x64xf32> to vector<2x64xf32>
    %c0_281 = arith.constant 0 : index
    %c19_282 = arith.constant 19 : index
    %c0_283 = arith.constant 0 : index
    %295 = vector.load %arg12[%c0_281, %c19_282, %c0_283] : memref<2x64x64xf32, #tpu.memory_space<vmem>>, vector<2x1x64xf32>
    %296 = vector.shape_cast %295 : vector<2x1x64xf32> to vector<2x64xf32>
    %297 = arith.maximumf %294, %296 : vector<2x64xf32>
    %c0_284 = arith.constant 0 : index
    %c26 = arith.constant 26 : index
    %c0_285 = arith.constant 0 : index
    %298 = vector.load %arg12[%c0_284, %c26, %c0_285] : memref<2x64x64xf32, #tpu.memory_space<vmem>>, vector<2x1x64xf32>
    %299 = vector.shape_cast %298 : vector<2x1x64xf32> to vector<2x64xf32>
    %c0_286 = arith.constant 0 : index
    %c27 = arith.constant 27 : index
    %c0_287 = arith.constant 0 : index
    %300 = vector.load %arg12[%c0_286, %c27, %c0_287] : memref<2x64x64xf32, #tpu.memory_space<vmem>>, vector<2x1x64xf32>
    %301 = vector.shape_cast %300 : vector<2x1x64xf32> to vector<2x64xf32>
    %302 = arith.maximumf %299, %301 : vector<2x64xf32>
    %303 = arith.maximumf %297, %302 : vector<2x64xf32>
    %304 = arith.truncf %303 : vector<2x64xf32> to vector<2x64xbf16>
    %c5_288 = arith.constant 5 : index
    %c0_289 = arith.constant 0 : index
    %c0_290 = arith.constant 0 : index
    %305 = vector.load %arg8[%c5_288, %c0_289, %c0_290] : memref<16x64x512xbf16, #tpu.memory_space<vmem>>, vector<1x64x512xbf16>
    %306 = vector.shape_cast %305 : vector<1x64x512xbf16> to vector<64x512xbf16>
    %cst_291 = arith.constant dense<0.000000e+00> : vector<2x512xf32>
    %307 = tpu.matmul %304, %306, %cst_291 {dimension_numbers = #tpu.dot_dimension_numbers<[1], [0], [0], [1], [0, 0, 1, 1], [], []>} : vector<2x64xbf16>, vector<64x512xbf16>, vector<2x512xf32> -> vector<2x512xf32>
    %308 = arith.addf %292, %307 : vector<2x512xf32>
    %c0_292 = arith.constant 0 : index
    %c20_293 = arith.constant 20 : index
    %c0_294 = arith.constant 0 : index
    %309 = vector.load %arg12[%c0_292, %c20_293, %c0_294] : memref<2x64x64xf32, #tpu.memory_space<vmem>>, vector<2x1x64xf32>
    %310 = vector.shape_cast %309 : vector<2x1x64xf32> to vector<2x64xf32>
    %c0_295 = arith.constant 0 : index
    %c21_296 = arith.constant 21 : index
    %c0_297 = arith.constant 0 : index
    %311 = vector.load %arg12[%c0_295, %c21_296, %c0_297] : memref<2x64x64xf32, #tpu.memory_space<vmem>>, vector<2x1x64xf32>
    %312 = vector.shape_cast %311 : vector<2x1x64xf32> to vector<2x64xf32>
    %313 = arith.maximumf %310, %312 : vector<2x64xf32>
    %c0_298 = arith.constant 0 : index
    %c28 = arith.constant 28 : index
    %c0_299 = arith.constant 0 : index
    %314 = vector.load %arg12[%c0_298, %c28, %c0_299] : memref<2x64x64xf32, #tpu.memory_space<vmem>>, vector<2x1x64xf32>
    %315 = vector.shape_cast %314 : vector<2x1x64xf32> to vector<2x64xf32>
    %c0_300 = arith.constant 0 : index
    %c29 = arith.constant 29 : index
    %c0_301 = arith.constant 0 : index
    %316 = vector.load %arg12[%c0_300, %c29, %c0_301] : memref<2x64x64xf32, #tpu.memory_space<vmem>>, vector<2x1x64xf32>
    %317 = vector.shape_cast %316 : vector<2x1x64xf32> to vector<2x64xf32>
    %318 = arith.maximumf %315, %317 : vector<2x64xf32>
    %319 = arith.maximumf %313, %318 : vector<2x64xf32>
    %320 = arith.truncf %319 : vector<2x64xf32> to vector<2x64xbf16>
    %c6_302 = arith.constant 6 : index
    %c0_303 = arith.constant 0 : index
    %c0_304 = arith.constant 0 : index
    %321 = vector.load %arg8[%c6_302, %c0_303, %c0_304] : memref<16x64x512xbf16, #tpu.memory_space<vmem>>, vector<1x64x512xbf16>
    %322 = vector.shape_cast %321 : vector<1x64x512xbf16> to vector<64x512xbf16>
    %cst_305 = arith.constant dense<0.000000e+00> : vector<2x512xf32>
    %323 = tpu.matmul %320, %322, %cst_305 {dimension_numbers = #tpu.dot_dimension_numbers<[1], [0], [0], [1], [0, 0, 1, 1], [], []>} : vector<2x64xbf16>, vector<64x512xbf16>, vector<2x512xf32> -> vector<2x512xf32>
    %324 = arith.addf %308, %323 : vector<2x512xf32>
    %c0_306 = arith.constant 0 : index
    %c22_307 = arith.constant 22 : index
    %c0_308 = arith.constant 0 : index
    %325 = vector.load %arg12[%c0_306, %c22_307, %c0_308] : memref<2x64x64xf32, #tpu.memory_space<vmem>>, vector<2x1x64xf32>
    %326 = vector.shape_cast %325 : vector<2x1x64xf32> to vector<2x64xf32>
    %c0_309 = arith.constant 0 : index
    %c23_310 = arith.constant 23 : index
    %c0_311 = arith.constant 0 : index
    %327 = vector.load %arg12[%c0_309, %c23_310, %c0_311] : memref<2x64x64xf32, #tpu.memory_space<vmem>>, vector<2x1x64xf32>
    %328 = vector.shape_cast %327 : vector<2x1x64xf32> to vector<2x64xf32>
    %329 = arith.maximumf %326, %328 : vector<2x64xf32>
    %c0_312 = arith.constant 0 : index
    %c30 = arith.constant 30 : index
    %c0_313 = arith.constant 0 : index
    %330 = vector.load %arg12[%c0_312, %c30, %c0_313] : memref<2x64x64xf32, #tpu.memory_space<vmem>>, vector<2x1x64xf32>
    %331 = vector.shape_cast %330 : vector<2x1x64xf32> to vector<2x64xf32>
    %c0_314 = arith.constant 0 : index
    %c31 = arith.constant 31 : index
    %c0_315 = arith.constant 0 : index
    %332 = vector.load %arg12[%c0_314, %c31, %c0_315] : memref<2x64x64xf32, #tpu.memory_space<vmem>>, vector<2x1x64xf32>
    %333 = vector.shape_cast %332 : vector<2x1x64xf32> to vector<2x64xf32>
    %334 = arith.maximumf %331, %333 : vector<2x64xf32>
    %335 = arith.maximumf %329, %334 : vector<2x64xf32>
    %336 = arith.truncf %335 : vector<2x64xf32> to vector<2x64xbf16>
    %c7_316 = arith.constant 7 : index
    %c0_317 = arith.constant 0 : index
    %c0_318 = arith.constant 0 : index
    %337 = vector.load %arg8[%c7_316, %c0_317, %c0_318] : memref<16x64x512xbf16, #tpu.memory_space<vmem>>, vector<1x64x512xbf16>
    %338 = vector.shape_cast %337 : vector<1x64x512xbf16> to vector<64x512xbf16>
    %cst_319 = arith.constant dense<0.000000e+00> : vector<2x512xf32>
    %339 = tpu.matmul %336, %338, %cst_319 {dimension_numbers = #tpu.dot_dimension_numbers<[1], [0], [0], [1], [0, 0, 1, 1], [], []>} : vector<2x64xbf16>, vector<64x512xbf16>, vector<2x512xf32> -> vector<2x512xf32>
    %340 = arith.addf %324, %339 : vector<2x512xf32>
    %c0_320 = arith.constant 0 : index
    %c32 = arith.constant 32 : index
    %c0_321 = arith.constant 0 : index
    %341 = vector.load %arg12[%c0_320, %c32, %c0_321] : memref<2x64x64xf32, #tpu.memory_space<vmem>>, vector<2x1x64xf32>
    %342 = vector.shape_cast %341 : vector<2x1x64xf32> to vector<2x64xf32>
    %c0_322 = arith.constant 0 : index
    %c33 = arith.constant 33 : index
    %c0_323 = arith.constant 0 : index
    %343 = vector.load %arg12[%c0_322, %c33, %c0_323] : memref<2x64x64xf32, #tpu.memory_space<vmem>>, vector<2x1x64xf32>
    %344 = vector.shape_cast %343 : vector<2x1x64xf32> to vector<2x64xf32>
    %345 = arith.maximumf %342, %344 : vector<2x64xf32>
    %c0_324 = arith.constant 0 : index
    %c40 = arith.constant 40 : index
    %c0_325 = arith.constant 0 : index
    %346 = vector.load %arg12[%c0_324, %c40, %c0_325] : memref<2x64x64xf32, #tpu.memory_space<vmem>>, vector<2x1x64xf32>
    %347 = vector.shape_cast %346 : vector<2x1x64xf32> to vector<2x64xf32>
    %c0_326 = arith.constant 0 : index
    %c41 = arith.constant 41 : index
    %c0_327 = arith.constant 0 : index
    %348 = vector.load %arg12[%c0_326, %c41, %c0_327] : memref<2x64x64xf32, #tpu.memory_space<vmem>>, vector<2x1x64xf32>
    %349 = vector.shape_cast %348 : vector<2x1x64xf32> to vector<2x64xf32>
    %350 = arith.maximumf %347, %349 : vector<2x64xf32>
    %351 = arith.maximumf %345, %350 : vector<2x64xf32>
    %352 = arith.truncf %351 : vector<2x64xf32> to vector<2x64xbf16>
    %c8_328 = arith.constant 8 : index
    %c0_329 = arith.constant 0 : index
    %c0_330 = arith.constant 0 : index
    %353 = vector.load %arg8[%c8_328, %c0_329, %c0_330] : memref<16x64x512xbf16, #tpu.memory_space<vmem>>, vector<1x64x512xbf16>
    %354 = vector.shape_cast %353 : vector<1x64x512xbf16> to vector<64x512xbf16>
    %cst_331 = arith.constant dense<0.000000e+00> : vector<2x512xf32>
    %355 = tpu.matmul %352, %354, %cst_331 {dimension_numbers = #tpu.dot_dimension_numbers<[1], [0], [0], [1], [0, 0, 1, 1], [], []>} : vector<2x64xbf16>, vector<64x512xbf16>, vector<2x512xf32> -> vector<2x512xf32>
    %356 = arith.addf %340, %355 : vector<2x512xf32>
    %c0_332 = arith.constant 0 : index
    %c34 = arith.constant 34 : index
    %c0_333 = arith.constant 0 : index
    %357 = vector.load %arg12[%c0_332, %c34, %c0_333] : memref<2x64x64xf32, #tpu.memory_space<vmem>>, vector<2x1x64xf32>
    %358 = vector.shape_cast %357 : vector<2x1x64xf32> to vector<2x64xf32>
    %c0_334 = arith.constant 0 : index
    %c35 = arith.constant 35 : index
    %c0_335 = arith.constant 0 : index
    %359 = vector.load %arg12[%c0_334, %c35, %c0_335] : memref<2x64x64xf32, #tpu.memory_space<vmem>>, vector<2x1x64xf32>
    %360 = vector.shape_cast %359 : vector<2x1x64xf32> to vector<2x64xf32>
    %361 = arith.maximumf %358, %360 : vector<2x64xf32>
    %c0_336 = arith.constant 0 : index
    %c42 = arith.constant 42 : index
    %c0_337 = arith.constant 0 : index
    %362 = vector.load %arg12[%c0_336, %c42, %c0_337] : memref<2x64x64xf32, #tpu.memory_space<vmem>>, vector<2x1x64xf32>
    %363 = vector.shape_cast %362 : vector<2x1x64xf32> to vector<2x64xf32>
    %c0_338 = arith.constant 0 : index
    %c43 = arith.constant 43 : index
    %c0_339 = arith.constant 0 : index
    %364 = vector.load %arg12[%c0_338, %c43, %c0_339] : memref<2x64x64xf32, #tpu.memory_space<vmem>>, vector<2x1x64xf32>
    %365 = vector.shape_cast %364 : vector<2x1x64xf32> to vector<2x64xf32>
    %366 = arith.maximumf %363, %365 : vector<2x64xf32>
    %367 = arith.maximumf %361, %366 : vector<2x64xf32>
    %368 = arith.truncf %367 : vector<2x64xf32> to vector<2x64xbf16>
    %c9_340 = arith.constant 9 : index
    %c0_341 = arith.constant 0 : index
    %c0_342 = arith.constant 0 : index
    %369 = vector.load %arg8[%c9_340, %c0_341, %c0_342] : memref<16x64x512xbf16, #tpu.memory_space<vmem>>, vector<1x64x512xbf16>
    %370 = vector.shape_cast %369 : vector<1x64x512xbf16> to vector<64x512xbf16>
    %cst_343 = arith.constant dense<0.000000e+00> : vector<2x512xf32>
    %371 = tpu.matmul %368, %370, %cst_343 {dimension_numbers = #tpu.dot_dimension_numbers<[1], [0], [0], [1], [0, 0, 1, 1], [], []>} : vector<2x64xbf16>, vector<64x512xbf16>, vector<2x512xf32> -> vector<2x512xf32>
    %372 = arith.addf %356, %371 : vector<2x512xf32>
    %c0_344 = arith.constant 0 : index
    %c36 = arith.constant 36 : index
    %c0_345 = arith.constant 0 : index
    %373 = vector.load %arg12[%c0_344, %c36, %c0_345] : memref<2x64x64xf32, #tpu.memory_space<vmem>>, vector<2x1x64xf32>
    %374 = vector.shape_cast %373 : vector<2x1x64xf32> to vector<2x64xf32>
    %c0_346 = arith.constant 0 : index
    %c37 = arith.constant 37 : index
    %c0_347 = arith.constant 0 : index
    %375 = vector.load %arg12[%c0_346, %c37, %c0_347] : memref<2x64x64xf32, #tpu.memory_space<vmem>>, vector<2x1x64xf32>
    %376 = vector.shape_cast %375 : vector<2x1x64xf32> to vector<2x64xf32>
    %377 = arith.maximumf %374, %376 : vector<2x64xf32>
    %c0_348 = arith.constant 0 : index
    %c44 = arith.constant 44 : index
    %c0_349 = arith.constant 0 : index
    %378 = vector.load %arg12[%c0_348, %c44, %c0_349] : memref<2x64x64xf32, #tpu.memory_space<vmem>>, vector<2x1x64xf32>
    %379 = vector.shape_cast %378 : vector<2x1x64xf32> to vector<2x64xf32>
    %c0_350 = arith.constant 0 : index
    %c45 = arith.constant 45 : index
    %c0_351 = arith.constant 0 : index
    %380 = vector.load %arg12[%c0_350, %c45, %c0_351] : memref<2x64x64xf32, #tpu.memory_space<vmem>>, vector<2x1x64xf32>
    %381 = vector.shape_cast %380 : vector<2x1x64xf32> to vector<2x64xf32>
    %382 = arith.maximumf %379, %381 : vector<2x64xf32>
    %383 = arith.maximumf %377, %382 : vector<2x64xf32>
    %384 = arith.truncf %383 : vector<2x64xf32> to vector<2x64xbf16>
    %c10_352 = arith.constant 10 : index
    %c0_353 = arith.constant 0 : index
    %c0_354 = arith.constant 0 : index
    %385 = vector.load %arg8[%c10_352, %c0_353, %c0_354] : memref<16x64x512xbf16, #tpu.memory_space<vmem>>, vector<1x64x512xbf16>
    %386 = vector.shape_cast %385 : vector<1x64x512xbf16> to vector<64x512xbf16>
    %cst_355 = arith.constant dense<0.000000e+00> : vector<2x512xf32>
    %387 = tpu.matmul %384, %386, %cst_355 {dimension_numbers = #tpu.dot_dimension_numbers<[1], [0], [0], [1], [0, 0, 1, 1], [], []>} : vector<2x64xbf16>, vector<64x512xbf16>, vector<2x512xf32> -> vector<2x512xf32>
    %388 = arith.addf %372, %387 : vector<2x512xf32>
    %c0_356 = arith.constant 0 : index
    %c38 = arith.constant 38 : index
    %c0_357 = arith.constant 0 : index
    %389 = vector.load %arg12[%c0_356, %c38, %c0_357] : memref<2x64x64xf32, #tpu.memory_space<vmem>>, vector<2x1x64xf32>
    %390 = vector.shape_cast %389 : vector<2x1x64xf32> to vector<2x64xf32>
    %c0_358 = arith.constant 0 : index
    %c39 = arith.constant 39 : index
    %c0_359 = arith.constant 0 : index
    %391 = vector.load %arg12[%c0_358, %c39, %c0_359] : memref<2x64x64xf32, #tpu.memory_space<vmem>>, vector<2x1x64xf32>
    %392 = vector.shape_cast %391 : vector<2x1x64xf32> to vector<2x64xf32>
    %393 = arith.maximumf %390, %392 : vector<2x64xf32>
    %c0_360 = arith.constant 0 : index
    %c46 = arith.constant 46 : index
    %c0_361 = arith.constant 0 : index
    %394 = vector.load %arg12[%c0_360, %c46, %c0_361] : memref<2x64x64xf32, #tpu.memory_space<vmem>>, vector<2x1x64xf32>
    %395 = vector.shape_cast %394 : vector<2x1x64xf32> to vector<2x64xf32>
    %c0_362 = arith.constant 0 : index
    %c47 = arith.constant 47 : index
    %c0_363 = arith.constant 0 : index
    %396 = vector.load %arg12[%c0_362, %c47, %c0_363] : memref<2x64x64xf32, #tpu.memory_space<vmem>>, vector<2x1x64xf32>
    %397 = vector.shape_cast %396 : vector<2x1x64xf32> to vector<2x64xf32>
    %398 = arith.maximumf %395, %397 : vector<2x64xf32>
    %399 = arith.maximumf %393, %398 : vector<2x64xf32>
    %400 = arith.truncf %399 : vector<2x64xf32> to vector<2x64xbf16>
    %c11_364 = arith.constant 11 : index
    %c0_365 = arith.constant 0 : index
    %c0_366 = arith.constant 0 : index
    %401 = vector.load %arg8[%c11_364, %c0_365, %c0_366] : memref<16x64x512xbf16, #tpu.memory_space<vmem>>, vector<1x64x512xbf16>
    %402 = vector.shape_cast %401 : vector<1x64x512xbf16> to vector<64x512xbf16>
    %cst_367 = arith.constant dense<0.000000e+00> : vector<2x512xf32>
    %403 = tpu.matmul %400, %402, %cst_367 {dimension_numbers = #tpu.dot_dimension_numbers<[1], [0], [0], [1], [0, 0, 1, 1], [], []>} : vector<2x64xbf16>, vector<64x512xbf16>, vector<2x512xf32> -> vector<2x512xf32>
    %404 = arith.addf %388, %403 : vector<2x512xf32>
    %c0_368 = arith.constant 0 : index
    %c48 = arith.constant 48 : index
    %c0_369 = arith.constant 0 : index
    %405 = vector.load %arg12[%c0_368, %c48, %c0_369] : memref<2x64x64xf32, #tpu.memory_space<vmem>>, vector<2x1x64xf32>
    %406 = vector.shape_cast %405 : vector<2x1x64xf32> to vector<2x64xf32>
    %c0_370 = arith.constant 0 : index
    %c49 = arith.constant 49 : index
    %c0_371 = arith.constant 0 : index
    %407 = vector.load %arg12[%c0_370, %c49, %c0_371] : memref<2x64x64xf32, #tpu.memory_space<vmem>>, vector<2x1x64xf32>
    %408 = vector.shape_cast %407 : vector<2x1x64xf32> to vector<2x64xf32>
    %409 = arith.maximumf %406, %408 : vector<2x64xf32>
    %c0_372 = arith.constant 0 : index
    %c56 = arith.constant 56 : index
    %c0_373 = arith.constant 0 : index
    %410 = vector.load %arg12[%c0_372, %c56, %c0_373] : memref<2x64x64xf32, #tpu.memory_space<vmem>>, vector<2x1x64xf32>
    %411 = vector.shape_cast %410 : vector<2x1x64xf32> to vector<2x64xf32>
    %c0_374 = arith.constant 0 : index
    %c57 = arith.constant 57 : index
    %c0_375 = arith.constant 0 : index
    %412 = vector.load %arg12[%c0_374, %c57, %c0_375] : memref<2x64x64xf32, #tpu.memory_space<vmem>>, vector<2x1x64xf32>
    %413 = vector.shape_cast %412 : vector<2x1x64xf32> to vector<2x64xf32>
    %414 = arith.maximumf %411, %413 : vector<2x64xf32>
    %415 = arith.maximumf %409, %414 : vector<2x64xf32>
    %416 = arith.truncf %415 : vector<2x64xf32> to vector<2x64xbf16>
    %c12_376 = arith.constant 12 : index
    %c0_377 = arith.constant 0 : index
    %c0_378 = arith.constant 0 : index
    %417 = vector.load %arg8[%c12_376, %c0_377, %c0_378] : memref<16x64x512xbf16, #tpu.memory_space<vmem>>, vector<1x64x512xbf16>
    %418 = vector.shape_cast %417 : vector<1x64x512xbf16> to vector<64x512xbf16>
    %cst_379 = arith.constant dense<0.000000e+00> : vector<2x512xf32>
    %419 = tpu.matmul %416, %418, %cst_379 {dimension_numbers = #tpu.dot_dimension_numbers<[1], [0], [0], [1], [0, 0, 1, 1], [], []>} : vector<2x64xbf16>, vector<64x512xbf16>, vector<2x512xf32> -> vector<2x512xf32>
    %420 = arith.addf %404, %419 : vector<2x512xf32>
    %c0_380 = arith.constant 0 : index
    %c50 = arith.constant 50 : index
    %c0_381 = arith.constant 0 : index
    %421 = vector.load %arg12[%c0_380, %c50, %c0_381] : memref<2x64x64xf32, #tpu.memory_space<vmem>>, vector<2x1x64xf32>
    %422 = vector.shape_cast %421 : vector<2x1x64xf32> to vector<2x64xf32>
    %c0_382 = arith.constant 0 : index
    %c51 = arith.constant 51 : index
    %c0_383 = arith.constant 0 : index
    %423 = vector.load %arg12[%c0_382, %c51, %c0_383] : memref<2x64x64xf32, #tpu.memory_space<vmem>>, vector<2x1x64xf32>
    %424 = vector.shape_cast %423 : vector<2x1x64xf32> to vector<2x64xf32>
    %425 = arith.maximumf %422, %424 : vector<2x64xf32>
    %c0_384 = arith.constant 0 : index
    %c58 = arith.constant 58 : index
    %c0_385 = arith.constant 0 : index
    %426 = vector.load %arg12[%c0_384, %c58, %c0_385] : memref<2x64x64xf32, #tpu.memory_space<vmem>>, vector<2x1x64xf32>
    %427 = vector.shape_cast %426 : vector<2x1x64xf32> to vector<2x64xf32>
    %c0_386 = arith.constant 0 : index
    %c59 = arith.constant 59 : index
    %c0_387 = arith.constant 0 : index
    %428 = vector.load %arg12[%c0_386, %c59, %c0_387] : memref<2x64x64xf32, #tpu.memory_space<vmem>>, vector<2x1x64xf32>
    %429 = vector.shape_cast %428 : vector<2x1x64xf32> to vector<2x64xf32>
    %430 = arith.maximumf %427, %429 : vector<2x64xf32>
    %431 = arith.maximumf %425, %430 : vector<2x64xf32>
    %432 = arith.truncf %431 : vector<2x64xf32> to vector<2x64xbf16>
    %c13_388 = arith.constant 13 : index
    %c0_389 = arith.constant 0 : index
    %c0_390 = arith.constant 0 : index
    %433 = vector.load %arg8[%c13_388, %c0_389, %c0_390] : memref<16x64x512xbf16, #tpu.memory_space<vmem>>, vector<1x64x512xbf16>
    %434 = vector.shape_cast %433 : vector<1x64x512xbf16> to vector<64x512xbf16>
    %cst_391 = arith.constant dense<0.000000e+00> : vector<2x512xf32>
    %435 = tpu.matmul %432, %434, %cst_391 {dimension_numbers = #tpu.dot_dimension_numbers<[1], [0], [0], [1], [0, 0, 1, 1], [], []>} : vector<2x64xbf16>, vector<64x512xbf16>, vector<2x512xf32> -> vector<2x512xf32>
    %436 = arith.addf %420, %435 : vector<2x512xf32>
    %c0_392 = arith.constant 0 : index
    %c52 = arith.constant 52 : index
    %c0_393 = arith.constant 0 : index
    %437 = vector.load %arg12[%c0_392, %c52, %c0_393] : memref<2x64x64xf32, #tpu.memory_space<vmem>>, vector<2x1x64xf32>
    %438 = vector.shape_cast %437 : vector<2x1x64xf32> to vector<2x64xf32>
    %c0_394 = arith.constant 0 : index
    %c53 = arith.constant 53 : index
    %c0_395 = arith.constant 0 : index
    %439 = vector.load %arg12[%c0_394, %c53, %c0_395] : memref<2x64x64xf32, #tpu.memory_space<vmem>>, vector<2x1x64xf32>
    %440 = vector.shape_cast %439 : vector<2x1x64xf32> to vector<2x64xf32>
    %441 = arith.maximumf %438, %440 : vector<2x64xf32>
    %c0_396 = arith.constant 0 : index
    %c60 = arith.constant 60 : index
    %c0_397 = arith.constant 0 : index
    %442 = vector.load %arg12[%c0_396, %c60, %c0_397] : memref<2x64x64xf32, #tpu.memory_space<vmem>>, vector<2x1x64xf32>
    %443 = vector.shape_cast %442 : vector<2x1x64xf32> to vector<2x64xf32>
    %c0_398 = arith.constant 0 : index
    %c61 = arith.constant 61 : index
    %c0_399 = arith.constant 0 : index
    %444 = vector.load %arg12[%c0_398, %c61, %c0_399] : memref<2x64x64xf32, #tpu.memory_space<vmem>>, vector<2x1x64xf32>
    %445 = vector.shape_cast %444 : vector<2x1x64xf32> to vector<2x64xf32>
    %446 = arith.maximumf %443, %445 : vector<2x64xf32>
    %447 = arith.maximumf %441, %446 : vector<2x64xf32>
    %448 = arith.truncf %447 : vector<2x64xf32> to vector<2x64xbf16>
    %c14_400 = arith.constant 14 : index
    %c0_401 = arith.constant 0 : index
    %c0_402 = arith.constant 0 : index
    %449 = vector.load %arg8[%c14_400, %c0_401, %c0_402] : memref<16x64x512xbf16, #tpu.memory_space<vmem>>, vector<1x64x512xbf16>
    %450 = vector.shape_cast %449 : vector<1x64x512xbf16> to vector<64x512xbf16>
    %cst_403 = arith.constant dense<0.000000e+00> : vector<2x512xf32>
    %451 = tpu.matmul %448, %450, %cst_403 {dimension_numbers = #tpu.dot_dimension_numbers<[1], [0], [0], [1], [0, 0, 1, 1], [], []>} : vector<2x64xbf16>, vector<64x512xbf16>, vector<2x512xf32> -> vector<2x512xf32>
    %452 = arith.addf %436, %451 : vector<2x512xf32>
    %c0_404 = arith.constant 0 : index
    %c54 = arith.constant 54 : index
    %c0_405 = arith.constant 0 : index
    %453 = vector.load %arg12[%c0_404, %c54, %c0_405] : memref<2x64x64xf32, #tpu.memory_space<vmem>>, vector<2x1x64xf32>
    %454 = vector.shape_cast %453 : vector<2x1x64xf32> to vector<2x64xf32>
    %c0_406 = arith.constant 0 : index
    %c55 = arith.constant 55 : index
    %c0_407 = arith.constant 0 : index
    %455 = vector.load %arg12[%c0_406, %c55, %c0_407] : memref<2x64x64xf32, #tpu.memory_space<vmem>>, vector<2x1x64xf32>
    %456 = vector.shape_cast %455 : vector<2x1x64xf32> to vector<2x64xf32>
    %457 = arith.maximumf %454, %456 : vector<2x64xf32>
    %c0_408 = arith.constant 0 : index
    %c62 = arith.constant 62 : index
    %c0_409 = arith.constant 0 : index
    %458 = vector.load %arg12[%c0_408, %c62, %c0_409] : memref<2x64x64xf32, #tpu.memory_space<vmem>>, vector<2x1x64xf32>
    %459 = vector.shape_cast %458 : vector<2x1x64xf32> to vector<2x64xf32>
    %c0_410 = arith.constant 0 : index
    %c63 = arith.constant 63 : index
    %c0_411 = arith.constant 0 : index
    %460 = vector.load %arg12[%c0_410, %c63, %c0_411] : memref<2x64x64xf32, #tpu.memory_space<vmem>>, vector<2x1x64xf32>
    %461 = vector.shape_cast %460 : vector<2x1x64xf32> to vector<2x64xf32>
    %462 = arith.maximumf %459, %461 : vector<2x64xf32>
    %463 = arith.maximumf %457, %462 : vector<2x64xf32>
    %464 = arith.truncf %463 : vector<2x64xf32> to vector<2x64xbf16>
    %c15_412 = arith.constant 15 : index
    %c0_413 = arith.constant 0 : index
    %c0_414 = arith.constant 0 : index
    %465 = vector.load %arg8[%c15_412, %c0_413, %c0_414] : memref<16x64x512xbf16, #tpu.memory_space<vmem>>, vector<1x64x512xbf16>
    %466 = vector.shape_cast %465 : vector<1x64x512xbf16> to vector<64x512xbf16>
    %cst_415 = arith.constant dense<0.000000e+00> : vector<2x512xf32>
    %467 = tpu.matmul %464, %466, %cst_415 {dimension_numbers = #tpu.dot_dimension_numbers<[1], [0], [0], [1], [0, 0, 1, 1], [], []>} : vector<2x64xbf16>, vector<64x512xbf16>, vector<2x512xf32> -> vector<2x512xf32>
    %468 = arith.addf %452, %467 : vector<2x512xf32>
    %c0_416 = arith.constant 0 : index
    %c0_417 = arith.constant 0 : index
    %469 = vector.load %arg9[%c0_416, %c0_417] : memref<1x512xf32, #tpu.memory_space<vmem>>, vector<1x512xf32>
    %470 = vector.broadcast %469 : vector<1x512xf32> to vector<2x512xf32>
    %471 = arith.addf %468, %470 : vector<2x512xf32>
    %c0_418 = arith.constant 0 : index
    %c0_419 = arith.constant 0 : index
    %472 = vector.load %arg10[%c0_418, %c0_419] : memref<2x512xf32, #tpu.memory_space<vmem>>, vector<2x512xf32>
    tpu.vector_store %arg10[%c0_418, %c0_419], %471 {strides = array<i32>} : memref<2x512xf32, #tpu.memory_space<vmem>>, vector<2x512xf32>,
    return
  }
  func.func @transform_0(%arg0: i32) -> (i32, i32, i32) {
    %c0_i32 = arith.constant 0 : i32
    %c0_i32_0 = arith.constant 0 : i32
    %c0_i32_1 = arith.constant 0 : i32
    return %arg0, %c0_i32, %c0_i32_0 : i32, i32, i32
  }
  func.func @transform_1(%arg0: i32) -> (i32, i32) {
    %c0_i32 = arith.constant 0 : i32
    %c0_i32_0 = arith.constant 0 : i32
    %c0_i32_1 = arith.constant 0 : i32
    return %c0_i32, %c0_i32_0 : i32, i32
  }
  func.func @transform_2(%arg0: i32) -> (i32, i32) {
    %c0_i32 = arith.constant 0 : i32
    %c0_i32_0 = arith.constant 0 : i32
    %c0_i32_1 = arith.constant 0 : i32
    return %c0_i32, %c0_i32_0 : i32, i32
  }
  func.func @transform_3(%arg0: i32) -> (i32, i32) {
    %c0_i32 = arith.constant 0 : i32
    %c0_i32_0 = arith.constant 0 : i32
    %c0_i32_1 = arith.constant 0 : i32
    return %c0_i32, %c0_i32_0 : i32, i32
  }
  func.func @transform_4(%arg0: i32) -> (i32, i32, i32) {
    %c0_i32 = arith.constant 0 : i32
    %c0_i32_0 = arith.constant 0 : i32
    %c0_i32_1 = arith.constant 0 : i32
    %c0_i32_2 = arith.constant 0 : i32
    return %c0_i32, %c0_i32_0, %c0_i32_1 : i32, i32, i32
  }
  func.func @transform_5(%arg0: i32) -> (i32, i32) {
    %c0_i32 = arith.constant 0 : i32
    %c0_i32_0 = arith.constant 0 : i32
    %c0_i32_1 = arith.constant 0 : i32
    return %c0_i32, %c0_i32_0 : i32, i32
  }
  func.func @transform_6(%arg0: i32) -> (i32, i32) {
    %c0_i32 = arith.constant 0 : i32
    %c0_i32_0 = arith.constant 0 : i32
    %c0_i32_1 = arith.constant 0 : i32
    return %c0_i32, %c0_i32_0 : i32, i32
  }
  func.func @transform_7(%arg0: i32) -> (i32, i32, i32) {
    %c0_i32 = arith.constant 0 : i32
    %c0_i32_0 = arith.constant 0 : i32
    %c0_i32_1 = arith.constant 0 : i32
    %c0_i32_2 = arith.constant 0 : i32
    return %c0_i32, %c0_i32_0, %c0_i32_1 : i32, i32, i32
  }
  func.func @transform_8(%arg0: i32) -> (i32, i32) {
    %c0_i32 = arith.constant 0 : i32
    %c0_i32_0 = arith.constant 0 : i32
    %c0_i32_1 = arith.constant 0 : i32
    return %c0_i32, %c0_i32_0 : i32, i32
  }
  func.func @transform_9(%arg0: i32) -> (i32, i32) {
    %c0_i32 = arith.constant 0 : i32
    %c0_i32_0 = arith.constant 0 : i32
    return %arg0, %c0_i32 : i32, i32
  }
}

</mosaic_0001>

<bundles_post_ra>
// kernel: gfe_forward.1
= control target key start
LH: loop header
LB: loop body
LE: loop exit
PB: predicated region body
PF: predicated region fallthrough
CT: control target
= control target key end

     0   :  { %vm722_vm0 = vcmask 261120   ;;  %s16658_s0 = inlined_call_operand.vmem [shape: bf16[2,768,32], index: 0, kind: input, shape index: {}]   ;;  %s16659_s1 = inlined_call_operand.vmem [shape: bf16[32,32], index: 1, kind: input, shape index: {}]   ;;  %s16660_s2 = inlined_call_operand.vmem [shape: f32[1,32], index: 2, kind: input, shape index: {}]   ;;  %s16661_s3 = inlined_call_operand.vmem [shape: f32[1,32], index: 3, kind: input, shape index: {}]   ;;  %s16662_s4 = inlined_call_operand.vmem [shape: bf16[25,32,64], index: 4, kind: input, shape index: {}]   ;;  %s16663_s5 = inlined_call_operand.vmem [shape: f32[1,64], index: 5, kind: input, shape index: {}]   ;;  %s16664_s6 = inlined_call_operand.vmem [shape: f32[1,64], index: 6, kind: input, shape index: {}]   ;;  %s16665_s7 = inlined_call_operand.vmem [shape: bf16[16,64,512], index: 7, kind: input, shape index: {}]   ;;  %s16666_s8 = inlined_call_operand.vmem [shape: f32[1,512], index: 8, kind: input, shape index: {}]   ;;  %s16667_s9 = inlined_call_operand.hbm [shape: f32[2,512], index: 9, kind: output, shape index: {}]  }
   0x1   :  { %v12996_v0 = vld [vmem:[%s16659_s1] sm:$0xff]   ;;  %v12997_v1 = vld [vmem:[%s16659_s1 + $0x8] sm:$0xff]   ;;  %v13000_v4 = vld [vmem:[%s16658_s0 + $0x10] sm:$0xff]  }
   0x2   :  { %11913 = vmatprep.subr.bf16.mxu0 %v12996_v0  ;;  %v12998_v2 = vld [vmem:[%s16658_s0] sm:$0xff]   ;;  %v12999_v3 = vld [vmem:[%s16658_s0 + $0x8] sm:$0xff]   ;;  %v13001_v5 = vld [vmem:[%s16658_s0 + $0x18] sm:$0xff]  }
   0x3   :  { %11914 = vmatpush3.bf16.msra.mxu0 %v12996_v0  ;;  %11917 = vmatprep.mubr.msk.bf16.mxu0 %vm722_vm0, %v12998_v2  ;;  %v13002_v6 = vld [vmem:[%s16658_s0 + $0x20] sm:$0xff]   ;;  %v13003_v7 = vld [vmem:[%s16658_s0 + $0x28] sm:$0xff]   ;;  %v13004_v8 = vld [vmem:[%s16658_s0 + $0x30] sm:$0xff]  }
   0x4   :  { %11915 = vmatprep.subr.bf16.mxu0 %v12997_v1  ;;  %v13005_v9 = vld [vmem:[%s16658_s0 + $0x38] sm:$0xff]   ;;  %v13006_v10 = vld [vmem:[%s16658_s0 + $0x40] sm:$0xff]   ;;  %v13007_v11 = vld [vmem:[%s16658_s0 + $0x48] sm:$0xff]  }
   0x5   :  { %v13008_v12 = vld [vmem:[%s16658_s0 + $0x50] sm:$0xff]   ;;  %v13009_v13 = vld [vmem:[%s16658_s0 + $0x58] sm:$0xff]   ;;  %v13010_v14 = vld [vmem:[%s16658_s0 + $0x60] sm:$0xff]  }
   0x6   :  { %v13011_v15 = vld [vmem:[%s16658_s0 + $0x68] sm:$0xff]   ;;  %v13012_v16 = vld [vmem:[%s16658_s0 + $0x70] sm:$0xff]   ;;  %v13013_v17 = vld [vmem:[%s16658_s0 + $0x78] sm:$0xff]  }
   0x7   :  { %11916 = vmatpush3.bf16.msra.mxu0 %v12997_v1  ;;  %v13014_v18 = vld [vmem:[%s16658_s0 + $0x80] sm:$0xff]   ;;  %v13015_v19 = vld [vmem:[%s16658_s0 + $0x88] sm:$0xff]   ;;  %v13016_v20 = vld [vmem:[%s16658_s0 + $0x90] sm:$0xff]  }
   0x8   :  { %v13017_v21 = vld [vmem:[%s16658_s0 + $0x98] sm:$0xff]   ;;  %v13018_v22 = vld [vmem:[%s16658_s0 + $0xa0] sm:$0xff]   ;;  %v13019_v23 = vld [vmem:[%s16658_s0 + $0xa8] sm:$0xff]  }
   0x9   :  { %v13020_v24 = vld [vmem:[%s16658_s0 + $0xb0] sm:$0xff]   ;;  %v13021_v25 = vld [vmem:[%s16658_s0 + $0xb8] sm:$0xff]   ;;  %v13022_v26 = vld [vmem:[%s16658_s0 + $0xc0] sm:$0xff]  }
   0xa   :  { %11918 = vmatmul.mubr.msk.bf16.vlgmr.msra.gmra.mrb[0].mxu0 %vm722_vm0, %v12999_v3  ;;  %v13023_v27 = vld [vmem:[%s16658_s0 + $0xc8] sm:$0xff]   ;;  %v13024_v28 = vld [vmem:[%s16658_s0 + $0xd0] sm:$0xff]   ;;  %v13025_v29 = vld [vmem:[%s16658_s0 + $0xd8] sm:$0xff]  }
   0xb   :  { %11921 = vmatprep.mubr.msk.bf16.mxu0 %vm722_vm0, %v13000_v4  ;;  %v13026_v30 = vld [vmem:[%s16658_s0 + $0xe0] sm:$0xff]   ;;  %v13027_v31 = vld [vmem:[%s16658_s0 + $0xe8] sm:$0xff]   ;;  %v13028_v32 = vld [vmem:[%s16658_s0 + $0xf0] sm:$0xff]  }
   0xc   :  { %v13029_v33 = vld [vmem:[%s16658_s0 + $0xf8] sm:$0xff]   ;;  %v13030_v34 = vld [vmem:[%s16658_s0 + $0x100] sm:$0xff]   ;;  %v13031_v35 = vld [vmem:[%s16658_s0 + $0x108] sm:$0xff]  }
   0xd   :  { %v13032_v36 = vld [vmem:[%s16658_s0 + $0x110] sm:$0xff]   ;;  %v13033_v37 = vld [vmem:[%s16658_s0 + $0x118] sm:$0xff]   ;;  %v13034_v38 = vld [vmem:[%s16658_s0 + $0x120] sm:$0xff]  }
   0xe   :  { %v13035_v39 = vld [vmem:[%s16658_s0 + $0x128] sm:$0xff]   ;;  %v13036_v40 = vld [vmem:[%s16658_s0 + $0x130] sm:$0xff]   ;;  %v13037_v41 = vld [vmem:[%s16658_s0 + $0x138] sm:$0xff]  }
   0xf   :  { %v13038_v42 = vld [vmem:[%s16658_s0 + $0x140] sm:$0xff]   ;;  %v13070_v43 = vld [vmem:[%s16662_s4 + $0x10] sm:$0xff]   ;;  %v13039_v44 = vld [vmem:[%s16658_s0 + $0x148] sm:$0xff]  }
  0x10   :  { %12109 = vmatprep.subr.bf16.mxu1 %v13070_v43  ;;  %v13040_v45 = vld [vmem:[%s16658_s0 + $0x150] sm:$0xff]   ;;  %v13072_v46 = vld [vmem:[%s16662_s4 + $0x18] sm:$0xff]   ;;  %v13042_v48 = vld [vmem:[%s16658_s0 + $0x160] sm:$0xff]  }
  0x11   :  { %12110 = vmatpush3.bf16.msra.mxu1 %v13070_v43  ;;  %v13041_v47 = vld [vmem:[%s16658_s0 + $0x158] sm:$0xff]   ;;  %v13043_v49 = vld [vmem:[%s16658_s0 + $0x168] sm:$0xff]   ;;  %v13044_v50 = vld [vmem:[%s16658_s0 + $0x170] sm:$0xff]  }
  0x12   :  { %11922 = vmatmul.mubr.msk.bf16.gmra.mrb[4].mxu0 %vm722_vm0, %v13001_v5  ;;  %12111 = vmatprep.subr.bf16.mxu1 %v13072_v46  ;;  %v13045_v51 = vld [vmem:[%s16658_s0 + $0x178] sm:$0xff]   ;;  %v13046_v52 = vld [vmem:[%s16658_s0 + $0x180] sm:$0xff]   ;;  %v13047_v53 = vld [vmem:[%s16658_s0 + $0x188] sm:$0xff]  }
  0x13   :  { %11925 = vmatprep.mubr.msk.bf16.mxu0 %vm722_vm0, %v13002_v6  ;;  %v13048_v54 = vld [vmem:[%s16658_s0 + $0x190] sm:$0xff]   ;;  %v13049_v55 = vld [vmem:[%s16658_s0 + $0x198] sm:$0xff]   ;;  %v13050_v56 = vld [vmem:[%s16658_s0 + $0x1a0] sm:$0xff]  }
  0x14   :  { %v13051_v57 = vld [vmem:[%s16658_s0 + $0x1a8] sm:$0xff]  }
  0x15   :  { %12112 = vmatpush3.bf16.msra.mxu1 %v13072_v46 }
  0x1a   :  { %11926 = vmatmul.mubr.msk.bf16.gmra.mrb[8].mxu0 %vm722_vm0, %v13003_v7 }
  0x1b   :  { %11929 = vmatprep.mubr.msk.bf16.mxu0 %vm722_vm0, %v13004_v8 }
  0x22   :  { %11930 = vmatmul.mubr.msk.bf16.gmra.mrb[12].mxu0 %vm722_vm0, %v13005_v9 }
  0x23   :  { %11933 = vmatprep.mubr.msk.bf16.mxu0 %vm722_vm0, %v13006_v10 }
  0x2a   :  { %11934 = vmatmul.mubr.msk.bf16.gmra.mrb[16].mxu0 %vm722_vm0, %v13007_v11 }
  0x2b   :  { %11937 = vmatprep.mubr.msk.bf16.mxu0 %vm722_vm0, %v13008_v12 }
  0x32   :  { %11938 = vmatmul.mubr.msk.bf16.gmra.mrb[20].mxu0 %vm722_vm0, %v13009_v13 }
  0x33   :  { %11941 = vmatprep.mubr.msk.bf16.mxu0 %vm722_vm0, %v13010_v14 }
  0x3a   :  { %11942 = vmatmul.mubr.msk.bf16.gmra.mrb[24].mxu0 %vm722_vm0, %v13011_v15 }
  0x3b   :  { %11945 = vmatprep.mubr.msk.bf16.mxu0 %vm722_vm0, %v13012_v16 }
  0x42   :  { %11946 = vmatmul.mubr.msk.bf16.gmra.mrb[28].mxu0 %vm722_vm0, %v13013_v17 }
  0x43   :  { %11949 = vmatprep.mubr.msk.bf16.mxu0 %vm722_vm0, %v13014_v18 }
  0x4a   :  { %11950 = vmatmul.mubr.msk.bf16.gmra.mrb[32].mxu0 %vm722_vm0, %v13015_v19 }
  0x4b   :  { %11953 = vmatprep.mubr.msk.bf16.mxu0 %vm722_vm0, %v13016_v20 }
  0x52   :  { %11954 = vmatmul.mubr.msk.bf16.gmra.mrb[36].mxu0 %vm722_vm0, %v13017_v21 }
  0x53   :  { %11957 = vmatprep.mubr.msk.bf16.mxu0 %vm722_vm0, %v13018_v22 }
  0x5a   :  { %11958 = vmatmul.mubr.msk.bf16.gmra.mrb[40].mxu0 %vm722_vm0, %v13019_v23 }
  0x5b   :  { %11961 = vmatprep.mubr.msk.bf16.mxu0 %vm722_vm0, %v13020_v24 }
  0x62   :  { %11962 = vmatmul.mubr.msk.bf16.gmra.mrb[44].mxu0 %vm722_vm0, %v13021_v25 }
  0x63   :  { %11965 = vmatprep.mubr.msk.bf16.mxu0 %vm722_vm0, %v13022_v26 }
  0x6a   :  { %11966 = vmatmul.mubr.msk.bf16.gmra.mrb[48].mxu0 %vm722_vm0, %v13023_v27 }
  0x6b   :  { %11969 = vmatprep.mubr.msk.bf16.mxu0 %vm722_vm0, %v13024_v28 }
  0x72   :  { %11970 = vmatmul.mubr.msk.bf16.gmra.mrb[52].mxu0 %vm722_vm0, %v13025_v29 }
  0x73   :  { %11973 = vmatprep.mubr.msk.bf16.mxu0 %vm722_vm0, %v13026_v30 }
  0x7a   :  { %11974 = vmatmul.mubr.msk.bf16.gmra.mrb[56].mxu0 %vm722_vm0, %v13027_v31 }
  0x7b   :  { %11977 = vmatprep.mubr.msk.bf16.mxu0 %vm722_vm0, %v13028_v32 }
  0x82   :  { %11978 = vmatmul.mubr.msk.bf16.gmra.mrb[60].mxu0 %vm722_vm0, %v13029_v33 }
  0x83   :  { %11981 = vmatprep.mubr.msk.bf16.mxu0 %vm722_vm0, %v13030_v34 }
  0x8a   :  { %11982 = vmatmul.mubr.msk.bf16.gmra.mrb[64].mxu0 %vm722_vm0, %v13031_v35 }
  0x8b   :  { %11985 = vmatprep.mubr.msk.bf16.mxu0 %vm722_vm0, %v13032_v36 }
  0x92   :  { %11986 = vmatmul.mubr.msk.bf16.gmra.mrb[68].mxu0 %vm722_vm0, %v13033_v37 }
  0x93   :  { %11989 = vmatprep.mubr.msk.bf16.mxu0 %vm722_vm0, %v13034_v38 }
  0x9a   :  { %11990 = vmatmul.mubr.msk.bf16.gmra.mrb[72].mxu0 %vm722_vm0, %v13035_v39 }
  0x9b   :  { %11993 = vmatprep.mubr.msk.bf16.mxu0 %vm722_vm0, %v13036_v40 }
  0xa2   :  { %11994 = vmatmul.mubr.msk.bf16.gmra.mrb[76].mxu0 %vm722_vm0, %v13037_v41 }
  0xa3   :  { %11997 = vmatprep.mubr.msk.bf16.mxu0 %vm722_vm0, %v13038_v42 }
  0xaa   :  { %11998 = vmatmul.mubr.msk.bf16.gmra.mrb[80].mxu0 %vm722_vm0, %v13039_v44 }
  0xab   :  { %12001 = vmatprep.mubr.msk.bf16.mxu0 %vm722_vm0, %v13040_v45 }
  0xb2   :  { %12002 = vmatmul.mubr.msk.bf16.gmra.mrb[84].mxu0 %vm722_vm0, %v13041_v47 }
  0xb3   :  { %12005 = vmatprep.mubr.msk.bf16.mxu0 %vm722_vm0, %v13042_v48 }
  0xba   :  { %12006 = vmatmul.mubr.msk.bf16.gmra.mrb[88].mxu0 %vm722_vm0, %v13043_v49 }
  0xbb   :  { %12009 = vmatprep.mubr.msk.bf16.mxu0 %vm722_vm0, %v13044_v50 }
  0xc2   :  { %12010 = vmatmul.mubr.msk.bf16.gmra.mrb[92].mxu0 %vm722_vm0, %v13045_v51 }
  0xc3   :  { %12013 = vmatprep.mubr.msk.bf16.mxu0 %vm722_vm0, %v13046_v52 }
  0xca   :  { %12014 = vmatmul.mubr.msk.bf16.gmra.mrb[96].mxu0 %vm722_vm0, %v13047_v53 }
  0xcb   :  { %12017 = vmatprep.mubr.msk.bf16.mxu0 %vm722_vm0, %v13048_v54 }
  0xd2   :  { %12018 = vmatmul.mubr.msk.bf16.gmra.mrb[100].mxu0 %vm722_vm0, %v13049_v55 }
  0xd3   :  { %12021 = vmatprep.mubr.msk.bf16.mxu0 %vm722_vm0, %v13050_v56 }
  0xd4   :  { %14 = vsyncpa [#allocation5], 0  ;;  %v13052_v58 = vld [vmem:[%s16658_s0 + $0x1b0] sm:$0xff]   ;;  %v13905_v59 = vld [vmem:[%s16660_s2] ss:$0 sm:$0xff]  ;;  %vm7077_vm1 = vcmask 523264  }
  0xd5   :  { %v13911_v61 = vld [vmem:[%s16661_s3] ss:$0 sm:$0xff]  ;;  %v13053_v0 = vld [vmem:[%s16658_s0 + $0x1b8] sm:$0xff]   ;;  %v13055_v19 = vld [vmem:[%s16658_s0 + $0x1c8] sm:$0xff]   ;;  %vm7164_vm2 = vcmask 1041409  }
  0xd6   :  { %v13054_v3 = vld [vmem:[%s16658_s0 + $0x1c0] sm:$0xff]   ;;  %v13056_v23 = vld [vmem:[%s16658_s0 + $0x1d0] sm:$0xff]   ;;  %v13057_v39 = vld [vmem:[%s16658_s0 + $0x1d8] sm:$0xff]  }
  0xd7   :  { %v13058_v44 = vld [vmem:[%s16658_s0 + $0x1e0] sm:$0xff]  }
  0xda   :  { %12022 = vmatmul.mubr.msk.bf16.gmra.mrb[104].mxu0 %vm722_vm0, %v13051_v57 }
  0xdb   :  { %12025 = vmatprep.mubr.msk.bf16.mxu0 %vm722_vm0, %v13052_v58 }
  0xdd   :  { %v11919_v60 = vpop.f32.mrb[0].mxu0 }
  0xde   :  { %v1821_v62 = vmul.f32 %v11919_v60, %v13905_v59  ;;  %v1045_v63 = vpop.f32.mrb[1].mxu0 }
  0xdf   :  { %v1819_v1 = vmul.f32 %v13905_v59, %v1045_v63  ;;  %v11920_v2 = vpop.f32.mrb[2].mxu0  ;;  %v13059_v63 = vld [vmem:[%s16658_s0 + $0x1e8] sm:$0xff]  }
  0xe0   :  { %v2020_v4 = vadd.f32 %v13911_v61, %v1821_v62  ;;  %v1822_v5 = vmul.f32 %v11920_v2, %v13905_v59  ;;  %v1048_v6 = vpop.f32.mrb[3].mxu0 }
  0xe1   :  { %v2018_v7 = vadd.f32 %v13911_v61, %v1819_v1  ;;  %v1820_v8 = vmul.f32 %v13905_v59, %v1048_v6 }
  0xe2   :  { %v2212_v9 = vmax.f32 %v2020_v4, 0.0  ;;  %v2021_v10 = vadd.f32 %v13911_v61, %v1822_v5  ;;  %12026 = vmatmul.mubr.msk.bf16.gmra.mrb[108].mxu0 %vm722_vm0, %v13053_v0 }
  0xe3   :  { %v2210_v11 = vmax.f32 %v2018_v7, 0.0  ;;  %v2019_v12 = vadd.f32 %v13911_v61, %v1820_v8  ;;  %12029 = vmatprep.mubr.msk.bf16.mxu0 %vm722_vm0, %v13054_v3  ;;  %v13060_v3 = vld [vmem:[%s16658_s0 + $0x1f0] sm:$0xff]  }
  0xe4   :  { %v2213_v13 = vmax.f32 %v2021_v10, 0.0 }
  0xe5   :  { %v2402_v14 = vmax.f32 %v2210_v11, %v2212_v9  ;;  %v2211_v15 = vmax.f32 %v2019_v12, 0.0  ;;  %v11923_v16 = vpop.f32.mrb[4].mxu0 }
  0xe6   :  { %v1825_v17 = vmul.f32 %v11923_v16, %v13905_v59  ;;  %v1061_v18 = vpop.f32.mrb[5].mxu0 }
  0xe7   :  { %v2403_v20 = vmax.f32 %v2211_v15, %v2213_v13  ;;  %v1823_v21 = vmul.f32 %v13905_v59, %v1061_v18  ;;  %v11924_v22 = vpop.f32.mrb[6].mxu0 }
  0xe8   :  { %v2024_v24 = vadd.f32 %v13911_v61, %v1825_v17  ;;  %v1826_v25 = vmul.f32 %v11924_v22, %v13905_v59  ;;  %v1064_v26 = vpop.f32.mrb[7].mxu0 }
  0xe9   :  { %v2022_v27 = vadd.f32 %v13911_v61, %v1823_v21  ;;  %v1824_v28 = vmul.f32 %v13905_v59, %v1064_v26 }
  0xea   :  { %v2216_v29 = vmax.f32 %v2024_v24, 0.0  ;;  %v2025_v30 = vadd.f32 %v13911_v61, %v1826_v25  ;;  %12030 = vmatmul.mubr.msk.bf16.gmra.mrb[112].mxu0 %vm722_vm0, %v13055_v19  ;;  %v13061_v19 = vld [vmem:[%s16658_s0 + $0x1f8] sm:$0xff]   ;;  %v13062_v24 = vld [vmem:[%s16658_s0 + $0x200] sm:$0xff]  }
  0xeb   :  { %v2214_v31 = vmax.f32 %v2022_v27, 0.0  ;;  %v2023_v32 = vadd.f32 %v13911_v61, %v1824_v28  ;;  %12033 = vmatprep.mubr.msk.bf16.mxu0 %vm722_vm0, %v13056_v23 }
  0xec   :  { %v2217_v33 = vmax.f32 %v2025_v30, 0.0 }
  0xed   :  { %v2450_v34 = vmax.f32 %v2214_v31, %v2216_v29  ;;  %v2215_v35 = vmax.f32 %v2023_v32, 0.0  ;;  %v11927_v36 = vpop.f32.mrb[8].mxu0 }
  0xee   :  { %v1829_v37 = vmul.f32 %v11927_v36, %v13905_v59  ;;  %v1077_v38 = vpop.f32.mrb[9].mxu0 }
  0xef   :  { %v2498_v40 = vmax.f32 %v2402_v14, %v2450_v34  ;;  %v2451_v41 = vmax.f32 %v2215_v35, %v2217_v33  ;;  %v1827_v42 = vmul.f32 %v13905_v59, %v1077_v38  ;;  %v11928_v43 = vpop.f32.mrb[10].mxu0 }
  0xf0   :  { %v2028_v45 = vadd.f32 %v13911_v61, %v1829_v37  ;;  %v1830_v46 = vmul.f32 %v11928_v43, %v13905_v59  ;;  %v1080_v47 = vpop.f32.mrb[11].mxu0 }
  0xf1   :  { %2546 = vst.msk [vmem:[#allocation2] sm:$0xff] %vm722_vm0, %v2498_v40  ;;  %v2499_v48 = vmax.f32 %v2403_v20, %v2451_v41  ;;  %v2026_v49 = vadd.f32 %v13911_v61, %v1827_v42  ;;  %v1828_v50 = vmul.f32 %v13905_v59, %v1080_v47  ;;  %v13063_v41 = vld [vmem:[%s16658_s0 + $0x208] sm:$0xff]  }
  0xf2   :  { %v2220_v51 = vmax.f32 %v2028_v45, 0.0  ;;  %v2029_v52 = vadd.f32 %v13911_v61, %v1830_v46  ;;  %12034 = vmatmul.mubr.msk.bf16.gmra.mrb[116].mxu0 %vm722_vm0, %v13057_v39  ;;  %v13064_v45 = vld [vmem:[%s16658_s0 + $0x210] sm:$0xff]  }
  0xf3   :  { %2547 = vst.msk [vmem:[#allocation2 + $0x8] sm:$0xff] %vm722_vm0, %v2499_v48  ;;  %v2218_v53 = vmax.f32 %v2026_v49, 0.0  ;;  %v2027_v54 = vadd.f32 %v13911_v61, %v1828_v50  ;;  %12037 = vmatprep.mubr.msk.bf16.mxu0 %vm722_vm0, %v13058_v44 }
  0xf4   :  { %v2221_v55 = vmax.f32 %v2029_v52, 0.0 }
  0xf5   :  { %v2404_v56 = vmax.f32 %v2218_v53, %v2220_v51  ;;  %v2219_v57 = vmax.f32 %v2027_v54, 0.0  ;;  %v11931_v58 = vpop.f32.mrb[12].mxu0 }
  0xf6   :  { %v1833_v60 = vmul.f32 %v11931_v58, %v13905_v59  ;;  %v1093_v62 = vpop.f32.mrb[13].mxu0 }
  0xf7   :  { %v2405_v0 = vmax.f32 %v2219_v57, %v2221_v55  ;;  %v1831_v1 = vmul.f32 %v13905_v59, %v1093_v62  ;;  %v11932_v2 = vpop.f32.mrb[14].mxu0 }
  0xf8   :  { %v2032_v4 = vadd.f32 %v13911_v61, %v1833_v60  ;;  %v1834_v5 = vmul.f32 %v11932_v2, %v13905_v59  ;;  %v1096_v6 = vpop.f32.mrb[15].mxu0  ;;  %v13065_v2 = vld [vmem:[%s16658_s0 + $0x218] sm:$0xff]  }
  0xf9   :  { %v2030_v7 = vadd.f32 %v13911_v61, %v1831_v1  ;;  %v1832_v8 = vmul.f32 %v13905_v59, %v1096_v6 }
  0xfa   :  { %v2224_v9 = vmax.f32 %v2032_v4, 0.0  ;;  %v2033_v10 = vadd.f32 %v13911_v61, %v1834_v5  ;;  %12038 = vmatmul.mubr.msk.bf16.gmra.mrb[120].mxu0 %vm722_vm0, %v13059_v63  ;;  %v2622_v53 = vld [vmem:[#allocation2 + $0x1] sm:$0xff] }
  0xfb   :  { %v2222_v11 = vmax.f32 %v2030_v7, 0.0  ;;  %v2031_v12 = vadd.f32 %v13911_v61, %v1832_v8  ;;  %12041 = vmatprep.mubr.msk.bf16.mxu0 %vm722_vm0, %v13060_v3  ;;  %v13066_v7 = vld [vmem:[%s16658_s0 + $0x220] sm:$0xff]  }
  0xfc   :  { %v2225_v13 = vmax.f32 %v2033_v10, 0.0 }
  0xfd   :  { %v2452_v14 = vmax.f32 %v2222_v11, %v2224_v9  ;;  %v2223_v15 = vmax.f32 %v2031_v12, 0.0  ;;  %v11935_v16 = vpop.f32.mrb[16].mxu0 }
  0xfe   :  { %v1837_v17 = vmul.f32 %v11935_v16, %v13905_v59  ;;  %v1109_v18 = vpop.f32.mrb[17].mxu0 }
  0xff   :  { %v2500_v20 = vmax.f32 %v2404_v56, %v2452_v14  ;;  %v2453_v21 = vmax.f32 %v2223_v15, %v2225_v13  ;;  %v1835_v22 = vmul.f32 %v13905_v59, %v1109_v18  ;;  %v11936_v23 = vpop.f32.mrb[18].mxu0 }
 0x100   :  { %v2036_v25 = vadd.f32 %v13911_v61, %v1837_v17  ;;  %v1838_v26 = vmul.f32 %v11936_v23, %v13905_v59  ;;  %v1112_v27 = vpop.f32.mrb[19].mxu0 }
 0x101   :  { %2548 = vst.msk [vmem:[#allocation2 + $0x10] sm:$0xff] %vm722_vm0, %v2500_v20  ;;  %v2501_v28 = vmax.f32 %v2405_v0, %v2453_v21  ;;  %v2034_v29 = vadd.f32 %v13911_v61, %v1835_v22  ;;  %v1836_v30 = vmul.f32 %v13905_v59, %v1112_v27 }
 0x102   :  { %v2228_v31 = vmax.f32 %v2036_v25, 0.0  ;;  %v2037_v32 = vadd.f32 %v13911_v61, %v1838_v26  ;;  %12042 = vmatmul.mubr.msk.bf16.gmra.mrb[124].mxu0 %vm722_vm0, %v13061_v19 }
 0x103   :  { %2549 = vst.msk [vmem:[#allocation2 + $0x18] sm:$0xff] %vm722_vm0, %v2501_v28  ;;  %v2226_v33 = vmax.f32 %v2034_v29, 0.0  ;;  %v2035_v34 = vadd.f32 %v13911_v61, %v1836_v30  ;;  %12045 = vmatprep.mubr.msk.bf16.mxu0 %vm722_vm0, %v13062_v24  ;;  %v13067_v24 = vld [vmem:[%s16658_s0 + $0x228] sm:$0xff]   ;;  %v13068_v28 = vld [vmem:[%s16658_s0 + $0x230] sm:$0xff]  }
 0x104   :  { %v2229_v35 = vmax.f32 %v2037_v32, 0.0 }
 0x105   :  { %v2406_v36 = vmax.f32 %v2226_v33, %v2228_v31  ;;  %v2227_v37 = vmax.f32 %v2035_v34, 0.0  ;;  %v11939_v38 = vpop.f32.mrb[20].mxu0 }
 0x106   :  { %v1841_v39 = vmul.f32 %v11939_v38, %v13905_v59  ;;  %v1125_v40 = vpop.f32.mrb[21].mxu0 }
 0x107   :  { %v2407_v42 = vmax.f32 %v2227_v37, %v2229_v35  ;;  %v1839_v43 = vmul.f32 %v13905_v59, %v1125_v40  ;;  %v11940_v44 = vpop.f32.mrb[22].mxu0 }
 0x108   :  { %v2040_v46 = vadd.f32 %v13911_v61, %v1841_v39  ;;  %v1842_v47 = vmul.f32 %v11940_v44, %v13905_v59  ;;  %v1128_v48 = vpop.f32.mrb[23].mxu0  ;;  %v14042_v32 = vld [vmem:[#allocation2 + $0x10] sm:$0xff] }
 0x109   :  { %v2038_v49 = vadd.f32 %v13911_v61, %v1839_v43  ;;  %v1840_v50 = vmul.f32 %v13905_v59, %v1128_v48 }
 0x10a   :  { %v2232_v51 = vmax.f32 %v2040_v46, 0.0  ;;  %v2041_v52 = vadd.f32 %v13911_v61, %v1842_v47  ;;  %12046 = vmatmul.mubr.msk.bf16.gmra.mrb[128].mxu0 %vm722_vm0, %v13063_v41  ;;  %v2623_v54 = vld [vmem:[#allocation2 + $0x11] sm:$0xff] }
 0x10b   :  { %v2230_v55 = vmax.f32 %v2038_v49, 0.0  ;;  %v2039_v56 = vadd.f32 %v13911_v61, %v1840_v50  ;;  %v2638_v57 = vpack.c.bf16 %v2623_v54, %v2622_v53  ;;  %12049 = vmatprep.mubr.msk.bf16.mxu0 %vm722_vm0, %v13064_v45  ;;  %v14056_v41 = vld [vmem:[#allocation2 + $0x13] sm:$0xff]  ;;  %v13087_v50 = vld [vmem:[%s16658_s0 + $0x2b8] sm:$0xff]  }
 0x10c   :  { %v2233_v58 = vmax.f32 %v2041_v52, 0.0  ;;  %16750 = vst [vmem:[#allocation7_spill] sm:$0xff] %v14056_v41  ;;  %v14062_v45 = vld [vmem:[#allocation2 + $0x14] sm:$0xff] }
 0x10d   :  { %v2454_v60 = vmax.f32 %v2230_v55, %v2232_v51  ;;  %v2231_v62 = vmax.f32 %v2039_v56, 0.0  ;;  %v11943_v63 = vpop.f32.mrb[24].mxu0  ;;  %12113 = vmatprep.mubr.msk.bf16.mxu1 %vm722_vm0, %v2638_v57  ;;  %16752 = vst [vmem:[#allocation9_spill] sm:$0xff] %v14062_v45  ;;  %v13069_v56 = vld [vmem:[%s16658_s0 + $0x238] sm:$0xff]  }
 0x10e   :  { %v1845_v0 = vmul.f32 %v11943_v63, %v13905_v59  ;;  %v1141_v1 = vpop.f32.mrb[25].mxu0  ;;  %v13071_v63 = vld [vmem:[%s16658_s0 + $0x240] sm:$0xff]  }
 0x10f   :  { %v2502_v3 = vmax.f32 %v2406_v36, %v2454_v60  ;;  %v2455_v4 = vmax.f32 %v2231_v62, %v2233_v58  ;;  %v1843_v5 = vmul.f32 %v13905_v59, %v1141_v1  ;;  %v11944_v6 = vpop.f32.mrb[26].mxu0  ;;  %v14048_v36 = vld [vmem:[#allocation2 + $0x12] sm:$0xff] }
 0x110   :  { %v2044_v8 = vadd.f32 %v13911_v61, %v1845_v0  ;;  %v1846_v9 = vmul.f32 %v11944_v6, %v13905_v59  ;;  %v1144_v10 = vpop.f32.mrb[27].mxu0 }
 0x111   :  { %2550 = vst.msk [vmem:[#allocation2 + $0x20] sm:$0xff] %vm722_vm0, %v2502_v3  ;;  %v2503_v11 = vmax.f32 %v2407_v42, %v2455_v4  ;;  %v2042_v12 = vadd.f32 %v13911_v61, %v1843_v5  ;;  %v1844_v13 = vmul.f32 %v13905_v59, %v1144_v10 }
 0x112   :  { %v2236_v14 = vmax.f32 %v2044_v8, 0.0  ;;  %v2045_v15 = vadd.f32 %v13911_v61, %v1846_v9  ;;  %12050 = vmatmul.mubr.msk.bf16.gmra.mrb[132].mxu0 %vm722_vm0, %v13065_v2 }
 0x113   :  { %2551 = vst.msk [vmem:[#allocation2 + $0x28] sm:$0xff] %vm722_vm0, %v2503_v11  ;;  %v2234_v16 = vmax.f32 %v2042_v12, 0.0  ;;  %v2043_v17 = vadd.f32 %v13911_v61, %v1844_v13  ;;  %12053 = vmatprep.mubr.msk.bf16.mxu0 %vm722_vm0, %v13066_v7 }
 0x114   :  { %v2237_v18 = vmax.f32 %v2045_v15, 0.0 }
 0x115   :  { %v2408_v19 = vmax.f32 %v2234_v16, %v2236_v14  ;;  %v2235_v20 = vmax.f32 %v2043_v17, 0.0  ;;  %v11947_v21 = vpop.f32.mrb[28].mxu0  ;;  %v13073_v16 = vld [vmem:[%s16658_s0 + $0x248] sm:$0xff]  }
 0x116   :  { %v1849_v22 = vmul.f32 %v11947_v21, %v13905_v59  ;;  %v1157_v23 = vpop.f32.mrb[29].mxu0 }
 0x117   :  { %v2409_v25 = vmax.f32 %v2235_v20, %v2237_v18  ;;  %v1847_v26 = vmul.f32 %v13905_v59, %v1157_v23  ;;  %v11948_v27 = vpop.f32.mrb[30].mxu0  ;;  %v13074_v20 = vld [vmem:[%s16658_s0 + $0x250] sm:$0xff]  }
 0x118   :  { %v2048_v29 = vadd.f32 %v13911_v61, %v1849_v22  ;;  %v1850_v30 = vmul.f32 %v11948_v27, %v13905_v59  ;;  %v1160_v31 = vpop.f32.mrb[31].mxu0  ;;  %v14044_v33 = vld [vmem:[#allocation2 + $0x20] sm:$0xff] }
 0x119   :  { %v2046_v34 = vadd.f32 %v13911_v61, %v1847_v26  ;;  %v1848_v35 = vmul.f32 %v13905_v59, %v1160_v31 }
 0x11a   :  { %v2240_v38 = vmax.f32 %v2048_v29, 0.0  ;;  %v2049_v39 = vadd.f32 %v13911_v61, %v1850_v30  ;;  %12054 = vmatmul.mubr.msk.bf16.gmra.mrb[136].mxu0 %vm722_vm0, %v13067_v24  ;;  %v14054_v40 = vld [vmem:[#allocation2 + $0x22] sm:$0xff] }
 0x11b   :  { %v14058_v42 = vld [vmem:[#allocation2 + $0x23] sm:$0xff]  ;;  %v2238_v43 = vmax.f32 %v2046_v34, 0.0  ;;  %v2047_v44 = vadd.f32 %v13911_v61, %v1848_v35  ;;  %12057 = vmatprep.mubr.msk.bf16.mxu0 %vm722_vm0, %v13068_v28 }
 0x11c   :  { %16751 = vst [vmem:[#allocation8_spill] sm:$0xff] %v14058_v42  ;;  %v14064_v46 = vld [vmem:[#allocation2 + $0x24] sm:$0xff]  ;;  %v2241_v49 = vmax.f32 %v2049_v39, 0.0 }
 0x11d   :  { %16753 = vst [vmem:[#allocation10_spill] sm:$0xff] %v14064_v46  ;;  %v2456_v51 = vmax.f32 %v2238_v43, %v2240_v38  ;;  %v2239_v52 = vmax.f32 %v2047_v44, 0.0  ;;  %v11951_v53 = vpop.f32.mrb[32].mxu0  ;;  %v2624_v28 = vld [vmem:[#allocation2 + $0x21] sm:$0xff] }
 0x11e   :  { %v1853_v54 = vmul.f32 %v11951_v53, %v13905_v59  ;;  %v1173_v55 = vpop.f32.mrb[33].mxu0  ;;  %v14106_v35 = vld [vmem:[#allocation2 + $0x21] sm:$0xff] }
 0x11f   :  { %v2504_v57 = vmax.f32 %v2408_v19, %v2456_v51  ;;  %v2457_v58 = vmax.f32 %v2239_v52, %v2241_v49  ;;  %v1851_v60 = vmul.f32 %v13905_v59, %v1173_v55  ;;  %v11952_v62 = vpop.f32.mrb[34].mxu0  ;;  %16754 = vst [vmem:[#allocation11_spill] sm:$0xff] %v14106_v35 }
 0x120   :  { %v2052_v0 = vadd.f32 %v13911_v61, %v1853_v54  ;;  %v1854_v1 = vmul.f32 %v11952_v62, %v13905_v59  ;;  %v1176_v2 = vpop.f32.mrb[35].mxu0  ;;  %v13075_v54 = vld [vmem:[%s16658_s0 + $0x258] sm:$0xff]  }
 0x121   :  { %2552 = vst.msk [vmem:[#allocation2 + $0x30] sm:$0xff] %vm722_vm0, %v2504_v57  ;;  %v2505_v3 = vmax.f32 %v2409_v25, %v2457_v58  ;;  %v2050_v4 = vadd.f32 %v13911_v61, %v1851_v60  ;;  %v1852_v5 = vmul.f32 %v13905_v59, %v1176_v2  ;;  %v13076_v60 = vld [vmem:[%s16658_s0 + $0x260] sm:$0xff]  }
 0x122   :  { %v2244_v6 = vmax.f32 %v2052_v0, 0.0  ;;  %v2053_v7 = vadd.f32 %v13911_v61, %v1854_v1  ;;  %12058 = vmatmul.mubr.msk.bf16.gmra.mrb[140].mxu0 %vm722_vm0, %v13069_v56 }
 0x123   :  { %2553 = vst.msk [vmem:[#allocation2 + $0x38] sm:$0xff] %vm722_vm0, %v2505_v3  ;;  %v2242_v8 = vmax.f32 %v2050_v4, 0.0  ;;  %v2051_v9 = vadd.f32 %v13911_v61, %v1852_v5  ;;  %12061 = vmatprep.mubr.msk.bf16.mxu0 %vm722_vm0, %v13071_v63 }
 0x124   :  { %v2245_v10 = vmax.f32 %v2053_v7, 0.0 }
 0x125   :  { %v2410_v11 = vmax.f32 %v2242_v8, %v2244_v6  ;;  %v2243_v12 = vmax.f32 %v2051_v9, 0.0  ;;  %v11955_v13 = vpop.f32.mrb[36].mxu0 }
 0x126   :  { %v1857_v14 = vmul.f32 %v11955_v13, %v13905_v59  ;;  %v1189_v15 = vpop.f32.mrb[37].mxu0 }
 0x127   :  { %v2411_v17 = vmax.f32 %v2243_v12, %v2245_v10  ;;  %v1855_v18 = vmul.f32 %v13905_v59, %v1189_v15  ;;  %v11956_v19 = vpop.f32.mrb[38].mxu0 }
 0x128   :  { %v2056_v21 = vadd.f32 %v13911_v61, %v1857_v14  ;;  %v1858_v22 = vmul.f32 %v11956_v19, %v13905_v59  ;;  %v1192_v23 = vpop.f32.mrb[39].mxu0  ;;  %v13077_v14 = vld [vmem:[%s16658_s0 + $0x268] sm:$0xff]  }
 0x129   :  { %v2054_v24 = vadd.f32 %v13911_v61, %v1855_v18  ;;  %v1856_v25 = vmul.f32 %v13905_v59, %v1192_v23  ;;  %v13078_v18 = vld [vmem:[%s16658_s0 + $0x270] sm:$0xff]  }
 0x12a   :  { %v2248_v26 = vmax.f32 %v2056_v21, 0.0  ;;  %v2057_v27 = vadd.f32 %v13911_v61, %v1858_v22  ;;  %12062 = vmatmul.mubr.msk.bf16.gmra.mrb[144].mxu0 %vm722_vm0, %v13073_v16  ;;  %v2625_v29 = vld [vmem:[#allocation2 + $0x31] sm:$0xff] }
 0x12b   :  { %v2246_v30 = vmax.f32 %v2054_v24, 0.0  ;;  %v2055_v31 = vadd.f32 %v13911_v61, %v1856_v25  ;;  %v2639_v34 = vpack.c.bf16 %v2625_v29, %v2624_v28  ;;  %12065 = vmatprep.mubr.msk.bf16.mxu0 %vm722_vm0, %v13074_v20  ;;  %v14108_v38 = vld [vmem:[#allocation2 + $0x31] sm:$0xff] }
 0x12c   :  { %16755 = vst [vmem:[#allocation12_spill] sm:$0xff] %v14108_v38  ;;  %v2249_v39 = vmax.f32 %v2057_v27, 0.0  ;;  %v14141_v22 = vld [vmem:[#allocation2 + $0x30] sm:$0xff] }
 0x12d   :  { %v2458_v44 = vmax.f32 %v2246_v30, %v2248_v26  ;;  %v2247_v49 = vmax.f32 %v2055_v31, 0.0  ;;  %v11959_v51 = vpop.f32.mrb[40].mxu0  ;;  %12114 = vmatmul.mubr.msk.bf16.vlgmr.msra.gmra.mrb[0].mxu1 %vm722_vm0, %v2639_v34  ;;  %v14147_v26 = vld [vmem:[#allocation2 + $0x32] sm:$0xff] }
 0x12e   :  { %v1861_v52 = vmul.f32 %v11959_v51, %v13905_v59  ;;  %v1205_v53 = vpop.f32.mrb[41].mxu0  ;;  %16756 = vst [vmem:[#allocation13_spill] sm:$0xff] %v14147_v26  ;;  %v14149_v27 = vld [vmem:[#allocation2 + $0x33] sm:$0xff] }
 0x12f   :  { %v2506_v55 = vmax.f32 %v2410_v11, %v2458_v44  ;;  %v2459_v56 = vmax.f32 %v2247_v49, %v2249_v39  ;;  %v1859_v57 = vmul.f32 %v13905_v59, %v1205_v53  ;;  %v11960_v58 = vpop.f32.mrb[42].mxu0  ;;  %16757 = vst [vmem:[#allocation14_spill] sm:$0xff] %v14149_v27  ;;  %v14159_v39 = vld [vmem:[#allocation2 + $0x34] sm:$0xff] }
 0x130   :  { %v2060_v62 = vadd.f32 %v13911_v61, %v1861_v52  ;;  %v1862_v63 = vmul.f32 %v11960_v58, %v13905_v59  ;;  %v1208_v0 = vpop.f32.mrb[43].mxu0  ;;  %16759 = vst [vmem:[#allocation16_spill] sm:$0xff] %v14159_v39  ;;  %v14175_v58 = vld [vmem:[#allocation2 + $0x33] sm:$0xff] }
 0x131   :  { %2554 = vst.msk [vmem:[#allocation2 + $0x40] sm:$0xff] %vm722_vm0, %v2506_v55  ;;  %v2507_v1 = vmax.f32 %v2411_v17, %v2459_v56  ;;  %v2058_v2 = vadd.f32 %v13911_v61, %v1859_v57  ;;  %v1860_v3 = vmul.f32 %v13905_v59, %v1208_v0  ;;  %16763 = vst [vmem:[#allocation20_spill] sm:$0xff] %v14175_v58 }
 0x132   :  { %v2252_v4 = vmax.f32 %v2060_v62, 0.0  ;;  %v2061_v5 = vadd.f32 %v13911_v61, %v1862_v63  ;;  %12066 = vmatmul.mubr.msk.bf16.gmra.mrb[148].mxu0 %vm722_vm0, %v13075_v54  ;;  %v14169_v54 = vld [vmem:[#allocation2 + $0x32] sm:$0xff] }
 0x133   :  { %2555 = vst.msk [vmem:[#allocation2 + $0x48] sm:$0xff] %vm722_vm0, %v2507_v1  ;;  %v2250_v6 = vmax.f32 %v2058_v2, 0.0  ;;  %v2059_v7 = vadd.f32 %v13911_v61, %v1860_v3  ;;  %12069 = vmatprep.mubr.msk.bf16.mxu0 %vm722_vm0, %v13076_v60  ;;  %16761 = vst [vmem:[#allocation18_spill] sm:$0xff] %v14169_v54 }
 0x134   :  { %v2253_v8 = vmax.f32 %v2061_v5, 0.0  ;;  %v13079_v5 = vld [vmem:[%s16658_s0 + $0x278] sm:$0xff]  }
 0x135   :  { %v2412_v9 = vmax.f32 %v2250_v6, %v2252_v4  ;;  %v2251_v10 = vmax.f32 %v2059_v7, 0.0  ;;  %v11963_v11 = vpop.f32.mrb[44].mxu0 }
 0x136   :  { %v1865_v12 = vmul.f32 %v11963_v11, %v13905_v59  ;;  %v1221_v13 = vpop.f32.mrb[45].mxu0  ;;  %v13080_v11 = vld [vmem:[%s16658_s0 + $0x280] sm:$0xff]  }
 0x137   :  { %v2413_v15 = vmax.f32 %v2251_v10, %v2253_v8  ;;  %v1863_v16 = vmul.f32 %v13905_v59, %v1221_v13  ;;  %v11964_v17 = vpop.f32.mrb[46].mxu0 }
 0x138   :  { %v2064_v19 = vadd.f32 %v13911_v61, %v1865_v12  ;;  %v1866_v20 = vmul.f32 %v11964_v17, %v13905_v59  ;;  %v1224_v21 = vpop.f32.mrb[47].mxu0  ;;  %v14143_v23 = vld [vmem:[#allocation2 + $0x40] sm:$0xff] }
 0x139   :  { %v2062_v24 = vadd.f32 %v13911_v61, %v1863_v16  ;;  %v1864_v25 = vmul.f32 %v13905_v59, %v1224_v21 }
 0x13a   :  { %v2256_v29 = vmax.f32 %v2064_v19, 0.0  ;;  %v2065_v30 = vadd.f32 %v13911_v61, %v1866_v20  ;;  %12070 = vmatmul.mubr.msk.bf16.gmra.mrb[152].mxu0 %vm722_vm0, %v13077_v14  ;;  %v14155_v31 = vld [vmem:[#allocation2 + $0x42] sm:$0xff] }
 0x13b   :  { %v14157_v34 = vld [vmem:[#allocation2 + $0x43] sm:$0xff]  ;;  %v2254_v44 = vmax.f32 %v2062_v24, 0.0  ;;  %v2063_v49 = vadd.f32 %v13911_v61, %v1864_v25  ;;  %12073 = vmatprep.mubr.msk.bf16.mxu0 %vm722_vm0, %v13078_v18 }
 0x13c   :  { %16758 = vst [vmem:[#allocation15_spill] sm:$0xff] %v14157_v34  ;;  %v14163_v51 = vld [vmem:[#allocation2 + $0x44] sm:$0xff]  ;;  %v2257_v56 = vmax.f32 %v2065_v30, 0.0 }
 0x13d   :  { %16760 = vst [vmem:[#allocation17_spill] sm:$0xff] %v14163_v51  ;;  %v14171_v55 = vld [vmem:[#allocation2 + $0x42] sm:$0xff]  ;;  %v2460_v63 = vmax.f32 %v2254_v44, %v2256_v29  ;;  %v2255_v0 = vmax.f32 %v2063_v49, 0.0  ;;  %v11967_v1 = vpop.f32.mrb[48].mxu0  ;;  %v13081_v49 = vld [vmem:[%s16658_s0 + $0x288] sm:$0xff]  }
 0x13e   :  { %16762 = vst [vmem:[#allocation19_spill] sm:$0xff] %v14171_v55  ;;  %v14177_v60 = vld [vmem:[#allocation2 + $0x43] sm:$0xff]  ;;  %v1869_v3 = vmul.f32 %v11967_v1, %v13905_v59  ;;  %v1237_v4 = vpop.f32.mrb[49].mxu0  ;;  %v13082_v1 = vld [vmem:[%s16658_s0 + $0x290] sm:$0xff]  }
 0x13f   :  { %16764 = vst [vmem:[#allocation21_spill] sm:$0xff] %v14177_v60  ;;  %v2508_v6 = vmax.f32 %v2412_v9, %v2460_v63  ;;  %v2461_v7 = vmax.f32 %v2255_v0, %v2257_v56  ;;  %v1867_v8 = vmul.f32 %v13905_v59, %v1237_v4  ;;  %v11968_v10 = vpop.f32.mrb[50].mxu0 }
 0x140   :  { %v2068_v12 = vadd.f32 %v13911_v61, %v1869_v3  ;;  %v1870_v13 = vmul.f32 %v11968_v10, %v13905_v59  ;;  %v1240_v14 = vpop.f32.mrb[51].mxu0 }
 0x141   :  { %2556 = vst.msk [vmem:[#allocation2 + $0x50] sm:$0xff] %vm722_vm0, %v2508_v6  ;;  %v2509_v16 = vmax.f32 %v2413_v15, %v2461_v7  ;;  %v2066_v17 = vadd.f32 %v13911_v61, %v1867_v8  ;;  %v1868_v9 = vmul.f32 %v13905_v59, %v1240_v14  ;;  %v14211_v6 = vld [vmem:[#allocation2 + $0x40] sm:$0xff] }
 0x142   :  { %v2260_v18 = vmax.f32 %v2068_v12, 0.0  ;;  %v2069_v19 = vadd.f32 %v13911_v61, %v1870_v13  ;;  %12074 = vmatmul.mubr.msk.bf16.gmra.mrb[156].mxu0 %vm722_vm0, %v13079_v5  ;;  %16765 = vst [vmem:[#allocation22_spill] sm:$0xff] %v14211_v6  ;;  %v2626_v14 = vld [vmem:[#allocation2 + $0x41] sm:$0xff] }
 0x143   :  { %2557 = vst.msk [vmem:[#allocation2 + $0x58] sm:$0xff] %vm722_vm0, %v2509_v16  ;;  %v2258_v20 = vmax.f32 %v2066_v17, 0.0  ;;  %v2067_v21 = vadd.f32 %v13911_v61, %v1868_v9  ;;  %12077 = vmatprep.mubr.msk.bf16.mxu0 %vm722_vm0, %v13080_v11 }
 0x144   :  { %v2261_v24 = vmax.f32 %v2069_v19, 0.0  ;;  %v14223_v19 = vld [vmem:[#allocation2 + $0x41] sm:$0xff] }
 0x145   :  { %v2414_v25 = vmax.f32 %v2258_v20, %v2260_v18  ;;  %v2259_v29 = vmax.f32 %v2067_v21, 0.0  ;;  %v11971_v15 = vpop.f32.mrb[52].mxu0  ;;  %16767 = vst [vmem:[#allocation24_spill] sm:$0xff] %v14223_v19 }
 0x146   :  { %v1873_v30 = vmul.f32 %v11971_v15, %v13905_v59  ;;  %v1253_v44 = vpop.f32.mrb[53].mxu0 }
 0x147   :  { %v2415_v56 = vmax.f32 %v2259_v29, %v2261_v24  ;;  %v1871_v63 = vmul.f32 %v13905_v59, %v1253_v44  ;;  %v11972_v0 = vpop.f32.mrb[54].mxu0 }
 0x148   :  { %v2072_v3 = vadd.f32 %v13911_v61, %v1873_v30  ;;  %v1874_v4 = vmul.f32 %v11972_v0, %v13905_v59  ;;  %v1256_v5 = vpop.f32.mrb[55].mxu0  ;;  %v14213_v7 = vld [vmem:[#allocation2 + $0x50] sm:$0xff] }
 0x149   :  { %16766 = vst [vmem:[#allocation23_spill] sm:$0xff] %v14213_v7  ;;  %v2070_v8 = vadd.f32 %v13911_v61, %v1871_v63  ;;  %v1872_v10 = vmul.f32 %v13905_v59, %v1256_v5 }
 0x14a   :  { %v2264_v12 = vmax.f32 %v2072_v3, 0.0  ;;  %v2073_v13 = vadd.f32 %v13911_v61, %v1874_v4  ;;  %12078 = vmatmul.mubr.msk.bf16.gmra.mrb[160].mxu0 %vm722_vm0, %v13081_v49  ;;  %v2627_v16 = vld [vmem:[#allocation2 + $0x51] sm:$0xff]  ;;  %v14232_v49 = vld [vmem:[#allocation2 + $0x44] sm:$0xff] }
 0x14b   :  { %v2262_v17 = vmax.f32 %v2070_v8, 0.0  ;;  %v2071_v9 = vadd.f32 %v13911_v61, %v1872_v10  ;;  %v2640_v18 = vpack.c.bf16 %v2627_v16, %v2626_v14  ;;  %12081 = vmatprep.mubr.msk.bf16.mxu0 %vm722_vm0, %v13082_v1  ;;  %v14225_v20 = vld [vmem:[#allocation2 + $0x51] sm:$0xff]  ;;  %16770 = vst [vmem:[#allocation27_spill] sm:$0xff] %v14232_v49  ;;  %v13083_v1 = vld [vmem:[%s16658_s0 + $0x298] sm:$0xff]  }
 0x14c   :  { %16768 = vst [vmem:[#allocation25_spill] sm:$0xff] %v14225_v20  ;;  %v2265_v21 = vmax.f32 %v2073_v13, 0.0  ;;  %v14229_v29 = vld [vmem:[#allocation2 + $0x54] sm:$0xff] }
 0x14d   :  { %16769 = vst [vmem:[#allocation26_spill] sm:$0xff] %v14229_v29  ;;  %v2462_v15 = vmax.f32 %v2262_v17, %v2264_v12  ;;  %v2263_v30 = vmax.f32 %v2071_v9, 0.0  ;;  %v11975_v44 = vpop.f32.mrb[56].mxu0  ;;  %12117 = vmatprep.mubr.msk.bf16.mxu1 %vm722_vm0, %v2640_v18  ;;  %v13084_v12 = vld [vmem:[%s16658_s0 + $0x2a0] sm:$0xff]  }
 0x14e   :  { %v1877_v63 = vmul.f32 %v11975_v44, %v13905_v59  ;;  %v1269_v0 = vpop.f32.mrb[57].mxu0 }
 0x14f   :  { %v2510_v4 = vmax.f32 %v2414_v25, %v2462_v15  ;;  %v2463_v5 = vmax.f32 %v2263_v30, %v2265_v21  ;;  %v1875_v8 = vmul.f32 %v13905_v59, %v1269_v0  ;;  %v11976_v10 = vpop.f32.mrb[58].mxu0 }
 0x150   :  { %v2076_v13 = vadd.f32 %v13911_v61, %v1877_v63  ;;  %v1878_v14 = vmul.f32 %v11976_v10, %v13905_v59  ;;  %v1272_v16 = vpop.f32.mrb[59].mxu0 }
 0x151   :  { %2558 = vst.msk [vmem:[#allocation2 + $0x60] sm:$0xff] %vm722_vm0, %v2510_v4  ;;  %v2511_v17 = vmax.f32 %v2415_v56, %v2463_v5  ;;  %v2074_v9 = vadd.f32 %v13911_v61, %v1875_v8  ;;  %v1876_v25 = vmul.f32 %v13905_v59, %v1272_v16  ;;  %v13085_v8 = vld [vmem:[%s16658_s0 + $0x2a8] sm:$0xff]  }
 0x152   :  { %v2268_v18 = vmax.f32 %v2076_v13, 0.0  ;;  %v2077_v21 = vadd.f32 %v13911_v61, %v1878_v14  ;;  %12082 = vmatmul.mubr.msk.bf16.gmra.mrb[164].mxu0 %vm722_vm0, %v13083_v1  ;;  %v13086_v14 = vld [vmem:[%s16658_s0 + $0x2b0] sm:$0xff]  }
 0x153   :  { %2559 = vst.msk [vmem:[#allocation2 + $0x68] sm:$0xff] %vm722_vm0, %v2511_v17  ;;  %v2266_v15 = vmax.f32 %v2074_v9, 0.0  ;;  %v2075_v30 = vadd.f32 %v13911_v61, %v1876_v25  ;;  %12085 = vmatprep.mubr.msk.bf16.mxu0 %vm722_vm0, %v13084_v12  ;;  %v14264_v9 = vld [vmem:[#allocation2 + $0x50] sm:$0xff] }
 0x154   :  { %v2269_v44 = vmax.f32 %v2077_v21, 0.0 }
 0x155   :  { %v2416_v63 = vmax.f32 %v2266_v15, %v2268_v18  ;;  %v2267_v0 = vmax.f32 %v2075_v30, 0.0  ;;  %v11979_v56 = vpop.f32.mrb[60].mxu0  ;;  %v14270_v15 = vld [vmem:[#allocation2 + $0x52] sm:$0xff] }
 0x156   :  { %v1881_v4 = vmul.f32 %v11979_v56, %v13905_v59  ;;  %v1285_v5 = vpop.f32.mrb[61].mxu0  ;;  %16771 = vst [vmem:[#allocation28_spill] sm:$0xff] %v14270_v15  ;;  %v14272_v30 = vld [vmem:[#allocation2 + $0x53] sm:$0xff] }
 0x157   :  { %v2417_v10 = vmax.f32 %v2267_v0, %v2269_v44  ;;  %v1879_v1 = vmul.f32 %v13905_v59, %v1285_v5  ;;  %v11980_v13 = vpop.f32.mrb[62].mxu0  ;;  %16772 = vst [vmem:[#allocation29_spill] sm:$0xff] %v14272_v30 }
 0x158   :  { %v2080_v12 = vadd.f32 %v13911_v61, %v1881_v4  ;;  %v1882_v16 = vmul.f32 %v11980_v13, %v13905_v59  ;;  %v1288_v17 = vpop.f32.mrb[63].mxu0  ;;  %v14266_v25 = vld [vmem:[#allocation2 + $0x60] sm:$0xff]  ;;  %v14282_v13 = vld [vmem:[#allocation2 + $0x54] sm:$0xff] }
 0x159   :  { %v2078_v18 = vadd.f32 %v13911_v61, %v1879_v1  ;;  %v1880_v21 = vmul.f32 %v13905_v59, %v1288_v17  ;;  %16775 = vst [vmem:[#allocation32_spill] sm:$0xff] %v14282_v13 }
 0x15a   :  { %v2272_v0 = vmax.f32 %v2080_v12, 0.0  ;;  %v2081_v56 = vadd.f32 %v13911_v61, %v1882_v16  ;;  %12086 = vmatmul.mubr.msk.bf16.gmra.mrb[168].mxu0 %vm722_vm0, %v13085_v8  ;;  %v14278_v4 = vld [vmem:[#allocation2 + $0x62] sm:$0xff]  ;;  %v14292_v8 = vld [vmem:[#allocation2 + $0x52] sm:$0xff] }
 0x15b   :  { %16773 = vst [vmem:[#allocation30_spill] sm:$0xff] %v14278_v4  ;;  %v14280_v5 = vld [vmem:[#allocation2 + $0x63] sm:$0xff]  ;;  %v2270_v1 = vmax.f32 %v2078_v18, 0.0  ;;  %v2079_v17 = vadd.f32 %v13911_v61, %v1880_v21  ;;  %12089 = vmatprep.mubr.msk.bf16.mxu0 %vm722_vm0, %v13086_v14  ;;  %16777 = vst [vmem:[#allocation34_spill] sm:$0xff] %v14292_v8 }
 0x15c   :  { %16774 = vst [vmem:[#allocation31_spill] sm:$0xff] %v14280_v5  ;;  %v14286_v3 = vld [vmem:[#allocation2 + $0x64] sm:$0xff]  ;;  %v2273_v2 = vmax.f32 %v2081_v56, 0.0 }
 0x15d   :  { %16776 = vst [vmem:[#allocation33_spill] sm:$0xff] %v14286_v3  ;;  %v14294_v11 = vld [vmem:[#allocation2 + $0x62] sm:$0xff]  ;;  %v2464_v14 = vmax.f32 %v2270_v1, %v2272_v0  ;;  %v2271_v62 = vmax.f32 %v2079_v17, 0.0  ;;  %v11983_v24 = vpop.f32.mrb[64].mxu0 }
 0x15e   :  { %16778 = vst [vmem:[#allocation35_spill] sm:$0xff] %v14294_v11  ;;  %v1885_v43 = vmul.f32 %v11983_v24, %v13905_v59  ;;  %v1301_v57 = vpop.f32.mrb[65].mxu0 }
 0x15f   :  { %v2512_v16 = vmax.f32 %v2416_v63, %v2464_v14  ;;  %v2465_v53 = vmax.f32 %v2271_v62, %v2273_v2  ;;  %v1883_v56 = vmul.f32 %v13905_v59, %v1301_v57  ;;  %v11984_v48 = vpop.f32.mrb[66].mxu0 }
 0x160   :  { %v2084_v18 = vadd.f32 %v13911_v61, %v1885_v43  ;;  %v1886_v12 = vmul.f32 %v11984_v48, %v13905_v59  ;;  %v1304_v21 = vpop.f32.mrb[67].mxu0 }
 0x161   :  { %2560 = vst.msk [vmem:[#allocation2 + $0x70] sm:$0xff] %vm722_vm0, %v2512_v16  ;;  %v2513_v0 = vmax.f32 %v2417_v10, %v2465_v53  ;;  %v2082_v24 = vadd.f32 %v13911_v61, %v1883_v56  ;;  %v1884_v1 = vmul.f32 %v13905_v59, %v1304_v21  ;;  %v14318_v56 = vld [vmem:[#allocation2 + $0x60] sm:$0xff] }
 0x162   :  { %v2276_v17 = vmax.f32 %v2084_v18, 0.0  ;;  %v2085_v52 = vadd.f32 %v13911_v61, %v1886_v12  ;;  %12090 = vmatmul.mubr.msk.bf16.gmra.mrb[172].mxu0 %vm722_vm0, %v13087_v50  ;;  %16779 = vst [vmem:[#allocation36_spill] sm:$0xff] %v14318_v56 }
 0x163   :  { %2561 = vst.msk [vmem:[#allocation2 + $0x78] sm:$0xff] %vm722_vm0, %v2513_v0  ;;  %v2274_v57 = vmax.f32 %v2082_v24, 0.0  ;;  %v2083_v43 = vadd.f32 %v13911_v61, %v1884_v1 }
 0x164   :  { %v2277_v62 = vmax.f32 %v2085_v52, 0.0 }
 0x165   :  { %v2418_v48 = vmax.f32 %v2274_v57, %v2276_v17  ;;  %v2275_v2 = vmax.f32 %v2083_v43, 0.0  ;;  %v11987_v63 = vpop.f32.mrb[68].mxu0  ;;  %v2628_v43 = vld [vmem:[#allocation2 + $0x61] sm:$0xff] }
 0x166   :  { %v1889_v53 = vmul.f32 %v11987_v63, %v13905_v59  ;;  %v1317_v10 = vpop.f32.mrb[69].mxu0 }
 0x167   :  { %v2419_v16 = vmax.f32 %v2275_v2, %v2277_v62  ;;  %v1887_v21 = vmul.f32 %v13905_v59, %v1317_v10  ;;  %v11988_v18 = vpop.f32.mrb[70].mxu0  ;;  %v14328_v10 = vld [vmem:[#allocation2 + $0x61] sm:$0xff] }
 0x168   :  { %v2088_v12 = vadd.f32 %v13911_v61, %v1889_v53  ;;  %v1890_v50 = vmul.f32 %v11988_v18, %v13905_v59  ;;  %v1320_v14 = vpop.f32.mrb[71].mxu0  ;;  %v14320_v0 = vld [vmem:[#allocation2 + $0x70] sm:$0xff]  ;;  %16781 = vst [vmem:[#allocation38_spill] sm:$0xff] %v14328_v10 }
 0x169   :  { %16780 = vst [vmem:[#allocation37_spill] sm:$0xff] %v14320_v0  ;;  %v2086_v52 = vadd.f32 %v13911_v61, %v1887_v21  ;;  %v1888_v24 = vmul.f32 %v13905_v59, %v1320_v14 }
 0x16a   :  { %v2280_v17 = vmax.f32 %v2088_v12, 0.0  ;;  %v2089_v57 = vadd.f32 %v13911_v61, %v1890_v50  ;;  %v2629_v62 = vld [vmem:[#allocation2 + $0x71] sm:$0xff] }
 0x16b   :  { %v2278_v2 = vmax.f32 %v2086_v52, 0.0  ;;  %v2087_v63 = vadd.f32 %v13911_v61, %v1888_v24  ;;  %v2641_v53 = vpack.c.bf16 %v2629_v62, %v2628_v43  ;;  %v14330_v18 = vld [vmem:[#allocation2 + $0x71] sm:$0xff]  ;;  %v14339_v52 = vld [vmem:[#allocation2 + $0x63] sm:$0xff] }
 0x16c   :  { %16782 = vst [vmem:[#allocation39_spill] sm:$0xff] %v14330_v18  ;;  %v2281_v47 = vmax.f32 %v2089_v57, 0.0  ;;  %v14334_v14 = vld [vmem:[#allocation2 + $0x73] sm:$0xff]  ;;  %16785 = vst [vmem:[#allocation42_spill] sm:$0xff] %v14339_v52  ;;  %v14341_v61 = vld [vmem:[#allocation2 + $0x64] sm:$0xff] }
 0x16d   :  { %16783 = vst [vmem:[#allocation40_spill] sm:$0xff] %v14334_v14  ;;  %v14336_v1 = vld [vmem:[#allocation2 + $0x74] sm:$0xff]  ;;  %v2466_v12 = vmax.f32 %v2278_v2, %v2280_v17  ;;  %v2279_v50 = vmax.f32 %v2087_v63, 0.0  ;;  %v11991_v44 = vpop.f32.mrb[72].mxu0  ;;  %12118 = vmatmul.mubr.msk.bf16.gmra.mrb[4].mxu1 %vm722_vm0, %v2641_v53  ;;  %16786 = vst [vmem:[#allocation43_spill] sm:$0xff] %v14341_v61 }
 0x16e   :  { %16784 = vst [vmem:[#allocation41_spill] sm:$0xff] %v14336_v1  ;;  %v1893_v24 = vmul.f32 %v11991_v44, %v13905_v59  ;;  %v1333_v43 = vpop.f32.mrb[73].mxu0  ;;  %v14351_v17 = vld [vmem:[%s16660_s2] ss:$0 sm:$0xff] }
 0x16f   :  { %v2514_v21 = vmax.f32 %v2418_v48, %v2466_v12  ;;  %v2467_v28 = vmax.f32 %v2279_v50, %v2281_v47  ;;  %v1891_v2 = vmul.f32 %v14351_v17, %v1333_v43  ;;  %v11992_v63 = vpop.f32.mrb[74].mxu0  ;;  %v14357_v59 = vld [vmem:[%s16661_s3] ss:$0 sm:$0xff] }
 0x170   :  { %v2092_v44 = vadd.f32 %v14357_v59, %v1893_v24  ;;  %v1894_v53 = vmul.f32 %v14351_v17, %v11992_v63  ;;  %v1336_v62 = vpop.f32.mrb[75].mxu0 }
 0x171   :  { %2562 = vst.msk [vmem:[#allocation2 + $0x80] sm:$0xff] %vm722_vm0, %v2514_v21  ;;  %v2515_v47 = vmax.f32 %v2419_v16, %v2467_v28  ;;  %v2090_v48 = vadd.f32 %v14357_v59, %v1891_v2  ;;  %v1892_v12 = vmul.f32 %v14351_v17, %v1336_v62 }
 0x172   :  { %v2284_v50 = vmax.f32 %v2092_v44, 0.0  ;;  %v2093_v43 = vadd.f32 %v14357_v59, %v1894_v53 }
 0x173   :  { %2563 = vst.msk [vmem:[#allocation2 + $0x88] sm:$0xff] %vm722_vm0, %v2515_v47  ;;  %v2282_v57 = vmax.f32 %v2090_v48, 0.0  ;;  %v2091_v37 = vadd.f32 %v14357_v59, %v1892_v12 }
 0x174   :  { %v2285_v61 = vmax.f32 %v2093_v43, 0.0 }
 0x175   :  { %v2420_v24 = vmax.f32 %v2282_v57, %v2284_v50  ;;  %v2283_v1 = vmax.f32 %v2091_v37, 0.0  ;;  %v11995_v63 = vpop.f32.mrb[76].mxu0 }
 0x176   :  { %v1897_v49 = vmul.f32 %v14351_v17, %v11995_v63  ;;  %v1349_v21 = vpop.f32.mrb[77].mxu0 }
 0x177   :  { %v2421_v28 = vmax.f32 %v2283_v1, %v2285_v61  ;;  %v1895_v16 = vmul.f32 %v14351_v17, %v1349_v21  ;;  %v11996_v2 = vpop.f32.mrb[78].mxu0  ;;  %v14377_v61 = vld [vmem:[#allocation2 + $0x72] sm:$0xff] }
 0x178   :  { %v2096_v62 = vadd.f32 %v14357_v59, %v1897_v49  ;;  %v1898_v44 = vmul.f32 %v14351_v17, %v11996_v2  ;;  %v1352_v53 = vpop.f32.mrb[79].mxu0  ;;  %16788 = vst [vmem:[#allocation45_spill] sm:$0xff] %v14377_v61 }
 0x179   :  { %v2094_v47 = vadd.f32 %v14357_v59, %v1895_v16  ;;  %v1896_v48 = vmul.f32 %v14351_v17, %v1352_v53 }
 0x17a   :  { %v2288_v12 = vmax.f32 %v2096_v62, 0.0  ;;  %v2097_v37 = vadd.f32 %v14357_v59, %v1898_v44  ;;  %v14374_v57 = vld [vmem:[#allocation2 + $0x82] sm:$0xff] }
 0x17b   :  { %16787 = vst [vmem:[#allocation44_spill] sm:$0xff] %v14374_v57  ;;  %v2286_v50 = vmax.f32 %v2094_v47, 0.0  ;;  %v2095_v1 = vadd.f32 %v14357_v59, %v1896_v48 }
 0x17c   :  { %v2289_v43 = vmax.f32 %v2097_v37, 0.0 }
 0x17d   :  { %v2468_v63 = vmax.f32 %v2286_v50, %v2288_v12  ;;  %v2287_v21 = vmax.f32 %v2095_v1, 0.0  ;;  %v11999_v2 = vpop.f32.mrb[80].mxu0 }
 0x17e   :  { %v1901_v16 = vmul.f32 %v14351_v17, %v11999_v2  ;;  %v1365_v53 = vpop.f32.mrb[81].mxu0 }
 0x17f   :  { %v2516_v62 = vmax.f32 %v2420_v24, %v2468_v63  ;;  %v2469_v29 = vmax.f32 %v2287_v21, %v2289_v43  ;;  %v1899_v44 = vmul.f32 %v14351_v17, %v1365_v53  ;;  %v12000_v52 = vpop.f32.mrb[82].mxu0 }
 0x180   :  { %v2100_v47 = vadd.f32 %v14357_v59, %v1901_v16  ;;  %v1902_v48 = vmul.f32 %v14351_v17, %v12000_v52  ;;  %v1368_v14 = vpop.f32.mrb[83].mxu0 }
 0x181   :  { %2564 = vst.msk [vmem:[#allocation2 + $0x90] sm:$0xff] %vm722_vm0, %v2516_v62  ;;  %v2517_v37 = vmax.f32 %v2421_v28, %v2469_v29  ;;  %v2098_v12 = vadd.f32 %v14357_v59, %v1899_v44  ;;  %v1900_v50 = vmul.f32 %v14351_v17, %v1368_v14 }
 0x182   :  { %v2292_v1 = vmax.f32 %v2100_v47, 0.0  ;;  %v2101_v2 = vadd.f32 %v14357_v59, %v1902_v48 }
 0x183   :  { %2565 = vst.msk [vmem:[#allocation2 + $0x98] sm:$0xff] %vm722_vm0, %v2517_v37  ;;  %v2290_v24 = vmax.f32 %v2098_v12, 0.0  ;;  %v2099_v43 = vadd.f32 %v14357_v59, %v1900_v50 }
 0x184   :  { %v2293_v63 = vmax.f32 %v2101_v2, 0.0 }
 0x185   :  { %v2422_v21 = vmax.f32 %v2290_v24, %v2292_v1  ;;  %v2291_v16 = vmax.f32 %v2099_v43, 0.0  ;;  %v12003_v52 = vpop.f32.mrb[84].mxu0 }
 0x186   :  { %v1905_v53 = vmul.f32 %v14351_v17, %v12003_v52  ;;  %v1381_v62 = vpop.f32.mrb[85].mxu0 }
 0x187   :  { %v2423_v29 = vmax.f32 %v2291_v16, %v2293_v63  ;;  %v1903_v28 = vmul.f32 %v14351_v17, %v1381_v62  ;;  %v12004_v44 = vpop.f32.mrb[86].mxu0 }
 0x188   :  { %v2104_v14 = vadd.f32 %v14357_v59, %v1905_v53  ;;  %v1906_v47 = vmul.f32 %v14351_v17, %v12004_v44  ;;  %v1384_v48 = vpop.f32.mrb[87].mxu0 }
 0x189   :  { %v2102_v37 = vadd.f32 %v14357_v59, %v1903_v28  ;;  %v1904_v12 = vmul.f32 %v14351_v17, %v1384_v48 }
 0x18a   :  { %v2296_v50 = vmax.f32 %v2104_v14, 0.0  ;;  %v2105_v1 = vadd.f32 %v14357_v59, %v1906_v47 }
 0x18b   :  { %v2294_v2 = vmax.f32 %v2102_v37, 0.0  ;;  %v2103_v24 = vadd.f32 %v14357_v59, %v1904_v12 }
 0x18c   :  { %v2297_v43 = vmax.f32 %v2105_v1, 0.0 }
 0x18d   :  { %v2470_v63 = vmax.f32 %v2294_v2, %v2296_v50  ;;  %v2295_v16 = vmax.f32 %v2103_v24, 0.0  ;;  %v12007_v52 = vpop.f32.mrb[88].mxu0 }
 0x18e   :  { %v1909_v62 = vmul.f32 %v14351_v17, %v12007_v52  ;;  %v1397_v53 = vpop.f32.mrb[89].mxu0 }
 0x18f   :  { %v2518_v49 = vmax.f32 %v2422_v21, %v2470_v63  ;;  %v2471_v44 = vmax.f32 %v2295_v16, %v2297_v43  ;;  %v1907_v56 = vmul.f32 %v14351_v17, %v1397_v53  ;;  %v12008_v28 = vpop.f32.mrb[90].mxu0 }
 0x190   :  { %v2108_v48 = vadd.f32 %v14357_v59, %v1909_v62  ;;  %v1910_v14 = vmul.f32 %v14351_v17, %v12008_v28  ;;  %v1400_v47 = vpop.f32.mrb[91].mxu0 }
 0x191   :  { %2566 = vst.msk [vmem:[#allocation2 + $0xa0] sm:$0xff] %vm722_vm0, %v2518_v49  ;;  %v2519_v37 = vmax.f32 %v2423_v29, %v2471_v44  ;;  %v2106_v12 = vadd.f32 %v14357_v59, %v1907_v56  ;;  %v1908_v50 = vmul.f32 %v14351_v17, %v1400_v47  ;;  %v13088_v44 = vld [vmem:[%s16662_s4] sm:$0xff]  }
 0x192   :  { %v2300_v1 = vmax.f32 %v2108_v48, 0.0  ;;  %v2109_v2 = vadd.f32 %v14357_v59, %v1910_v14  ;;  %12129 = vmatprep.subr.bf16.mxu1 %v13088_v44 }
 0x193   :  { %2567 = vst.msk [vmem:[#allocation2 + $0xa8] sm:$0xff] %vm722_vm0, %v2519_v37  ;;  %v2298_v21 = vmax.f32 %v2106_v12, 0.0  ;;  %v2107_v24 = vadd.f32 %v14357_v59, %v1908_v50  ;;  %12130 = vmatpush3.bf16.msra.mxu1 %v13088_v44 }
 0x194   :  { %v2301_v43 = vmax.f32 %v2109_v2, 0.0 }
 0x195   :  { %v2424_v63 = vmax.f32 %v2298_v21, %v2300_v1  ;;  %v2299_v16 = vmax.f32 %v2107_v24, 0.0  ;;  %v12011_v52 = vpop.f32.mrb[92].mxu0 }
 0x196   :  { %v1913_v62 = vmul.f32 %v14351_v17, %v12011_v52  ;;  %v1413_v49 = vpop.f32.mrb[93].mxu0 }
 0x197   :  { %v2425_v29 = vmax.f32 %v2299_v16, %v2301_v43  ;;  %v1911_v56 = vmul.f32 %v14351_v17, %v1413_v49  ;;  %v12012_v53 = vpop.f32.mrb[94].mxu0 }
 0x198   :  { %v2112_v28 = vadd.f32 %v14357_v59, %v1913_v62  ;;  %v1914_v48 = vmul.f32 %v14351_v17, %v12012_v53  ;;  %v1416_v14 = vpop.f32.mrb[95].mxu0 }
 0x199   :  { %v2110_v47 = vadd.f32 %v14357_v59, %v1911_v56  ;;  %v1912_v37 = vmul.f32 %v14351_v17, %v1416_v14 }
 0x19a   :  { %v2304_v12 = vmax.f32 %v2112_v28, 0.0  ;;  %v2113_v50 = vadd.f32 %v14357_v59, %v1914_v48 }
 0x19b   :  { %v2302_v1 = vmax.f32 %v2110_v47, 0.0  ;;  %v2111_v2 = vadd.f32 %v14357_v59, %v1912_v37 }
 0x19c   :  { %v2305_v21 = vmax.f32 %v2113_v50, 0.0 }
 0x19d   :  { %v2472_v24 = vmax.f32 %v2302_v1, %v2304_v12  ;;  %v2303_v43 = vmax.f32 %v2111_v2, 0.0  ;;  %v12015_v16 = vpop.f32.mrb[96].mxu0 }
 0x19e   :  { %v1917_v52 = vmul.f32 %v14351_v17, %v12015_v16  ;;  %v1429_v62 = vpop.f32.mrb[97].mxu0 }
 0x19f   :  { %v2520_v49 = vmax.f32 %v2424_v63, %v2472_v24  ;;  %v2473_v53 = vmax.f32 %v2303_v43, %v2305_v21  ;;  %v1915_v56 = vmul.f32 %v14351_v17, %v1429_v62  ;;  %v12016_v14 = vpop.f32.mrb[98].mxu0 }
 0x1a0   :  { %v2116_v28 = vadd.f32 %v14357_v59, %v1917_v52  ;;  %v1918_v48 = vmul.f32 %v14351_v17, %v12016_v14  ;;  %v1432_v44 = vpop.f32.mrb[99].mxu0 }
 0x1a1   :  { %2568 = vst.msk [vmem:[#allocation2 + $0xb0] sm:$0xff] %vm722_vm0, %v2520_v49  ;;  %v2521_v47 = vmax.f32 %v2425_v29, %v2473_v53  ;;  %v2114_v37 = vadd.f32 %v14357_v59, %v1915_v56  ;;  %v1916_v12 = vmul.f32 %v14351_v17, %v1432_v44  ;;  %v13089_v56 = vld [vmem:[%s16662_s4 + $0x8] sm:$0xff]  }
 0x1a2   :  { %v2308_v50 = vmax.f32 %v2116_v28, 0.0  ;;  %v2117_v1 = vadd.f32 %v14357_v59, %v1918_v48  ;;  %12131 = vmatprep.subr.bf16.mxu1 %v13089_v56 }
 0x1a3   :  { %2569 = vst.msk [vmem:[#allocation2 + $0xb8] sm:$0xff] %vm722_vm0, %v2521_v47  ;;  %v2306_v63 = vmax.f32 %v2114_v37, 0.0  ;;  %v2115_v2 = vadd.f32 %v14357_v59, %v1916_v12  ;;  %12132 = vmatpush3.bf16.msra.mxu1 %v13089_v56 }
 0x1a4   :  { %v2309_v21 = vmax.f32 %v2117_v1, 0.0 }
 0x1a5   :  { %v2426_v24 = vmax.f32 %v2306_v63, %v2308_v50  ;;  %v2307_v43 = vmax.f32 %v2115_v2, 0.0  ;;  %v12019_v16 = vpop.f32.mrb[100].mxu0 }
 0x1a6   :  { %v1921_v52 = vmul.f32 %v14351_v17, %v12019_v16  ;;  %v1445_v62 = vpop.f32.mrb[101].mxu0 }
 0x1a7   :  { %v2427_v29 = vmax.f32 %v2307_v43, %v2309_v21  ;;  %v1919_v49 = vmul.f32 %v14351_v17, %v1445_v62  ;;  %v12020_v53 = vpop.f32.mrb[102].mxu0 }
 0x1a8   :  { %v2120_v14 = vadd.f32 %v14357_v59, %v1921_v52  ;;  %v1922_v28 = vmul.f32 %v14351_v17, %v12020_v53  ;;  %v1448_v48 = vpop.f32.mrb[103].mxu0 }
 0x1a9   :  { %v2118_v44 = vadd.f32 %v14357_v59, %v1919_v49  ;;  %v1920_v47 = vmul.f32 %v14351_v17, %v1448_v48 }
 0x1aa   :  { %v2312_v37 = vmax.f32 %v2120_v14, 0.0  ;;  %v2121_v12 = vadd.f32 %v14357_v59, %v1922_v28 }
 0x1ab   :  { %v2310_v50 = vmax.f32 %v2118_v44, 0.0  ;;  %v2119_v1 = vadd.f32 %v14357_v59, %v1920_v47 }
 0x1ac   :  { %v2313_v63 = vmax.f32 %v2121_v12, 0.0 }
 0x1ad   :  { %v2474_v2 = vmax.f32 %v2310_v50, %v2312_v37  ;;  %v2311_v21 = vmax.f32 %v2119_v1, 0.0  ;;  %v12023_v43 = vpop.f32.mrb[104].mxu0 }
 0x1ae   :  { %v1925_v16 = vmul.f32 %v14351_v17, %v12023_v43  ;;  %v1461_v52 = vpop.f32.mrb[105].mxu0 }
 0x1af   :  { %v2522_v62 = vmax.f32 %v2426_v24, %v2474_v2  ;;  %v2475_v53 = vmax.f32 %v2311_v21, %v2313_v63  ;;  %v1923_v49 = vmul.f32 %v14351_v17, %v1461_v52  ;;  %v12024_v48 = vpop.f32.mrb[106].mxu0  ;;  %v14454_v63 = vld [vmem:[%s16662_s4 + $0x20] sm:$0xff]  }
 0x1b0   :  { %v2124_v14 = vadd.f32 %v14357_v59, %v1925_v16  ;;  %v1926_v28 = vmul.f32 %v14351_v17, %v12024_v48  ;;  %v1464_v56 = vpop.f32.mrb[107].mxu0  ;;  %12149 = vmatprep.subr.bf16.mxu1 %v14454_v63 }
 0x1b1   :  { %2570 = vst.msk [vmem:[#allocation2 + $0xc0] sm:$0xff] %vm722_vm0, %v2522_v62  ;;  %v2523_v44 = vmax.f32 %v2427_v29, %v2475_v53  ;;  %v2122_v47 = vadd.f32 %v14357_v59, %v1923_v49  ;;  %v1924_v37 = vmul.f32 %v14351_v17, %v1464_v56 }
 0x1b2   :  { %v2316_v12 = vmax.f32 %v2124_v14, 0.0  ;;  %v2125_v50 = vadd.f32 %v14357_v59, %v1926_v28 }
 0x1b3   :  { %2571 = vst.msk [vmem:[#allocation2 + $0xc8] sm:$0xff] %vm722_vm0, %v2523_v44  ;;  %v2314_v24 = vmax.f32 %v2122_v47, 0.0  ;;  %v2123_v1 = vadd.f32 %v14357_v59, %v1924_v37 }
 0x1b4   :  { %v2317_v2 = vmax.f32 %v2125_v50, 0.0 }
 0x1b5   :  { %v2428_v21 = vmax.f32 %v2314_v24, %v2316_v12  ;;  %v2315_v29 = vmax.f32 %v2123_v1, 0.0  ;;  %v12027_v43 = vpop.f32.mrb[108].mxu0 }
 0x1b6   :  { %v1929_v16 = vmul.f32 %v14351_v17, %v12027_v43  ;;  %v1477_v52 = vpop.f32.mrb[109].mxu0 }
 0x1b7   :  { %v2429_v62 = vmax.f32 %v2315_v29, %v2317_v2  ;;  %v1927_v53 = vmul.f32 %v14351_v17, %v1477_v52  ;;  %v12028_v49 = vpop.f32.mrb[110].mxu0 }
 0x1b8   :  { %v2128_v48 = vadd.f32 %v14357_v59, %v1929_v16  ;;  %v1930_v14 = vmul.f32 %v14351_v17, %v12028_v49  ;;  %v1480_v28 = vpop.f32.mrb[111].mxu0 }
 0x1b9   :  { %v2126_v56 = vadd.f32 %v14357_v59, %v1927_v53  ;;  %v1928_v44 = vmul.f32 %v14351_v17, %v1480_v28 }
 0x1ba   :  { %v2320_v47 = vmax.f32 %v2128_v48, 0.0  ;;  %v2129_v37 = vadd.f32 %v14357_v59, %v1930_v14 }
 0x1bb   :  { %v2318_v12 = vmax.f32 %v2126_v56, 0.0  ;;  %v2127_v50 = vadd.f32 %v14357_v59, %v1928_v44 }
 0x1bc   :  { %v2321_v24 = vmax.f32 %v2129_v37, 0.0 }
 0x1bd   :  { %v2476_v1 = vmax.f32 %v2318_v12, %v2320_v47  ;;  %v2319_v2 = vmax.f32 %v2127_v50, 0.0  ;;  %v12031_v29 = vpop.f32.mrb[112].mxu0 }
 0x1be   :  { %v1933_v43 = vmul.f32 %v14351_v17, %v12031_v29  ;;  %v1493_v16 = vpop.f32.mrb[113].mxu0 }
 0x1bf   :  { %v2524_v52 = vmax.f32 %v2428_v21, %v2476_v1  ;;  %v2477_v49 = vmax.f32 %v2319_v2, %v2321_v24  ;;  %v1931_v0 = vmul.f32 %v14351_v17, %v1493_v16  ;;  %v12032_v53 = vpop.f32.mrb[114].mxu0 }
 0x1c0   :  { %v2132_v28 = vadd.f32 %v14357_v59, %v1933_v43  ;;  %v1934_v48 = vmul.f32 %v14351_v17, %v12032_v53  ;;  %v1496_v14 = vpop.f32.mrb[115].mxu0 }
 0x1c1   :  { %2572 = vst.msk [vmem:[#allocation2 + $0xd0] sm:$0xff] %vm722_vm0, %v2524_v52  ;;  %v2525_v56 = vmax.f32 %v2429_v62, %v2477_v49  ;;  %v2130_v44 = vadd.f32 %v14357_v59, %v1931_v0  ;;  %v1932_v47 = vmul.f32 %v14351_v17, %v1496_v14 }
 0x1c2   :  { %v2324_v37 = vmax.f32 %v2132_v28, 0.0  ;;  %v2133_v12 = vadd.f32 %v14357_v59, %v1934_v48 }
 0x1c3   :  { %2573 = vst.msk [vmem:[#allocation2 + $0xd8] sm:$0xff] %vm722_vm0, %v2525_v56  ;;  %v2322_v21 = vmax.f32 %v2130_v44, 0.0  ;;  %v2131_v50 = vadd.f32 %v14357_v59, %v1932_v47  ;;  %v2630_v47 = vld [vmem:[#allocation2 + $0xc1] sm:$0xff] }
 0x1c4   :  { %v2325_v24 = vmax.f32 %v2133_v12, 0.0 }
 0x1c5   :  { %v2430_v1 = vmax.f32 %v2322_v21, %v2324_v37  ;;  %v2323_v2 = vmax.f32 %v2131_v50, 0.0  ;;  %v12035_v29 = vpop.f32.mrb[116].mxu0 }
 0x1c6   :  { %v1937_v43 = vmul.f32 %v14351_v17, %v12035_v29  ;;  %v1509_v16 = vpop.f32.mrb[117].mxu0 }
 0x1c7   :  { %v2431_v62 = vmax.f32 %v2323_v2, %v2325_v24  ;;  %v1935_v0 = vmul.f32 %v14351_v17, %v1509_v16  ;;  %v12036_v52 = vpop.f32.mrb[118].mxu0 }
 0x1c8   :  { %v2136_v49 = vadd.f32 %v14357_v59, %v1937_v43  ;;  %v1938_v53 = vmul.f32 %v14351_v17, %v12036_v52  ;;  %v1512_v28 = vpop.f32.mrb[119].mxu0 }
 0x1c9   :  { %v2134_v48 = vadd.f32 %v14357_v59, %v1935_v0  ;;  %v1936_v14 = vmul.f32 %v14351_v17, %v1512_v28 }
 0x1ca   :  { %v2328_v56 = vmax.f32 %v2136_v49, 0.0  ;;  %v2137_v44 = vadd.f32 %v14357_v59, %v1938_v53  ;;  %v2631_v37 = vld [vmem:[#allocation2 + $0xd1] sm:$0xff] }
 0x1cb   :  { %v2326_v12 = vmax.f32 %v2134_v48, 0.0  ;;  %v2135_v21 = vadd.f32 %v14357_v59, %v1936_v14  ;;  %v2642_v50 = vpack.c.bf16 %v2631_v37, %v2630_v47 }
 0x1cc   :  { %v2329_v24 = vmax.f32 %v2137_v44, 0.0 }
 0x1cd   :  { %v2478_v2 = vmax.f32 %v2326_v12, %v2328_v56  ;;  %v2327_v29 = vmax.f32 %v2135_v21, 0.0  ;;  %v12039_v43 = vpop.f32.mrb[120].mxu0  ;;  %12121 = vmatprep.mubr.msk.bf16.mxu1 %vm722_vm0, %v2642_v50 }
 0x1ce   :  { %v1941_v16 = vmul.f32 %v14351_v17, %v12039_v43  ;;  %v1525_v0 = vpop.f32.mrb[121].mxu0 }
 0x1cf   :  { %v2526_v52 = vmax.f32 %v2430_v1, %v2478_v2  ;;  %v2479_v28 = vmax.f32 %v2327_v29, %v2329_v24  ;;  %v1939_v49 = vmul.f32 %v14351_v17, %v1525_v0  ;;  %v12040_v53 = vpop.f32.mrb[122].mxu0 }
 0x1d0   :  { %v2140_v6 = vadd.f32 %v14357_v59, %v1941_v16  ;;  %v1942_v48 = vmul.f32 %v14351_v17, %v12040_v53  ;;  %v1528_v14 = vpop.f32.mrb[123].mxu0  ;;  %v14498_v53 = vld [vmem:[#allocation2 + $0xd0] sm:$0xff] }
 0x1d1   :  { %2574 = vst.msk [vmem:[#allocation2 + $0xe0] sm:$0xff] %vm722_vm0, %v2526_v52  ;;  %v2527_v56 = vmax.f32 %v2431_v62, %v2479_v28  ;;  %v2138_v44 = vadd.f32 %v14357_v59, %v1939_v49  ;;  %v1940_v47 = vmul.f32 %v14351_v17, %v1528_v14 }
 0x1d2   :  { %v2332_v37 = vmax.f32 %v2140_v6, 0.0  ;;  %v2141_v12 = vadd.f32 %v14357_v59, %v1942_v48 }
 0x1d3   :  { %2575 = vst.msk [vmem:[#allocation2 + $0xe8] sm:$0xff] %vm722_vm0, %v2527_v56  ;;  %v2330_v1 = vmax.f32 %v2138_v44, 0.0  ;;  %v2139_v21 = vadd.f32 %v14357_v59, %v1940_v47 }
 0x1d4   :  { %v2333_v50 = vmax.f32 %v2141_v12, 0.0  ;;  %v14507_v12 = vld [vmem:[#allocation2 + $0xd2] sm:$0xff] }
 0x1d5   :  { %v2432_v24 = vmax.f32 %v2330_v1, %v2332_v37  ;;  %v2331_v2 = vmax.f32 %v2139_v21, 0.0  ;;  %v12043_v29 = vpop.f32.mrb[124].mxu0 }
 0x1d6   :  { %v1945_v43 = vmul.f32 %v14351_v17, %v12043_v29  ;;  %v1541_v16 = vpop.f32.mrb[125].mxu0  ;;  %v14514_v29 = vld [vmem:[#allocation2 + $0xd3] sm:$0xff] }
 0x1d7   :  { %v2433_v62 = vmax.f32 %v2331_v2, %v2333_v50  ;;  %v1943_v0 = vmul.f32 %v14351_v17, %v1541_v16  ;;  %v12044_v52 = vpop.f32.mrb[126].mxu0 }
 0x1d8   :  { %v2144_v6 = vadd.f32 %v14357_v59, %v1945_v43  ;;  %v1946_v28 = vmul.f32 %v14351_v17, %v12044_v52  ;;  %v1544_v49 = vpop.f32.mrb[127].mxu0  ;;  %v14500_v48 = vld [vmem:[#allocation2 + $0xe0] sm:$0xff]  ;;  %v14516_v43 = vld [vmem:[#allocation2 + $0xd4] sm:$0xff] }
 0x1d9   :  { %v2142_v14 = vadd.f32 %v14357_v59, %v1943_v0  ;;  %v1944_v56 = vmul.f32 %v14351_v17, %v1544_v49 }
 0x1da   :  { %v2336_v47 = vmax.f32 %v2144_v6, 0.0  ;;  %v2145_v37 = vadd.f32 %v14357_v59, %v1946_v28  ;;  %v14509_v1 = vld [vmem:[#allocation2 + $0xe2] sm:$0xff] }
 0x1db   :  { %v14511_v21 = vld [vmem:[#allocation2 + $0xe3] sm:$0xff]  ;;  %v2334_v50 = vmax.f32 %v2142_v14, 0.0  ;;  %v2143_v2 = vadd.f32 %v14357_v59, %v1944_v56 }
 0x1dc   :  { %v14518_v16 = vld [vmem:[#allocation2 + $0xe4] sm:$0xff]  ;;  %v2337_v52 = vmax.f32 %v2145_v37, 0.0 }
 0x1dd   :  { %v2480_v49 = vmax.f32 %v2334_v50, %v2336_v47  ;;  %v2335_v14 = vmax.f32 %v2143_v2, 0.0  ;;  %v12047_v44 = vpop.f32.mrb[128].mxu0 }
 0x1de   :  { %v1949_v56 = vmul.f32 %v14351_v17, %v12047_v44  ;;  %v1557_v7 = vpop.f32.mrb[129].mxu0 }
 0x1df   :  { %v2528_v58 = vmax.f32 %v2432_v24, %v2480_v49  ;;  %v2481_v60 = vmax.f32 %v2335_v14, %v2337_v52  ;;  %v1947_v61 = vmul.f32 %v14351_v17, %v1557_v7  ;;  %v12048_v57 = vpop.f32.mrb[130].mxu0 }
 0x1e0   :  { %v2148_v0 = vadd.f32 %v14357_v59, %v1949_v56  ;;  %v1950_v37 = vmul.f32 %v14351_v17, %v12048_v57  ;;  %v1560_v8 = vpop.f32.mrb[131].mxu0 }
 0x1e1   :  { %2576 = vst.msk [vmem:[#allocation2 + $0xf0] sm:$0xff] %vm722_vm0, %v2528_v58  ;;  %v2529_v6 = vmax.f32 %v2433_v62, %v2481_v60  ;;  %v2146_v47 = vadd.f32 %v14357_v59, %v1947_v61  ;;  %v1948_v50 = vmul.f32 %v14351_v17, %v1560_v8 }
 0x1e2   :  { %v2340_v2 = vmax.f32 %v2148_v0, 0.0  ;;  %v2149_v44 = vadd.f32 %v14357_v59, %v1950_v37 }
 0x1e3   :  { %2577 = vst.msk [vmem:[#allocation2 + $0xf8] sm:$0xff] %vm722_vm0, %v2529_v6  ;;  %v2338_v24 = vmax.f32 %v2146_v47, 0.0  ;;  %v2147_v7 = vadd.f32 %v14357_v59, %v1948_v50 }
 0x1e4   :  { %v2341_v52 = vmax.f32 %v2149_v44, 0.0  ;;  %v14543_v44 = vld [vmem:[#allocation2 + $0xe1] sm:$0xff] }
 0x1e5   :  { %v2434_v49 = vmax.f32 %v2338_v24, %v2340_v2  ;;  %v2339_v14 = vmax.f32 %v2147_v7, 0.0  ;;  %v12051_v57 = vpop.f32.mrb[132].mxu0 }
 0x1e6   :  { %v1953_v56 = vmul.f32 %v14351_v17, %v12051_v57  ;;  %v1573_v58 = vpop.f32.mrb[133].mxu0 }
 0x1e7   :  { %v2435_v60 = vmax.f32 %v2339_v14, %v2341_v52  ;;  %v1951_v61 = vmul.f32 %v14351_v17, %v1573_v58  ;;  %v12052_v62 = vpop.f32.mrb[134].mxu0 }
 0x1e8   :  { %v2152_v8 = vadd.f32 %v14357_v59, %v1953_v56  ;;  %v1954_v0 = vmul.f32 %v14351_v17, %v12052_v62  ;;  %v1576_v37 = vpop.f32.mrb[135].mxu0 }
 0x1e9   :  { %v2150_v6 = vadd.f32 %v14357_v59, %v1951_v61  ;;  %v1952_v47 = vmul.f32 %v14351_v17, %v1576_v37  ;;  %v13095_v37 = vld [vmem:[%s16658_s0 + $0x2c8] sm:$0xff]  }
 0x1ea   :  { %v2344_v50 = vmax.f32 %v2152_v8, 0.0  ;;  %v2153_v2 = vadd.f32 %v14357_v59, %v1954_v0  ;;  %v14545_v24 = vld [vmem:[#allocation2 + $0xf1] sm:$0xff]  ;;  %v13094_v0 = vld [vmem:[%s16658_s0 + $0x2c0] sm:$0xff]  }
 0x1eb   :  { %v2342_v7 = vmax.f32 %v2150_v6, 0.0  ;;  %v2151_v52 = vadd.f32 %v14357_v59, %v1952_v47  ;;  %v2643_v14 = vpack.c.bf16 %v14545_v24, %v14543_v44  ;;  %12093 = vmatprep.mubr.msk.bf16.mxu0 %vm722_vm0, %v13094_v0 }
 0x1ec   :  { %v2345_v57 = vmax.f32 %v2153_v2, 0.0  ;;  %12094 = vmatmul.mubr.msk.bf16.gmra.mrb[176].mxu0 %vm722_vm0, %v13095_v37  ;;  %v13098_v37 = vld [vmem:[%s16658_s0 + $0x2d8] sm:$0xff]  }
 0x1ed   :  { %v2482_v56 = vmax.f32 %v2342_v7, %v2344_v50  ;;  %v2343_v58 = vmax.f32 %v2151_v52, 0.0  ;;  %v12055_v62 = vpop.f32.mrb[136].mxu0  ;;  %12122 = vmatmul.mubr.msk.bf16.gmra.mrb[8].mxu1 %vm722_vm0, %v2643_v14 }
 0x1ee   :  { %v1957_v61 = vmul.f32 %v14351_v17, %v12055_v62  ;;  %v1589_v8 = vpop.f32.mrb[137].mxu0 }
 0x1ef   :  { %v2530_v6 = vmax.f32 %v2434_v49, %v2482_v56  ;;  %v2483_v47 = vmax.f32 %v2343_v58, %v2345_v57  ;;  %v1955_v2 = vmul.f32 %v14351_v17, %v1589_v8  ;;  %v12056_v50 = vpop.f32.mrb[138].mxu0 }
 0x1f0   :  { %v2156_v7 = vadd.f32 %v14357_v59, %v1957_v61  ;;  %v1958_v52 = vmul.f32 %v14351_v17, %v12056_v50  ;;  %v1592_v14 = vpop.f32.mrb[139].mxu0 }
 0x1f1   :  { %2578 = vst.msk [vmem:[#allocation2 + $0x100] sm:$0xff] %vm722_vm0, %v2530_v6  ;;  %v2531_v62 = vmax.f32 %v2435_v60, %v2483_v47  ;;  %v2154_v28 = vadd.f32 %v14357_v59, %v1955_v2  ;;  %v1956_v11 = vmul.f32 %v14351_v17, %v1592_v14  ;;  %v13097_v47 = vld [vmem:[%s16658_s0 + $0x2d0] sm:$0xff]  }
 0x1f2   :  { %v2348_v49 = vmax.f32 %v2156_v7, 0.0  ;;  %v2157_v57 = vadd.f32 %v14357_v59, %v1958_v52  ;;  %12097 = vmatprep.mubr.msk.bf16.mxu0 %vm722_vm0, %v13097_v47 }
 0x1f3   :  { %2579 = vst.msk [vmem:[#allocation2 + $0x108] sm:$0xff] %vm722_vm0, %v2531_v62  ;;  %v2346_v56 = vmax.f32 %v2154_v28, 0.0  ;;  %v2155_v58 = vadd.f32 %v14357_v59, %v1956_v11  ;;  %v14579_v62 = vld [vmem:[#allocation2 + $0xf0] sm:$0xff] }
 0x1f4   :  { %v2349_v61 = vmax.f32 %v2157_v57, 0.0  ;;  %v14583_v57 = vld [vmem:[#allocation2 + $0xf2] sm:$0xff]  ;;  %12098 = vmatmul.mubr.msk.bf16.gmra.mrb[180].mxu0 %vm722_vm0, %v13098_v37 }
 0x1f5   :  { %v2436_v8 = vmax.f32 %v2346_v56, %v2348_v49  ;;  %v2347_v0 = vmax.f32 %v2155_v58, 0.0  ;;  %v12059_v50 = vpop.f32.mrb[140].mxu0 }
 0x1f6   :  { %v1961_v60 = vmul.f32 %v14351_v17, %v12059_v50  ;;  %v1605_v6 = vpop.f32.mrb[141].mxu0 }
 0x1f7   :  { %v2437_v2 = vmax.f32 %v2347_v0, %v2349_v61  ;;  %v1959_v28 = vmul.f32 %v14351_v17, %v1605_v6  ;;  %v12060_v7 = vpop.f32.mrb[142].mxu0  ;;  %v14589_v61 = vld [vmem:[#allocation2 + $0xf3] sm:$0xff] }
 0x1f8   :  { %v2160_v11 = vadd.f32 %v14357_v59, %v1961_v60  ;;  %v1962_v52 = vmul.f32 %v14351_v17, %v12060_v7  ;;  %v1608_v14 = vpop.f32.mrb[143].mxu0  ;;  %v14581_v49 = vld [vmem:[#allocation2 + $0x100] sm:$0xff]  ;;  %v14591_v0 = vld [vmem:[#allocation2 + $0xf4] sm:$0xff] }
 0x1f9   :  { %v2158_v56 = vadd.f32 %v14357_v59, %v1959_v28  ;;  %v1960_v58 = vmul.f32 %v14351_v17, %v1608_v14  ;;  %v14595_v60 = vld [vmem:[#allocation2 + $0xf1] sm:$0xff] }
 0x1fa   :  { %16789 = vst [vmem:[#allocation46_spill] sm:$0xff] %v14595_v60  ;;  %v2352_v6 = vmax.f32 %v2160_v11, 0.0  ;;  %v2161_v7 = vadd.f32 %v14357_v59, %v1962_v52  ;;  %v14598_v54 = vld [vmem:[#allocation2 + $0x101] sm:$0xff] }
 0x1fb   :  { %v14600_v47 = vld [vmem:[#allocation2 + $0x102] sm:$0xff]  ;;  %v2350_v14 = vmax.f32 %v2158_v56, 0.0  ;;  %v2159_v37 = vadd.f32 %v14357_v59, %v1960_v58  ;;  %v14619_v58 = vld [vmem:[#allocation2 + $0xf2] sm:$0xff] }
 0x1fc   :  { %v14602_v28 = vld [vmem:[#allocation2 + $0x103] sm:$0xff]  ;;  %v2353_v18 = vmax.f32 %v2161_v7, 0.0  ;;  %16792 = vst [vmem:[#allocation49_spill] sm:$0xff] %v14619_v58 }
 0x1fd   :  { %v14605_v55 = vld [vmem:[#allocation2 + $0x104] sm:$0xff]  ;;  %v2484_v10 = vmax.f32 %v2350_v14, %v2352_v6  ;;  %v2351_v35 = vmax.f32 %v2159_v37, 0.0  ;;  %v12063_v38 = vpop.f32.mrb[144].mxu0 }
 0x1fe   :  { %v14611_v11 = vld [vmem:[#allocation2 + $0x101] sm:$0xff]  ;;  %v1965_v13 = vmul.f32 %v14351_v17, %v12063_v38  ;;  %v1621_v7 = vpop.f32.mrb[145].mxu0 }
 0x1ff   :  { %16790 = vst [vmem:[#allocation47_spill] sm:$0xff] %v14611_v11  ;;  %v14613_v52 = vld [vmem:[#allocation2 + $0x102] sm:$0xff]  ;;  %v2532_v3 = vmax.f32 %v2436_v8, %v2484_v10  ;;  %v2485_v39 = vmax.f32 %v2351_v35, %v2353_v18  ;;  %v1963_v19 = vmul.f32 %v14351_v17, %v1621_v7  ;;  %v12064_v51 = vpop.f32.mrb[146].mxu0 }
 0x200   :  { %16791 = vst [vmem:[#allocation48_spill] sm:$0xff] %v14613_v52  ;;  %v2164_v56 = vadd.f32 %v14357_v59, %v1965_v13  ;;  %v1966_v45 = vmul.f32 %v14351_v17, %v12064_v51  ;;  %v1624_v46 = vpop.f32.mrb[147].mxu0 }
 0x201   :  { %2580 = vst.msk [vmem:[#allocation2 + $0x110] sm:$0xff] %vm722_vm0, %v2532_v3  ;;  %v2533_v6 = vmax.f32 %v2437_v2, %v2485_v39  ;;  %v2162_v14 = vadd.f32 %v14357_v59, %v1963_v19  ;;  %v1964_v37 = vmul.f32 %v14351_v17, %v1624_v46 }
 0x202   :  { %v2356_v50 = vmax.f32 %v2164_v56, 0.0  ;;  %v2165_v38 = vadd.f32 %v14357_v59, %v1966_v45 }
 0x203   :  { %2581 = vst.msk [vmem:[#allocation2 + $0x118] sm:$0xff] %vm722_vm0, %v2533_v6  ;;  %v2354_v35 = vmax.f32 %v2162_v14, 0.0  ;;  %v2163_v10 = vadd.f32 %v14357_v59, %v1964_v37  ;;  %v14639_v6 = vld [vmem:[#allocation2 + $0x100] sm:$0xff] }
 0x204   :  { %v2357_v18 = vmax.f32 %v2165_v38, 0.0  ;;  %16793 = vst [vmem:[#allocation50_spill] sm:$0xff] %v14639_v6 }
 0x205   :  { %v2438_v13 = vmax.f32 %v2354_v35, %v2356_v50  ;;  %v2355_v8 = vmax.f32 %v2163_v10, 0.0  ;;  %v12067_v51 = vpop.f32.mrb[148].mxu0 }
 0x206   :  { %v1969_v7 = vmul.f32 %v14351_v17, %v12067_v51  ;;  %v1637_v3 = vpop.f32.mrb[149].mxu0 }
 0x207   :  { %v2439_v39 = vmax.f32 %v2355_v8, %v2357_v18  ;;  %v1967_v19 = vmul.f32 %v14351_v17, %v1637_v3  ;;  %v12068_v2 = vpop.f32.mrb[150].mxu0 }
 0x208   :  { %v2168_v46 = vadd.f32 %v14357_v59, %v1969_v7  ;;  %v1970_v45 = vmul.f32 %v14351_v17, %v12068_v2  ;;  %v1640_v56 = vpop.f32.mrb[151].mxu0  ;;  %v14641_v14 = vld [vmem:[#allocation2 + $0x110] sm:$0xff]  ;;  %v14653_v2 = vld [vmem:[#allocation2 + $0x103] sm:$0xff] }
 0x209   :  { %16794 = vst [vmem:[#allocation51_spill] sm:$0xff] %v14641_v14  ;;  %v2166_v50 = vadd.f32 %v14357_v59, %v1967_v19  ;;  %v1968_v37 = vmul.f32 %v14351_v17, %v1640_v56  ;;  %16795 = vst [vmem:[#allocation52_spill] sm:$0xff] %v14653_v2 }
 0x20a   :  { %v2360_v35 = vmax.f32 %v2168_v46, 0.0  ;;  %v2169_v10 = vadd.f32 %v14357_v59, %v1970_v45  ;;  %v14648_v18 = vld [vmem:[#allocation2 + $0x111] sm:$0xff]  ;;  %v14660_v45 = vld [vmem:[#allocation2 + $0x104] sm:$0xff] }
 0x20b   :  { %v2358_v8 = vmax.f32 %v2166_v50, 0.0  ;;  %v2167_v51 = vadd.f32 %v14357_v59, %v1968_v37  ;;  %v2644_v7 = vpack.c.bf16 %v14648_v18, %v14598_v54  ;;  %v14655_v19 = vld [vmem:[#allocation2 + $0x113] sm:$0xff]  ;;  %16798 = vst [vmem:[#allocation55_spill] sm:$0xff] %v14660_v45 }
 0x20c   :  { %v2361_v3 = vmax.f32 %v2169_v10, 0.0  ;;  %16796 = vst [vmem:[#allocation53_spill] sm:$0xff] %v14655_v19  ;;  %v14657_v56 = vld [vmem:[#allocation2 + $0x114] sm:$0xff] }
 0x20d   :  { %16797 = vst [vmem:[#allocation54_spill] sm:$0xff] %v14657_v56  ;;  %v2486_v20 = vmax.f32 %v2358_v8, %v2360_v35  ;;  %v2359_v38 = vmax.f32 %v2167_v51, 0.0  ;;  %v12071_v46 = vpop.f32.mrb[152].mxu0  ;;  %12125 = vmatprep.mubr.msk.bf16.mxu1 %vm722_vm0, %v2644_v7 }
 0x20e   :  { %v1973_v37 = vmul.f32 %v14351_v17, %v12071_v46  ;;  %v1653_v6 = vpop.f32.mrb[153].mxu0 }
 0x20f   :  { %v2534_v14 = vmax.f32 %v2438_v13, %v2486_v20  ;;  %v2487_v58 = vmax.f32 %v2359_v38, %v2361_v3  ;;  %v1971_v52 = vmul.f32 %v14351_v17, %v1653_v6  ;;  %v12072_v35 = vpop.f32.mrb[154].mxu0 }
 0x210   :  { %v2172_v8 = vadd.f32 %v14357_v59, %v1973_v37  ;;  %v1974_v51 = vmul.f32 %v14351_v17, %v12072_v35  ;;  %v1656_v7 = vpop.f32.mrb[155].mxu0 }
 0x211   :  { %2582 = vst.msk [vmem:[#allocation2 + $0x120] sm:$0xff] %vm722_vm0, %v2534_v14  ;;  %v2535_v60 = vmax.f32 %v2439_v39, %v2487_v58  ;;  %v2170_v50 = vadd.f32 %v14357_v59, %v1971_v52  ;;  %v1972_v46 = vmul.f32 %v14351_v17, %v1656_v7 }
 0x212   :  { %v2364_v2 = vmax.f32 %v2172_v8, 0.0  ;;  %v2173_v10 = vadd.f32 %v14357_v59, %v1974_v51 }
 0x213   :  { %2583 = vst.msk [vmem:[#allocation2 + $0x128] sm:$0xff] %vm722_vm0, %v2535_v60  ;;  %v2362_v20 = vmax.f32 %v2170_v50, 0.0  ;;  %v2171_v13 = vadd.f32 %v14357_v59, %v1972_v46  ;;  %v14680_v60 = vld [vmem:[#allocation2 + $0x110] sm:$0xff] }
 0x214   :  { %v2365_v6 = vmax.f32 %v2173_v10, 0.0  ;;  %v14684_v10 = vld [vmem:[#allocation2 + $0x112] sm:$0xff] }
 0x215   :  { %v2440_v38 = vmax.f32 %v2362_v20, %v2364_v2  ;;  %v2363_v3 = vmax.f32 %v2171_v13, 0.0  ;;  %v12075_v37 = vpop.f32.mrb[156].mxu0  ;;  %v14688_v20 = vld [vmem:[#allocation2 + $0x113] sm:$0xff] }
 0x216   :  { %v1977_v35 = vmul.f32 %v14351_v17, %v12075_v37  ;;  %v1669_v14 = vpop.f32.mrb[157].mxu0  ;;  %v14690_v13 = vld [vmem:[#allocation2 + $0x114] sm:$0xff] }
 0x217   :  { %v2441_v58 = vmax.f32 %v2363_v3, %v2365_v6  ;;  %v1975_v52 = vmul.f32 %v14351_v17, %v1669_v14  ;;  %v12076_v39 = vpop.f32.mrb[158].mxu0  ;;  %v14694_v3 = vld [vmem:[#allocation2 + $0x111] sm:$0xff] }
 0x218   :  { %v2176_v8 = vadd.f32 %v14357_v59, %v1977_v35  ;;  %v1978_v51 = vmul.f32 %v14351_v17, %v12076_v39  ;;  %v1672_v7 = vpop.f32.mrb[159].mxu0  ;;  %v14682_v50 = vld [vmem:[#allocation2 + $0x120] sm:$0xff]  ;;  %16799 = vst [vmem:[#allocation56_spill] sm:$0xff] %v14694_v3  ;;  %v13532_v3 = vld [vmem:[#allocation2 + $0x10] sm:$0xff] }
 0x219   :  { %v2174_v2 = vadd.f32 %v14357_v59, %v1975_v52  ;;  %v1976_v46 = vmul.f32 %v14351_v17, %v1672_v7 }
 0x21a   :  { %v2368_v37 = vmax.f32 %v2176_v8, 0.0  ;;  %v2177_v35 = vadd.f32 %v14357_v59, %v1978_v51  ;;  %v14697_v14 = vld [vmem:[#allocation2 + $0x121] sm:$0xff] }
 0x21b   :  { %v14699_v39 = vld [vmem:[#allocation2 + $0x122] sm:$0xff]  ;;  %v2366_v52 = vmax.f32 %v2174_v2, 0.0  ;;  %v2175_v17 = vadd.f32 %v14357_v59, %v1976_v46  ;;  %v14718_v59 = vld [vmem:[#allocation2 + $0x112] sm:$0xff] }
 0x21c   :  { %v14701_v45 = vld [vmem:[#allocation2 + $0x123] sm:$0xff]  ;;  %v2369_v19 = vmax.f32 %v2177_v35, 0.0  ;;  %16802 = vst [vmem:[#allocation59_spill] sm:$0xff] %v14718_v59 }
 0x21d   :  { %v14704_v7 = vld [vmem:[#allocation2 + $0x124] sm:$0xff]  ;;  %v2488_v56 = vmax.f32 %v2366_v52, %v2368_v37  ;;  %v2367_v30 = vmax.f32 %v2175_v17, 0.0  ;;  %v12079_v5 = vpop.f32.mrb[160].mxu0 }
 0x21e   :  { %v14710_v8 = vld [vmem:[#allocation2 + $0x121] sm:$0xff]  ;;  %v1685_v27 = vpop.f32.mrb[161].mxu0 }
 0x21f   :  { %16800 = vst [vmem:[#allocation57_spill] sm:$0xff] %v14710_v8  ;;  %v14712_v51 = vld [vmem:[#allocation2 + $0x122] sm:$0xff]  ;;  %v2536_v2 = vmax.f32 %v2440_v38, %v2488_v56  ;;  %v2489_v34 = vmax.f32 %v2367_v30, %v2369_v19  ;;  %v12080_v42 = vpop.f32.mrb[162].mxu0 }
 0x220   :  { %16801 = vst [vmem:[#allocation58_spill] sm:$0xff] %v14712_v51  ;;  %v14727_v35 = vld [vmem:[%s16660_s2] ss:$0 sm:$0xff]  ;;  %v1688_v6 = vpop.f32.mrb[163].mxu0 }
 0x221   :  { %v1981_v11 = vmul.f32 %v14727_v35, %v12079_v5  ;;  %v1979_v41 = vmul.f32 %v14727_v35, %v1685_v27  ;;  %v14734_v37 = vld [vmem:[%s16661_s3] ss:$0 sm:$0xff]  ;;  %v1982_v17 = vmul.f32 %v14727_v35, %v12080_v42  ;;  %2584 = vst.msk [vmem:[#allocation2 + $0x130] sm:$0xff] %vm722_vm0, %v2536_v2  ;;  %v2537_v46 = vmax.f32 %v2441_v58, %v2489_v34 }
 0x222   :  { %v1980_v30 = vmul.f32 %v14727_v35, %v1688_v6  ;;  %v14762_v15 = vld [vmem:[#allocation2 + $0x123] sm:$0xff] }
 0x223   :  { %v2180_v52 = vadd.f32 %v14734_v37, %v1981_v11  ;;  %v2178_v5 = vadd.f32 %v14734_v37, %v1979_v41  ;;  %v2181_v27 = vadd.f32 %v14734_v37, %v1982_v17  ;;  %2585 = vst.msk [vmem:[#allocation2 + $0x138] sm:$0xff] %vm722_vm0, %v2537_v46  ;;  %v14748_v46 = vld [vmem:[#allocation2 + $0x120] sm:$0xff]  ;;  %16805 = vst [vmem:[#allocation62_spill] sm:$0xff] %v14762_v15 }
 0x224   :  { %v2179_v38 = vadd.f32 %v14734_v37, %v1980_v30  ;;  %16803 = vst [vmem:[#allocation60_spill] sm:$0xff] %v14748_v46 }
 0x225   :  { %v2372_v19 = vmax.f32 %v2180_v52, 0.0  ;;  %v2370_v56 = vmax.f32 %v2178_v5, 0.0  ;;  %v2373_v51 = vmax.f32 %v2181_v27, 0.0  ;;  %v12083_v42 = vpop.f32.mrb[164].mxu0 }
 0x226   :  { %v2371_v59 = vmax.f32 %v2179_v38, 0.0  ;;  %v1985_v8 = vmul.f32 %v14727_v35, %v12083_v42  ;;  %v1701_v2 = vpop.f32.mrb[165].mxu0 }
 0x227   :  { %v2442_v11 = vmax.f32 %v2370_v56, %v2372_v19  ;;  %v1983_v41 = vmul.f32 %v14727_v35, %v1701_v2  ;;  %v12084_v58 = vpop.f32.mrb[166].mxu0  ;;  %v2594_v2 = vld [vmem:[#allocation2] sm:$0xff] }
 0x228   :  { %v2443_v34 = vmax.f32 %v2371_v59, %v2373_v51  ;;  %v2184_v6 = vadd.f32 %v14734_v37, %v1985_v8  ;;  %v1986_v52 = vmul.f32 %v14727_v35, %v12084_v58  ;;  %v1704_v17 = vpop.f32.mrb[167].mxu0  ;;  %v14750_v5 = vld [vmem:[#allocation2 + $0x130] sm:$0xff] }
 0x229   :  { %16804 = vst [vmem:[#allocation61_spill] sm:$0xff] %v14750_v5  ;;  %v2182_v30 = vadd.f32 %v14734_v37, %v1983_v41  ;;  %v1984_v19 = vmul.f32 %v14727_v35, %v1704_v17  ;;  %v2610_v41 = vpack.c.bf16 %v13532_v3, %v2594_v2  ;;  %v14769_v5 = vld [vmem:[#allocation2 + $0x124] sm:$0xff] }
 0x22a   :  { %v2376_v51 = vmax.f32 %v2184_v6, 0.0  ;;  %v2185_v59 = vadd.f32 %v14734_v37, %v1986_v52  ;;  %v14757_v56 = vld [vmem:[#allocation2 + $0x131] sm:$0xff]  ;;  %16808 = vst [vmem:[#allocation65_spill] sm:$0xff] %v14769_v5 }
 0x22b   :  { %v2374_v8 = vmax.f32 %v2182_v30, 0.0  ;;  %v2183_v38 = vadd.f32 %v14734_v37, %v1984_v19  ;;  %v2645_v42 = vpack.c.bf16 %v14757_v56, %v14697_v14  ;;  %v14764_v17 = vld [vmem:[#allocation2 + $0x133] sm:$0xff] }
 0x22c   :  { %v2377_v58 = vmax.f32 %v2185_v59, 0.0  ;;  %16806 = vst [vmem:[#allocation63_spill] sm:$0xff] %v14764_v17  ;;  %v14766_v27 = vld [vmem:[#allocation2 + $0x134] sm:$0xff] }
 0x22d   :  { %16807 = vst [vmem:[#allocation64_spill] sm:$0xff] %v14766_v27  ;;  %v2490_v6 = vmax.f32 %v2374_v8, %v2376_v51  ;;  %v2375_v52 = vmax.f32 %v2183_v38, 0.0  ;;  %12126 = vmatmul.mubr.msk.bf16.gmra.mrb[12].mxu1 %vm722_vm0, %v2645_v42  ;;  %v12087_v30 = vpop.f32.mrb[168].mxu0 }
 0x22e   :  { %12133 = vmatprep.mubr.msk.bf16.mxu1 %vm722_vm0, %v2610_v41  ;;  %v1989_v3 = vmul.f32 %v14727_v35, %v12087_v30  ;;  %v1717_v59 = vpop.f32.mrb[169].mxu0 }
 0x22f   :  { %v2538_v46 = vmax.f32 %v2442_v11, %v2490_v6  ;;  %v2491_v4 = vmax.f32 %v2375_v52, %v2377_v58  ;;  %v1987_v51 = vmul.f32 %v14727_v35, %v1717_v59  ;;  %v12088_v8 = vpop.f32.mrb[170].mxu0  ;;  %v13533_v11 = vld [vmem:[#allocation2 + $0x20] sm:$0xff]  ;;  %v13534_v58 = vld [vmem:[#allocation2 + $0x30] sm:$0xff] }
 0x230   :  { %v2188_v38 = vadd.f32 %v14734_v37, %v1989_v3  ;;  %v1990_v42 = vmul.f32 %v14727_v35, %v12088_v8  ;;  %v1720_v26 = vpop.f32.mrb[171].mxu0  ;;  %v14785_v6 = vpack.c.bf16 %v13534_v58, %v13533_v11  ;;  %v13091_v52 = vld [vmem:[%s16662_s4 + $0x28] sm:$0xff]  }
 0x231   :  { %2586 = vst.msk [vmem:[#allocation2 + $0x140] sm:$0xff] %vm722_vm0, %v2538_v46  ;;  %v2539_v19 = vmax.f32 %v2443_v34, %v2491_v4  ;;  %v2186_v41 = vadd.f32 %v14734_v37, %v1987_v51  ;;  %v1988_v30 = vmul.f32 %v14727_v35, %v1720_v26  ;;  %v13535_v34 = vld [vmem:[#allocation2 + $0x40] sm:$0xff]  ;;  %v13536_v46 = vld [vmem:[#allocation2 + $0x50] sm:$0xff] }
 0x232   :  { %v2380_v15 = vmax.f32 %v2188_v38, 0.0  ;;  %v2189_v2 = vadd.f32 %v14734_v37, %v1990_v42  ;;  %v14791_v59 = vpack.c.bf16 %v13536_v46, %v13535_v34 }
 0x233   :  { %2587 = vst.msk [vmem:[#allocation2 + $0x148] sm:$0xff] %vm722_vm0, %v2539_v19  ;;  %v2378_v3 = vmax.f32 %v2186_v41, 0.0  ;;  %v2187_v4 = vadd.f32 %v14734_v37, %v1988_v30  ;;  %v13092_v41 = vld [vmem:[%s16662_s4 + $0x30] sm:$0xff]  }
 0x234   :  { %16809 = vst [vmem:[#allocation66_spill] sm:$0xff] %v14791_v59  ;;  %v2381_v26 = vmax.f32 %v2189_v2, 0.0 }
 0x235   :  { %12134 = vmatmul.mubr.msk.bf16.vlgmr.msra.gmra.mrb[0].mxu1 %vm722_vm0, %v14785_v6  ;;  %v2444_v19 = vmax.f32 %v2378_v3, %v2380_v15  ;;  %v2379_v51 = vmax.f32 %v2187_v4, 0.0  ;;  %v12091_v8 = vpop.f32.mrb[172].mxu0  ;;  %v14803_v15 = vld [vmem:[#allocation2 + $0x70] sm:$0xff] }
 0x236   :  { %12150 = vmatpush3.bf16.msra.mxu1 %v14454_v63  ;;  %12137 = vmatprep.mubr.msk.bf16.mxu1 %vm722_vm0, %v14791_v59  ;;  %v1993_v38 = vmul.f32 %v14727_v35, %v12091_v8  ;;  %v1733_v42 = vpop.f32.mrb[173].mxu0 }
 0x237   :  { %12151 = vmatprep.subr.bf16.mxu1 %v13091_v52  ;;  %v2445_v2 = vmax.f32 %v2379_v51, %v2381_v26  ;;  %v1991_v30 = vmul.f32 %v14727_v35, %v1733_v42  ;;  %v12092_v11 = vpop.f32.mrb[174].mxu0  ;;  %v13537_v51 = vld [vmem:[#allocation2 + $0x60] sm:$0xff] }
 0x238   :  { %v2192_v58 = vadd.f32 %v14734_v37, %v1993_v38  ;;  %v1994_v63 = vmul.f32 %v14727_v35, %v12092_v11  ;;  %v1736_v3 = vpop.f32.mrb[175].mxu0  ;;  %v14815_v42 = vpack.c.bf16 %v14803_v15, %v13537_v51  ;;  %v2602_v38 = vld [vmem:[#allocation2 + $0xc0] sm:$0xff] }
 0x239   :  { %v2190_v4 = vadd.f32 %v14734_v37, %v1991_v30  ;;  %v1992_v34 = vmul.f32 %v14727_v35, %v1736_v3  ;;  %v14818_v30 = vld [vmem:[#allocation2 + $0x131] sm:$0xff] }
 0x23a   :  { %12152 = vmatpush3.bf16.msra.mxu1 %v13091_v52  ;;  %v2384_v46 = vmax.f32 %v2192_v58, 0.0  ;;  %v2193_v8 = vadd.f32 %v14734_v37, %v1994_v63  ;;  %v14810_v5 = vld [vmem:[#allocation2 + $0x141] sm:$0xff]  ;;  %16810 = vst [vmem:[#allocation67_spill] sm:$0xff] %v14818_v30  ;;  %v2614_v52 = vpack.c.bf16 %v14498_v53, %v2602_v38  ;;  %v14821_v3 = vld [vmem:[#allocation2 + $0x132] sm:$0xff]  ;;  %v14833_v38 = vpack.c.bf16 %v14579_v62, %v14500_v48 }
 0x23b   :  { %v14812_v26 = vld [vmem:[#allocation2 + $0x142] sm:$0xff]  ;;  %12169 = vmatprep.subr.bf16.mxu1 %v13092_v41  ;;  %v2382_v11 = vmax.f32 %v2190_v4, 0.0  ;;  %v2191_v27 = vadd.f32 %v14734_v37, %v1992_v34  ;;  %16811 = vst [vmem:[#allocation68_spill] sm:$0xff] %v14821_v3  ;;  %v13548_v3 = vld [vmem:[#allocation2 + $0x53] sm:$0xff] }
 0x23c   :  { %v2385_v58 = vmax.f32 %v2193_v8, 0.0 }
 0x23d   :  { %12138 = vmatmul.mubr.msk.bf16.gmra.mrb[4].mxu1 %vm722_vm0, %v14815_v42  ;;  %v2492_v51 = vmax.f32 %v2382_v11, %v2384_v46  ;;  %v2383_v17 = vmax.f32 %v2191_v27, 0.0  ;;  %v14838_v46 = vpack.c.bf16 %v14680_v60, %v14581_v49  ;;  %v14844_v27 = vld [vmem:[#allocation2 + $0x130] sm:$0xff]  ;;  %v13539_v11 = vld [vmem:[#allocation2 + $0x22] sm:$0xff] }
 0x23e   :  { %12141 = vmatprep.mubr.msk.bf16.mxu1 %vm722_vm0, %v2614_v52  ;;  %v13540_v52 = vld [vmem:[#allocation2 + $0x32] sm:$0xff] }
 0x23f   :  { %v2540_v34 = vmax.f32 %v2444_v19, %v2492_v51  ;;  %v2493_v59 = vmax.f32 %v2383_v17, %v2385_v58  ;;  %v14848_v17 = vpack.c.bf16 %v14844_v27, %v14682_v50  ;;  %v13538_v19 = vld [vmem:[#allocation2 + $0x12] sm:$0xff]  ;;  %v2934_v58 = vpack.c.bf16 %v13540_v52, %v13539_v11  ;;  %v13093_v51 = vld [vmem:[%s16662_s4 + $0x38] sm:$0xff]  }
 0x240   :  { %v2925_v52 = vld [vmem:[#allocation2 + $0xc2] sm:$0xff] }
 0x241   :  { %2588 = vst.msk [vmem:[#allocation2 + $0x150] sm:$0xff] %vm722_vm0, %v2540_v34  ;;  %v2541_v8 = vmax.f32 %v2445_v2, %v2493_v59  ;;  %v2917_v59 = vld [vmem:[#allocation2 + $0x2] sm:$0xff] }
 0x242   :  { %v2933_v2 = vpack.c.bf16 %v13538_v19, %v2917_v59  ;;  %v13541_v34 = vld [vmem:[#allocation2 + $0x42] sm:$0xff]  ;;  %v14861_v19 = vld [vmem:[#allocation2 + $0x72] sm:$0xff] }
 0x243   :  { %2589 = vst.msk [vmem:[#allocation2 + $0x158] sm:$0xff] %vm722_vm0, %v2541_v8  ;;  %v13542_v8 = vld [vmem:[#allocation2 + $0x52] sm:$0xff]  ;;  %v13096_v59 = vld [vmem:[%s16662_s4 + $0x40] sm:$0xff]  }
 0x244   :  { %v2935_v4 = vpack.c.bf16 %v13542_v8, %v13541_v34  ;;  %v2937_v34 = vpack.c.bf16 %v14507_v12, %v2925_v52  ;;  %v3095_v8 = vld [vmem:[#allocation2 + $0x3] sm:$0xff] }
 0x245   :  { %12142 = vmatmul.mubr.msk.bf16.gmra.mrb[8].mxu1 %vm722_vm0, %v14833_v38  ;;  %v13545_v52 = vld [vmem:[#allocation2 + $0x23] sm:$0xff] }
 0x246   :  { %12145 = vmatprep.mubr.msk.bf16.mxu1 %vm722_vm0, %v14838_v46 }
 0x24d   :  { %12146 = vmatmul.mubr.msk.bf16.gmra.mrb[12].mxu1 %vm722_vm0, %v14848_v17 }
 0x24e   :  { %12153 = vmatprep.mubr.msk.bf16.mxu1 %vm722_vm0, %v2933_v2  ;;  %v13543_v2 = vld [vmem:[#allocation2 + $0x62] sm:$0xff] }
 0x24f   :  { %v2936_v11 = vpack.c.bf16 %v14861_v19, %v13543_v2  ;;  %v13544_v2 = vld [vmem:[#allocation2 + $0x13] sm:$0xff] }
 0x255   :  { %12154 = vmatmul.mubr.msk.bf16.vlgmr.msra.gmra.mrb[0].mxu1 %vm722_vm0, %v2934_v58  ;;  %v14873_v58 = vld [vmem:[#allocation2 + $0x132] sm:$0xff] }
 0x256   :  { %12170 = vmatpush3.bf16.msra.mxu1 %v13092_v41  ;;  %12157 = vmatprep.mubr.msk.bf16.mxu1 %vm722_vm0, %v2935_v4  ;;  %v2938_v41 = vpack.c.bf16 %v14583_v57, %v14509_v1  ;;  %v2939_v4 = vpack.c.bf16 %v14684_v10, %v14600_v47 }
 0x257   :  { %12171 = vmatprep.subr.bf16.mxu1 %v13093_v51 }
 0x25a   :  { %12172 = vmatpush3.bf16.msra.mxu1 %v13093_v51  ;;  %v2940_v51 = vpack.c.bf16 %v14873_v58, %v14699_v39 }
 0x25b   :  { %12189 = vmatprep.subr.bf16.mxu1 %v13096_v59 }
 0x25d   :  { %12158 = vmatmul.mubr.msk.bf16.gmra.mrb[4].mxu1 %vm722_vm0, %v2936_v11  ;;  %v3111_v11 = vpack.c.bf16 %v13544_v2, %v3095_v8  ;;  %v14887_v8 = vld [vmem:[#allocation2 + $0x73] sm:$0xff]  ;;  %v13549_v2 = vld [vmem:[#allocation2 + $0x63] sm:$0xff] }
 0x25e   :  { %12161 = vmatprep.mubr.msk.bf16.mxu1 %vm722_vm0, %v2937_v34  ;;  %v13546_v34 = vld [vmem:[#allocation2 + $0x33] sm:$0xff] }
 0x25f   :  { %v3112_v63 = vpack.c.bf16 %v13546_v34, %v13545_v52  ;;  %v3103_v52 = vld [vmem:[#allocation2 + $0xc3] sm:$0xff] }
 0x265   :  { %12162 = vmatmul.mubr.msk.bf16.gmra.mrb[8].mxu1 %vm722_vm0, %v2938_v41  ;;  %v13099_v41 = vld [vmem:[%s16662_s4 + $0x48] sm:$0xff]  }
 0x266   :  { %12165 = vmatprep.mubr.msk.bf16.mxu1 %vm722_vm0, %v2939_v4  ;;  %v13547_v4 = vld [vmem:[#allocation2 + $0x43] sm:$0xff] }
 0x267   :  { %v3113_v30 = vpack.c.bf16 %v13548_v3, %v13547_v4  ;;  %v3115_v3 = vpack.c.bf16 %v14514_v29, %v3103_v52  ;;  %v13550_v4 = vld [vmem:[#allocation2 + $0x14] sm:$0xff]  ;;  %v13108_v52 = vld [vmem:[%s16658_s0 + $0x2e0] sm:$0xff]  }
 0x268   :  { %12101 = vmatprep.mubr.msk.bf16.mxu0 %vm722_vm0, %v13108_v52  ;;  %v14945_v52 = vld [vmem:[#allocation2 + $0x74] sm:$0xff] }
 0x26d   :  { %12166 = vmatmul.mubr.msk.bf16.gmra.mrb[12].mxu1 %vm722_vm0, %v2940_v51  ;;  %v13100_v51 = vld [vmem:[%s16662_s4 + $0x50] sm:$0xff]  }
 0x26e   :  { %12173 = vmatprep.mubr.msk.bf16.mxu1 %vm722_vm0, %v3111_v11  ;;  %v14890_v11 = vpack.c.bf16 %v14887_v8, %v13549_v2 }
 0x270   :  { %16812 = vst [vmem:[#allocation69_spill] sm:$0xff] %v14890_v11 }
 0x275   :  { %12174 = vmatmul.mubr.msk.bf16.vlgmr.msra.gmra.mrb[0].mxu1 %vm722_vm0, %v3112_v63  ;;  %v14902_v63 = vpack.c.bf16 %v14688_v20, %v14602_v28 }
 0x276   :  { %12190 = vmatpush3.bf16.msra.mxu1 %v13096_v59  ;;  %12177 = vmatprep.mubr.msk.bf16.mxu1 %vm722_vm0, %v3113_v30  ;;  %v14898_v30 = vpack.c.bf16 %v14589_v61, %v14511_v21  ;;  %v14908_v59 = vld [vmem:[#allocation2 + $0x133] sm:$0xff] }
 0x277   :  { %12191 = vmatprep.subr.bf16.mxu1 %v13099_v41  ;;  %16814 = vst [vmem:[#allocation71_spill] sm:$0xff] %v14902_v63  ;;  %v14912_v34 = vpack.c.bf16 %v14908_v59, %v14701_v45 }
 0x278   :  { %16813 = vst [vmem:[#allocation70_spill] sm:$0xff] %v14898_v30 }
 0x279   :  { %16815 = vst [vmem:[#allocation72_spill] sm:$0xff] %v14912_v34 }
 0x27a   :  { %12192 = vmatpush3.bf16.msra.mxu1 %v13099_v41  ;;  %v3273_v41 = vld [vmem:[#allocation2 + $0x4] sm:$0xff] }
 0x27b   :  { %12209 = vmatprep.subr.bf16.mxu1 %v13100_v51  ;;  %v3289_v2 = vpack.c.bf16 %v13550_v4, %v3273_v41  ;;  %v13101_v4 = vld [vmem:[%s16662_s4 + $0x58] sm:$0xff]  }
 0x27d   :  { %12178 = vmatmul.mubr.msk.bf16.gmra.mrb[4].mxu1 %vm722_vm0, %v14890_v11 }
 0x27e   :  { %12181 = vmatprep.mubr.msk.bf16.mxu1 %vm722_vm0, %v3115_v3  ;;  %v13109_v3 = vld [vmem:[%s16658_s0 + $0x2e8] sm:$0xff]  }
 0x27f   :  { %12102 = vmatmul.mubr.msk.bf16.gmra.mrb[184].mxu0 %vm722_vm0, %v13109_v3 }
 0x285   :  { %12182 = vmatmul.mubr.msk.bf16.gmra.mrb[8].mxu1 %vm722_vm0, %v14898_v30  ;;  %v13552_v30 = vld [vmem:[#allocation2 + $0x34] sm:$0xff] }
 0x286   :  { %12185 = vmatprep.mubr.msk.bf16.mxu1 %vm722_vm0, %v14902_v63  ;;  %v13551_v63 = vld [vmem:[#allocation2 + $0x24] sm:$0xff] }
 0x287   :  { %v14925_v41 = vpack.c.bf16 %v13552_v30, %v13551_v63  ;;  %v13111_v30 = vld [vmem:[%s16658_s0 + $0x2f0] sm:$0xff]   ;;  %v13112_v63 = vld [vmem:[%s16658_s0 + $0x2f8] sm:$0xff]  }
 0x288   :  { %12105 = vmatprep.mubr.msk.bf16.mxu0 %vm722_vm0, %v13111_v30  ;;  %v14968_v30 = vld [vmem:[#allocation2 + $0x134] sm:$0xff] }
 0x289   :  { %16816 = vst [vmem:[#allocation73_spill] sm:$0xff] %v14925_v41  ;;  %12106 = vmatmul.mubr.msk.bf16.gmra.mrb[188].mxu0 %vm722_vm0, %v13112_v63  ;;  %v14972_v63 = vpack.c.bf16 %v14968_v30, %v14704_v7 }
 0x28b   :  { %16821 = vst [vmem:[#allocation78_spill] sm:$0xff] %v14972_v63 }
 0x28d   :  { %12186 = vmatmul.mubr.msk.bf16.gmra.mrb[12].mxu1 %vm722_vm0, %v14912_v34  ;;  %v13554_v34 = vld [vmem:[#allocation2 + $0x54] sm:$0xff] }
 0x28e   :  { %12193 = vmatprep.mubr.msk.bf16.mxu1 %vm722_vm0, %v3289_v2  ;;  %v13553_v2 = vld [vmem:[#allocation2 + $0x44] sm:$0xff] }
 0x28f   :  { %v14930_v11 = vpack.c.bf16 %v13554_v34, %v13553_v2  ;;  %v13102_v34 = vld [vmem:[%s16662_s4 + $0x60] sm:$0xff]  }
 0x290   :  { %v3281_v2 = vld [vmem:[#allocation2 + $0xc4] sm:$0xff] }
 0x291   :  { %16817 = vst [vmem:[#allocation74_spill] sm:$0xff] %v14930_v11 }
 0x295   :  { %12194 = vmatmul.mubr.msk.bf16.vlgmr.msra.gmra.mrb[0].mxu1 %vm722_vm0, %v14925_v41  ;;  %v14958_v41 = vpack.c.bf16 %v14591_v0, %v14518_v16 }
 0x296   :  { %12210 = vmatpush3.bf16.msra.mxu1 %v13100_v51  ;;  %12197 = vmatprep.mubr.msk.bf16.mxu1 %vm722_vm0, %v14930_v11  ;;  %v13555_v51 = vld [vmem:[#allocation2 + $0x64] sm:$0xff]  ;;  %v3293_v11 = vpack.c.bf16 %v14516_v43, %v3281_v2  ;;  %v16823_v2 = vpack.c.bf16 %v14143_v23, %v14141_v22  ;;  %v16825_v22 = vpack.c.bf16 %v14500_v48, %v14498_v53 }
 0x297   :  { %12211 = vmatprep.subr.bf16.mxu1 %v13101_v4  ;;  %v14950_v3 = vpack.c.bf16 %v14945_v52, %v13555_v51  ;;  %16819 = vst [vmem:[#allocation76_spill] sm:$0xff] %v14958_v41  ;;  %v13103_v51 = vld [vmem:[%s16662_s4 + $0x68] sm:$0xff]   ;;  %v16826_v23 = vpack.c.bf16 %v14581_v49, %v14579_v62 }
 0x299   :  { %16818 = vst [vmem:[#allocation75_spill] sm:$0xff] %v14950_v3 }
 0x29a   :  { %12212 = vmatpush3.bf16.msra.mxu1 %v13101_v4  ;;  %v14962_v4 = vpack.c.bf16 %v14690_v13, %v14605_v55 }
 0x29b   :  { %12229 = vmatprep.subr.bf16.mxu1 %v13102_v34 }
 0x29c   :  { %16820 = vst [vmem:[#allocation77_spill] sm:$0xff] %v14962_v4 }
 0x29d   :  { %12198 = vmatmul.mubr.msk.bf16.gmra.mrb[4].mxu1 %vm722_vm0, %v14950_v3 }
 0x29e   :  { %12201 = vmatprep.mubr.msk.bf16.mxu1 %vm722_vm0, %v3293_v11  ;;  %v16822_v11 = vpack.c.bf16 %v14044_v33, %v14042_v32  ;;  %v13104_v32 = vld [vmem:[%s16662_s4 + $0x70] sm:$0xff]   ;;  %v14994_v33 = vld [vmem:[#allocation2 + $0x80] sm:$0xff] }
 0x2a5   :  { %12202 = vmatmul.mubr.msk.bf16.gmra.mrb[8].mxu1 %vm722_vm0, %v14958_v41 }
 0x2a6   :  { %12205 = vmatprep.mubr.msk.bf16.mxu1 %vm722_vm0, %v14962_v4  ;;  %v16824_v4 = vpack.c.bf16 %v14266_v25, %v14264_v9  ;;  %v16827_v9 = vpack.c.bf16 %v14682_v50, %v14680_v60 }
 0x2ad   :  { %12206 = vmatmul.mubr.msk.bf16.gmra.mrb[12].mxu1 %vm722_vm0, %v14972_v63 }
 0x2ae   :  { %12213 = vmatprep.mubr.msk.bf16.mxu1 %vm722_vm0, %v16822_v11  ;;  %v3471_v11 = vpack.c.bf16 %v14994_v33, %v14803_v15 }
 0x2b5   :  { %12214 = vmatmul.mubr.msk.bf16.vlgmr.msra.gmra.mrb[0].mxu1 %vm722_vm0, %v16823_v2 }
 0x2b6   :  { %12230 = vmatpush3.bf16.msra.mxu1 %v13102_v34  ;;  %12217 = vmatprep.mubr.msk.bf16.mxu1 %vm722_vm0, %v16824_v4  ;;  %v15012_v4 = vld [vmem:[#allocation2 + $0x140] sm:$0xff] }
 0x2b7   :  { %12231 = vmatprep.subr.bf16.mxu1 %v13103_v51  ;;  %16828 = vst [vmem:[#allocation79_spill] sm:$0xff] %v15012_v4  ;;  %v3475_v50 = vpack.c.bf16 %v15012_v4, %v14844_v27 }
 0x2ba   :  { %12232 = vmatpush3.bf16.msra.mxu1 %v13103_v51 }
 0x2bb   :  { %12249 = vmatprep.subr.bf16.mxu1 %v13104_v32 }
 0x2bd   :  { %12218 = vmatmul.mubr.msk.bf16.gmra.mrb[4].mxu1 %vm722_vm0, %v3471_v11  ;;  %v3630_v11 = vld [vmem:[#allocation2 + $0x11] sm:$0xff] }
 0x2be   :  { %12221 = vmatprep.mubr.msk.bf16.mxu1 %vm722_vm0, %v16825_v22 }
 0x2bf   :  { %v12095_v25 = vpop.f32.mrb[176].mxu0 }
 0x2c0   :  { %v1997_v15 = vmul.f32 %v14727_v35, %v12095_v25  ;;  %v1749_v34 = vpop.f32.mrb[177].mxu0 }
 0x2c1   :  { %v1995_v53 = vmul.f32 %v14727_v35, %v1749_v34  ;;  %v12096_v48 = vpop.f32.mrb[178].mxu0 }
 0x2c2   :  { %v2196_v51 = vadd.f32 %v14734_v37, %v1997_v15  ;;  %v1998_v62 = vmul.f32 %v14727_v35, %v12096_v48  ;;  %v1752_v49 = vpop.f32.mrb[179].mxu0 }
 0x2c3   :  { %v2194_v2 = vadd.f32 %v14734_v37, %v1995_v53  ;;  %v1996_v60 = vmul.f32 %v14727_v35, %v1752_v49 }
 0x2c4   :  { %v2388_v22 = vmax.f32 %v2196_v51, 0.0 }
 0x2c5   :  { %12222 = vmatmul.mubr.msk.bf16.gmra.mrb[8].mxu1 %vm722_vm0, %v16826_v23  ;;  %v2197_v23 = vadd.f32 %v14734_v37, %v1998_v62  ;;  %v2386_v34 = vmax.f32 %v2194_v2, 0.0  ;;  %v2195_v63 = vadd.f32 %v14734_v37, %v1996_v60 }
 0x2c6   :  { %12225 = vmatprep.mubr.msk.bf16.mxu1 %vm722_vm0, %v16827_v9  ;;  %v13556_v9 = vld [vmem:[#allocation2 + $0x21] sm:$0xff] }
 0x2c7   :  { %v3646_v25 = vpack.c.bf16 %v13556_v9, %v3630_v11  ;;  %v12099_v15 = vpop.f32.mrb[180].mxu0  ;;  %v2389_v48 = vmax.f32 %v2197_v23, 0.0  ;;  %v2446_v49 = vmax.f32 %v2386_v34, %v2388_v22  ;;  %v2387_v27 = vmax.f32 %v2195_v63, 0.0  ;;  %v13557_v63 = vld [vmem:[#allocation2 + $0x31] sm:$0xff] }
 0x2c8   :  { %v2001_v53 = vmul.f32 %v14727_v35, %v12099_v15  ;;  %v1765_v41 = vpop.f32.mrb[181].mxu0 }
 0x2c9   :  { %v1999_v51 = vmul.f32 %v14727_v35, %v1765_v41  ;;  %v12100_v3 = vpop.f32.mrb[182].mxu0  ;;  %v2447_v60 = vmax.f32 %v2387_v27, %v2389_v48  ;;  %v13559_v48 = vld [vmem:[#allocation2 + $0x51] sm:$0xff] }
 0x2ca   :  { %v2200_v62 = vadd.f32 %v14734_v37, %v2001_v53  ;;  %v2002_v2 = vmul.f32 %v14727_v35, %v12100_v3  ;;  %v1768_v11 = vpop.f32.mrb[183].mxu0  ;;  %v13105_v3 = vld [vmem:[%s16662_s4 + $0x78] sm:$0xff]  }
 0x2cb   :  { %v2198_v9 = vadd.f32 %v14734_v37, %v1999_v51  ;;  %v13560_v53 = vld [vmem:[#allocation2 + $0x61] sm:$0xff] }
 0x2cc   :  { %v2392_v23 = vmax.f32 %v2200_v62, 0.0  ;;  %v2201_v15 = vadd.f32 %v14734_v37, %v2002_v2  ;;  %v15038_v27 = vpack.c.bf16 %v13560_v53, %v13559_v48  ;;  %v16839_v48 = vpack.c.bf16 %v14699_v39, %v14684_v10  ;;  %v16840_v53 = vld [vmem:[#allocation8_spill] sm:$0xff]  ;;  %v16846_v10 = vld [vmem:[#allocation31_spill] sm:$0xff]  ;;  %v16847_v39 = vld [vmem:[#allocation29_spill] sm:$0xff] }
 0x2cd   :  { %12226 = vmatmul.mubr.msk.bf16.gmra.mrb[12].mxu1 %vm722_vm0, %v3475_v50  ;;  %v2000_v50 = vmul.f32 %v14727_v35, %v1768_v11  ;;  %v2390_v4 = vmax.f32 %v2198_v9, 0.0  ;;  %v13106_v9 = vld [vmem:[%s16662_s4 + $0x80] sm:$0xff]  }
 0x2ce   :  { %12233 = vmatprep.mubr.msk.bf16.mxu1 %vm722_vm0, %v3646_v25  ;;  %v13558_v25 = vld [vmem:[#allocation2 + $0x41] sm:$0xff]  ;;  %v2393_v34 = vmax.f32 %v2201_v15, 0.0  ;;  %v3638_v15 = vld [vmem:[#allocation2 + $0xd1] sm:$0xff] }
 0x2cf   :  { %v2199_v22 = vadd.f32 %v14734_v37, %v2000_v50  ;;  %v15033_v41 = vpack.c.bf16 %v13558_v25, %v13557_v63  ;;  %v2494_v51 = vmax.f32 %v2390_v4, %v2392_v23  ;;  %v15047_v50 = vld [vmem:[#allocation2 + $0x81] sm:$0xff]  ;;  %v13561_v23 = vld [vmem:[#allocation2 + $0x71] sm:$0xff]  ;;  %v3653_v63 = vpack.c.bf16 %v14810_v5, %v14757_v56 }
 0x2d1   :  { %v2391_v62 = vmax.f32 %v2199_v22, 0.0  ;;  %v2542_v2 = vmax.f32 %v2446_v49, %v2494_v51  ;;  %v3650_v49 = vpack.c.bf16 %v14543_v44, %v3638_v15  ;;  %v16829_v22 = vpack.c.bf16 %v14598_v54, %v14545_v24  ;;  %v13107_v54 = vld [vmem:[%s16662_s4 + $0x88] sm:$0xff]   ;;  %v16832_v24 = vld [vmem:[#allocation13_spill] sm:$0xff]  ;;  %v16841_v51 = vld [vmem:[#allocation7_spill] sm:$0xff] }
 0x2d2   :  { %v16831_v44 = vpack.c.bf16 %v14054_v40, %v14048_v36  ;;  %v16833_v25 = vpack.c.bf16 %v14155_v31, %v16832_v24  ;;  %v13110_v36 = vld [vmem:[%s16662_s4 + $0x90] sm:$0xff]   ;;  %v15087_v40 = vld [vmem:[#allocation2 + $0x82] sm:$0xff]  ;;  %v16837_v31 = vpack.c.bf16 %v14509_v1, %v14507_v12  ;;  %v16842_v12 = vpack.c.bf16 %v16840_v53, %v16841_v51 }
 0x2d3   :  { %v2495_v11 = vmax.f32 %v2391_v62, %v2393_v34  ;;  %2590 = vst.msk [vmem:[#allocation2 + $0x160] sm:$0xff] %vm722_vm0, %v2542_v2  ;;  %v16838_v34 = vpack.c.bf16 %v14600_v47, %v14583_v57  ;;  %v13113_v1 = vld [vmem:[%s16662_s4 + $0x98] sm:$0xff]   ;;  %v16843_v57 = vld [vmem:[#allocation15_spill] sm:$0xff]  ;;  %v16851_v15 = vpack.c.bf16 %v14701_v45, %v14688_v20  ;;  %v16856_v45 = vld [vmem:[#allocation16_spill] sm:$0xff] }
 0x2d4   :  { %v16844_v47 = vld [vmem:[#allocation14_spill] sm:$0xff]  ;;  %v13114_v2 = vld [vmem:[%s16662_s4 + $0xa0] sm:$0xff]  }
 0x2d5   :  { %12234 = vmatmul.mubr.msk.bf16.vlgmr.msra.gmra.mrb[0].mxu1 %vm722_vm0, %v15033_v41  ;;  %v2543_v4 = vmax.f32 %v2447_v60, %v2495_v11  ;;  %v16830_v60 = vpack.c.bf16 %v14697_v14, %v14648_v18  ;;  %v16834_v18 = vld [vmem:[#allocation30_spill] sm:$0xff]  ;;  %v16835_v14 = vld [vmem:[#allocation28_spill] sm:$0xff]  ;;  %v16845_v62 = vpack.c.bf16 %v16843_v57, %v16844_v47 }
 0x2d6   :  { %12250 = vmatpush3.bf16.msra.mxu1 %v13104_v32  ;;  %12237 = vmatprep.mubr.msk.bf16.mxu1 %vm722_vm0, %v15038_v27  ;;  %v15052_v32 = vpack.c.bf16 %v15047_v50, %v13561_v23  ;;  %v16836_v56 = vpack.c.bf16 %v16834_v18, %v16835_v14  ;;  %v15125_v11 = vld [vmem:[#allocation2 + $0x83] sm:$0xff]  ;;  %v16850_v23 = vpack.c.bf16 %v14602_v28, %v14589_v61  ;;  %v13115_v61 = vld [vmem:[%s16662_s4 + $0xa8] sm:$0xff]   ;;  %v16855_v28 = vld [vmem:[#allocation17_spill] sm:$0xff] }
 0x2d7   :  { %12251 = vmatprep.subr.bf16.mxu1 %v13105_v3  ;;  %2591 = vst.msk [vmem:[#allocation2 + $0x168] sm:$0xff] %vm722_vm0, %v2543_v4  ;;  %v16849_v4 = vpack.c.bf16 %v14511_v21, %v14514_v29  ;;  %v16852_v21 = vld [vmem:[#allocation10_spill] sm:$0xff]  ;;  %v16853_v29 = vld [vmem:[#allocation9_spill] sm:$0xff]  ;;  %v16857_v20 = vpack.c.bf16 %v16855_v28, %v16856_v45  ;;  %v16862_v18 = vpack.c.bf16 %v14605_v55, %v14591_v0  ;;  %v15199_v0 = vld [vmem:[#allocation2 + $0x90] sm:$0xff] }
 0x2d8   :  { %v16863_v14 = vpack.c.bf16 %v14704_v7, %v14690_v13  ;;  %v13117_v55 = vld [vmem:[%s16662_s4 + $0xb8] sm:$0xff]   ;;  %v4362_v13 = vpack.c.bf16 %v15199_v0, %v14994_v33 }
 0x2da   :  { %12252 = vmatpush3.bf16.msra.mxu1 %v13105_v3  ;;  %v3827_v3 = vpack.c.bf16 %v15087_v40, %v14861_v19  ;;  %v3831_v19 = vpack.c.bf16 %v14812_v26, %v14873_v58  ;;  %v16848_v58 = vpack.c.bf16 %v16846_v10, %v16847_v39  ;;  %v16866_v39 = vld [vmem:[#allocation12_spill] sm:$0xff] }
 0x2db   :  { %12269 = vmatprep.subr.bf16.mxu1 %v13106_v9 }
 0x2dd   :  { %12238 = vmatmul.mubr.msk.bf16.gmra.mrb[4].mxu1 %vm722_vm0, %v15052_v32 }
 0x2de   :  { %12241 = vmatprep.mubr.msk.bf16.mxu1 %vm722_vm0, %v3650_v49  ;;  %v15142_v49 = vld [vmem:[#allocation2 + $0x143] sm:$0xff] }
 0x2e5   :  { %12242 = vmatmul.mubr.msk.bf16.gmra.mrb[8].mxu1 %vm722_vm0, %v16829_v22  ;;  %v16854_v22 = vpack.c.bf16 %v16852_v21, %v16853_v29 }
 0x2e6   :  { %12245 = vmatprep.mubr.msk.bf16.mxu1 %vm722_vm0, %v16830_v60  ;;  %v16858_v60 = vld [vmem:[#allocation33_spill] sm:$0xff] }
 0x2ed   :  { %12246 = vmatmul.mubr.msk.bf16.gmra.mrb[12].mxu1 %vm722_vm0, %v3653_v63  ;;  %v16859_v63 = vld [vmem:[#allocation32_spill] sm:$0xff] }
 0x2ee   :  { %12253 = vmatprep.mubr.msk.bf16.mxu1 %vm722_vm0, %v16831_v44  ;;  %v13116_v44 = vld [vmem:[%s16662_s4 + $0xb0] sm:$0xff]  }
 0x2f5   :  { %12254 = vmatmul.mubr.msk.bf16.vlgmr.msra.gmra.mrb[0].mxu1 %vm722_vm0, %v16833_v25  ;;  %v16861_v25 = vpack.c.bf16 %v14518_v16, %v14516_v43  ;;  %v16864_v43 = vld [vmem:[#allocation66_spill] sm:$0xff]  ;;  %v13118_v16 = vld [vmem:[%s16662_s4 + $0xc0] sm:$0xff]  }
 0x2f6   :  { %12270 = vmatpush3.bf16.msra.mxu1 %v13106_v9  ;;  %12257 = vmatprep.mubr.msk.bf16.mxu1 %vm722_vm0, %v16836_v56  ;;  %v4005_v9 = vpack.c.bf16 %v15125_v11, %v14887_v8  ;;  %v4009_v8 = vpack.c.bf16 %v15142_v49, %v14908_v59  ;;  %v16860_v59 = vpack.c.bf16 %v16858_v60, %v16859_v63  ;;  %v15182_v56 = vld [vmem:[#allocation2 + $0x144] sm:$0xff] }
 0x2f7   :  { %12271 = vmatprep.subr.bf16.mxu1 %v13107_v54 }
 0x2fa   :  { %12272 = vmatpush3.bf16.msra.mxu1 %v13107_v54  ;;  %v15165_v54 = vld [vmem:[#allocation2 + $0x84] sm:$0xff] }
 0x2fb   :  { %12289 = vmatprep.subr.bf16.mxu1 %v13110_v36  ;;  %v4183_v24 = vpack.c.bf16 %v15165_v54, %v14945_v52  ;;  %v4187_v52 = vpack.c.bf16 %v15182_v56, %v14968_v30  ;;  %v15211_v30 = vld [vmem:[#allocation2 + $0x150] sm:$0xff] }
 0x2fd   :  { %12258 = vmatmul.mubr.msk.bf16.gmra.mrb[4].mxu1 %vm722_vm0, %v3827_v3 }
 0x2fe   :  { %12261 = vmatprep.mubr.msk.bf16.mxu1 %vm722_vm0, %v16837_v31 }
 0x305   :  { %12262 = vmatmul.mubr.msk.bf16.gmra.mrb[8].mxu1 %vm722_vm0, %v16838_v34 }
 0x306   :  { %12265 = vmatprep.mubr.msk.bf16.mxu1 %vm722_vm0, %v16839_v48 }
 0x30d   :  { %12266 = vmatmul.mubr.msk.bf16.gmra.mrb[12].mxu1 %vm722_vm0, %v3831_v19  ;;  %v16865_v19 = vld [vmem:[#allocation79_spill] sm:$0xff] }
 0x30e   :  { %12273 = vmatprep.mubr.msk.bf16.mxu1 %vm722_vm0, %v16842_v12 }
 0x315   :  { %12274 = vmatmul.mubr.msk.bf16.vlgmr.msra.gmra.mrb[0].mxu1 %vm722_vm0, %v16845_v62 }
 0x316   :  { %12290 = vmatpush3.bf16.msra.mxu1 %v13110_v36  ;;  %12277 = vmatprep.mubr.msk.bf16.mxu1 %vm722_vm0, %v16848_v58  ;;  %v16867_v58 = vld [vmem:[#allocation11_spill] sm:$0xff] }
 0x317   :  { %12291 = vmatprep.subr.bf16.mxu1 %v13113_v1 }
 0x31a   :  { %12292 = vmatpush3.bf16.msra.mxu1 %v13113_v1 }
 0x31b   :  { %12309 = vmatprep.subr.bf16.mxu1 %v13114_v2 }
 0x31d   :  { %12278 = vmatmul.mubr.msk.bf16.gmra.mrb[4].mxu1 %vm722_vm0, %v4005_v9 }
 0x31e   :  { %12281 = vmatprep.mubr.msk.bf16.mxu1 %vm722_vm0, %v16849_v4 }
 0x325   :  { %12282 = vmatmul.mubr.msk.bf16.gmra.mrb[8].mxu1 %vm722_vm0, %v16850_v23 }
 0x326   :  { %12285 = vmatprep.mubr.msk.bf16.mxu1 %vm722_vm0, %v16851_v15 }
 0x32d   :  { %12286 = vmatmul.mubr.msk.bf16.gmra.mrb[12].mxu1 %vm722_vm0, %v4009_v8 }
 0x32e   :  { %12293 = vmatprep.mubr.msk.bf16.mxu1 %vm722_vm0, %v16854_v22 }
 0x335   :  { %12294 = vmatmul.mubr.msk.bf16.vlgmr.msra.gmra.mrb[0].mxu1 %vm722_vm0, %v16857_v20 }
 0x336   :  { %12310 = vmatpush3.bf16.msra.mxu1 %v13114_v2  ;;  %12297 = vmatprep.mubr.msk.bf16.mxu1 %vm722_vm0, %v16860_v59  ;;  %v16868_v2 = vpack.c.bf16 %v16866_v39, %v16867_v58  ;;  %v13119_v59 = vld [vmem:[%s16662_s4 + $0xc8] sm:$0xff]   ;;  %v13121_v39 = vld [vmem:[%s16662_s4 + $0xd8] sm:$0xff]  }
 0x337   :  { %12311 = vmatprep.subr.bf16.mxu1 %v13115_v61  ;;  %v13568_v58 = vld [vmem:[#allocation2 + $0x62] sm:$0xff] }
 0x33a   :  { %12312 = vmatpush3.bf16.msra.mxu1 %v13115_v61 }
 0x33b   :  { %12329 = vmatprep.subr.bf16.mxu1 %v13116_v44 }
 0x33d   :  { %12298 = vmatmul.mubr.msk.bf16.gmra.mrb[4].mxu1 %vm722_vm0, %v4183_v24 }
 0x33e   :  { %12301 = vmatprep.mubr.msk.bf16.mxu1 %vm722_vm0, %v16861_v25 }
 0x345   :  { %12302 = vmatmul.mubr.msk.bf16.gmra.mrb[8].mxu1 %vm722_vm0, %v16862_v18  ;;  %v16869_v18 = vld [vmem:[#allocation25_spill] sm:$0xff] }
 0x346   :  { %12305 = vmatprep.mubr.msk.bf16.mxu1 %vm722_vm0, %v16863_v14  ;;  %v16870_v14 = vld [vmem:[#allocation24_spill] sm:$0xff] }
 0x34d   :  { %12306 = vmatmul.mubr.msk.bf16.gmra.mrb[12].mxu1 %vm722_vm0, %v4187_v52  ;;  %v16871_v52 = vpack.c.bf16 %v16869_v18, %v16870_v14  ;;  %v13573_v18 = vld [vmem:[#allocation2 + $0x43] sm:$0xff] }
 0x34e   :  { %12313 = vmatprep.mubr.msk.bf16.mxu1 %vm722_vm0, %v14785_v6 }
 0x352   :  { %v12103_v7 = vpop.f32.mrb[184].mxu0 }
 0x353   :  { %v2005_v6 = vmul.f32 %v14727_v35, %v12103_v7  ;;  %v13120_v7 = vld [vmem:[%s16662_s4 + $0xd0] sm:$0xff]  }
 0x355   :  { %12314 = vmatmul.mubr.msk.bf16.vlgmr.msra.gmra.mrb[0].mxu1 %vm722_vm0, %v16864_v43  ;;  %v2204_v31 = vadd.f32 %v14734_v37, %v2005_v6  ;;  %v15249_v6 = vld [vmem:[#allocation2 + $0x91] sm:$0xff] }
 0x356   :  { %12330 = vmatpush3.bf16.msra.mxu1 %v13116_v44  ;;  %12317 = vmatprep.mubr.msk.bf16.mxu1 %vm722_vm0, %v14815_v42  ;;  %v1781_v42 = vpop.f32.mrb[185].mxu0 }
 0x357   :  { %12331 = vmatprep.subr.bf16.mxu1 %v13117_v55  ;;  %v2003_v36 = vmul.f32 %v14727_v35, %v1781_v42  ;;  %v12104_v3 = vpop.f32.mrb[186].mxu0  ;;  %v2396_v53 = vmax.f32 %v2204_v31, 0.0 }
 0x358   :  { %v2006_v34 = vmul.f32 %v14727_v35, %v12104_v3  ;;  %v13563_v3 = vld [vmem:[#allocation2 + $0xf1] sm:$0xff] }
 0x359   :  { %v2202_v48 = vadd.f32 %v14734_v37, %v2003_v36  ;;  %v4529_v36 = vld [vmem:[#allocation2 + $0xe1] sm:$0xff] }
 0x35a   :  { %12332 = vmatpush3.bf16.msra.mxu1 %v13117_v55  ;;  %v2205_v51 = vadd.f32 %v14734_v37, %v2006_v34  ;;  %v16873_v55 = vld [vmem:[#allocation38_spill] sm:$0xff]  ;;  %v4541_v31 = vpack.c.bf16 %v13563_v3, %v4529_v36  ;;  %v16885_v3 = vld [vmem:[#allocation73_spill] sm:$0xff] }
 0x35b   :  { %12349 = vmatprep.subr.bf16.mxu1 %v13118_v16  ;;  %v2394_v12 = vmax.f32 %v2202_v48, 0.0  ;;  %v13564_v34 = vld [vmem:[#allocation2 + $0x101] sm:$0xff] }
 0x35c   :  { %v2397_v47 = vmax.f32 %v2205_v51, 0.0 }
 0x35d   :  { %12318 = vmatmul.mubr.msk.bf16.gmra.mrb[4].mxu1 %vm722_vm0, %v4362_v13  ;;  %v2448_v9 = vmax.f32 %v2394_v12, %v2396_v53  ;;  %v4699_v12 = vld [vmem:[#allocation2 + $0x22] sm:$0xff] }
 0x35e   :  { %12321 = vmatprep.mubr.msk.bf16.mxu1 %vm722_vm0, %v14833_v38  ;;  %v1784_v38 = vpop.f32.mrb[187].mxu0 }
 0x35f   :  { %v12107_v57 = vpop.f32.mrb[188].mxu0 }
 0x360   :  { %v2009_v62 = vmul.f32 %v14727_v35, %v12107_v57  ;;  %v1797_v10 = vpop.f32.mrb[189].mxu0 }
 0x361   :  { %v2007_v23 = vmul.f32 %v14727_v35, %v1797_v10  ;;  %v12108_v15 = vpop.f32.mrb[190].mxu0 }
 0x362   :  { %v2208_v8 = vadd.f32 %v14734_v37, %v2009_v62  ;;  %v2010_v21 = vmul.f32 %v14727_v35, %v12108_v15  ;;  %v1800_v29 = vpop.f32.mrb[191].mxu0  ;;  %v13567_v62 = vld [vmem:[#allocation2 + $0x52] sm:$0xff] }
 0x363   :  { %v2206_v61 = vadd.f32 %v14734_v37, %v2007_v23  ;;  %v2008_v28 = vmul.f32 %v14727_v35, %v1800_v29  ;;  %v15288_v23 = vld [vmem:[#allocation2 + $0x92] sm:$0xff] }
 0x364   :  { %v2400_v45 = vmax.f32 %v2208_v8, 0.0  ;;  %v2209_v20 = vadd.f32 %v14734_v37, %v2010_v21  ;;  %v4718_v15 = vpack.c.bf16 %v15288_v23, %v15087_v40  ;;  %v4707_v8 = vld [vmem:[#allocation2 + $0xe2] sm:$0xff]  ;;  %v13570_v21 = vld [vmem:[#allocation2 + $0xf2] sm:$0xff] }
 0x365   :  { %12322 = vmatmul.mubr.msk.bf16.gmra.mrb[8].mxu1 %vm722_vm0, %v14838_v46  ;;  %v2004_v46 = vmul.f32 %v14727_v35, %v1784_v38  ;;  %v2398_v60 = vmax.f32 %v2206_v61, 0.0  ;;  %v2207_v63 = vadd.f32 %v14734_v37, %v2008_v28  ;;  %v16872_v35 = vld [vmem:[#allocation39_spill] sm:$0xff]  ;;  %v16875_v38 = vld [vmem:[#allocation56_spill] sm:$0xff]  ;;  %v4719_v29 = vpack.c.bf16 %v13570_v21, %v4707_v8 }
 0x366   :  { %12325 = vmatprep.mubr.msk.bf16.mxu1 %vm722_vm0, %v14848_v17  ;;  %v4366_v17 = vpack.c.bf16 %v15211_v30, %v16865_v19  ;;  %v2401_v44 = vmax.f32 %v2209_v20, 0.0  ;;  %v16874_v43 = vpack.c.bf16 %v16872_v35, %v16873_v55  ;;  %v15258_v48 = vpack.c.bf16 %v16875_v38, %v13564_v34  ;;  %v16878_v61 = vld [vmem:[#allocation59_spill] sm:$0xff]  ;;  %v16880_v20 = vld [vmem:[#allocation68_spill] sm:$0xff]  ;;  %v16881_v35 = vld [vmem:[#allocation69_spill] sm:$0xff] }
 0x367   :  { %v2203_v1 = vadd.f32 %v14734_v37, %v2004_v46  ;;  %v2496_v24 = vmax.f32 %v2398_v60, %v2400_v45  ;;  %v2399_v25 = vmax.f32 %v2207_v63, 0.0  ;;  %v16876_v46 = vld [vmem:[#allocation57_spill] sm:$0xff]  ;;  %v16879_v45 = vld [vmem:[#allocation58_spill] sm:$0xff]  ;;  %v13575_v21 = vld [vmem:[#allocation2 + $0x50] sm:$0xff] }
 0x368   :  { %v15299_v60 = vpack.c.bf16 %v16880_v20, %v16879_v45  ;;  %v15305_v40 = vld [vmem:[#allocation2 + $0x152] sm:$0xff]  ;;  %v16886_v34 = vld [vmem:[#allocation74_spill] sm:$0xff] }
 0x369   :  { %v2395_v4 = vmax.f32 %v2203_v1, 0.0  ;;  %v2544_v13 = vmax.f32 %v2448_v9, %v2496_v24  ;;  %v2497_v37 = vmax.f32 %v2399_v25, %v2401_v44  ;;  %v13565_v1 = vld [vmem:[#allocation2 + $0x32] sm:$0xff]  ;;  %v4722_v63 = vpack.c.bf16 %v15305_v40, %v14812_v26 }
 0x36a   :  { %v4715_v57 = vpack.c.bf16 %v13565_v1, %v4699_v12  ;;  %v13572_v44 = vld [vmem:[#allocation2 + $0x33] sm:$0xff]  ;;  %v13126_v12 = vld [vmem:[%s16662_s4 + $0x100] sm:$0xff]  }
 0x36b   :  { %v2449_v22 = vmax.f32 %v2395_v4, %v2397_v47  ;;  %2592 = vst.msk [vmem:[#allocation2 + $0x170] sm:$0xff] %vm722_vm0, %v2544_v13  ;;  %v13566_v47 = vld [vmem:[#allocation2 + $0x42] sm:$0xff]  ;;  %v15311_v25 = vld [vmem:[#allocation2 + $0x53] sm:$0xff] }
 0x36c   :  { %v15274_v10 = vpack.c.bf16 %v13567_v62, %v13566_v47  ;;  %v13122_v4 = vld [vmem:[%s16662_s4 + $0xe0] sm:$0xff]   ;;  %v15314_v14 = vpack.c.bf16 %v15311_v25, %v13573_v18  ;;  %v13124_v55 = vld [vmem:[%s16662_s4 + $0xf0] sm:$0xff]   ;;  %v16888_v47 = vld [vmem:[#allocation76_spill] sm:$0xff] }
 0x36d   :  { %12326 = vmatmul.mubr.msk.bf16.gmra.mrb[12].mxu1 %vm722_vm0, %v4366_v17  ;;  %v2545_v42 = vmax.f32 %v2449_v22, %v2497_v37  ;;  %v16877_v17 = vld [vmem:[#allocation67_spill] sm:$0xff]  ;;  %v16882_v37 = vld [vmem:[#allocation70_spill] sm:$0xff]  ;;  %v15354_v1 = vld [vmem:[#allocation2 + $0x94] sm:$0xff] }
 0x36e   :  { %12333 = vmatprep.mubr.msk.bf16.mxu1 %vm722_vm0, %v16868_v2  ;;  %v15262_v53 = vpack.c.bf16 %v16877_v17, %v16876_v46  ;;  %v13569_v2 = vld [vmem:[#allocation2 + $0x72] sm:$0xff]  ;;  %v13571_v22 = vld [vmem:[#allocation2 + $0x102] sm:$0xff] }
 0x36f   :  { %2593 = vst.msk [vmem:[#allocation2 + $0x178] sm:$0xff] %vm722_vm0, %v2545_v42  ;;  %v15279_v9 = vpack.c.bf16 %v13569_v2, %v13568_v58  ;;  %v15295_v28 = vpack.c.bf16 %v16878_v61, %v13571_v22  ;;  %v16884_v42 = vld [vmem:[#allocation72_spill] sm:$0xff]  ;;  %v16889_v62 = vld [vmem:[#allocation77_spill] sm:$0xff]  ;;  %v15380_v18 = vld [vmem:[#allocation2 + $0xa0] sm:$0xff] }
 0x370   :  { %v15365_v58 = vld [vmem:[#allocation2 + $0x154] sm:$0xff] }
 0x371   :  { %v5078_v2 = vpack.c.bf16 %v15365_v58, %v15182_v56 }
 0x375   :  { %12334 = vmatmul.mubr.msk.bf16.vlgmr.msra.gmra.mrb[0].mxu1 %vm722_vm0, %v16871_v52  ;;  %v13123_v52 = vld [vmem:[%s16662_s4 + $0xe8] sm:$0xff]  }
 0x376   :  { %12350 = vmatpush3.bf16.msra.mxu1 %v13118_v16  ;;  %12337 = vmatprep.mubr.msk.bf16.mxu1 %vm722_vm0, %v16874_v43  ;;  %v4540_v16 = vpack.c.bf16 %v15249_v6, %v15047_v50  ;;  %v15268_v50 = vld [vmem:[#allocation2 + $0x151] sm:$0xff] }
 0x377   :  { %12351 = vmatprep.subr.bf16.mxu1 %v13119_v59  ;;  %v4544_v51 = vpack.c.bf16 %v15268_v50, %v14810_v5  ;;  %v15326_v43 = vld [vmem:[#allocation2 + $0x93] sm:$0xff] }
 0x378   :  { %v4896_v13 = vpack.c.bf16 %v15326_v43, %v15125_v11 }
 0x37a   :  { %12352 = vmatpush3.bf16.msra.mxu1 %v13119_v59  ;;  %v4877_v59 = vld [vmem:[#allocation2 + $0x23] sm:$0xff] }
 0x37b   :  { %12369 = vmatprep.subr.bf16.mxu1 %v13120_v7  ;;  %v4893_v24 = vpack.c.bf16 %v13572_v44, %v4877_v59  ;;  %v13577_v59 = vld [vmem:[#allocation2 + $0x70] sm:$0xff] }
 0x37c   :  { %v5252_v44 = vpack.c.bf16 %v14994_v33, %v13577_v59  ;;  %v13132_v59 = vld [vmem:[%s16662_s4 + $0x130] sm:$0xff]  }
 0x37d   :  { %12338 = vmatmul.mubr.msk.bf16.gmra.mrb[4].mxu1 %vm722_vm0, %v4540_v16  ;;  %v15337_v16 = vld [vmem:[#allocation2 + $0x153] sm:$0xff] }
 0x37e   :  { %12341 = vmatprep.mubr.msk.bf16.mxu1 %vm722_vm0, %v4541_v31  ;;  %v4900_v36 = vpack.c.bf16 %v15337_v16, %v15142_v49  ;;  %v13125_v31 = vld [vmem:[%s16662_s4 + $0xf8] sm:$0xff]  }
 0x385   :  { %12342 = vmatmul.mubr.msk.bf16.gmra.mrb[8].mxu1 %vm722_vm0, %v15258_v48 }
 0x386   :  { %12345 = vmatprep.mubr.msk.bf16.mxu1 %vm722_vm0, %v15262_v53 }
 0x38d   :  { %12346 = vmatmul.mubr.msk.bf16.gmra.mrb[12].mxu1 %vm722_vm0, %v4544_v51  ;;  %v16887_v51 = vld [vmem:[#allocation75_spill] sm:$0xff] }
 0x38e   :  { %12353 = vmatprep.mubr.msk.bf16.mxu1 %vm722_vm0, %v4715_v57  ;;  %v5074_v57 = vpack.c.bf16 %v15354_v1, %v15165_v54 }
 0x395   :  { %12354 = vmatmul.mubr.msk.bf16.vlgmr.msra.gmra.mrb[0].mxu1 %vm722_vm0, %v15274_v10 }
 0x396   :  { %12370 = vmatpush3.bf16.msra.mxu1 %v13120_v7  ;;  %12357 = vmatprep.mubr.msk.bf16.mxu1 %vm722_vm0, %v15279_v9  ;;  %v16883_v7 = vld [vmem:[#allocation71_spill] sm:$0xff] }
 0x397   :  { %12371 = vmatprep.subr.bf16.mxu1 %v13121_v39 }
 0x39a   :  { %12372 = vmatpush3.bf16.msra.mxu1 %v13121_v39  ;;  %v16890_v39 = vld [vmem:[#allocation78_spill] sm:$0xff] }
 0x39b   :  { %12389 = vmatprep.subr.bf16.mxu1 %v13122_v4 }
 0x39d   :  { %12358 = vmatmul.mubr.msk.bf16.gmra.mrb[4].mxu1 %vm722_vm0, %v4718_v15  ;;  %v13574_v15 = vld [vmem:[#allocation2 + $0x40] sm:$0xff] }
 0x39e   :  { %12361 = vmatprep.mubr.msk.bf16.mxu1 %vm722_vm0, %v4719_v29  ;;  %v13576_v29 = vld [vmem:[#allocation2 + $0x60] sm:$0xff] }
 0x39f   :  { %v5251_v22 = vpack.c.bf16 %v13576_v29, %v13575_v21  ;;  %v16904_v29 = vld [vmem:[#allocation44_spill] sm:$0xff] }
 0x3a5   :  { %12362 = vmatmul.mubr.msk.bf16.gmra.mrb[8].mxu1 %vm722_vm0, %v15295_v28 }
 0x3a6   :  { %12365 = vmatprep.mubr.msk.bf16.mxu1 %vm722_vm0, %v15299_v60 }
 0x3ad   :  { %12366 = vmatmul.mubr.msk.bf16.gmra.mrb[12].mxu1 %vm722_vm0, %v4722_v63  ;;  %v13127_v63 = vld [vmem:[%s16662_s4 + $0x108] sm:$0xff]  }
 0x3ae   :  { %12373 = vmatprep.mubr.msk.bf16.mxu1 %vm722_vm0, %v4893_v24  ;;  %v13128_v24 = vld [vmem:[%s16662_s4 + $0x110] sm:$0xff]  }
 0x3b5   :  { %12374 = vmatmul.mubr.msk.bf16.vlgmr.msra.gmra.mrb[0].mxu1 %vm722_vm0, %v15314_v14 }
 0x3b6   :  { %12390 = vmatpush3.bf16.msra.mxu1 %v13122_v4  ;;  %12377 = vmatprep.mubr.msk.bf16.mxu1 %vm722_vm0, %v16881_v35  ;;  %v5234_v4 = vld [vmem:[#allocation2 + $0x30] sm:$0xff] }
 0x3b7   :  { %12391 = vmatprep.subr.bf16.mxu1 %v13123_v52  ;;  %v5250_v8 = vpack.c.bf16 %v13574_v15, %v5234_v4  ;;  %v5242_v35 = vld [vmem:[#allocation2 + $0xf0] sm:$0xff]  ;;  %v16898_v15 = vld [vmem:[#allocation19_spill] sm:$0xff] }
 0x3ba   :  { %12392 = vmatpush3.bf16.msra.mxu1 %v13123_v52  ;;  %v5253_v52 = vpack.c.bf16 %v15380_v18, %v15199_v0 }
 0x3bb   :  { %12409 = vmatprep.subr.bf16.mxu1 %v13124_v55 }
 0x3bd   :  { %12378 = vmatmul.mubr.msk.bf16.gmra.mrb[4].mxu1 %vm722_vm0, %v4896_v13  ;;  %v13579_v13 = vld [vmem:[#allocation2 + $0x110] sm:$0xff] }
 0x3be   :  { %12381 = vmatprep.mubr.msk.bf16.mxu1 %vm722_vm0, %v16882_v37  ;;  %v16891_v37 = vld [vmem:[#allocation60_spill] sm:$0xff] }
 0x3c5   :  { %12382 = vmatmul.mubr.msk.bf16.gmra.mrb[8].mxu1 %vm722_vm0, %v16883_v7  ;;  %v5255_v7 = vpack.c.bf16 %v16891_v37, %v13579_v13  ;;  %v16911_v13 = vpack.c.bf16 %v14812_v26, %v16880_v20  ;;  %v13133_v26 = vld [vmem:[%s16662_s4 + $0x138] sm:$0xff]   ;;  %v13581_v20 = vld [vmem:[#allocation2 + $0x73] sm:$0xff] }
 0x3c6   :  { %12385 = vmatprep.mubr.msk.bf16.mxu1 %vm722_vm0, %v16884_v42  ;;  %v16892_v42 = vld [vmem:[#allocation61_spill] sm:$0xff] }
 0x3cd   :  { %12386 = vmatmul.mubr.msk.bf16.gmra.mrb[12].mxu1 %vm722_vm0, %v4900_v36  ;;  %v5256_v36 = vpack.c.bf16 %v16865_v19, %v16892_v42  ;;  %v13137_v19 = vld [vmem:[%s16665_s7 + $0x80] ss:$16 sps:$4 sm:$0xff]  }
 0x3ce   :  { %12393 = vmatprep.mubr.msk.bf16.mxu1 %vm722_vm0, %v16885_v3  ;;  %v15391_v3 = vld [vmem:[#allocation2 + $0x160] sm:$0xff] }
 0x3d5   :  { %12394 = vmatmul.mubr.msk.bf16.vlgmr.msra.gmra.mrb[0].mxu1 %vm722_vm0, %v16886_v34  ;;  %v13129_v34 = vld [vmem:[%s16662_s4 + $0x118] sm:$0xff]  }
 0x3d6   :  { %12410 = vmatpush3.bf16.msra.mxu1 %v13124_v55  ;;  %12397 = vmatprep.mubr.msk.bf16.mxu1 %vm722_vm0, %v16887_v51  ;;  %v13578_v55 = vld [vmem:[#allocation2 + $0x100] sm:$0xff]  ;;  %v13139_v51 = vld [vmem:[%s16665_s7 + $0x84] ss:$16 sps:$4 sm:$0xff]  }
 0x3d7   :  { %12411 = vmatprep.subr.bf16.mxu1 %v13125_v31  ;;  %v5254_v33 = vpack.c.bf16 %v13578_v55, %v5242_v35  ;;  %7250 = vmatprep.subr.bf16.mxu0 %v13139_v51  ;;  %v16908_v35 = vld [vmem:[#allocation49_spill] sm:$0xff]  ;;  %v5786_v51 = vpack.c.bf16 %v15125_v11, %v13581_v20 }
 0x3d8   :  { %7251 = vmatpush1.bf16.msra.mxu0 %v13137_v19 }
 0x3da   :  { %12412 = vmatpush3.bf16.msra.mxu1 %v13125_v31  ;;  %v5257_v31 = vpack.c.bf16 %v15391_v3, %v15211_v30 }
 0x3db   :  { %12429 = vmatprep.subr.bf16.mxu1 %v13126_v12 }
 0x3dd   :  { %12398 = vmatmul.mubr.msk.bf16.gmra.mrb[4].mxu1 %vm722_vm0, %v5074_v57  ;;  %v16894_v57 = vld [vmem:[#allocation46_spill] sm:$0xff] }
 0x3de   :  { %12401 = vmatprep.mubr.msk.bf16.mxu1 %vm722_vm0, %v16888_v47 }
 0x3e5   :  { %12402 = vmatmul.mubr.msk.bf16.gmra.mrb[8].mxu1 %vm722_vm0, %v16889_v62  ;;  %v16896_v62 = vpack.c.bf16 %v16876_v46, %v16875_v38  ;;  %v13131_v38 = vld [vmem:[%s16662_s4 + $0x128] sm:$0xff]   ;;  %v16901_v46 = vld [vmem:[#allocation35_spill] sm:$0xff] }
 0x3e6   :  { %12405 = vmatprep.mubr.msk.bf16.mxu1 %vm722_vm0, %v16890_v39  ;;  %v16897_v39 = vpack.c.bf16 %v14810_v5, %v16877_v17  ;;  %v16902_v5 = vld [vmem:[#allocation34_spill] sm:$0xff] }
 0x3e7   :  { %v16903_v17 = vpack.c.bf16 %v16901_v46, %v16902_v5  ;;  %v13586_v46 = vld [vmem:[#allocation2 + $0x44] sm:$0xff] }
 0x3ed   :  { %12406 = vmatmul.mubr.msk.bf16.gmra.mrb[12].mxu1 %vm722_vm0, %v5078_v2  ;;  %v15431_v2 = vld [vmem:[#allocation2 + $0x161] sm:$0xff] }
 0x3ee   :  { %12413 = vmatprep.mubr.msk.bf16.mxu1 %vm722_vm0, %v5250_v8  ;;  %v5435_v4 = vpack.c.bf16 %v15431_v2, %v15268_v50  ;;  %v16899_v8 = vld [vmem:[#allocation18_spill] sm:$0xff] }
 0x3ef   :  { %v16900_v21 = vpack.c.bf16 %v16898_v15, %v16899_v8  ;;  %v15499_v8 = vld [vmem:[#allocation2 + $0x163] sm:$0xff] }
 0x3f5   :  { %12414 = vmatmul.mubr.msk.bf16.vlgmr.msra.gmra.mrb[0].mxu1 %vm722_vm0, %v5251_v22  ;;  %v16905_v22 = vld [vmem:[#allocation45_spill] sm:$0xff] }
 0x3f6   :  { %12430 = vmatpush3.bf16.msra.mxu1 %v13126_v12  ;;  %12417 = vmatprep.mubr.msk.bf16.mxu1 %vm722_vm0, %v5252_v44  ;;  %v15414_v12 = vld [vmem:[#allocation2 + $0xa1] sm:$0xff] }
 0x3f7   :  { %12431 = vmatprep.subr.bf16.mxu1 %v13127_v63  ;;  %v15454_v44 = vld [vmem:[#allocation2 + $0xa2] sm:$0xff] }
 0x3fa   :  { %12432 = vmatpush3.bf16.msra.mxu1 %v13127_v63  ;;  %v16906_v63 = vpack.c.bf16 %v16904_v29, %v16905_v22  ;;  %v13588_v29 = vld [vmem:[#allocation2 + $0x64] sm:$0xff] }
 0x3fb   :  { %12449 = vmatprep.subr.bf16.mxu1 %v13128_v24 }
 0x3fd   :  { %12418 = vmatmul.mubr.msk.bf16.gmra.mrb[4].mxu1 %vm722_vm0, %v5253_v52  ;;  %v16907_v52 = vld [vmem:[#allocation48_spill] sm:$0xff] }
 0x3fe   :  { %12421 = vmatprep.mubr.msk.bf16.mxu1 %vm722_vm0, %v5254_v33  ;;  %v16909_v55 = vpack.c.bf16 %v16907_v52, %v16908_v35  ;;  %v16910_v33 = vpack.c.bf16 %v16879_v45, %v16878_v61  ;;  %v13580_v61 = vld [vmem:[#allocation2 + $0x63] sm:$0xff]  ;;  %v13148_v52 = vld [vmem:[%s16665_s7 + $0xa4] ss:$16 sps:$4 sm:$0xff]  }
 0x3ff   :  { %v5785_v45 = vpack.c.bf16 %v13580_v61, %v15311_v25  ;;  %v13136_v35 = vld [vmem:[%s16662_s4 + $0x150] sm:$0xff]   ;;  %7252 = vmatprep.subr.bf16.mxu0 %v13148_v52 }
 0x400   :  { %v13593_v61 = vld [vmem:[#allocation2 + $0x134] sm:$0xff] }
 0x405   :  { %12422 = vmatmul.mubr.msk.bf16.gmra.mrb[8].mxu1 %vm722_vm0, %v5255_v7  ;;  %v15471_v7 = vld [vmem:[#allocation2 + $0x162] sm:$0xff] }
 0x406   :  { %12425 = vmatprep.mubr.msk.bf16.mxu1 %vm722_vm0, %v5256_v36  ;;  %v5613_v36 = vpack.c.bf16 %v15471_v7, %v15305_v40 }
 0x40d   :  { %12426 = vmatmul.mubr.msk.bf16.gmra.mrb[12].mxu1 %vm722_vm0, %v5257_v31  ;;  %v16912_v31 = vld [vmem:[#allocation21_spill] sm:$0xff] }
 0x40e   :  { %12433 = vmatprep.mubr.msk.bf16.mxu1 %vm722_vm0, %v15033_v41  ;;  %v13130_v41 = vld [vmem:[%s16662_s4 + $0x120] sm:$0xff]  }
 0x415   :  { %12434 = vmatmul.mubr.msk.bf16.vlgmr.msra.gmra.mrb[0].mxu1 %vm722_vm0, %v15038_v27  ;;  %v5431_v27 = vpack.c.bf16 %v15414_v12, %v15249_v6 }
 0x416   :  { %12450 = vmatpush3.bf16.msra.mxu1 %v13128_v24  ;;  %12437 = vmatprep.mubr.msk.bf16.mxu1 %vm722_vm0, %v15052_v32  ;;  %v16893_v32 = vld [vmem:[#allocation47_spill] sm:$0xff]  ;;  %v5609_v24 = vpack.c.bf16 %v15454_v44, %v15288_v23 }
 0x417   :  { %12451 = vmatprep.subr.bf16.mxu1 %v13129_v34  ;;  %v16895_v47 = vpack.c.bf16 %v16893_v32, %v16894_v57  ;;  %v5776_v32 = vld [vmem:[#allocation2 + $0xf3] sm:$0xff]  ;;  %v13582_v57 = vld [vmem:[#allocation2 + $0x103] sm:$0xff] }
 0x418   :  { %v5788_v11 = vpack.c.bf16 %v13582_v57, %v5776_v32  ;;  %v6129_v32 = vld [vmem:[#allocation2 + $0x80] sm:$0xff] }
 0x419   :  { %v6143_v57 = vpack.c.bf16 %v15199_v0, %v6129_v32  ;;  %v16921_v0 = vld [vmem:[#allocation51_spill] sm:$0xff]  ;;  %v16929_v32 = vld [vmem:[#allocation52_spill] sm:$0xff] }
 0x41a   :  { %12452 = vmatpush3.bf16.msra.mxu1 %v13129_v34  ;;  %v16913_v34 = vld [vmem:[#allocation20_spill] sm:$0xff] }
 0x41b   :  { %12469 = vmatprep.subr.bf16.mxu1 %v13130_v41  ;;  %v16914_v19 = vpack.c.bf16 %v16912_v31, %v16913_v34  ;;  %v13591_v31 = vld [vmem:[#allocation2 + $0x114] sm:$0xff]  ;;  %v13592_v34 = vld [vmem:[#allocation2 + $0x124] sm:$0xff] }
 0x41d   :  { %12438 = vmatmul.mubr.msk.bf16.gmra.mrb[4].mxu1 %vm722_vm0, %v5431_v27  ;;  %v15490_v27 = vld [vmem:[#allocation2 + $0xa3] sm:$0xff] }
 0x41e   :  { %12441 = vmatprep.mubr.msk.bf16.mxu1 %vm722_vm0, %v16895_v47  ;;  %v5787_v25 = vpack.c.bf16 %v15490_v27, %v15326_v43  ;;  %v13583_v47 = vld [vmem:[#allocation2 + $0x113] sm:$0xff] }
 0x425   :  { %12442 = vmatmul.mubr.msk.bf16.gmra.mrb[8].mxu1 %vm722_vm0, %v16896_v62  ;;  %v13584_v62 = vld [vmem:[#allocation2 + $0x123] sm:$0xff] }
 0x426   :  { %12445 = vmatprep.mubr.msk.bf16.mxu1 %vm722_vm0, %v16897_v39  ;;  %v5789_v39 = vpack.c.bf16 %v13584_v62, %v13583_v47  ;;  %v16919_v47 = vld [vmem:[#allocation36_spill] sm:$0xff] }
 0x42d   :  { %12446 = vmatmul.mubr.msk.bf16.gmra.mrb[12].mxu1 %vm722_vm0, %v5435_v4  ;;  %v13585_v4 = vld [vmem:[#allocation2 + $0x133] sm:$0xff] }
 0x42e   :  { %12453 = vmatprep.mubr.msk.bf16.mxu1 %vm722_vm0, %v16900_v21  ;;  %v5790_v15 = vpack.c.bf16 %v15142_v49, %v13585_v4  ;;  %v5791_v21 = vpack.c.bf16 %v15499_v8, %v15337_v16  ;;  %v13135_v49 = vld [vmem:[%s16662_s4 + $0x148] sm:$0xff]  }
 0x42f   :  { %v6132_v4 = vld [vmem:[#allocation2 + $0xb0] sm:$0xff] }
 0x435   :  { %12454 = vmatmul.mubr.msk.bf16.vlgmr.msra.gmra.mrb[0].mxu1 %vm722_vm0, %v16903_v17  ;;  %v13587_v17 = vld [vmem:[#allocation2 + $0x54] sm:$0xff] }
 0x436   :  { %12470 = vmatpush3.bf16.msra.mxu1 %v13130_v41  ;;  %12457 = vmatprep.mubr.msk.bf16.mxu1 %vm722_vm0, %v16906_v63  ;;  %v13134_v41 = vld [vmem:[%s16662_s4 + $0x140] sm:$0xff]   ;;  %v5963_v22 = vpack.c.bf16 %v13588_v29, %v13587_v17  ;;  %v13589_v63 = vld [vmem:[#allocation2 + $0x74] sm:$0xff]  ;;  %v16924_v17 = vpack.c.bf16 %v16892_v42, %v16891_v37 }
 0x437   :  { %12471 = vmatprep.subr.bf16.mxu1 %v13131_v38  ;;  %v6140_v29 = vld [vmem:[#allocation2 + $0x170] sm:$0xff]  ;;  %v13155_v37 = vld [vmem:[%s16665_s7 + $0xe4] ss:$16 sps:$4 sm:$0xff]  }
 0x438   :  { %v6306_v42 = vld [vmem:[#allocation2 + $0x71] sm:$0xff] }
 0x43a   :  { %12472 = vmatpush3.bf16.msra.mxu1 %v13131_v38  ;;  %v5946_v38 = vld [vmem:[#allocation2 + $0x34] sm:$0xff] }
 0x43b   :  { %12489 = vmatprep.subr.bf16.mxu1 %v13132_v59  ;;  %v5962_v5 = vpack.c.bf16 %v13586_v46, %v5946_v38  ;;  %v6137_v46 = vld [vmem:[#allocation2 + $0x140] sm:$0xff] }
 0x43d   :  { %12458 = vmatmul.mubr.msk.bf16.gmra.mrb[4].mxu1 %vm722_vm0, %v5609_v24  ;;  %v13146_v24 = vld [vmem:[%s16665_s7 + $0xa0] ss:$16 sps:$4 sm:$0xff]  }
 0x43e   :  { %12461 = vmatprep.mubr.msk.bf16.mxu1 %vm722_vm0, %v16909_v55  ;;  %v15520_v55 = vld [vmem:[#allocation2 + $0xa4] sm:$0xff]  ;;  %7253 = vmatpush1.bf16.msra.mxu0 %v13146_v24 }
 0x43f   :  { %v6305_v24 = vld [vmem:[#allocation2 + $0x61] sm:$0xff] }
 0x440   :  { %v6320_v52 = vpack.c.bf16 %v6306_v42, %v6305_v24  ;;  %v13158_v42 = vld [vmem:[%s16665_s7 + $0x68c] ss:$16 sps:$4 sm:$0xff]  }
 0x441   :  { %v13164_v24 = vld [vmem:[%s16665_s7 + $0x6cc] ss:$16 sps:$4 sm:$0xff]  }
 0x445   :  { %12462 = vmatmul.mubr.msk.bf16.gmra.mrb[8].mxu1 %vm722_vm0, %v16910_v33  ;;  %v5954_v33 = vld [vmem:[#allocation2 + $0xf4] sm:$0xff] }
 0x446   :  { %12465 = vmatprep.mubr.msk.bf16.mxu1 %vm722_vm0, %v16911_v13  ;;  %v13590_v13 = vld [vmem:[#allocation2 + $0x104] sm:$0xff] }
 0x44d   :  { %12466 = vmatmul.mubr.msk.bf16.gmra.mrb[12].mxu1 %vm722_vm0, %v5613_v36  ;;  %v5966_v36 = vpack.c.bf16 %v13590_v13, %v5954_v33  ;;  %v13143_v13 = vld [vmem:[%s16662_s4 + $0x170] sm:$0xff]  }
 0x44e   :  { %12473 = vmatprep.mubr.msk.bf16.mxu1 %vm722_vm0, %v16914_v19  ;;  %v5967_v19 = vpack.c.bf16 %v13592_v34, %v13591_v31 }
 0x455   :  { %12474 = vmatmul.mubr.msk.bf16.vlgmr.msra.gmra.mrb[0].mxu1 %vm722_vm0, %v5785_v45  ;;  %v5968_v45 = vpack.c.bf16 %v15182_v56, %v13593_v61  ;;  %v13140_v56 = vld [vmem:[%s16662_s4 + $0x158] sm:$0xff]  }
 0x456   :  { %12490 = vmatpush3.bf16.msra.mxu1 %v13132_v59  ;;  %12477 = vmatprep.mubr.msk.bf16.mxu1 %vm722_vm0, %v5786_v51  ;;  %v5964_v59 = vpack.c.bf16 %v15165_v54, %v13589_v63  ;;  %v5965_v54 = vpack.c.bf16 %v15520_v55, %v15354_v1  ;;  %v16915_v51 = vld [vmem:[#allocation23_spill] sm:$0xff] }
 0x457   :  { %12491 = vmatprep.subr.bf16.mxu1 %v13133_v26 }
 0x45a   :  { %12492 = vmatpush3.bf16.msra.mxu1 %v13133_v26  ;;  %v15529_v26 = vld [vmem:[#allocation2 + $0x164] sm:$0xff] }
 0x45b   :  { %12509 = vmatprep.subr.bf16.mxu1 %v13134_v41  ;;  %v5969_v20 = vpack.c.bf16 %v15529_v26, %v15365_v58 }
 0x45d   :  { %12478 = vmatmul.mubr.msk.bf16.gmra.mrb[4].mxu1 %vm722_vm0, %v5787_v25 }
 0x45e   :  { %12481 = vmatprep.mubr.msk.bf16.mxu1 %vm722_vm0, %v5788_v11  ;;  %v16918_v11 = vld [vmem:[#allocation37_spill] sm:$0xff] }
 0x45f   :  { %v16920_v62 = vpack.c.bf16 %v16918_v11, %v16919_v47  ;;  %v16931_v11 = vld [vmem:[#allocation63_spill] sm:$0xff]  ;;  %v16932_v47 = vld [vmem:[#allocation62_spill] sm:$0xff] }
 0x465   :  { %12482 = vmatmul.mubr.msk.bf16.gmra.mrb[8].mxu1 %vm722_vm0, %v5789_v39  ;;  %v13141_v39 = vld [vmem:[%s16662_s4 + $0x160] sm:$0xff]  }
 0x466   :  { %12485 = vmatprep.mubr.msk.bf16.mxu1 %vm722_vm0, %v5790_v15  ;;  %v6144_v15 = vpack.c.bf16 %v6132_v4, %v15380_v18  ;;  %v6304_v18 = vld [vmem:[#allocation2 + $0x51] sm:$0xff]  ;;  %v16934_v4 = vld [vmem:[#allocation26_spill] sm:$0xff] }
 0x46d   :  { %12486 = vmatmul.mubr.msk.bf16.gmra.mrb[12].mxu1 %vm722_vm0, %v5791_v21  ;;  %v16922_v21 = vld [vmem:[#allocation50_spill] sm:$0xff] }
 0x46e   :  { %12493 = vmatprep.mubr.msk.bf16.mxu1 %vm722_vm0, %v5962_v5  ;;  %v16923_v38 = vpack.c.bf16 %v16921_v0, %v16922_v21  ;;  %v6147_v5 = vpack.c.bf16 %v15211_v30, %v6137_v46  ;;  %v13152_v30 = vld [vmem:[%s16665_s7 + $0xc4] ss:$16 sps:$4 sm:$0xff]   ;;  %v6841_v21 = vld [vmem:[#allocation2 + $0x84] sm:$0xff] }
 0x46f   :  { %7254 = vmatprep.subr.bf16.mxu0 %v13152_v30  ;;  %v16938_v46 = vld [vmem:[#allocation43_spill] sm:$0xff] }
 0x475   :  { %12494 = vmatmul.mubr.msk.bf16.vlgmr.msra.gmra.mrb[0].mxu1 %vm722_vm0, %v5963_v22  ;;  %v6148_v22 = vpack.c.bf16 %v6140_v29, %v15391_v3  ;;  %v13153_v3 = vld [vmem:[%s16665_s7 + $0xe0] ss:$16 sps:$4 sm:$0xff]   ;;  %v16940_v29 = vld [vmem:[#allocation54_spill] sm:$0xff] }
 0x476   :  { %12510 = vmatpush3.bf16.msra.mxu1 %v13134_v41  ;;  %12497 = vmatprep.mubr.msk.bf16.mxu1 %vm722_vm0, %v5964_v59  ;;  %v16916_v41 = vld [vmem:[#allocation22_spill] sm:$0xff]  ;;  %v13150_v59 = vld [vmem:[%s16665_s7 + $0xc0] ss:$16 sps:$4 sm:$0xff]  }
 0x477   :  { %12511 = vmatprep.subr.bf16.mxu1 %v13135_v49  ;;  %v16917_v25 = vpack.c.bf16 %v16915_v51, %v16916_v41  ;;  %7255 = vmatpush1.bf16.msra.mxu0 %v13150_v59  ;;  %v16925_v51 = vld [vmem:[#allocation40_spill] sm:$0xff]  ;;  %v16926_v41 = vld [vmem:[#allocation42_spill] sm:$0xff]  ;;  %v16944_v59 = vld [vmem:[#allocation65_spill] sm:$0xff] }
 0x478   :  { %7256 = vmatprep.subr.bf16.mxu0 %v13155_v37  ;;  %v6852_v37 = vld [vmem:[#allocation2 + $0x174] sm:$0xff] }
 0x47a   :  { %12512 = vmatpush3.bf16.msra.mxu1 %v13135_v49  ;;  %v6303_v49 = vld [vmem:[#allocation2 + $0x41] sm:$0xff] }
 0x47b   :  { %12529 = vmatprep.subr.bf16.mxu1 %v13136_v35  ;;  %v6319_v63 = vpack.c.bf16 %v6304_v18, %v6303_v49  ;;  %7257 = vmatpush1.bf16.msra.mxu0 %v13153_v3  ;;  %v16941_v18 = vld [vmem:[#allocation55_spill] sm:$0xff]  ;;  %v13161_v3 = vld [vmem:[%s16665_s7 + $0x6ac] ss:$16 sps:$4 sm:$0xff]  }
 0x47c   :  { %v6849_v49 = vld [vmem:[#allocation2 + $0x144] sm:$0xff] }
 0x47d   :  { %12498 = vmatmul.mubr.msk.bf16.gmra.mrb[4].mxu1 %vm722_vm0, %v5965_v54  ;;  %v13142_v54 = vld [vmem:[%s16662_s4 + $0x168] sm:$0xff]  }
 0x47e   :  { %12501 = vmatprep.mubr.msk.bf16.mxu1 %vm722_vm0, %v5966_v36  ;;  %v6310_v36 = vld [vmem:[#allocation2 + $0xb1] sm:$0xff] }
 0x47f   :  { %v6322_v31 = vpack.c.bf16 %v6310_v36, %v15414_v12  ;;  %v6485_v12 = vld [vmem:[#allocation2 + $0x82] sm:$0xff] }
 0x480   :  { %v13176_v36 = vld [vmem:[%s16665_s7 + $0x70c] ss:$16 sps:$4 sm:$0xff]  }
 0x485   :  { %12502 = vmatmul.mubr.msk.bf16.gmra.mrb[8].mxu1 %vm722_vm0, %v5967_v19  ;;  %v6318_v19 = vld [vmem:[#allocation2 + $0x171] sm:$0xff] }
 0x486   :  { %12505 = vmatprep.mubr.msk.bf16.mxu1 %vm722_vm0, %v5968_v45  ;;  %v6326_v61 = vpack.c.bf16 %v6318_v19, %v15431_v2  ;;  %v6488_v2 = vld [vmem:[#allocation2 + $0xb2] sm:$0xff] }
 0x487   :  { %v6496_v45 = vld [vmem:[#allocation2 + $0x172] sm:$0xff] }
 0x48d   :  { %12506 = vmatmul.mubr.msk.bf16.gmra.mrb[12].mxu1 %vm722_vm0, %v5969_v20  ;;  %v6504_v20 = vpack.c.bf16 %v6496_v45, %v15471_v7  ;;  %v6666_v7 = vld [vmem:[#allocation2 + $0xb3] sm:$0xff] }
 0x48e   :  { %12513 = vmatprep.mubr.msk.bf16.mxu1 %vm722_vm0, %v16917_v25  ;;  %v16928_v25 = vld [vmem:[#allocation53_spill] sm:$0xff] }
 0x495   :  { %12514 = vmatmul.mubr.msk.bf16.vlgmr.msra.gmra.mrb[0].mxu1 %vm722_vm0, %v16920_v62  ;;  %v16933_v62 = vpack.c.bf16 %v16931_v11, %v16932_v47 }
 0x496   :  { %12530 = vmatpush3.bf16.msra.mxu1 %v13136_v35  ;;  %12517 = vmatprep.mubr.msk.bf16.mxu1 %vm722_vm0, %v6143_v57  ;;  %v6307_v35 = vld [vmem:[#allocation2 + $0x81] sm:$0xff] }
 0x497   :  { %12531 = vmatprep.subr.bf16.mxu1 %v13140_v56  ;;  %v6321_v33 = vpack.c.bf16 %v15249_v6, %v6307_v35  ;;  %v6315_v6 = vld [vmem:[#allocation2 + $0x141] sm:$0xff] }
 0x498   :  { %v6325_v34 = vpack.c.bf16 %v15268_v50, %v6315_v6  ;;  %v6499_v50 = vpack.c.bf16 %v15288_v23, %v6485_v12  ;;  %v6493_v23 = vld [vmem:[#allocation2 + $0x142] sm:$0xff] }
 0x499   :  { %v13167_v35 = vld [vmem:[%s16665_s7 + $0x8c] ss:$16 sps:$4 sm:$0xff]  }
 0x49a   :  { %12532 = vmatpush3.bf16.msra.mxu1 %v13140_v56  ;;  %v16930_v56 = vpack.c.bf16 %v16928_v25, %v16929_v32  ;;  %7291 = vmatprep.subr.bf16.mxu0 %v13167_v35 }
 0x49b   :  { %12549 = vmatprep.subr.bf16.mxu1 %v13141_v39 }
 0x49d   :  { %12518 = vmatmul.mubr.msk.bf16.gmra.mrb[4].mxu1 %vm722_vm0, %v6144_v15  ;;  %v16935_v15 = vld [vmem:[#allocation27_spill] sm:$0xff] }
 0x49e   :  { %12521 = vmatprep.mubr.msk.bf16.mxu1 %vm722_vm0, %v16923_v38  ;;  %v16936_v0 = vpack.c.bf16 %v16934_v4, %v16935_v15  ;;  %v16937_v38 = vld [vmem:[#allocation41_spill] sm:$0xff] }
 0x4a5   :  { %12522 = vmatmul.mubr.msk.bf16.gmra.mrb[8].mxu1 %vm722_vm0, %v16924_v17  ;;  %v6844_v17 = vld [vmem:[#allocation2 + $0xb4] sm:$0xff] }
 0x4a6   :  { %12525 = vmatprep.mubr.msk.bf16.mxu1 %vm722_vm0, %v6147_v5  ;;  %v16939_v5 = vpack.c.bf16 %v16937_v38, %v16938_v46 }
 0x4ad   :  { %12526 = vmatmul.mubr.msk.bf16.gmra.mrb[12].mxu1 %vm722_vm0, %v6148_v22  ;;  %v16942_v22 = vpack.c.bf16 %v16940_v29, %v16941_v18 }
 0x4ae   :  { %12533 = vmatprep.mubr.msk.bf16.mxu1 %vm722_vm0, %v6319_v63  ;;  %v16943_v63 = vld [vmem:[#allocation64_spill] sm:$0xff] }
 0x4af   :  { %v16945_v30 = vpack.c.bf16 %v16943_v63, %v16944_v59 }
 0x4b5   :  { %12534 = vmatmul.mubr.msk.bf16.vlgmr.msra.gmra.mrb[0].mxu1 %vm722_vm0, %v6320_v52  ;;  %v13162_v52 = vld [vmem:[%s16665_s7 + $0x6c8] ss:$16 sps:$4 sm:$0xff]  }
 0x4b6   :  { %12550 = vmatpush3.bf16.msra.mxu1 %v13141_v39  ;;  %12537 = vmatprep.mubr.msk.bf16.mxu1 %vm722_vm0, %v6321_v33  ;;  %v6674_v39 = vld [vmem:[#allocation2 + $0x173] sm:$0xff] }
 0x4b7   :  { %12551 = vmatprep.subr.bf16.mxu1 %v13142_v54  ;;  %v13168_v33 = vld [vmem:[%s16665_s7 + $0x6e8] ss:$16 sps:$4 sm:$0xff]  }
 0x4ba   :  { %12552 = vmatpush3.bf16.msra.mxu1 %v13142_v54  ;;  %v13618_v54 = vmov 0  }
 0x4bb   :  { %12569 = vmatprep.subr.bf16.mxu1 %v13143_v13  ;;  %7282 = vmatprep.mubr.bf16.mxu0 %v13618_v54 }
 0x4bd   :  { %12538 = vmatmul.mubr.msk.bf16.gmra.mrb[4].mxu1 %vm722_vm0, %v6322_v31  ;;  %v15702_v31 = vld [vmem:[%s16663_s5] ss:$0 sm:$0xff] }
 0x4be   :  { %12541 = vmatprep.mubr.msk.bf16.mxu1 %vm722_vm0, %v15258_v48  ;;  %v13144_v48 = vld [vmem:[%s16662_s4 + $0x178] sm:$0xff]  }
 0x4c5   :  { %12542 = vmatmul.mubr.msk.bf16.gmra.mrb[8].mxu1 %vm722_vm0, %v15262_v53  ;;  %v13145_v53 = vld [vmem:[%s16662_s4 + $0x180] sm:$0xff]  }
 0x4c6   :  { %12545 = vmatprep.mubr.msk.bf16.mxu1 %vm722_vm0, %v6325_v34  ;;  %v15707_v34 = vld [vmem:[%s16664_s6] ss:$0 sm:$0xff] }
 0x4cd   :  { %12546 = vmatmul.mubr.msk.bf16.gmra.mrb[12].mxu1 %vm722_vm0, %v6326_v61 }
 0x4ce   :  { %12553 = vmatprep.mubr.msk.bf16.mxu1 %vm722_vm0, %v15274_v10  ;;  %v6500_v10 = vpack.c.bf16 %v6488_v2, %v15454_v44  ;;  %v6663_v44 = vld [vmem:[#allocation2 + $0x83] sm:$0xff] }
 0x4d5   :  { %12554 = vmatmul.mubr.msk.bf16.vlgmr.msra.gmra.mrb[0].mxu1 %vm722_vm0, %v15279_v9  ;;  %v6503_v9 = vpack.c.bf16 %v15305_v40, %v6493_v23  ;;  %v6677_v40 = vpack.c.bf16 %v15326_v43, %v6663_v44  ;;  %v6671_v43 = vld [vmem:[#allocation2 + $0x143] sm:$0xff] }
 0x4d6   :  { %12570 = vmatpush3.bf16.msra.mxu1 %v13143_v13  ;;  %12557 = vmatprep.mubr.msk.bf16.mxu1 %vm722_vm0, %v6499_v50  ;;  %v6681_v57 = vpack.c.bf16 %v15337_v16, %v6671_v43  ;;  %v6855_v16 = vpack.c.bf16 %v15354_v1, %v6841_v21  ;;  %v6859_v1 = vpack.c.bf16 %v15365_v58, %v6849_v49  ;;  %v13156_v58 = vld [vmem:[%s16665_s7 + $0x688] ss:$16 sps:$4 sm:$0xff]   ;;  %v13170_v13 = vld [vmem:[%s16665_s7 + $0x6ec] ss:$16 sps:$4 sm:$0xff]  }
 0x4d7   :  { %12571 = vmatprep.subr.bf16.mxu1 %v13144_v48 }
 0x4da   :  { %12572 = vmatpush3.bf16.msra.mxu1 %v13144_v48 }
 0x4db   :  { %12589 = vmatprep.subr.bf16.mxu1 %v13145_v53 }
 0x4dd   :  { %12558 = vmatmul.mubr.msk.bf16.gmra.mrb[4].mxu1 %vm722_vm0, %v6500_v10 }
 0x4de   :  { %12561 = vmatprep.mubr.msk.bf16.mxu1 %vm722_vm0, %v15295_v28  ;;  %v13149_v28 = vld [vmem:[%s16662_s4 + $0x188] sm:$0xff]  }
 0x4e5   :  { %12562 = vmatmul.mubr.msk.bf16.gmra.mrb[8].mxu1 %vm722_vm0, %v15299_v60  ;;  %v16927_v60 = vpack.c.bf16 %v16925_v51, %v16926_v41 }
 0x4e6   :  { %12565 = vmatprep.mubr.msk.bf16.mxu1 %vm722_vm0, %v6503_v9 }
 0x4ed   :  { %12566 = vmatmul.mubr.msk.bf16.gmra.mrb[12].mxu1 %vm722_vm0, %v6504_v20 }
 0x4ee   :  { %12573 = vmatprep.mubr.msk.bf16.mxu1 %vm722_vm0, %v15314_v14  ;;  %v6678_v14 = vpack.c.bf16 %v6666_v7, %v15490_v27  ;;  %v6682_v27 = vpack.c.bf16 %v6674_v39, %v15499_v8  ;;  %v6856_v8 = vpack.c.bf16 %v6844_v17, %v15520_v55  ;;  %v6860_v55 = vpack.c.bf16 %v6852_v37, %v15529_v26  ;;  %v13159_v26 = vld [vmem:[%s16665_s7 + $0x6a8] ss:$16 sps:$4 sm:$0xff]  }
 0x4f5   :  { %12574 = vmatmul.mubr.msk.bf16.vlgmr.msra.gmra.mrb[0].mxu1 %vm722_vm0, %v16927_v60 }
 0x4f6   :  { %12590 = vmatpush3.bf16.msra.mxu1 %v13145_v53  ;;  %12577 = vmatprep.mubr.msk.bf16.mxu1 %vm722_vm0, %v6677_v40 }
 0x4f7   :  { %12591 = vmatprep.subr.bf16.mxu1 %v13149_v28 }
 0x4fa   :  { %12592 = vmatpush3.bf16.msra.mxu1 %v13149_v28 }
 0x4fb   :  { %9967 = vmatprep.subr.bf16.mxu1 %v13158_v42 }
 0x4fd   :  { %12578 = vmatmul.mubr.msk.bf16.gmra.mrb[4].mxu1 %vm722_vm0, %v6678_v14 }
 0x4fe   :  { %12581 = vmatprep.mubr.msk.bf16.mxu1 %vm722_vm0, %v16930_v56 }
 0x505   :  { %12582 = vmatmul.mubr.msk.bf16.gmra.mrb[8].mxu1 %vm722_vm0, %v16933_v62 }
 0x506   :  { %12585 = vmatprep.mubr.msk.bf16.mxu1 %vm722_vm0, %v6681_v57 }
 0x50d   :  { %12586 = vmatmul.mubr.msk.bf16.gmra.mrb[12].mxu1 %vm722_vm0, %v6682_v27 }
 0x50e   :  { %12593 = vmatprep.mubr.msk.bf16.mxu1 %vm722_vm0, %v16936_v0 }
 0x515   :  { %12594 = vmatmul.mubr.msk.bf16.vlgmr.msra.gmra.mrb[0].mxu1 %vm722_vm0, %v16939_v5 }
 0x516   :  { %12597 = vmatprep.mubr.msk.bf16.mxu1 %vm722_vm0, %v6855_v16  ;;  %9968 = vmatpush1.bf16.msra.mxu1 %v13156_v58 }
 0x517   :  { %9969 = vmatprep.subr.bf16.mxu1 %v13161_v3 }
 0x51a   :  { %9970 = vmatpush1.bf16.msra.mxu1 %v13159_v26 }
 0x51b   :  { %9971 = vmatprep.subr.bf16.mxu1 %v13164_v24 }
 0x51d   :  { %12598 = vmatmul.mubr.msk.bf16.gmra.mrb[4].mxu1 %vm722_vm0, %v6856_v8 }
 0x51e   :  { %12601 = vmatprep.mubr.msk.bf16.mxu1 %vm722_vm0, %v16942_v22  ;;  %9972 = vmatpush1.bf16.msra.mxu1 %v13162_v52 }
 0x51f   :  { %9973 = vmatprep.subr.bf16.mxu1 %v13170_v13 }
 0x522   :  { %9974 = vmatpush1.bf16.msra.mxu1 %v13168_v33 }
 0x523   :  { %10176 = vmatprep.subr.bf16.mxu1 %v13176_v36 }
 0x525   :  { %12602 = vmatmul.mubr.msk.bf16.gmra.mrb[8].mxu1 %vm722_vm0, %v16945_v30 }
 0x526   :  { %12605 = vmatprep.mubr.msk.bf16.mxu1 %vm722_vm0, %v6859_v1 }
 0x52d   :  { %12606 = vmatmul.mubr.msk.bf16.gmra.mrb[12].mxu1 %vm722_vm0, %v6860_v55 }
 0x52e   :  { %9999 = vmatprep.mubr.bf16.mxu1 %v13618_v54 }
 0x5e8   :  { %v12595_v6 = vpop.f32.mrb[0].mxu1 }
 0x5e9   :  { %v7024_v19 = vmul.f32 %v12595_v6, %v15702_v31  ;;  %v6936_v61 = vpop.f32.mrb[1].mxu1 }
 0x5ea   :  { %v7022_v12 = vmul.f32 %v15702_v31, %v6936_v61  ;;  %v12596_v48 = vpop.f32.mrb[2].mxu1 }
 0x5eb   :  { %v7047_v50 = vadd.f32 %v15707_v34, %v7024_v19  ;;  %v7025_v53 = vmul.f32 %v12596_v48, %v15702_v31  ;;  %v6939_v2 = vpop.f32.mrb[3].mxu1 }
 0x5ec   :  { %v7045_v10 = vadd.f32 %v15707_v34, %v7022_v12  ;;  %v7023_v23 = vmul.f32 %v15702_v31, %v6939_v2 }
 0x5ed   :  { %v7063_v9 = vmax.f32 %v7047_v50, 0.0  ;;  %v7048_v45 = vadd.f32 %v15707_v34, %v7025_v53 }
 0x5ee   :  { %v7061_v20 = vmax.f32 %v7045_v10, 0.0  ;;  %v7046_v44 = vadd.f32 %v15707_v34, %v7023_v23 }
 0x5ef   :  { %7080 = vst.msk [vmem:[#allocation3 + $0x10] sm:$0xff] %vm7077_vm1, %v7063_v9  ;;  %v7064_v28 = vmax.f32 %v7048_v45, 0.0 }
 0x5f0   :  { %7078 = vst.msk [vmem:[#allocation3] sm:$0xff] %vm7077_vm1, %v7061_v20  ;;  %v7062_v40 = vmax.f32 %v7046_v44, 0.0  ;;  %v12599_v51 = vpop.f32.mrb[4].mxu1 }
 0x5f1   :  { %7081 = vst.msk [vmem:[#allocation3 + $0x18] sm:$0xff] %vm7077_vm1, %v7064_v28  ;;  %v7028_v41 = vmul.f32 %v12599_v51, %v15702_v31  ;;  %v6952_v60 = vpop.f32.mrb[5].mxu1 }
 0x5f2   :  { %7079 = vst.msk [vmem:[#allocation3 + $0x8] sm:$0xff] %vm7077_vm1, %v7062_v40  ;;  %v7026_v7 = vmul.f32 %v15702_v31, %v6952_v60  ;;  %v12600_v14 = vpop.f32.mrb[6].mxu1 }
 0x5f3   :  { %v7051_v25 = vadd.f32 %v15707_v34, %v7028_v41  ;;  %v7029_v32 = vmul.f32 %v12600_v14, %v15702_v31  ;;  %v6955_v56 = vpop.f32.mrb[7].mxu1 }
 0x5f4   :  { %v7049_v43 = vadd.f32 %v15707_v34, %v7026_v7  ;;  %v7027_v57 = vmul.f32 %v15702_v31, %v6955_v56 }
 0x5f5   :  { %v7067_v11 = vmax.f32 %v7051_v25, 0.0  ;;  %v7052_v47 = vadd.f32 %v15707_v34, %v7029_v32 }
 0x5f6   :  { %v7065_v62 = vmax.f32 %v7049_v43, 0.0  ;;  %v7050_v39 = vadd.f32 %v15707_v34, %v7027_v57 }
 0x5f7   :  { %7084 = vst.msk [vmem:[#allocation3 + $0x30] sm:$0xff] %vm7077_vm1, %v7067_v11  ;;  %v7068_v27 = vmax.f32 %v7052_v47, 0.0  ;;  %v7126_v53 = vld [vmem:[#allocation3 + $0x2] sm:$0x1]  ;;  %v7128_v2 = vld [vmem:[#allocation3 + $0x3] sm:$0x1] }
 0x5f8   :  { %7082 = vst.msk [vmem:[#allocation3 + $0x20] sm:$0xff] %vm7077_vm1, %v7065_v62  ;;  %v7066_v4 = vmax.f32 %v7050_v39, 0.0  ;;  %v12603_v15 = vpop.f32.mrb[8].mxu1  ;;  %v7130_v44 = vmax.f32 %v7126_v53, %v7128_v2 }
 0x5f9   :  { %7085 = vst.msk [vmem:[#allocation3 + $0x38] sm:$0xff] %vm7077_vm1, %v7068_v27  ;;  %v7032_v0 = vmul.f32 %v12603_v15, %v15702_v31  ;;  %v6968_v21 = vpop.f32.mrb[9].mxu1  ;;  %v7132_v19 = vld [vmem:[#allocation3 + $0xa] sm:$0x1]  ;;  %v7134_v61 = vld [vmem:[#allocation3 + $0xb] sm:$0x1] }
 0x5fa   :  { %7083 = vst.msk [vmem:[#allocation3 + $0x28] sm:$0xff] %vm7077_vm1, %v7066_v4  ;;  %v7030_v16 = vmul.f32 %v15702_v31, %v6968_v21  ;;  %v12604_v38 = vpop.f32.mrb[10].mxu1 }
 0x5fb   :  { %v7055_v46 = vadd.f32 %v15707_v34, %v7032_v0  ;;  %v6971_v5 = vpop.f32.mrb[11].mxu1  ;;  %v7033_v18 = vmul.f32 %v12604_v38, %v15702_v31 }
 0x5fc   :  { %v7053_v17 = vadd.f32 %v15707_v34, %v7030_v16  ;;  %v7031_v22 = vmul.f32 %v15702_v31, %v6971_v5 }
 0x5fd   :  { %v7071_v8 = vmax.f32 %v7055_v46, 0.0  ;;  %v7056_v49 = vadd.f32 %v15707_v34, %v7033_v18  ;;  %v13165_v46 = vld [vmem:[%s16665_s7 + $0x88] ss:$16 sps:$4 sm:$0xff]  }
 0x5fe   :  { %v7069_v29 = vmax.f32 %v7053_v17, 0.0  ;;  %v7054_v1 = vadd.f32 %v15707_v34, %v7031_v22  ;;  %v9803_v7 = vld [vmem:[#allocation3 + $0x32] sm:$0x1]  ;;  %v9805_v14 = vld [vmem:[#allocation3 + $0x33] sm:$0x1] }
 0x5ff   :  { %7088 = vst.msk [vmem:[#allocation3 + $0x50] sm:$0xff] %vm7077_vm1, %v7071_v8  ;;  %v7072_v59 = vmax.f32 %v7056_v49, 0.0  ;;  %v9807_v57 = vmax.f32 %v9803_v7, %v9805_v14  ;;  %v13189_v14 = vld [vmem:[%s16665_s7] ss:$16 sps:$4 sm:$0xff]  }
 0x600   :  { %7086 = vst.msk [vmem:[#allocation3 + $0x40] sm:$0xff] %vm7077_vm1, %v7069_v29  ;;  %v12607_v63 = vpop.f32.mrb[12].mxu1  ;;  %v7070_v30 = vmax.f32 %v7054_v1, 0.0  ;;  %v9809_v51 = vld [vmem:[#allocation3 + $0x3a] sm:$0x1] }
 0x601   :  { %v7036_v37 = vmul.f32 %v12607_v63, %v15702_v31  ;;  %v6984_v55 = vpop.f32.mrb[13].mxu1  ;;  %7089 = vst.msk [vmem:[#allocation3 + $0x58] sm:$0xff] %vm7077_vm1, %v7072_v59  ;;  %v9811_v41 = vld [vmem:[#allocation3 + $0x3b] sm:$0x1]  ;;  %v13173_v29 = vld [vmem:[%s16665_s7 + $0xac] ss:$16 sps:$4 sm:$0xff]  }
 0x602   :  { %v12608_v42 = vpop.f32.mrb[14].mxu1  ;;  %7087 = vst.msk [vmem:[#allocation3 + $0x48] sm:$0xff] %vm7077_vm1, %v7070_v30  ;;  %v7034_v3 = vmul.f32 %v15702_v31, %v6984_v55  ;;  %v9813_v32 = vmax.f32 %v9809_v51, %v9811_v41  ;;  %v13171_v59 = vld [vmem:[%s16665_s7 + $0xa8] ss:$16 sps:$4 sm:$0xff]   ;;  %v10018_v30 = vld [vmem:[#allocation3 + $0x3c] sm:$0x1] }
 0x603   :  { %v7059_v58 = vadd.f32 %v15707_v34, %v7036_v37  ;;  %v7037_v26 = vmul.f32 %v12608_v42, %v15702_v31  ;;  %v6987_v24 = vpop.f32.mrb[15].mxu1  ;;  %v10020_v37 = vld [vmem:[#allocation3 + $0x3d] sm:$0x1]  ;;  %v13179_v55 = vld [vmem:[%s16665_s7 + $0xcc] ss:$16 sps:$4 sm:$0xff]  }
 0x604   :  { %v7057_v35 = vadd.f32 %v15707_v34, %v7034_v3  ;;  %v7035_v13 = vmul.f32 %v15702_v31, %v6987_v24  ;;  %v7136_v31 = vmax.f32 %v7132_v19, %v7134_v61  ;;  %v9815_v15 = vmax.f32 %v9807_v57, %v9813_v32  ;;  %v10014_v24 = vld [vmem:[#allocation3 + $0x35] sm:$0x1]  ;;  %v13186_v51 = vld [vmem:[%s16665_s7 + $0x748] ss:$16 sps:$4 sm:$0xff]  }
 0x605   :  { %v7075_v52 = vmax.f32 %v7059_v58, 0.0  ;;  %v7060_v33 = vadd.f32 %v15707_v34, %v7037_v26  ;;  %v10012_v26 = vld [vmem:[#allocation3 + $0x34] sm:$0x1]  ;;  %v7094_v32 = vld [vmem:[#allocation3] sm:$0x1] }
 0x606   :  { %v7073_v36 = vmax.f32 %v7057_v35, 0.0  ;;  %v7058_v12 = vadd.f32 %v15707_v34, %v7035_v13  ;;  %v7138_v40 = vmax.f32 %v7130_v44, %v7136_v31  ;;  %v9817_v18 = vpack.c.bf16 %v9815_v15, %v9815_v15  ;;  %v13182_v61 = vld [vmem:[%s16665_s7 + $0x72c] ss:$16 sps:$4 sm:$0xff]   ;;  %v13183_v31 = vld [vmem:[%s16665_s7 + $0xe8] ss:$16 sps:$4 sm:$0xff]  }
 0x607   :  { %7092 = vst.msk [vmem:[#allocation3 + $0x70] sm:$0xff] %vm7077_vm1, %v7075_v52  ;;  %v7076_v6 = vmax.f32 %v7060_v33, 0.0  ;;  %v7127_v48 = vld [vmem:[#allocation3 + $0x42] sm:$0x1]  ;;  %v7129_v50 = vld [vmem:[#allocation3 + $0x43] sm:$0x1]  ;;  %v10022_v33 = vmax.f32 %v10018_v30, %v10020_v37 }
 0x608   :  { %7090 = vst.msk [vmem:[#allocation3 + $0x60] sm:$0xff] %vm7077_vm1, %v7073_v36  ;;  %v7074_v10 = vmax.f32 %v7058_v12, 0.0  ;;  %v7131_v45 = vmax.f32 %v7127_v48, %v7129_v50  ;;  %v7140_v60 = vpack.c.bf16 %v7138_v40, %v7138_v40  ;;  %v9838_v42 = vunpack.c.l.b16 %v9817_v18  ;;  %v13174_v52 = vld [vmem:[%s16665_s7 + $0x708] ss:$16 sps:$4 sm:$0xff]   ;;  %v13185_v12 = vld [vmem:[%s16665_s7 + $0xec] ss:$16 sps:$4 sm:$0xff]  }
 0x609   :  { %7093 = vst.msk [vmem:[#allocation3 + $0x78] sm:$0xff] %vm7077_vm1, %v7076_v6  ;;  %v7133_v23 = vld [vmem:[#allocation3 + $0x4a] sm:$0x1]  ;;  %v7135_v9 = vld [vmem:[#allocation3 + $0x4b] sm:$0x1]  ;;  %v10016_v48 = vmax.f32 %v10012_v26, %v10014_v24 }
 0x60a   :  { %v7137_v20 = vmax.f32 %v7133_v23, %v7135_v9  ;;  %7091 = vst.msk [vmem:[#allocation3 + $0x68] sm:$0xff] %vm7077_vm1, %v7074_v10  ;;  %v7161_v11 = vunpack.c.l.b16 %v7140_v60  ;;  %v7101_v13 = vld [vmem:[#allocation3 + $0x48] sm:$0x1]  ;;  %v7103_v36 = vld [vmem:[#allocation3 + $0x49] sm:$0x1] }
 0x60b   :  { %v13177_v6 = vld [vmem:[%s16665_s7 + $0xc8] ss:$16 sps:$4 sm:$0xff]   ;;  %v7105_v10 = vmax.f32 %v7101_v13, %v7103_v36  ;;  %v10024_v9 = vmax.f32 %v10016_v48, %v10022_v33  ;;  %v13191_v44 = vld [vmem:[%s16665_s7 + $0x4] ss:$16 sps:$4 sm:$0xff]   ;;  %v7100_v40 = vld [vmem:[#allocation3 + $0x8] sm:$0x1] }
 0x60c   :  { %v7139_v28 = vmax.f32 %v7131_v45, %v7137_v20  ;;  %v7095_v53 = vld [vmem:[#allocation3 + $0x40] sm:$0x1]  ;;  %v7097_v2 = vld [vmem:[#allocation3 + $0x41] sm:$0x1]  ;;  %v13188_v45 = vld [vmem:[%s16665_s7 + $0x74c] ss:$16 sps:$4 sm:$0xff]  }
 0x60d   :  { %v13180_v23 = vld [vmem:[%s16665_s7 + $0x728] ss:$16 sps:$4 sm:$0xff]   ;;  %v7099_v20 = vmax.f32 %v7095_v53, %v7097_v2  ;;  %v13203_v18 = vld [vmem:[%s16665_s7 + $0x44] ss:$16 sps:$4 sm:$0xff]   ;;  %v13207_v13 = vld [vmem:[%s16665_s7 + $0x60] ss:$16 sps:$4 sm:$0xff]  }
 0x60e   :  { %v7141_v34 = vpack.c.bf16 %v7139_v28, %v7139_v28  ;;  %v9804_v56 = vld [vmem:[#allocation3 + $0x72] sm:$0x1]  ;;  %v9806_v43 = vld [vmem:[#allocation3 + $0x73] sm:$0x1]  ;;  %v10013_v5 = vld [vmem:[#allocation3 + $0x74] sm:$0x1] }
 0x60f   :  { %v9808_v27 = vmax.f32 %v9804_v56, %v9806_v43  ;;  %v10015_v17 = vld [vmem:[#allocation3 + $0x75] sm:$0x1]  ;;  %v7107_v41 = vmax.f32 %v7099_v20, %v7105_v10  ;;  %v7096_v56 = vld [vmem:[#allocation3 + $0x1] sm:$0x1] }
 0x610   :  { %v7162_v25 = vunpack.c.l.b16 %v7141_v34  ;;  %v9810_v47 = vld [vmem:[#allocation3 + $0x7a] sm:$0x1]  ;;  %v9812_v62 = vld [vmem:[#allocation3 + $0x7b] sm:$0x1]  ;;  %v10019_v0 = vld [vmem:[#allocation3 + $0x7c] sm:$0x1]  ;;  %v10017_v63 = vmax.f32 %v10013_v5, %v10015_v17 }
 0x611   :  { %v9814_v4 = vmax.f32 %v9810_v47, %v9812_v62  ;;  %v10021_v21 = vld [vmem:[#allocation3 + $0x7d] sm:$0x1]  ;;  %v7102_v34 = vld [vmem:[#allocation3 + $0x9] sm:$0x1]  ;;  %v10228_v60 = vld [vmem:[#allocation3 + $0x7e] sm:$0x1]  ;;  %v7109_v15 = vpack.c.bf16 %v7107_v41, %v7107_v41 }
 0x612   :  { %v7163_v39 = vrot.slane %v7162_v25, 7  ;;  %v10023_v49 = vmax.f32 %v10019_v0, %v10021_v21  ;;  %v10230_v7 = vld [vmem:[#allocation3 + $0x7f] sm:$0x1]  ;;  %v10026_v25 = vpack.c.bf16 %v10024_v9, %v10024_v9  ;;  %v13194_v43 = vld [vmem:[%s16665_s7 + $0x76c] ss:$16 sps:$4 sm:$0xff]   ;;  %v7104_v57 = vmax.f32 %v7100_v40, %v7102_v34 }
 0x613   :  { %v9816_v38 = vmax.f32 %v9808_v27, %v9814_v4  ;;  %v10224_v47 = vld [vmem:[#allocation3 + $0x77] sm:$0x1]  ;;  %v13197_v62 = vld [vmem:[%s16665_s7 + $0x24] ss:$16 sps:$4 sm:$0xff]   ;;  %v10232_v27 = vmax.f32 %v10228_v60, %v10230_v7  ;;  %v7098_v4 = vmax.f32 %v7094_v32, %v7096_v56  ;;  %v13192_v0 = vld [vmem:[%s16665_s7 + $0x768] ss:$16 sps:$4 sm:$0xff]  }
 0x614   :  { %v7165_v16 = vsel %vm7164_vm2, %v7163_v39, %v7161_v11  ;;  %v10025_v3 = vmax.f32 %v10017_v63, %v10023_v49  ;;  %v10222_v11 = vld [vmem:[#allocation3 + $0x76] sm:$0x1]  ;;  %v13195_v21 = vld [vmem:[%s16665_s7 + $0x20] ss:$16 sps:$4 sm:$0xff]   ;;  %v10227_v17 = vld [vmem:[#allocation3 + $0x3e] sm:$0x1]  ;;  %v7335_v49 = vunpack.c.l.b16 %v7109_v15 }
 0x615   :  { %v15761_v8 = vpack.c.b16 %v7165_v16, %v7165_v16  ;;  %v9818_v22 = vpack.c.bf16 %v9816_v38, %v9816_v38  ;;  %v10047_v16 = vunpack.c.l.b16 %v10026_v25  ;;  %v10226_v38 = vmax.f32 %v10222_v11, %v10224_v47  ;;  %v10223_v63 = vld [vmem:[#allocation3 + $0x37] sm:$0x1]  ;;  %v13213_v2 = vld [vmem:[%s16665_s7 + $0x8] ss:$16 sps:$4 sm:$0xff]   ;;  %v7511_v34 = vld [vmem:[#allocation3 + $0x4c] sm:$0x1] }
 0x616   :  { %v10027_v50 = vpack.c.bf16 %v10025_v3, %v10025_v3  ;;  %v7106_v5 = vmax.f32 %v7098_v4, %v7104_v57  ;;  %v13209_v3 = vld [vmem:[%s16665_s7 + $0x64] ss:$16 sps:$4 sm:$0xff]   ;;  %v13212_v36 = vld [vmem:[%s16665_s7 + $0x7cc] ss:$16 sps:$4 sm:$0xff]   ;;  %v13222_v60 = vld [vmem:[%s16665_s7 + $0x48] ss:$16 sps:$4 sm:$0xff]  }
 0x617   :  { %11069 = vmatmul.mubr.msk.bf16.vlgmr.msra.gmra.mrb[192].mxu0 %vm7077_vm1, %v15761_v8  ;;  %v9839_v1 = vunpack.c.l.b16 %v9818_v22  ;;  %v10234_v22 = vmax.f32 %v10226_v38, %v10232_v27  ;;  %v13218_v10 = vld [vmem:[%s16665_s7 + $0x7ec] ss:$16 sps:$4 sm:$0xff]   ;;  %v13225_v56 = vld [vmem:[%s16665_s7 + $0x68] ss:$16 sps:$4 sm:$0xff]   ;;  %v13230_v57 = vld [vmem:[%s16665_s7 + $0x104] ss:$16 sps:$4 sm:$0xff]  }
 0x618   :  { %7292 = vmatpush1.bf16.msra.mxu0 %v13165_v46  ;;  %7323 = vmatprep.mubr.bf16.mxu0 %v13618_v54  ;;  %v10048_v28 = vunpack.c.l.b16 %v10027_v50  ;;  %v13200_v46 = vld [vmem:[%s16665_s7 + $0x78c] ss:$16 sps:$4 sm:$0xff]   ;;  %v13210_v50 = vld [vmem:[%s16665_s7 + $0x7c8] ss:$16 sps:$4 sm:$0xff]   ;;  %v7510_v11 = vld [vmem:[#allocation3 + $0xc] sm:$0x1] }
 0x619   :  { %7293 = vmatprep.subr.bf16.mxu0 %v13173_v29  ;;  %v9840_v58 = vrot.slane %v9839_v1, 7  ;;  %v10221_v1 = vld [vmem:[#allocation3 + $0x36] sm:$0x1]  ;;  %v10236_v24 = vpack.c.bf16 %v10234_v22, %v10234_v22  ;;  %v7507_v25 = vld [vmem:[#allocation3 + $0x45] sm:$0x1] }
 0x61a   :  { %v10049_v39 = vrot.slane %v10048_v28, 7  ;;  %v10225_v26 = vmax.f32 %v10221_v1, %v10223_v63  ;;  %v13221_v9 = vld [vmem:[%s16665_s7 + $0x2c] ss:$16 sps:$4 sm:$0xff]   ;;  %v7512_v47 = vld [vmem:[#allocation3 + $0xd] sm:$0x1] }
 0x61b   :  { %v9841_v35 = vsel %vm7164_vm2, %v9840_v58, %v9838_v42  ;;  %v13206_v42 = vld [vmem:[%s16665_s7 + $0x7ac] ss:$16 sps:$4 sm:$0xff]   ;;  %v7108_v58 = vpack.c.bf16 %v7106_v5, %v7106_v5  ;;  %v13228_v4 = vld [vmem:[%s16665_s7 + $0x100] ss:$16 sps:$4 sm:$0xff]   ;;  %v7514_v15 = vmax.f32 %v7510_v11, %v7512_v47  ;;  %v13236_v5 = vld [vmem:[%s16665_s7 + $0x144] ss:$16 sps:$4 sm:$0xff]  }
 0x61c   :  { %7294 = vmatpush1.bf16.msra.mxu0 %v13171_v59  ;;  %v15782_v19 = vpack.c.b16 %v9841_v35, %v9841_v35  ;;  %v10050_v29 = vsel %vm7164_vm2, %v10049_v39, %v10047_v16  ;;  %v13198_v59 = vld [vmem:[%s16665_s7 + $0x788] ss:$16 sps:$4 sm:$0xff]   ;;  %v13224_v40 = vld [vmem:[%s16665_s7 + $0x4c] ss:$16 sps:$4 sm:$0xff]   ;;  %v13231_v38 = vld [vmem:[%s16665_s7 + $0x120] ss:$16 sps:$4 sm:$0xff]  }
 0x61d   :  { %7295 = vmatprep.subr.bf16.mxu0 %v13179_v55  ;;  %v15836_v37 = vpack.c.b16 %v10050_v29, %v10050_v29  ;;  %v13201_v55 = vld [vmem:[%s16665_s7 + $0x40] ss:$16 sps:$4 sm:$0xff]   ;;  %v13204_v35 = vld [vmem:[%s16665_s7 + $0x7a8] ss:$16 sps:$4 sm:$0xff]   ;;  %v13227_v7 = vld [vmem:[%s16665_s7 + $0x6c] ss:$16 sps:$4 sm:$0xff]  }
 0x61e   :  { %11496 = vmatmul.mubr.msk.bf16.vlgmr.msra.gmra.mrb[16].mxu1 %vm7077_vm1, %v15782_v19  ;;  %v7504_v39 = vld [vmem:[#allocation3 + $0x4] sm:$0x1]  ;;  %v7506_v27 = vld [vmem:[#allocation3 + $0x5] sm:$0x1] }
 0x61f   :  { %10177 = vmatpush1.bf16.msra.mxu1 %v13174_v52  ;;  %10208 = vmatprep.mubr.bf16.mxu1 %v13618_v54  ;;  %v7336_v52 = vrot.slane %v7335_v49, 7  ;;  %v13237_v49 = vld [vmem:[%s16665_s7 + $0x160] ss:$16 sps:$4 sm:$0xff]   ;;  %v13242_v63 = vld [vmem:[%s16665_s7 + $0x10c] ss:$16 sps:$4 sm:$0xff]  }
 0x620   :  { %7296 = vmatpush1.bf16.msra.mxu0 %v13177_v6  ;;  %10178 = vmatprep.subr.bf16.mxu1 %v13182_v61  ;;  %v7334_v6 = vunpack.c.l.b16 %v7108_v58  ;;  %v13215_v61 = vld [vmem:[%s16665_s7 + $0xc] ss:$16 sps:$4 sm:$0xff]   ;;  %v13243_v58 = vld [vmem:[%s16665_s7 + $0x128] ss:$16 sps:$4 sm:$0xff]  }
 0x621   :  { %7297 = vmatprep.subr.bf16.mxu0 %v13185_v12  ;;  %v10257_v12 = vunpack.c.l.b16 %v10236_v24  ;;  %v7722_v24 = vld [vmem:[#allocation3 + $0x4f] sm:$0x1]  ;;  %v13269_v47 = vld [vmem:[%s16665_s7 + $0x1ac] ss:$16 sps:$4 sm:$0xff]  }
 0x622   :  { %v7337_v48 = vsel %vm7164_vm2, %v7336_v52, %v7334_v6  ;;  %v13246_v52 = vld [vmem:[%s16665_s7 + $0x148] ss:$16 sps:$4 sm:$0xff]  }
 0x623   :  { %10179 = vmatpush1.bf16.msra.mxu1 %v13180_v23  ;;  %v7338_v23 = vpack.c.b16 %v7337_v48, %v7337_v48  ;;  %v13249_v6 = vld [vmem:[%s16665_s7 + $0x168] ss:$16 sps:$4 sm:$0xff]   ;;  %v7719_v48 = vld [vmem:[#allocation3 + $0xe] sm:$0x1] }
 0x624   :  { %7298 = vmatpush1.bf16.msra.mxu0 %v13183_v31  ;;  %10180 = vmatprep.subr.bf16.mxu1 %v13188_v45  ;;  %v10258_v31 = vrot.slane %v10257_v12, 7  ;;  %v13216_v45 = vld [vmem:[%s16665_s7 + $0x7e8] ss:$16 sps:$4 sm:$0xff]   ;;  %v13254_v12 = vld [vmem:[%s16665_s7 + $0x184] ss:$16 sps:$4 sm:$0xff]  }
 0x625   :  { %7422 = vmatprep.subr.bf16.mxu0 %v13191_v44  ;;  %v13219_v44 = vld [vmem:[%s16665_s7 + $0x28] ss:$16 sps:$4 sm:$0xff]  }
 0x627   :  { %11070 = vmatmul.mubr.msk.bf16.vlgmr.msra.gmra.mrb[196].mxu0 %vm7077_vm1, %v15761_v8  ;;  %10181 = vmatpush1.bf16.msra.mxu1 %v13186_v51  ;;  %v10229_v8 = vld [vmem:[#allocation3 + $0x3f] sm:$0x1]  ;;  %v7513_v51 = vld [vmem:[#allocation3 + $0x4d] sm:$0x1] }
 0x628   :  { %7423 = vmatpush1.bf16.msra.mxu0 %v13189_v14  ;;  %10182 = vmatprep.subr.bf16.mxu1 %v13194_v43  ;;  %v10231_v30 = vmax.f32 %v10227_v17, %v10229_v8  ;;  %v7505_v14 = vld [vmem:[#allocation3 + $0x44] sm:$0x1]  ;;  %v7515_v32 = vmax.f32 %v7511_v34, %v7513_v51  ;;  %v13234_v8 = vld [vmem:[%s16665_s7 + $0x140] ss:$16 sps:$4 sm:$0xff]  }
 0x629   :  { %7424 = vmatprep.subr.bf16.mxu0 %v13197_v62  ;;  %7454 = vmatprep.mubr.bf16.mxu0 %v13618_v54  ;;  %v7509_v43 = vmax.f32 %v7505_v14, %v7507_v25  ;;  %v13258_v51 = vld [vmem:[%s16665_s7 + $0x1c0] ss:$16 sps:$4 sm:$0xff]  }
 0x62a   :  { %v10233_v33 = vmax.f32 %v10225_v26, %v10231_v30  ;;  %v13240_v30 = vld [vmem:[%s16665_s7 + $0x108] ss:$16 sps:$4 sm:$0xff]   ;;  %v7720_v26 = vld [vmem:[#allocation3 + $0x4e] sm:$0x1]  ;;  %v13261_v25 = vld [vmem:[%s16665_s7 + $0x1e0] ss:$16 sps:$4 sm:$0xff]  }
 0x62b   :  { %10183 = vmatpush1.bf16.msra.mxu1 %v13192_v0  ;;  %v7517_v62 = vmax.f32 %v7509_v43, %v7515_v32  ;;  %v13233_v0 = vld [vmem:[%s16665_s7 + $0x124] ss:$16 sps:$4 sm:$0xff]  }
 0x62c   :  { %7425 = vmatpush1.bf16.msra.mxu0 %v13195_v21  ;;  %10385 = vmatprep.subr.bf16.mxu1 %v13200_v46  ;;  %v10235_v53 = vpack.c.bf16 %v10233_v33, %v10233_v33  ;;  %v7508_v21 = vmax.f32 %v7504_v39, %v7506_v27  ;;  %v7714_v33 = vld [vmem:[#allocation3 + $0x46] sm:$0x1]  ;;  %v7929_v27 = vld [vmem:[#allocation3 + $0x58] sm:$0x1] }
 0x62d   :  { %7426 = vmatprep.subr.bf16.mxu0 %v13203_v18  ;;  %v7519_v16 = vpack.c.bf16 %v7517_v62, %v7517_v62  ;;  %v13239_v18 = vld [vmem:[%s16665_s7 + $0x164] ss:$16 sps:$4 sm:$0xff]   ;;  %v13267_v62 = vld [vmem:[%s16665_s7 + $0x1a8] ss:$16 sps:$4 sm:$0xff]   ;;  %v13272_v39 = vld [vmem:[%s16665_s7 + $0x1cc] ss:$16 sps:$4 sm:$0xff]  }
 0x62e   :  { %11530 = vmatmul.mubr.msk.bf16.vlgmr.msra.gmra.mrb[20].mxu1 %vm7077_vm1, %v15836_v37  ;;  %v10256_v20 = vunpack.c.l.b16 %v10235_v53  ;;  %v7516_v46 = vmax.f32 %v7508_v21, %v7514_v15  ;;  %v13270_v15 = vld [vmem:[%s16665_s7 + $0x1c8] ss:$16 sps:$4 sm:$0xff]  }
 0x62f   :  { %10386 = vmatpush1.bf16.msra.mxu1 %v13198_v59  ;;  %10417 = vmatprep.mubr.bf16.mxu1 %v13618_v54  ;;  %v7540_v17 = vunpack.c.l.b16 %v7519_v16  ;;  %v7923_v21 = vld [vmem:[#allocation3 + $0x50] sm:$0x1]  ;;  %v7925_v16 = vld [vmem:[#allocation3 + $0x51] sm:$0x1] }
 0x630   :  { %7427 = vmatpush1.bf16.msra.mxu0 %v13201_v55  ;;  %10387 = vmatprep.subr.bf16.mxu1 %v13206_v42  ;;  %v10259_v28 = vsel %vm7164_vm2, %v10258_v31, %v10256_v20  ;;  %v7518_v29 = vpack.c.bf16 %v7516_v46, %v7516_v46  ;;  %v13245_v42 = vld [vmem:[%s16665_s7 + $0x12c] ss:$16 sps:$4 sm:$0xff]   ;;  %v13257_v31 = vld [vmem:[%s16665_s7 + $0x1a4] ss:$16 sps:$4 sm:$0xff]   ;;  %v13273_v46 = vld [vmem:[%s16665_s7 + $0x1e8] ss:$16 sps:$4 sm:$0xff]  }
 0x631   :  { %7428 = vmatprep.subr.bf16.mxu0 %v13209_v3  ;;  %v15887_v41 = vpack.c.b16 %v10259_v28, %v10259_v28  ;;  %v7541_v22 = vrot.slane %v7540_v17, 7  ;;  %v13248_v3 = vld [vmem:[%s16665_s7 + $0x14c] ss:$16 sps:$4 sm:$0xff]   ;;  %v13278_v17 = vld [vmem:[%s16665_s7 + $0x204] ss:$16 sps:$4 sm:$0xff]  }
 0x632   :  { %v7539_v1 = vunpack.c.l.b16 %v7518_v29  ;;  %v7930_v29 = vld [vmem:[#allocation3 + $0x19] sm:$0x1] }
 0x633   :  { %10388 = vmatpush1.bf16.msra.mxu1 %v13204_v35  ;;  %v13251_v35 = vld [vmem:[%s16665_s7 + $0x16c] ss:$16 sps:$4 sm:$0xff]  }
 0x634   :  { %7429 = vmatpush1.bf16.msra.mxu0 %v13207_v13  ;;  %10389 = vmatprep.subr.bf16.mxu1 %v13212_v36  ;;  %v7542_v59 = vsel %vm7164_vm2, %v7541_v22, %v7539_v1  ;;  %v7716_v13 = vld [vmem:[#allocation3 + $0x47] sm:$0x1]  ;;  %v7724_v36 = vmax.f32 %v7720_v26, %v7722_v24  ;;  %v7922_v22 = vld [vmem:[#allocation3 + $0x10] sm:$0x1]  ;;  %v13276_v1 = vld [vmem:[%s16665_s7 + $0x200] ss:$16 sps:$4 sm:$0xff]  }
 0x635   :  { %7463 = vmatprep.subr.bf16.mxu0 %v13215_v61  ;;  %v7543_v55 = vpack.c.b16 %v7542_v59, %v7542_v59  ;;  %v7718_v61 = vmax.f32 %v7714_v33, %v7716_v13  ;;  %v13281_v59 = vld [vmem:[%s16665_s7 + $0x224] ss:$16 sps:$4 sm:$0xff]   ;;  %v13282_v24 = vld [vmem:[%s16665_s7 + $0x240] ss:$16 sps:$4 sm:$0xff]  }
 0x636   :  { %v13285_v13 = vld [vmem:[%s16665_s7 + $0x260] ss:$16 sps:$4 sm:$0xff]  }
 0x637   :  { %11087 = vmatmul.mubr.msk.bf16.vlgmr.msra.gmra.mrb[200].mxu0 %vm7077_vm1, %v7338_v23  ;;  %10390 = vmatpush1.bf16.msra.mxu1 %v13210_v50  ;;  %v7721_v50 = vld [vmem:[#allocation3 + $0xf] sm:$0x1]  ;;  %v7726_v53 = vmax.f32 %v7718_v61, %v7724_v36 }
 0x638   :  { %7464 = vmatpush1.bf16.msra.mxu0 %v13213_v2  ;;  %10391 = vmatprep.subr.bf16.mxu1 %v13218_v10  ;;  %v7713_v2 = vld [vmem:[#allocation3 + $0x6] sm:$0x1]  ;;  %v7715_v10 = vld [vmem:[#allocation3 + $0x7] sm:$0x1] }
 0x639   :  { %7465 = vmatprep.subr.bf16.mxu0 %v13221_v9  ;;  %7495 = vmatprep.mubr.bf16.mxu0 %v13618_v54  ;;  %v7723_v9 = vmax.f32 %v7719_v48, %v7721_v50  ;;  %v7728_v20 = vpack.c.bf16 %v7726_v53, %v7726_v53  ;;  %v13293_v50 = vld [vmem:[%s16665_s7 + $0x22c] ss:$16 sps:$4 sm:$0xff]   ;;  %v13291_v53 = vld [vmem:[%s16665_s7 + $0x228] ss:$16 sps:$4 sm:$0xff]  }
 0x63b   :  { %10392 = vmatpush1.bf16.msra.mxu1 %v13216_v45  ;;  %v7717_v45 = vmax.f32 %v7713_v2, %v7715_v10  ;;  %v7749_v34 = vunpack.c.l.b16 %v7728_v20  ;;  %v13296_v2 = vld [vmem:[%s16665_s7 + $0x24c] ss:$16 sps:$4 sm:$0xff]   ;;  %v8138_v10 = vld [vmem:[#allocation3 + $0x5a] sm:$0x1]  ;;  %v8134_v20 = vld [vmem:[#allocation3 + $0x53] sm:$0x1] }
 0x63c   :  { %7466 = vmatpush1.bf16.msra.mxu0 %v13219_v44  ;;  %v13255_v44 = vld [vmem:[%s16665_s7 + $0x1a0] ss:$16 sps:$4 sm:$0xff]  }
 0x63d   :  { %7467 = vmatprep.subr.bf16.mxu0 %v13224_v40  ;;  %v7725_v28 = vmax.f32 %v7717_v45, %v7723_v9  ;;  %v13260_v40 = vld [vmem:[%s16665_s7 + $0x1c4] ss:$16 sps:$4 sm:$0xff]   ;;  %v7750_v14 = vrot.slane %v7749_v34, 7  ;;  %v13294_v9 = vld [vmem:[%s16665_s7 + $0x248] ss:$16 sps:$4 sm:$0xff]  }
 0x63e   :  { %11564 = vmatmul.mubr.msk.bf16.vlgmr.msra.gmra.mrb[24].mxu1 %vm7077_vm1, %v15887_v41  ;;  %v8132_v45 = vld [vmem:[#allocation3 + $0x52] sm:$0x1]  ;;  %v13302_v34 = vld [vmem:[%s16665_s7 + $0x284] ss:$16 sps:$4 sm:$0xff]  }
 0x640   :  { %7468 = vmatpush1.bf16.msra.mxu0 %v13222_v60  ;;  %v7727_v60 = vpack.c.bf16 %v7725_v28, %v7725_v28  ;;  %v13297_v28 = vld [vmem:[%s16665_s7 + $0x268] ss:$16 sps:$4 sm:$0xff]  }
 0x641   :  { %7469 = vmatprep.subr.bf16.mxu0 %v13227_v7  ;;  %v13263_v7 = vld [vmem:[%s16665_s7 + $0x1e4] ss:$16 sps:$4 sm:$0xff]  }
 0x642   :  { %v7748_v32 = vunpack.c.l.b16 %v7727_v60  ;;  %v8139_v60 = vld [vmem:[#allocation3 + $0x1b] sm:$0x1] }
 0x644   :  { %7470 = vmatpush1.bf16.msra.mxu0 %v13225_v56  ;;  %v13266_v56 = vld [vmem:[%s16665_s7 + $0x18c] ss:$16 sps:$4 sm:$0xff]   ;;  %v7751_v43 = vsel %vm7164_vm2, %v7750_v14, %v7748_v32  ;;  %v8131_v14 = vld [vmem:[#allocation3 + $0x12] sm:$0x1]  ;;  %v13300_v32 = vld [vmem:[%s16665_s7 + $0x280] ss:$16 sps:$4 sm:$0xff]  }
 0x645   :  { %7627 = vmatprep.subr.bf16.mxu0 %v13230_v57  ;;  %v13264_v57 = vld [vmem:[%s16665_s7 + $0x188] ss:$16 sps:$4 sm:$0xff]   ;;  %v7752_v11 = vpack.c.b16 %v7751_v43, %v7751_v43  ;;  %v13305_v43 = vld [vmem:[%s16665_s7 + $0x2a4] ss:$16 sps:$4 sm:$0xff]  }
 0x647   :  { %11088 = vmatmul.mubr.msk.bf16.vlgmr.msra.gmra.mrb[204].mxu0 %vm7077_vm1, %v7338_v23  ;;  %v13252_v23 = vld [vmem:[%s16665_s7 + $0x180] ss:$16 sps:$4 sm:$0xff]  }
 0x648   :  { %7628 = vmatpush1.bf16.msra.mxu0 %v13228_v4  ;;  %7659 = vmatprep.mubr.bf16.mxu0 %v13618_v54  ;;  %v7931_v4 = vld [vmem:[#allocation3 + $0x59] sm:$0x1] }
 0x649   :  { %7629 = vmatprep.subr.bf16.mxu0 %v13233_v0  ;;  %v13275_v0 = vld [vmem:[%s16665_s7 + $0x1ec] ss:$16 sps:$4 sm:$0xff]  }
 0x64c   :  { %7630 = vmatpush1.bf16.msra.mxu0 %v13231_v38  ;;  %v7933_v38 = vmax.f32 %v7929_v27, %v7931_v4  ;;  %v13306_v4 = vld [vmem:[%s16665_s7 + $0x2c0] ss:$16 sps:$4 sm:$0xff]  }
 0x64d   :  { %7631 = vmatprep.subr.bf16.mxu0 %v13236_v5  ;;  %v7927_v5 = vmax.f32 %v7923_v21, %v7925_v16  ;;  %v13309_v16 = vld [vmem:[%s16665_s7 + $0x2e0] ss:$16 sps:$4 sm:$0xff]  }
 0x650   :  { %7632 = vmatpush1.bf16.msra.mxu0 %v13234_v8  ;;  %v7928_v8 = vld [vmem:[#allocation3 + $0x18] sm:$0x1] }
 0x651   :  { %7633 = vmatprep.subr.bf16.mxu0 %v13239_v18  ;;  %v7935_v18 = vmax.f32 %v7927_v5, %v7933_v38 }
 0x654   :  { %7634 = vmatpush1.bf16.msra.mxu0 %v13237_v49  ;;  %v7924_v49 = vld [vmem:[#allocation3 + $0x11] sm:$0x1] }
 0x655   :  { %7668 = vmatprep.subr.bf16.mxu0 %v13242_v63  ;;  %v7932_v63 = vmax.f32 %v7928_v8, %v7930_v29  ;;  %v13317_v29 = vld [vmem:[%s16665_s7 + $0x2ac] ss:$16 sps:$4 sm:$0xff]  }
 0x657   :  { %11121 = vmatmul.mubr.msk.bf16.vlgmr.msra.gmra.mrb[208].mxu0 %vm7077_vm1, %v7543_v55 }
 0x658   :  { %7669 = vmatpush1.bf16.msra.mxu0 %v13240_v30  ;;  %7700 = vmatprep.mubr.bf16.mxu0 %v13618_v54  ;;  %v7926_v30 = vmax.f32 %v7922_v22, %v7924_v49  ;;  %v13320_v22 = vld [vmem:[%s16665_s7 + $0x2cc] ss:$16 sps:$4 sm:$0xff]   ;;  %v8347_v49 = vld [vmem:[#allocation3 + $0x5c] sm:$0x1] }
 0x659   :  { %7670 = vmatprep.subr.bf16.mxu0 %v13245_v42  ;;  %v13279_v42 = vld [vmem:[%s16665_s7 + $0x220] ss:$16 sps:$4 sm:$0xff]  }
 0x65c   :  { %7671 = vmatpush1.bf16.msra.mxu0 %v13243_v58  ;;  %v7934_v58 = vmax.f32 %v7926_v30, %v7932_v63  ;;  %v13318_v63 = vld [vmem:[%s16665_s7 + $0x2c8] ss:$16 sps:$4 sm:$0xff]   ;;  %v8341_v30 = vld [vmem:[#allocation3 + $0x54] sm:$0x1] }
 0x65d   :  { %7672 = vmatprep.subr.bf16.mxu0 %v13248_v3  ;;  %v13284_v3 = vld [vmem:[%s16665_s7 + $0x244] ss:$16 sps:$4 sm:$0xff]  }
 0x660   :  { %7673 = vmatpush1.bf16.msra.mxu0 %v13246_v52  ;;  %v7936_v52 = vpack.c.bf16 %v7934_v58, %v7934_v58  ;;  %v13321_v58 = vld [vmem:[%s16665_s7 + $0x2e8] ss:$16 sps:$4 sm:$0xff]  }
 0x661   :  { %7674 = vmatprep.subr.bf16.mxu0 %v13251_v35  ;;  %v13287_v35 = vld [vmem:[%s16665_s7 + $0x264] ss:$16 sps:$4 sm:$0xff]  }
 0x662   :  { %v7957_v36 = vunpack.c.l.b16 %v7936_v52  ;;  %v8348_v52 = vld [vmem:[#allocation3 + $0x1d] sm:$0x1] }
 0x664   :  { %7675 = vmatpush1.bf16.msra.mxu0 %v13249_v6  ;;  %v13290_v6 = vld [vmem:[%s16665_s7 + $0x20c] ss:$16 sps:$4 sm:$0xff]  }
 0x665   :  { %7836 = vmatprep.subr.bf16.mxu0 %v13254_v12  ;;  %v13288_v12 = vld [vmem:[%s16665_s7 + $0x208] ss:$16 sps:$4 sm:$0xff]  }
 0x667   :  { %11122 = vmatmul.mubr.msk.bf16.vlgmr.msra.gmra.mrb[212].mxu0 %vm7077_vm1, %v7543_v55  ;;  %v7937_v55 = vpack.c.bf16 %v7935_v18, %v7935_v18  ;;  %v13315_v18 = vld [vmem:[%s16665_s7 + $0x2a8] ss:$16 sps:$4 sm:$0xff]  }
 0x668   :  { %7837 = vmatpush1.bf16.msra.mxu0 %v13252_v23  ;;  %7868 = vmatprep.mubr.bf16.mxu0 %v13618_v54  ;;  %v8140_v23 = vld [vmem:[#allocation3 + $0x5b] sm:$0x1] }
 0x669   :  { %7838 = vmatprep.subr.bf16.mxu0 %v13257_v31  ;;  %v7958_v26 = vunpack.c.l.b16 %v7937_v55  ;;  %v13299_v31 = vld [vmem:[%s16665_s7 + $0x26c] ss:$16 sps:$4 sm:$0xff]  }
 0x66a   :  { %v8343_v55 = vld [vmem:[#allocation3 + $0x55] sm:$0x1] }
 0x66b   :  { %v7959_v33 = vrot.slane %v7958_v26, 7  ;;  %v13326_v26 = vld [vmem:[%s16665_s7 + $0x304] ss:$16 sps:$4 sm:$0xff]  }
 0x66c   :  { %7839 = vmatpush1.bf16.msra.mxu0 %v13255_v44  ;;  %v8142_v44 = vmax.f32 %v8138_v10, %v8140_v23  ;;  %v13330_v23 = vld [vmem:[%s16665_s7 + $0x340] ss:$16 sps:$4 sm:$0xff]  }
 0x66d   :  { %7840 = vmatprep.subr.bf16.mxu0 %v13260_v40  ;;  %v7960_v61 = vsel %vm7164_vm2, %v7959_v33, %v7957_v36  ;;  %v8136_v40 = vmax.f32 %v8132_v45, %v8134_v20  ;;  %v8340_v33 = vld [vmem:[#allocation3 + $0x14] sm:$0x1]  ;;  %v13324_v36 = vld [vmem:[%s16665_s7 + $0x300] ss:$16 sps:$4 sm:$0xff]  }
 0x66e   :  { %v7961_v48 = vpack.c.b16 %v7960_v61, %v7960_v61  ;;  %v13329_v61 = vld [vmem:[%s16665_s7 + $0x324] ss:$16 sps:$4 sm:$0xff]   ;;  %v13333_v20 = vld [vmem:[%s16665_s7 + $0x360] ss:$16 sps:$4 sm:$0xff]  }
 0x670   :  { %7841 = vmatpush1.bf16.msra.mxu0 %v13258_v51  ;;  %v8137_v51 = vld [vmem:[#allocation3 + $0x1a] sm:$0x1] }
 0x671   :  { %7842 = vmatprep.subr.bf16.mxu0 %v13263_v7  ;;  %v8144_v7 = vmax.f32 %v8136_v40, %v8142_v44 }
 0x674   :  { %7843 = vmatpush1.bf16.msra.mxu0 %v13261_v25  ;;  %v8133_v25 = vld [vmem:[#allocation3 + $0x13] sm:$0x1] }
 0x675   :  { %7877 = vmatprep.subr.bf16.mxu0 %v13266_v56  ;;  %v8141_v56 = vmax.f32 %v8137_v51, %v8139_v60  ;;  %v13341_v60 = vld [vmem:[%s16665_s7 + $0x32c] ss:$16 sps:$4 sm:$0xff]  }
 0x677   :  { %11155 = vmatmul.mubr.msk.bf16.vlgmr.msra.gmra.mrb[216].mxu0 %vm7077_vm1, %v7752_v11 }
 0x678   :  { %7878 = vmatpush1.bf16.msra.mxu0 %v13264_v57  ;;  %7909 = vmatprep.mubr.bf16.mxu0 %v13618_v54  ;;  %v8135_v57 = vmax.f32 %v8131_v14, %v8133_v25  ;;  %v13344_v14 = vld [vmem:[%s16665_s7 + $0x34c] ss:$16 sps:$4 sm:$0xff]   ;;  %v8556_v25 = vld [vmem:[#allocation3 + $0x5e] sm:$0x1] }
 0x679   :  { %7879 = vmatprep.subr.bf16.mxu0 %v13269_v47  ;;  %v13303_v47 = vld [vmem:[%s16665_s7 + $0x2a0] ss:$16 sps:$4 sm:$0xff]  }
 0x67c   :  { %7880 = vmatpush1.bf16.msra.mxu0 %v13267_v62  ;;  %v8143_v62 = vmax.f32 %v8135_v57, %v8141_v56  ;;  %v13342_v56 = vld [vmem:[%s16665_s7 + $0x348] ss:$16 sps:$4 sm:$0xff]   ;;  %v8550_v57 = vld [vmem:[#allocation3 + $0x56] sm:$0x1] }
 0x67d   :  { %7881 = vmatprep.subr.bf16.mxu0 %v13272_v39  ;;  %v13308_v39 = vld [vmem:[%s16665_s7 + $0x2c4] ss:$16 sps:$4 sm:$0xff]  }
 0x680   :  { %7882 = vmatpush1.bf16.msra.mxu0 %v13270_v15  ;;  %v8145_v15 = vpack.c.bf16 %v8143_v62, %v8143_v62  ;;  %v13345_v62 = vld [vmem:[%s16665_s7 + $0x368] ss:$16 sps:$4 sm:$0xff]  }
 0x681   :  { %7883 = vmatprep.subr.bf16.mxu0 %v13275_v0  ;;  %v13311_v0 = vld [vmem:[%s16665_s7 + $0x2e4] ss:$16 sps:$4 sm:$0xff]  }
 0x682   :  { %v8166_v38 = vunpack.c.l.b16 %v8145_v15  ;;  %v8557_v15 = vld [vmem:[#allocation3 + $0x1f] sm:$0x1] }
 0x684   :  { %7884 = vmatpush1.bf16.msra.mxu0 %v13273_v46  ;;  %v13314_v46 = vld [vmem:[%s16665_s7 + $0x28c] ss:$16 sps:$4 sm:$0xff]  }
 0x685   :  { %8045 = vmatprep.subr.bf16.mxu0 %v13278_v17  ;;  %v13312_v17 = vld [vmem:[%s16665_s7 + $0x288] ss:$16 sps:$4 sm:$0xff]  }
 0x687   :  { %11156 = vmatmul.mubr.msk.bf16.vlgmr.msra.gmra.mrb[220].mxu0 %vm7077_vm1, %v7752_v11  ;;  %v8146_v11 = vpack.c.bf16 %v8144_v7, %v8144_v7  ;;  %v13339_v7 = vld [vmem:[%s16665_s7 + $0x328] ss:$16 sps:$4 sm:$0xff]  }
 0x688   :  { %8046 = vmatpush1.bf16.msra.mxu0 %v13276_v1  ;;  %8077 = vmatprep.mubr.bf16.mxu0 %v13618_v54  ;;  %v8349_v1 = vld [vmem:[#allocation3 + $0x5d] sm:$0x1] }
 0x689   :  { %8047 = vmatprep.subr.bf16.mxu0 %v13281_v59  ;;  %v8167_v27 = vunpack.c.l.b16 %v8146_v11  ;;  %v13323_v59 = vld [vmem:[%s16665_s7 + $0x2ec] ss:$16 sps:$4 sm:$0xff]  }
 0x68a   :  { %v8552_v11 = vld [vmem:[#allocation3 + $0x57] sm:$0x1] }
 0x68b   :  { %v8168_v21 = vrot.slane %v8167_v27, 7  ;;  %v13350_v27 = vld [vmem:[%s16665_s7 + $0x384] ss:$16 sps:$4 sm:$0xff]  }
 0x68c   :  { %8048 = vmatpush1.bf16.msra.mxu0 %v13279_v42  ;;  %v8351_v42 = vmax.f32 %v8347_v49, %v8349_v1 }
 0x68d   :  { %8049 = vmatprep.subr.bf16.mxu0 %v13284_v3  ;;  %v8169_v5 = vsel %vm7164_vm2, %v8168_v21, %v8166_v38  ;;  %v8345_v3 = vmax.f32 %v8341_v30, %v8343_v55  ;;  %v8549_v21 = vld [vmem:[#allocation3 + $0x16] sm:$0x1]  ;;  %v13348_v38 = vld [vmem:[%s16665_s7 + $0x380] ss:$16 sps:$4 sm:$0xff]  }
 0x68e   :  { %v8170_v8 = vpack.c.b16 %v8169_v5, %v8169_v5  ;;  %v13353_v5 = vld [vmem:[%s16665_s7 + $0x3a4] ss:$16 sps:$4 sm:$0xff]   ;;  %v13354_v30 = vld [vmem:[%s16665_s7 + $0x3c0] ss:$16 sps:$4 sm:$0xff]  }
 0x690   :  { %8050 = vmatpush1.bf16.msra.mxu0 %v13282_v24  ;;  %v8346_v24 = vld [vmem:[#allocation3 + $0x1c] sm:$0x1] }
 0x691   :  { %8051 = vmatprep.subr.bf16.mxu0 %v13287_v35  ;;  %v8353_v35 = vmax.f32 %v8345_v3, %v8351_v42 }
 0x694   :  { %8052 = vmatpush1.bf16.msra.mxu0 %v13285_v13  ;;  %v8342_v13 = vld [vmem:[#allocation3 + $0x15] sm:$0x1] }
 0x695   :  { %8086 = vmatprep.subr.bf16.mxu0 %v13290_v6  ;;  %v8350_v6 = vmax.f32 %v8346_v24, %v8348_v52 }
 0x697   :  { %11189 = vmatmul.mubr.msk.bf16.vlgmr.msra.gmra.mrb[224].mxu0 %vm7077_vm1, %v7961_v48 }
 0x698   :  { %8087 = vmatpush1.bf16.msra.mxu0 %v13288_v12  ;;  %8118 = vmatprep.mubr.bf16.mxu0 %v13618_v54  ;;  %v8344_v12 = vmax.f32 %v8340_v33, %v8342_v13 }
 0x699   :  { %8088 = vmatprep.subr.bf16.mxu0 %v13293_v50  ;;  %v13327_v50 = vld [vmem:[%s16665_s7 + $0x320] ss:$16 sps:$4 sm:$0xff]  }
 0x69c   :  { %8089 = vmatpush1.bf16.msra.mxu0 %v13291_v53  ;;  %v8352_v53 = vmax.f32 %v8344_v12, %v8350_v6 }
 0x69d   :  { %8090 = vmatprep.subr.bf16.mxu0 %v13296_v2  ;;  %v13332_v2 = vld [vmem:[%s16665_s7 + $0x344] ss:$16 sps:$4 sm:$0xff]  }
 0x6a0   :  { %8091 = vmatpush1.bf16.msra.mxu0 %v13294_v9  ;;  %v8354_v9 = vpack.c.bf16 %v8352_v53, %v8352_v53  ;;  %v13368_v53 = vld [vmem:[%s16665_s7 + $0x3cc] ss:$16 sps:$4 sm:$0xff]  }
 0x6a1   :  { %8092 = vmatprep.subr.bf16.mxu0 %v13299_v31  ;;  %v13335_v31 = vld [vmem:[%s16665_s7 + $0x364] ss:$16 sps:$4 sm:$0xff]  }
 0x6a2   :  { %v8375_v44 = vunpack.c.l.b16 %v8354_v9 }
 0x6a4   :  { %8093 = vmatpush1.bf16.msra.mxu0 %v13297_v28  ;;  %v13338_v28 = vld [vmem:[%s16665_s7 + $0x30c] ss:$16 sps:$4 sm:$0xff]  }
 0x6a5   :  { %8254 = vmatprep.subr.bf16.mxu0 %v13302_v34  ;;  %v13336_v34 = vld [vmem:[%s16665_s7 + $0x308] ss:$16 sps:$4 sm:$0xff]  }
 0x6a7   :  { %11190 = vmatmul.mubr.msk.bf16.vlgmr.msra.gmra.mrb[228].mxu0 %vm7077_vm1, %v7961_v48  ;;  %v8355_v48 = vpack.c.bf16 %v8353_v35, %v8353_v35  ;;  %v13362_v35 = vld [vmem:[%s16665_s7 + $0x38c] ss:$16 sps:$4 sm:$0xff]  }
 0x6a8   :  { %8255 = vmatpush1.bf16.msra.mxu0 %v13300_v32  ;;  %8286 = vmatprep.mubr.bf16.mxu0 %v13618_v54  ;;  %v8558_v32 = vld [vmem:[#allocation3 + $0x5f] sm:$0x1] }
 0x6a9   :  { %8256 = vmatprep.subr.bf16.mxu0 %v13305_v43  ;;  %v8376_v10 = vunpack.c.l.b16 %v8355_v48  ;;  %v13347_v43 = vld [vmem:[%s16665_s7 + $0x36c] ss:$16 sps:$4 sm:$0xff]  }
 0x6aa   :  { %v13365_v48 = vld [vmem:[%s16665_s7 + $0x3ac] ss:$16 sps:$4 sm:$0xff]  }
 0x6ab   :  { %v8377_v45 = vrot.slane %v8376_v10, 7  ;;  %v8765_v10 = vld [vmem:[#allocation3 + $0x68] sm:$0x1] }
 0x6ac   :  { %8257 = vmatpush1.bf16.msra.mxu0 %v13303_v47  ;;  %v8560_v47 = vmax.f32 %v8556_v25, %v8558_v32  ;;  %v13374_v32 = vld [vmem:[%s16665_s7 + $0x404] ss:$16 sps:$4 sm:$0xff]  }
 0x6ad   :  { %8258 = vmatprep.subr.bf16.mxu0 %v13308_v39  ;;  %v8378_v40 = vsel %vm7164_vm2, %v8377_v45, %v8375_v44  ;;  %v8554_v39 = vmax.f32 %v8550_v57, %v8552_v11  ;;  %v8761_v44 = vld [vmem:[#allocation3 + $0x61] sm:$0x1]  ;;  %v8758_v57 = vld [vmem:[#allocation3 + $0x20] sm:$0x1] }
 0x6ae   :  { %v8379_v51 = vpack.c.b16 %v8378_v40, %v8378_v40  ;;  %v13371_v40 = vld [vmem:[%s16665_s7 + $0x3ec] ss:$16 sps:$4 sm:$0xff]   ;;  %v8760_v11 = vld [vmem:[#allocation3 + $0x21] sm:$0x1] }
 0x6b0   :  { %8259 = vmatpush1.bf16.msra.mxu0 %v13306_v4  ;;  %v8555_v4 = vld [vmem:[#allocation3 + $0x1e] sm:$0x1] }
 0x6b1   :  { %8260 = vmatprep.subr.bf16.mxu0 %v13311_v0  ;;  %v8562_v0 = vmax.f32 %v8554_v39, %v8560_v47 }
 0x6b4   :  { %8261 = vmatpush1.bf16.msra.mxu0 %v13309_v16  ;;  %v8551_v16 = vld [vmem:[#allocation3 + $0x17] sm:$0x1] }
 0x6b5   :  { %8295 = vmatprep.subr.bf16.mxu0 %v13314_v46  ;;  %v8559_v46 = vmax.f32 %v8555_v4, %v8557_v15  ;;  %v13377_v4 = vld [vmem:[%s16665_s7 + $0x424] ss:$16 sps:$4 sm:$0xff]   ;;  %v8762_v15 = vmax.f32 %v8758_v57, %v8760_v11  ;;  %v8969_v57 = vld [vmem:[#allocation3 + $0x23] sm:$0x1] }
 0x6b7   :  { %11223 = vmatmul.mubr.msk.bf16.vlgmr.msra.gmra.mrb[232].mxu0 %vm7077_vm1, %v8170_v8 }
 0x6b8   :  { %8296 = vmatpush1.bf16.msra.mxu0 %v13312_v17  ;;  %8327 = vmatprep.mubr.bf16.mxu0 %v13618_v54  ;;  %v8553_v17 = vmax.f32 %v8549_v21, %v8551_v16  ;;  %v13375_v16 = vld [vmem:[%s16665_s7 + $0x420] ss:$16 sps:$4 sm:$0xff]  }
 0x6b9   :  { %8297 = vmatprep.subr.bf16.mxu0 %v13317_v29  ;;  %v13351_v29 = vld [vmem:[%s16665_s7 + $0x3a0] ss:$16 sps:$4 sm:$0xff]  }
 0x6bc   :  { %8298 = vmatpush1.bf16.msra.mxu0 %v13315_v18  ;;  %v8561_v18 = vmax.f32 %v8553_v17, %v8559_v46 }
 0x6bd   :  { %8299 = vmatprep.subr.bf16.mxu0 %v13320_v22  ;;  %v13356_v22 = vld [vmem:[%s16665_s7 + $0x3c4] ss:$16 sps:$4 sm:$0xff]  }
 0x6be   :  { %v8563_v55 = vpack.c.bf16 %v8561_v18, %v8561_v18 }
 0x6c0   :  { %8300 = vmatpush1.bf16.msra.mxu0 %v13318_v63  ;;  %v8584_v24 = vunpack.c.l.b16 %v8563_v55 }
 0x6c1   :  { %8301 = vmatprep.subr.bf16.mxu0 %v13323_v59 }
 0x6c4   :  { %8302 = vmatpush1.bf16.msra.mxu0 %v13321_v58  ;;  %v13359_v58 = vld [vmem:[%s16665_s7 + $0x3e4] ss:$16 sps:$4 sm:$0xff]  }
 0x6c5   :  { %8463 = vmatprep.subr.bf16.mxu0 %v13326_v26  ;;  %v13357_v26 = vld [vmem:[%s16665_s7 + $0x3e0] ss:$16 sps:$4 sm:$0xff]  }
 0x6c7   :  { %11224 = vmatmul.mubr.msk.bf16.vlgmr.msra.gmra.mrb[236].mxu0 %vm7077_vm1, %v8170_v8  ;;  %v8564_v8 = vpack.c.bf16 %v8562_v0, %v8562_v0 }
 0x6c8   :  { %8464 = vmatpush1.bf16.msra.mxu0 %v13324_v36  ;;  %8495 = vmatprep.mubr.bf16.mxu0 %v13618_v54 }
 0x6c9   :  { %8465 = vmatprep.subr.bf16.mxu0 %v13329_v61  ;;  %v8585_v1 = vunpack.c.l.b16 %v8564_v8  ;;  %v13360_v61 = vld [vmem:[%s16665_s7 + $0x388] ss:$16 sps:$4 sm:$0xff]  }
 0x6cb   :  { %v8586_v3 = vrot.slane %v8585_v1, 7  ;;  %v13378_v1 = vld [vmem:[%s16665_s7 + $0x440] ss:$16 sps:$4 sm:$0xff]  }
 0x6cc   :  { %8466 = vmatpush1.bf16.msra.mxu0 %v13327_v50  ;;  %v13363_v50 = vld [vmem:[%s16665_s7 + $0x3a8] ss:$16 sps:$4 sm:$0xff]  }
 0x6cd   :  { %8467 = vmatprep.subr.bf16.mxu0 %v13332_v2  ;;  %v8587_v13 = vsel %vm7164_vm2, %v8586_v3, %v8584_v24 }
 0x6ce   :  { %v8588_v12 = vpack.c.b16 %v8587_v13, %v8587_v13  ;;  %v13384_v13 = vld [vmem:[%s16665_s7 + $0x408] ss:$16 sps:$4 sm:$0xff]  }
 0x6d0   :  { %8468 = vmatpush1.bf16.msra.mxu0 %v13330_v23  ;;  %v8767_v23 = vld [vmem:[#allocation3 + $0x69] sm:$0x1] }
 0x6d1   :  { %8469 = vmatprep.subr.bf16.mxu0 %v13335_v31  ;;  %v8759_v31 = vld [vmem:[#allocation3 + $0x60] sm:$0x1] }
 0x6d4   :  { %8470 = vmatpush1.bf16.msra.mxu0 %v13333_v20  ;;  %v13366_v20 = vld [vmem:[%s16665_s7 + $0x3c8] ss:$16 sps:$4 sm:$0xff]  }
 0x6d5   :  { %8504 = vmatprep.subr.bf16.mxu0 %v13338_v28 }
 0x6d7   :  { %11257 = vmatmul.mubr.msk.bf16.vlgmr.msra.gmra.mrb[240].mxu0 %vm7077_vm1, %v8379_v51 }
 0x6d8   :  { %8505 = vmatpush1.bf16.msra.mxu0 %v13336_v34  ;;  %8536 = vmatprep.mubr.bf16.mxu0 %v13618_v54  ;;  %v8769_v34 = vmax.f32 %v8765_v10, %v8767_v23 }
 0x6d9   :  { %8506 = vmatprep.subr.bf16.mxu0 %v13341_v60  ;;  %v8763_v60 = vmax.f32 %v8759_v31, %v8761_v44  ;;  %v8968_v31 = vld [vmem:[#allocation3 + $0x62] sm:$0x1] }
 0x6da   :  { %v13390_v44 = vld [vmem:[%s16665_s7 + $0x448] ss:$16 sps:$4 sm:$0xff]  }
 0x6dc   :  { %8507 = vmatpush1.bf16.msra.mxu0 %v13339_v7  ;;  %v13369_v7 = vld [vmem:[%s16665_s7 + $0x3e8] ss:$16 sps:$4 sm:$0xff]  }
 0x6dd   :  { %8508 = vmatprep.subr.bf16.mxu0 %v13344_v14  ;;  %v8766_v14 = vld [vmem:[#allocation3 + $0x29] sm:$0x1] }
 0x6e0   :  { %8509 = vmatpush1.bf16.msra.mxu0 %v13342_v56  ;;  %v8771_v56 = vmax.f32 %v8763_v60, %v8769_v34  ;;  %v13395_v34 = vld [vmem:[%s16665_s7 + $0x46c] ss:$16 sps:$4 sm:$0xff]   ;;  %v8973_v60 = vld [vmem:[#allocation3 + $0x2a] sm:$0x1] }
 0x6e1   :  { %8510 = vmatprep.subr.bf16.mxu0 %v13347_v43 }
 0x6e2   :  { %v8773_v0 = vpack.c.bf16 %v8771_v56, %v8771_v56  ;;  %v8967_v56 = vld [vmem:[#allocation3 + $0x22] sm:$0x1] }
 0x6e4   :  { %8511 = vmatpush1.bf16.msra.mxu0 %v13345_v62  ;;  %v8794_v46 = vunpack.c.l.b16 %v8773_v0  ;;  %v13404_v0 = vld [vmem:[%s16665_s7 + $0x4c4] ss:$16 sps:$4 sm:$0xff]  }
 0x6e5   :  { %8672 = vmatprep.subr.bf16.mxu0 %v13350_v27  ;;  %v13372_v27 = vld [vmem:[%s16665_s7 + $0x400] ss:$16 sps:$4 sm:$0xff]  }
 0x6e6   :  { %v8795_v55 = vrot.slane %v8794_v46, 7 }
 0x6e7   :  { %11258 = vmatmul.mubr.msk.bf16.vlgmr.msra.gmra.mrb[244].mxu0 %vm7077_vm1, %v8379_v51  ;;  %v8764_v51 = vld [vmem:[#allocation3 + $0x28] sm:$0x1] }
 0x6e8   :  { %8673 = vmatpush1.bf16.msra.mxu0 %v13348_v38  ;;  %8704 = vmatprep.mubr.bf16.mxu0 %v13618_v54  ;;  %v8768_v62 = vmax.f32 %v8764_v51, %v8766_v14  ;;  %v13380_v38 = vld [vmem:[%s16665_s7 + $0x444] ss:$16 sps:$4 sm:$0xff]  }
 0x6e9   :  { %8674 = vmatprep.subr.bf16.mxu0 %v13353_v5  ;;  %v13398_v14 = vld [vmem:[%s16665_s7 + $0x484] ss:$16 sps:$4 sm:$0xff]  }
 0x6ea   :  { %v16182_v49 = vpop.f32.mrb[192].mxu0  ;;  %v8770_v21 = vmax.f32 %v8762_v15, %v8768_v62  ;;  %v13401_v62 = vld [vmem:[%s16665_s7 + $0x4a4] ss:$16 sps:$4 sm:$0xff]   ;;  %v13399_v15 = vld [vmem:[%s16665_s7 + $0x4a0] ss:$16 sps:$4 sm:$0xff]  }
 0x6eb   :  { %v16184_v63 = vpop.f32.mrb[193].mxu0 }
 0x6ec   :  { %8675 = vmatpush1.bf16.msra.mxu0 %v13351_v29  ;;  %v7288_v59 = vpop.f32.mrb[194].mxu0  ;;  %v8772_v29 = vpack.c.bf16 %v8770_v21, %v8770_v21 }
 0x6ed   :  { %v7289_v42 = vpop.f32.mrb[195].mxu0  ;;  %8676 = vmatprep.subr.bf16.mxu0 %v13356_v22 }
 0x6f0   :  { %8677 = vmatpush1.bf16.msra.mxu0 %v13354_v30  ;;  %v13383_v30 = vld [vmem:[%s16665_s7 + $0x464] ss:$16 sps:$4 sm:$0xff]  }
 0x6f1   :  { %v16195_v52 = vpop.f32.mrb[16].mxu1  ;;  %8678 = vmatprep.subr.bf16.mxu0 %v13359_v58  ;;  %v13386_v58 = vld [vmem:[%s16665_s7 + $0x40c] ss:$16 sps:$4 sm:$0xff]  }
 0x6f2   :  { %v16200_v33 = vpop.f32.mrb[17].mxu1 }
 0x6f3   :  { %v10005_v36 = vpop.f32.mrb[18].mxu1 }
 0x6f4   :  { %8679 = vmatpush1.bf16.msra.mxu0 %v13357_v26  ;;  %v10006_v6 = vpop.f32.mrb[19].mxu1 }
 0x6f5   :  { %8713 = vmatprep.subr.bf16.mxu0 %v13362_v35  ;;  %v13389_v6 = vld [vmem:[%s16665_s7 + $0x42c] ss:$16 sps:$4 sm:$0xff]  }
 0x6f7   :  { %11291 = vmatmul.mubr.msk.bf16.vlgmr.msra.gmra.mrb[248].mxu0 %vm7077_vm1, %v8588_v12 }
 0x6f8   :  { %8714 = vmatpush1.bf16.msra.mxu0 %v13360_v61  ;;  %8745 = vmatprep.mubr.bf16.mxu0 %v13618_v54  ;;  %v13387_v61 = vld [vmem:[%s16665_s7 + $0x428] ss:$16 sps:$4 sm:$0xff]  }
 0x6f9   :  { %8715 = vmatprep.subr.bf16.mxu0 %v13365_v48 }
 0x6fa   :  { %v16217_v2 = vpop.f32.mrb[196].mxu0 }
 0x6fb   :  { %v16219_v9 = vpop.f32.mrb[197].mxu0 }
 0x6fc   :  { %v7329_v45 = vpop.f32.mrb[198].mxu0  ;;  %8716 = vmatpush1.bf16.msra.mxu0 %v13363_v50  ;;  %v8974_v50 = vld [vmem:[#allocation3 + $0x6a] sm:$0x1] }
 0x6fd   :  { %v7330_v28 = vpop.f32.mrb[199].mxu0  ;;  %8717 = vmatprep.subr.bf16.mxu0 %v13368_v53  ;;  %v8976_v53 = vld [vmem:[#allocation3 + $0x6b] sm:$0x1] }
 0x6fe   :  { %v8970_v28 = vld [vmem:[#allocation3 + $0x63] sm:$0x1] }
 0x6ff   :  { %v8972_v51 = vmax.f32 %v8968_v31, %v8970_v28  ;;  %v9179_v31 = vld [vmem:[#allocation3 + $0x65] sm:$0x1] }
 0x700   :  { %8718 = vmatpush1.bf16.msra.mxu0 %v13366_v20 }
 0x701   :  { %v16230_v25 = vpop.f32.mrb[20].mxu1  ;;  %8719 = vmatprep.subr.bf16.mxu0 %v13371_v40 }
 0x702   :  { %v16235_v43 = vpop.f32.mrb[21].mxu1 }
 0x703   :  { %v10214_v47 = vpop.f32.mrb[22].mxu1 }
 0x704   :  { %8720 = vmatpush1.bf16.msra.mxu0 %v13369_v7  ;;  %v10215_v39 = vpop.f32.mrb[23].mxu1  ;;  %v8975_v7 = vld [vmem:[#allocation3 + $0x2b] sm:$0x1] }
 0x705   :  { %8881 = vmatprep.subr.bf16.mxu0 %v13374_v32  ;;  %v8977_v11 = vmax.f32 %v8973_v60, %v8975_v7  ;;  %v13396_v47 = vld [vmem:[%s16665_s7 + $0x480] ss:$16 sps:$4 sm:$0xff]   ;;  %v8971_v39 = vmax.f32 %v8967_v56, %v8969_v57  ;;  %v9178_v60 = vld [vmem:[#allocation3 + $0x25] sm:$0x1] }
 0x707   :  { %11292 = vmatmul.mubr.msk.bf16.vlgmr.msra.gmra.mrb[252].mxu0 %vm7077_vm1, %v8588_v12  ;;  %v13392_v12 = vld [vmem:[%s16665_s7 + $0x44c] ss:$16 sps:$4 sm:$0xff]  }
 0x708   :  { %8882 = vmatpush1.bf16.msra.mxu0 %v13372_v27  ;;  %8913 = vmatprep.mubr.bf16.mxu0 %v13618_v54 }
 0x709   :  { %8883 = vmatprep.subr.bf16.mxu0 %v13377_v4  ;;  %v8979_v4 = vmax.f32 %v8971_v39, %v8977_v11 }
 0x70a   :  { %v7456_v5 = vpop.f32.mrb[200].mxu0 }
 0x70b   :  { %v16252_v17 = vadd.f32 %v7456_v5, %v16182_v49  ;;  %v7458_v8 = vpop.f32.mrb[201].mxu0  ;;  %v8793_v49 = vunpack.c.l.b16 %v8772_v29  ;;  %v8981_v5 = vpack.c.bf16 %v8979_v4, %v8979_v4 }
 0x70c   :  { %v16255_v18 = vadd.f32 %v7458_v8, %v16184_v63  ;;  %v7460_v22 = vpop.f32.mrb[202].mxu0  ;;  %8884 = vmatpush1.bf16.msra.mxu0 %v13375_v16  ;;  %v13381_v63 = vld [vmem:[%s16665_s7 + $0x460] ss:$16 sps:$4 sm:$0xff]  }
 0x70d   :  { %v7461_v59 = vpop.f32.mrb[203].mxu0  ;;  %8885 = vmatprep.subr.bf16.mxu0 %v13380_v38  ;;  %v8796_v26 = vsel %vm7164_vm2, %v8795_v55, %v8793_v49  ;;  %v13402_v22 = vld [vmem:[%s16665_s7 + $0x4c0] ss:$16 sps:$4 sm:$0xff]   ;;  %v13410_v55 = vld [vmem:[%s16665_s7 + $0x48c] ss:$16 sps:$4 sm:$0xff]  }
 0x70e   :  { %v8797_v36 = vpack.c.b16 %v8796_v26, %v8796_v26  ;;  %v13407_v59 = vld [vmem:[%s16665_s7 + $0x4e4] ss:$16 sps:$4 sm:$0xff]   ;;  %v13413_v26 = vld [vmem:[%s16665_s7 + $0x4ac] ss:$16 sps:$4 sm:$0xff]  }
 0x710   :  { %8886 = vmatpush1.bf16.msra.mxu0 %v13378_v1 }
 0x711   :  { %v16266_v42 = vpop.f32.mrb[24].mxu1  ;;  %8887 = vmatprep.subr.bf16.mxu0 %v13383_v30 }
 0x712   :  { %v16271_v3 = vpop.f32.mrb[25].mxu1 }
 0x713   :  { %v10423_v24 = vpop.f32.mrb[26].mxu1 }
 0x714   :  { %8888 = vmatpush1.bf16.msra.mxu0 %v13381_v63  ;;  %v10424_v35 = vpop.f32.mrb[27].mxu1  ;;  %v13408_v63 = vld [vmem:[%s16665_s7 + $0x488] ss:$16 sps:$4 sm:$0xff]  }
 0x715   :  { %8922 = vmatprep.subr.bf16.mxu0 %v13386_v58  ;;  %v13411_v24 = vld [vmem:[%s16665_s7 + $0x4a8] ss:$16 sps:$4 sm:$0xff]   ;;  %v13416_v35 = vld [vmem:[%s16665_s7 + $0x4cc] ss:$16 sps:$4 sm:$0xff]  }
 0x717   :  { %11325 = vmatmul.mubr.msk.bf16.vlgmr.msra.gmra.mrb[0].mxu0 %vm7077_vm1, %v8797_v36 }
 0x718   :  { %8923 = vmatpush1.bf16.msra.mxu0 %v13384_v13  ;;  %8954 = vmatprep.mubr.bf16.mxu0 %v13618_v54 }
 0x719   :  { %8924 = vmatprep.subr.bf16.mxu0 %v13389_v6  ;;  %v9185_v6 = vld [vmem:[#allocation3 + $0x6d] sm:$0x1] }
 0x71a   :  { %v7497_v48 = vpop.f32.mrb[204].mxu0 }
 0x71b   :  { %v16289_v10 = vadd.f32 %v7497_v48, %v16217_v2  ;;  %v7499_v23 = vpop.f32.mrb[205].mxu0  ;;  %v8978_v2 = vmax.f32 %v8974_v50, %v8976_v53  ;;  %v9177_v48 = vld [vmem:[#allocation3 + $0x64] sm:$0x1] }
 0x71c   :  { %v16292_v45 = vadd.f32 %v7499_v23, %v16219_v9  ;;  %v7501_v20 = vpop.f32.mrb[206].mxu0  ;;  %8925 = vmatpush1.bf16.msra.mxu0 %v13387_v61  ;;  %v13393_v9 = vld [vmem:[%s16665_s7 + $0x468] ss:$16 sps:$4 sm:$0xff]   ;;  %v9181_v28 = vmax.f32 %v9177_v48, %v9179_v31  ;;  %v9388_v48 = vld [vmem:[#allocation3 + $0x67] sm:$0x1] }
 0x71d   :  { %v7502_v40 = vpop.f32.mrb[207].mxu0  ;;  %8926 = vmatprep.subr.bf16.mxu0 %v13392_v12  ;;  %v8980_v32 = vmax.f32 %v8972_v51, %v8978_v2  ;;  %v13414_v23 = vld [vmem:[%s16665_s7 + $0x4c8] ss:$16 sps:$4 sm:$0xff]   ;;  %v13422_v2 = vld [vmem:[%s16665_s7 + $0x504] ss:$16 sps:$4 sm:$0xff]  }
 0x71e   :  { %v9182_v40 = vld [vmem:[#allocation3 + $0x2c] sm:$0x1] }
 0x71f   :  { %v8982_v27 = vpack.c.bf16 %v8980_v32, %v8980_v32  ;;  %v13425_v32 = vld [vmem:[%s16665_s7 + $0x524] ss:$16 sps:$4 sm:$0xff]  }
 0x720   :  { %8927 = vmatpush1.bf16.msra.mxu0 %v13390_v44  ;;  %v13419_v44 = vld [vmem:[%s16665_s7 + $0x4ec] ss:$16 sps:$4 sm:$0xff]  }
 0x721   :  { %8928 = vmatprep.subr.bf16.mxu0 %v13395_v34  ;;  %v9003_v21 = vunpack.c.l.b16 %v8982_v27  ;;  %v9184_v34 = vld [vmem:[#allocation3 + $0x2d] sm:$0x1] }
 0x722   :  { %v9186_v7 = vmax.f32 %v9182_v40, %v9184_v34  ;;  %v9387_v40 = vld [vmem:[#allocation3 + $0x27] sm:$0x1] }
 0x723   :  { %v9004_v30 = vrot.slane %v9003_v21, 7 }
 0x724   :  { %8929 = vmatpush1.bf16.msra.mxu0 %v13393_v9  ;;  %v9176_v9 = vld [vmem:[#allocation3 + $0x24] sm:$0x1] }
 0x725   :  { %9090 = vmatprep.subr.bf16.mxu0 %v13398_v14  ;;  %v13420_v14 = vld [vmem:[%s16665_s7 + $0x500] ss:$16 sps:$4 sm:$0xff]   ;;  %v9180_v56 = vmax.f32 %v9176_v9, %v9178_v60 }
 0x727   :  { %11326 = vmatmul.mubr.msk.bf16.vlgmr.msra.gmra.mrb[4].mxu0 %vm7077_vm1, %v8797_v36  ;;  %v9183_v36 = vld [vmem:[#allocation3 + $0x6c] sm:$0x1]  ;;  %v9188_v11 = vmax.f32 %v9180_v56, %v9186_v7 }
 0x728   :  { %9091 = vmatpush1.bf16.msra.mxu0 %v13396_v47  ;;  %9122 = vmatprep.mubr.bf16.mxu0 %v13618_v54  ;;  %v13423_v47 = vld [vmem:[%s16665_s7 + $0x520] ss:$16 sps:$4 sm:$0xff]  }
 0x729   :  { %9092 = vmatprep.subr.bf16.mxu0 %v13401_v62  ;;  %v13428_v62 = vld [vmem:[%s16665_s7 + $0x544] ss:$16 sps:$4 sm:$0xff]  }
 0x72a   :  { %v7661_v16 = vpop.f32.mrb[208].mxu0 }
 0x72b   :  { %v16321_v38 = vadd.f32 %v7661_v16, %v16252_v17  ;;  %v7663_v46 = vpop.f32.mrb[209].mxu0  ;;  %v9002_v17 = vunpack.c.l.b16 %v8981_v5 }
 0x72c   :  { %v16324_v8 = vadd.f32 %v7663_v46, %v16255_v18  ;;  %v7665_v29 = vpop.f32.mrb[210].mxu0  ;;  %9093 = vmatpush1.bf16.msra.mxu0 %v13399_v15  ;;  %v13405_v18 = vld [vmem:[%s16665_s7 + $0x4e0] ss:$16 sps:$4 sm:$0xff]  }
 0x72d   :  { %v7666_v1 = vpop.f32.mrb[211].mxu0  ;;  %9094 = vmatprep.subr.bf16.mxu0 %v13404_v0  ;;  %v9005_v49 = vsel %vm7164_vm2, %v9004_v30, %v9002_v17  ;;  %v9190_v0 = vpack.c.bf16 %v9188_v11, %v9188_v11  ;;  %v13426_v46 = vld [vmem:[%s16665_s7 + $0x540] ss:$16 sps:$4 sm:$0xff]   ;;  %v13431_v29 = vld [vmem:[%s16665_s7 + $0x564] ss:$16 sps:$4 sm:$0xff]  }
 0x72e   :  { %v9006_v58 = vpack.c.b16 %v9005_v49, %v9005_v49  ;;  %v13434_v1 = vld [vmem:[%s16665_s7 + $0x50c] ss:$16 sps:$4 sm:$0xff]   ;;  %v13432_v30 = vld [vmem:[%s16665_s7 + $0x508] ss:$16 sps:$4 sm:$0xff]  }
 0x72f   :  { %v13440_v49 = vld [vmem:[%s16665_s7 + $0x54c] ss:$16 sps:$4 sm:$0xff]  }
 0x730   :  { %9095 = vmatpush1.bf16.msra.mxu0 %v13402_v22 }
 0x731   :  { %9096 = vmatprep.subr.bf16.mxu0 %v13407_v59 }
 0x734   :  { %9097 = vmatpush1.bf16.msra.mxu0 %v13405_v18  ;;  %v13437_v18 = vld [vmem:[%s16665_s7 + $0x52c] ss:$16 sps:$4 sm:$0xff]  }
 0x735   :  { %9131 = vmatprep.subr.bf16.mxu0 %v13410_v55  ;;  %v13435_v55 = vld [vmem:[%s16665_s7 + $0x528] ss:$16 sps:$4 sm:$0xff]  }
 0x737   :  { %11359 = vmatmul.mubr.msk.bf16.vlgmr.msra.gmra.mrb[8].mxu0 %vm7077_vm1, %v9006_v58 }
 0x738   :  { %9132 = vmatpush1.bf16.msra.mxu0 %v13408_v63  ;;  %9163 = vmatprep.mubr.bf16.mxu0 %v13618_v54 }
 0x739   :  { %9133 = vmatprep.subr.bf16.mxu0 %v13413_v26  ;;  %v9394_v26 = vld [vmem:[#allocation3 + $0x6f] sm:$0x1] }
 0x73a   :  { %v7702_v13 = vpop.f32.mrb[212].mxu0 }
 0x73b   :  { %v16354_v61 = vadd.f32 %v7702_v13, %v16289_v10  ;;  %v7704_v12 = vpop.f32.mrb[213].mxu0  ;;  %v9187_v10 = vmax.f32 %v9183_v36, %v9185_v6  ;;  %v9386_v13 = vld [vmem:[#allocation3 + $0x66] sm:$0x1] }
 0x73c   :  { %v16357_v50 = vadd.f32 %v7704_v12, %v16292_v45  ;;  %v7706_v53 = vpop.f32.mrb[214].mxu0  ;;  %9134 = vmatpush1.bf16.msra.mxu0 %v13411_v24  ;;  %v13417_v45 = vld [vmem:[%s16665_s7 + $0x4e8] ss:$16 sps:$4 sm:$0xff]   ;;  %v9390_v31 = vmax.f32 %v9386_v13, %v9388_v48 }
 0x73d   :  { %v7707_v20 = vpop.f32.mrb[215].mxu0  ;;  %9135 = vmatprep.subr.bf16.mxu0 %v13416_v35  ;;  %v9189_v51 = vmax.f32 %v9181_v28, %v9187_v10  ;;  %v13438_v12 = vld [vmem:[%s16665_s7 + $0x548] ss:$16 sps:$4 sm:$0xff]   ;;  %v13446_v10 = vld [vmem:[%s16665_s7 + $0x584] ss:$16 sps:$4 sm:$0xff]  }
 0x73e   :  { %v9391_v20 = vld [vmem:[#allocation3 + $0x2e] sm:$0x1]  ;;  %v9597_v13 = vld [vmem:[#allocation3 + $0x71] sm:$0x1] }
 0x73f   :  { %v9191_v57 = vpack.c.bf16 %v9189_v51, %v9189_v51  ;;  %v13449_v51 = vld [vmem:[%s16665_s7 + $0x5a4] ss:$16 sps:$4 sm:$0xff]  }
 0x740   :  { %9136 = vmatpush1.bf16.msra.mxu0 %v13414_v23  ;;  %v13443_v23 = vld [vmem:[%s16665_s7 + $0x56c] ss:$16 sps:$4 sm:$0xff]  }
 0x741   :  { %9137 = vmatprep.subr.bf16.mxu0 %v13419_v44  ;;  %v9212_v39 = vunpack.c.l.b16 %v9191_v57  ;;  %v9393_v44 = vld [vmem:[#allocation3 + $0x2f] sm:$0x1] }
 0x742   :  { %v9395_v34 = vmax.f32 %v9391_v20, %v9393_v44  ;;  %v9596_v20 = vld [vmem:[#allocation3 + $0x31] sm:$0x1] }
 0x743   :  { %v9213_v22 = vrot.slane %v9212_v39, 7 }
 0x744   :  { %9138 = vmatpush1.bf16.msra.mxu0 %v13417_v45  ;;  %v9385_v45 = vld [vmem:[#allocation3 + $0x26] sm:$0x1] }
 0x745   :  { %9299 = vmatprep.subr.bf16.mxu0 %v13422_v2  ;;  %v13444_v2 = vld [vmem:[%s16665_s7 + $0x580] ss:$16 sps:$4 sm:$0xff]   ;;  %v9389_v9 = vmax.f32 %v9385_v45, %v9387_v40 }
 0x747   :  { %11360 = vmatmul.mubr.msk.bf16.vlgmr.msra.gmra.mrb[12].mxu0 %vm7077_vm1, %v9006_v58  ;;  %v9392_v58 = vld [vmem:[#allocation3 + $0x6e] sm:$0x1]  ;;  %v9397_v7 = vmax.f32 %v9389_v9, %v9395_v34 }
 0x748   :  { %9300 = vmatpush1.bf16.msra.mxu0 %v13420_v14  ;;  %9331 = vmatprep.mubr.bf16.mxu0 %v13618_v54  ;;  %v13447_v14 = vld [vmem:[%s16665_s7 + $0x5a0] ss:$16 sps:$4 sm:$0xff]  }
 0x749   :  { %9301 = vmatprep.subr.bf16.mxu0 %v13425_v32  ;;  %v13452_v32 = vld [vmem:[%s16665_s7 + $0x5c4] ss:$16 sps:$4 sm:$0xff]  }
 0x74a   :  { %v7870_v27 = vpop.f32.mrb[216].mxu0 }
 0x74b   :  { %v16386_v4 = vadd.f32 %v7870_v27, %v16321_v38  ;;  %v7872_v15 = vpop.f32.mrb[217].mxu0  ;;  %v9211_v38 = vunpack.c.l.b16 %v9190_v0 }
 0x74c   :  { %v16389_v21 = vadd.f32 %v7872_v15, %v16324_v8  ;;  %v7874_v16 = vpop.f32.mrb[218].mxu0  ;;  %9302 = vmatpush1.bf16.msra.mxu0 %v13423_v47  ;;  %v13429_v8 = vld [vmem:[%s16665_s7 + $0x560] ss:$16 sps:$4 sm:$0xff]  }
 0x74d   :  { %v7875_v5 = vpop.f32.mrb[219].mxu0  ;;  %9303 = vmatprep.subr.bf16.mxu0 %v13428_v62  ;;  %v9214_v59 = vsel %vm7164_vm2, %v9213_v22, %v9211_v38  ;;  %v9399_v62 = vpack.c.bf16 %v9397_v7, %v9397_v7  ;;  %v13450_v15 = vld [vmem:[%s16665_s7 + $0x5c0] ss:$16 sps:$4 sm:$0xff]   ;;  %v13455_v16 = vld [vmem:[%s16665_s7 + $0x5e4] ss:$16 sps:$4 sm:$0xff]  }
 0x74e   :  { %v9215_v17 = vpack.c.b16 %v9214_v59, %v9214_v59  ;;  %v13458_v5 = vld [vmem:[%s16665_s7 + $0x58c] ss:$16 sps:$4 sm:$0xff]   ;;  %v13456_v22 = vld [vmem:[%s16665_s7 + $0x588] ss:$16 sps:$4 sm:$0xff]  }
 0x74f   :  { %v13464_v59 = vld [vmem:[%s16665_s7 + $0x5cc] ss:$16 sps:$4 sm:$0xff]  }
 0x750   :  { %9304 = vmatpush1.bf16.msra.mxu0 %v13426_v46 }
 0x751   :  { %9305 = vmatprep.subr.bf16.mxu0 %v13431_v29 }
 0x754   :  { %9306 = vmatpush1.bf16.msra.mxu0 %v13429_v8  ;;  %v13461_v8 = vld [vmem:[%s16665_s7 + $0x5ac] ss:$16 sps:$4 sm:$0xff]  }
 0x755   :  { %9340 = vmatprep.subr.bf16.mxu0 %v13434_v1  ;;  %v13459_v1 = vld [vmem:[%s16665_s7 + $0x5a8] ss:$16 sps:$4 sm:$0xff]  }
 0x757   :  { %11393 = vmatmul.mubr.msk.bf16.vlgmr.msra.gmra.mrb[16].mxu0 %vm7077_vm1, %v9215_v17 }
 0x758   :  { %9341 = vmatpush1.bf16.msra.mxu0 %v13432_v30  ;;  %9372 = vmatprep.mubr.bf16.mxu0 %v13618_v54 }
 0x759   :  { %9342 = vmatprep.subr.bf16.mxu0 %v13437_v18  ;;  %v9603_v18 = vld [vmem:[#allocation3 + $0x79] sm:$0x1] }
 0x75a   :  { %v7911_v63 = vpop.f32.mrb[220].mxu0 }
 0x75b   :  { %v16419_v24 = vadd.f32 %v7911_v63, %v16354_v61  ;;  %v7913_v35 = vpop.f32.mrb[221].mxu0  ;;  %v9396_v61 = vmax.f32 %v9392_v58, %v9394_v26  ;;  %v9595_v63 = vld [vmem:[#allocation3 + $0x70] sm:$0x1] }
 0x75c   :  { %v16422_v36 = vadd.f32 %v7913_v35, %v16357_v50  ;;  %v7915_v6 = vpop.f32.mrb[222].mxu0  ;;  %9343 = vmatpush1.bf16.msra.mxu0 %v13435_v55  ;;  %v13441_v50 = vld [vmem:[%s16665_s7 + $0x568] ss:$16 sps:$4 sm:$0xff]   ;;  %v9599_v48 = vmax.f32 %v9595_v63, %v9597_v13  ;;  %v13492_v63 = vld [vmem:[%s16665_s7 + $0x680] ss:$16 sps:$4 sm:$0xff]  }
 0x75d   :  { %v7916_v53 = vpop.f32.mrb[223].mxu0  ;;  %9344 = vmatprep.subr.bf16.mxu0 %v13440_v49  ;;  %v9398_v28 = vmax.f32 %v9390_v31, %v9396_v61  ;;  %v13462_v35 = vld [vmem:[%s16665_s7 + $0x5c8] ss:$16 sps:$4 sm:$0xff]   ;;  %v13470_v61 = vld [vmem:[%s16665_s7 + $0x604] ss:$16 sps:$4 sm:$0xff]  }
 0x75e   :  { %v9600_v53 = vld [vmem:[#allocation3 + $0x38] sm:$0x1] }
 0x75f   :  { %v9400_v60 = vpack.c.bf16 %v9398_v28, %v9398_v28  ;;  %v13473_v28 = vld [vmem:[%s16665_s7 + $0x624] ss:$16 sps:$4 sm:$0xff]  }
 0x760   :  { %9345 = vmatpush1.bf16.msra.mxu0 %v13438_v12  ;;  %v13467_v12 = vld [vmem:[%s16665_s7 + $0x5ec] ss:$16 sps:$4 sm:$0xff]  }
 0x761   :  { %9346 = vmatprep.subr.bf16.mxu0 %v13443_v23  ;;  %v9421_v56 = vunpack.c.l.b16 %v9400_v60  ;;  %v9602_v23 = vld [vmem:[#allocation3 + $0x39] sm:$0x1] }
 0x762   :  { %v9604_v44 = vmax.f32 %v9600_v53, %v9602_v23  ;;  %v13503_v23 = vld [vmem:[%s16665_s7 + $0x6e4] ss:$16 sps:$4 sm:$0xff]  }
 0x763   :  { %v9422_v46 = vrot.slane %v9421_v56, 7 }
 0x764   :  { %9347 = vmatpush1.bf16.msra.mxu0 %v13441_v50  ;;  %v9594_v50 = vld [vmem:[#allocation3 + $0x30] sm:$0x1] }
 0x765   :  { %9508 = vmatprep.subr.bf16.mxu0 %v13446_v10  ;;  %v13468_v10 = vld [vmem:[%s16665_s7 + $0x600] ss:$16 sps:$4 sm:$0xff]   ;;  %v9598_v45 = vmax.f32 %v9594_v50, %v9596_v20  ;;  %v13509_v20 = vld [vmem:[%s16665_s7 + $0x724] ss:$16 sps:$4 sm:$0xff]  }
 0x766   :  { %v13504_v50 = vld [vmem:[%s16665_s7 + $0x700] ss:$16 sps:$4 sm:$0xff]  }
 0x767   :  { %11394 = vmatmul.mubr.msk.bf16.vlgmr.msra.gmra.mrb[20].mxu0 %vm7077_vm1, %v9215_v17  ;;  %v9601_v17 = vld [vmem:[#allocation3 + $0x78] sm:$0x1]  ;;  %v9606_v34 = vmax.f32 %v9598_v45, %v9604_v44 }
 0x768   :  { %9509 = vmatpush1.bf16.msra.mxu0 %v13444_v2  ;;  %9540 = vmatprep.mubr.bf16.mxu0 %v13618_v54  ;;  %v13471_v2 = vld [vmem:[%s16665_s7 + $0x620] ss:$16 sps:$4 sm:$0xff]  }
 0x769   :  { %9510 = vmatprep.subr.bf16.mxu0 %v13449_v51  ;;  %v13476_v51 = vld [vmem:[%s16665_s7 + $0x644] ss:$16 sps:$4 sm:$0xff]   ;;  %v13507_v44 = vld [vmem:[%s16665_s7 + $0x720] ss:$16 sps:$4 sm:$0xff]  }
 0x76a   :  { %v8079_v57 = vpop.f32.mrb[224].mxu0 }
 0x76b   :  { %v16451_v11 = vadd.f32 %v8079_v57, %v16386_v4  ;;  %v8081_v47 = vpop.f32.mrb[225].mxu0  ;;  %v9420_v4 = vunpack.c.l.b16 %v9399_v62 }
 0x76c   :  { %v16454_v39 = vadd.f32 %v8081_v47, %v16389_v21  ;;  %v8083_v27 = vpop.f32.mrb[226].mxu0  ;;  %9511 = vmatpush1.bf16.msra.mxu0 %v13447_v14  ;;  %v13453_v21 = vld [vmem:[%s16665_s7 + $0x5e0] ss:$16 sps:$4 sm:$0xff]  }
 0x76d   :  { %v8084_v0 = vpop.f32.mrb[227].mxu0  ;;  %9512 = vmatprep.subr.bf16.mxu0 %v13452_v32  ;;  %v9423_v29 = vsel %vm7164_vm2, %v9422_v46, %v9420_v4  ;;  %v9608_v32 = vpack.c.bf16 %v9606_v34, %v9606_v34  ;;  %v13474_v47 = vld [vmem:[%s16665_s7 + $0x640] ss:$16 sps:$4 sm:$0xff]   ;;  %v13479_v27 = vld [vmem:[%s16665_s7 + $0x664] ss:$16 sps:$4 sm:$0xff]  }
 0x76e   :  { %v9424_v38 = vpack.c.b16 %v9423_v29, %v9423_v29  ;;  %v13480_v46 = vld [vmem:[%s16665_s7 + $0x608] ss:$16 sps:$4 sm:$0xff]   ;;  %v13488_v29 = vld [vmem:[%s16665_s7 + $0x64c] ss:$16 sps:$4 sm:$0xff]  }
 0x76f   :  { %v9629_v0 = vunpack.c.l.b16 %v9608_v32  ;;  %v13521_v32 = vld [vmem:[%s16665_s7 + $0x7a4] ss:$16 sps:$4 sm:$0xff]  }
 0x770   :  { %9513 = vmatpush1.bf16.msra.mxu0 %v13450_v15 }
 0x771   :  { %9514 = vmatprep.subr.bf16.mxu0 %v13455_v16 }
 0x774   :  { %9515 = vmatpush1.bf16.msra.mxu0 %v13453_v21  ;;  %v13485_v21 = vld [vmem:[%s16665_s7 + $0x62c] ss:$16 sps:$4 sm:$0xff]  }
 0x775   :  { %9549 = vmatprep.subr.bf16.mxu0 %v13458_v5  ;;  %v13483_v5 = vld [vmem:[%s16665_s7 + $0x628] ss:$16 sps:$4 sm:$0xff]  }
 0x777   :  { %11427 = vmatmul.mubr.msk.bf16.vlgmr.msra.gmra.mrb[24].mxu0 %vm7077_vm1, %v9424_v38 }
 0x778   :  { %9550 = vmatpush1.bf16.msra.mxu0 %v13456_v22  ;;  %9581 = vmatprep.mubr.bf16.mxu0 %v13618_v54 }
 0x779   :  { %9551 = vmatprep.subr.bf16.mxu0 %v13461_v8 }
 0x77a   :  { %v8120_v30 = vpop.f32.mrb[228].mxu0 }
 0x77b   :  { %v16484_v55 = vadd.f32 %v8120_v30, %v16419_v24  ;;  %v8122_v49 = vpop.f32.mrb[229].mxu0  ;;  %v9605_v24 = vmax.f32 %v9601_v17, %v9603_v18  ;;  %v13486_v30 = vld [vmem:[%s16665_s7 + $0x648] ss:$16 sps:$4 sm:$0xff]   ;;  %v13491_v18 = vld [vmem:[%s16665_s7 + $0x66c] ss:$16 sps:$4 sm:$0xff]  }
 0x77c   :  { %v16487_v58 = vadd.f32 %v8122_v49, %v16422_v36  ;;  %v8124_v26 = vpop.f32.mrb[230].mxu0  ;;  %9552 = vmatpush1.bf16.msra.mxu0 %v13459_v1  ;;  %v13465_v36 = vld [vmem:[%s16665_s7 + $0x5e8] ss:$16 sps:$4 sm:$0xff]   ;;  %v13494_v49 = vld [vmem:[%s16665_s7 + $0x684] ss:$16 sps:$4 sm:$0xff]  }
 0x77d   :  { %v8125_v6 = vpop.f32.mrb[231].mxu0  ;;  %9553 = vmatprep.subr.bf16.mxu0 %v13464_v59  ;;  %v9607_v31 = vmax.f32 %v9599_v48, %v9605_v24  ;;  %v13495_v26 = vld [vmem:[%s16665_s7 + $0x6a0] ss:$16 sps:$4 sm:$0xff]  }
 0x77f   :  { %v9609_v40 = vpack.c.bf16 %v9607_v31, %v9607_v31  ;;  %v13506_v31 = vld [vmem:[%s16665_s7 + $0x704] ss:$16 sps:$4 sm:$0xff]  }
 0x780   :  { %9554 = vmatpush1.bf16.msra.mxu0 %v13462_v35  ;;  %v13500_v35 = vld [vmem:[%s16665_s7 + $0x6c4] ss:$16 sps:$4 sm:$0xff]  }
 0x781   :  { %9555 = vmatprep.subr.bf16.mxu0 %v13467_v12  ;;  %v9630_v9 = vunpack.c.l.b16 %v9609_v40 }
 0x783   :  { %v9631_v15 = vrot.slane %v9630_v9, 7  ;;  %v13515_v9 = vld [vmem:[%s16665_s7 + $0x764] ss:$16 sps:$4 sm:$0xff]  }
 0x784   :  { %9556 = vmatpush1.bf16.msra.mxu0 %v13465_v36  ;;  %v13498_v36 = vld [vmem:[%s16665_s7 + $0x6c0] ss:$16 sps:$4 sm:$0xff]  }
 0x785   :  { %9717 = vmatprep.subr.bf16.mxu0 %v13470_v61  ;;  %v9632_v16 = vsel %vm7164_vm2, %v9631_v15, %v9629_v0  ;;  %v13501_v61 = vld [vmem:[%s16665_s7 + $0x6e0] ss:$16 sps:$4 sm:$0xff]  }
 0x786   :  { %v9633_v4 = vpack.c.b16 %v9632_v16, %v9632_v16 }
 0x787   :  { %11428 = vmatmul.mubr.msk.bf16.vlgmr.msra.gmra.mrb[28].mxu0 %vm7077_vm1, %v9424_v38 }
 0x788   :  { %9718 = vmatpush1.bf16.msra.mxu0 %v13468_v10  ;;  %9749 = vmatprep.mubr.bf16.mxu0 %v13618_v54  ;;  %v13512_v10 = vld [vmem:[%s16665_s7 + $0x744] ss:$16 sps:$4 sm:$0xff]  }
 0x789   :  { %9719 = vmatprep.subr.bf16.mxu0 %v13473_v28 }
 0x78a   :  { %v8288_v60 = vpop.f32.mrb[232].mxu0 }
 0x78b   :  { %v8336_v7 = vadd.f32 %v8288_v60, %v16451_v11  ;;  %v8290_v14 = vpop.f32.mrb[233].mxu0  ;;  %v13477_v11 = vld [vmem:[%s16665_s7 + $0x660] ss:$16 sps:$4 sm:$0xff]  }
 0x78c   :  { %v8337_v56 = vadd.f32 %v8290_v14, %v16454_v39  ;;  %v8292_v57 = vpop.f32.mrb[234].mxu0  ;;  %9720 = vmatpush1.bf16.msra.mxu0 %v13471_v2  ;;  %v13482_v39 = vld [vmem:[%s16665_s7 + $0x60c] ss:$16 sps:$4 sm:$0xff]   ;;  %v13513_v60 = vld [vmem:[%s16665_s7 + $0x760] ss:$16 sps:$4 sm:$0xff]  }
 0x78d   :  { %v8293_v62 = vpop.f32.mrb[235].mxu0  ;;  %9721 = vmatprep.subr.bf16.mxu0 %v13476_v51  ;;  %v13516_v14 = vld [vmem:[%s16665_s7 + $0x780] ss:$16 sps:$4 sm:$0xff]   ;;  %v13524_v57 = vld [vmem:[%s16665_s7 + $0x7c4] ss:$16 sps:$4 sm:$0xff]  }
 0x790   :  { %9722 = vmatpush1.bf16.msra.mxu0 %v13474_v47 }
 0x791   :  { %9723 = vmatprep.subr.bf16.mxu0 %v13479_v27 }
 0x794   :  { %9724 = vmatpush1.bf16.msra.mxu0 %v13477_v11 }
 0x795   :  { %9758 = vmatprep.subr.bf16.mxu0 %v13482_v39  ;;  %v13525_v39 = vld [vmem:[%s16665_s7 + $0x7e0] ss:$16 sps:$4 sm:$0xff]  }
 0x797   :  { %11461 = vmatmul.mubr.msk.bf16.vlgmr.msra.gmra.mrb[32].mxu0 %vm7077_vm1, %v9633_v4 }
 0x798   :  { %9759 = vmatpush1.bf16.msra.mxu0 %v13480_v46  ;;  %9790 = vmatprep.mubr.bf16.mxu0 %v13618_v54 }
 0x799   :  { %9760 = vmatprep.subr.bf16.mxu0 %v13485_v21 }
 0x79a   :  { %v8329_v22 = vpop.f32.mrb[236].mxu0 }
 0x79b   :  { %v8338_v38 = vadd.f32 %v8329_v22, %v16484_v55  ;;  %v8331_v8 = vpop.f32.mrb[237].mxu0  ;;  %v13489_v55 = vld [vmem:[%s16665_s7 + $0x668] ss:$16 sps:$4 sm:$0xff]  }
 0x79c   :  { %v8339_v1 = vadd.f32 %v8331_v8, %v16487_v58  ;;  %v8333_v59 = vpop.f32.mrb[238].mxu0  ;;  %9761 = vmatpush1.bf16.msra.mxu0 %v13483_v5  ;;  %v13497_v58 = vld [vmem:[%s16665_s7 + $0x6a4] ss:$16 sps:$4 sm:$0xff]  }
 0x79d   :  { %v8334_v17 = vpop.f32.mrb[239].mxu0  ;;  %9762 = vmatprep.subr.bf16.mxu0 %v13488_v29 }
 0x7a0   :  { %9763 = vmatpush1.bf16.msra.mxu0 %v13486_v30 }
 0x7a1   :  { %9764 = vmatprep.subr.bf16.mxu0 %v13491_v18 }
 0x7a4   :  { %9765 = vmatpush1.bf16.msra.mxu0 %v13489_v55 }
 0x7a5   :  { %9926 = vmatprep.subr.bf16.mxu0 %v13494_v49 }
 0x7a7   :  { %11462 = vmatmul.mubr.msk.bf16.vlgmr.msra.gmra.mrb[36].mxu0 %vm7077_vm1, %v9633_v4 }
 0x7a8   :  { %9927 = vmatpush1.bf16.msra.mxu0 %v13492_v63  ;;  %9958 = vmatprep.mubr.bf16.mxu0 %v13618_v54 }
 0x7a9   :  { %9928 = vmatprep.subr.bf16.mxu0 %v13497_v58 }
 0x7aa   :  { %v8497_v13 = vpop.f32.mrb[240].mxu0 }
 0x7ab   :  { %v8545_v6 = vadd.f32 %v8497_v13, %v8336_v7  ;;  %v8499_v12 = vpop.f32.mrb[241].mxu0  ;;  %v13518_v7 = vld [vmem:[%s16665_s7 + $0x784] ss:$16 sps:$4 sm:$0xff]  }
 0x7ac   :  { %v8546_v24 = vadd.f32 %v8499_v12, %v8337_v56  ;;  %v8501_v48 = vpop.f32.mrb[242].mxu0  ;;  %9929 = vmatpush1.bf16.msra.mxu0 %v13495_v26  ;;  %v13519_v56 = vld [vmem:[%s16665_s7 + $0x7a0] ss:$16 sps:$4 sm:$0xff]  }
 0x7ad   :  { %v8502_v53 = vpop.f32.mrb[243].mxu0  ;;  %9930 = vmatprep.subr.bf16.mxu0 %v13500_v35 }
 0x7b0   :  { %9931 = vmatpush1.bf16.msra.mxu0 %v13498_v36 }
 0x7b1   :  { %9932 = vmatprep.subr.bf16.mxu0 %v13503_v23 }
 0x7b4   :  { %9933 = vmatpush1.bf16.msra.mxu0 %v13501_v61 }
 0x7b5   :  { %10135 = vmatprep.subr.bf16.mxu0 %v13506_v31 }
 0x7b7   :  { %11495 = vmatmul.mubr.msk.bf16.vlgmr.msra.gmra.mrb[40].mxu0 %vm7077_vm1, %v15782_v19  ;;  %v13510_v19 = vld [vmem:[%s16665_s7 + $0x740] ss:$16 sps:$4 sm:$0xff]  }
 0x7b8   :  { %10136 = vmatpush1.bf16.msra.mxu0 %v13504_v50  ;;  %10167 = vmatprep.mubr.bf16.mxu0 %v13618_v54 }
 0x7b9   :  { %10137 = vmatprep.subr.bf16.mxu0 %v13509_v20 }
 0x7ba   :  { %v8538_v28 = vpop.f32.mrb[244].mxu0 }
 0x7bb   :  { %v8547_v45 = vadd.f32 %v8538_v28, %v8338_v38  ;;  %v8540_v40 = vpop.f32.mrb[245].mxu0 }
 0x7bc   :  { %v8548_v34 = vadd.f32 %v8540_v40, %v8339_v1  ;;  %v8542_v2 = vpop.f32.mrb[246].mxu0  ;;  %10138 = vmatpush1.bf16.msra.mxu0 %v13507_v44 }
 0x7bd   :  { %v8543_v51 = vpop.f32.mrb[247].mxu0  ;;  %10139 = vmatprep.subr.bf16.mxu0 %v13512_v10 }
 0x7c0   :  { %10140 = vmatpush1.bf16.msra.mxu0 %v13510_v19 }
 0x7c1   :  { %10141 = vmatprep.subr.bf16.mxu0 %v13515_v9 }
 0x7c4   :  { %10142 = vmatpush1.bf16.msra.mxu0 %v13513_v60 }
 0x7c5   :  { %10344 = vmatprep.subr.bf16.mxu0 %v13518_v7 }
 0x7c7   :  { %11529 = vmatmul.mubr.msk.bf16.vlgmr.msra.gmra.mrb[44].mxu0 %vm7077_vm1, %v15836_v37  ;;  %v13522_v37 = vld [vmem:[%s16665_s7 + $0x7c0] ss:$16 sps:$4 sm:$0xff]  }
 0x7c8   :  { %10345 = vmatpush1.bf16.msra.mxu0 %v13516_v14  ;;  %10376 = vmatprep.mubr.bf16.mxu0 %v13618_v54  ;;  %v13527_v54 = vld [vmem:[%s16665_s7 + $0x7e4] ss:$16 sps:$4 sm:$0xff]  }
 0x7c9   :  { %10346 = vmatprep.subr.bf16.mxu0 %v13521_v32 }
 0x7ca   :  { %v8706_v47 = vpop.f32.mrb[248].mxu0 }
 0x7cb   :  { %v8754_v62 = vadd.f32 %v8706_v47, %v8545_v6  ;;  %v8708_v27 = vpop.f32.mrb[249].mxu0 }
 0x7cc   :  { %v8755_v15 = vadd.f32 %v8708_v27, %v8546_v24  ;;  %v8710_v0 = vpop.f32.mrb[250].mxu0  ;;  %10347 = vmatpush1.bf16.msra.mxu0 %v13519_v56 }
 0x7cd   :  { %v8711_v11 = vpop.f32.mrb[251].mxu0  ;;  %10348 = vmatprep.subr.bf16.mxu0 %v13524_v57 }
 0x7d0   :  { %10349 = vmatpush1.bf16.msra.mxu0 %v13522_v37 }
 0x7d1   :  { %10350 = vmatprep.subr.bf16.mxu0 %v13527_v54 }
 0x7d4   :  { %10351 = vmatpush1.bf16.msra.mxu0 %v13525_v39 }
 0x7d7   :  { %11563 = vmatmul.mubr.msk.bf16.vlgmr.msra.gmra.mrb[48].mxu0 %vm7077_vm1, %v15887_v41 }
 0x7da   :  { %v8747_v16 = vpop.f32.mrb[252].mxu0 }
 0x7db   :  { %v8756_v46 = vadd.f32 %v8747_v16, %v8547_v45  ;;  %v8749_v4 = vpop.f32.mrb[253].mxu0 }
 0x7dc   :  { %v8757_v21 = vadd.f32 %v8749_v4, %v8548_v34  ;;  %v8751_v5 = vpop.f32.mrb[254].mxu0  ;;  %v10432_v4 = vlaneseq }
 0x7dd   :  { %v8752_v29 = vpop.f32.mrb[255].mxu0 }
 0x7ea   :  { %v8915_v22 = vpop.f32.mrb[0].mxu0 }
 0x7eb   :  { %v8963_v38 = vadd.f32 %v8915_v22, %v8754_v62  ;;  %v8917_v8 = vpop.f32.mrb[1].mxu0 }
 0x7ec   :  { %v8964_v1 = vadd.f32 %v8917_v8, %v8755_v15  ;;  %v8919_v59 = vpop.f32.mrb[2].mxu0 }
 0x7ed   :  { %v8920_v30 = vpop.f32.mrb[3].mxu0  ;;  %v10430_v59 = vld [vmem:[%s16666_s8] sm:$0xf]  ;;  %s13620_s8 = smov [#allocation4]  }
 0x7ee   :  { %s10485_s6 = sshll.u32 %s13620_s8, 4  ;;  %s10486_s6 = int_to_ptr.vmem [resolvable:$true] %s10485_s6 }
 0x7ef   :  { %s13594_s30 = scalar_lea.vmem %s10486_s6, 128  ;;  %p13599_p1 = scmp.lt.s32.totalorder %s10486_s6, %s10486_s6 }
 0x7f0   :  { %p13595_p0 = scmp.ne.s32.totalorder %s10486_s6, %s13594_s30  ;;  %p13600_p2 = scmp.lt.s32.totalorder %s13594_s30, %s13594_s30 }
 0x7f2   :  { %p13601_p3 = por %p13600_p2, %p13599_p1 }
 0x7f4   :  { %p13602_p4 = pnand %p13601_p3, %p13595_p0 }
 0x7fa   :  { %v8956_v17 = vpop.f32.mrb[4].mxu0 }
 0x7fb   :  { %v8965_v18 = vadd.f32 %v8956_v17, %v8756_v46  ;;  %v8958_v55 = vpop.f32.mrb[5].mxu0 }
 0x7fc   :  { %v8966_v49 = vadd.f32 %v8958_v55, %v8757_v21  ;;  %v8960_v63 = vpop.f32.mrb[6].mxu0  ;;  %v10433_v21 = vshrl.u32 %v10432_v4, 7 }
 0x7fd   :  { %v8961_v58 = vpop.f32.mrb[7].mxu0 }
 0x7fe   :  { %v10446_v30 = vsub.s32 3, %v10433_v21 }
 0x80a   :  { %v9124_v26 = vpop.f32.mrb[8].mxu0 }
 0x80b   :  { %v9172_v41 = vadd.f32 %v9124_v26, %v8963_v38  ;;  %v9126_v35 = vpop.f32.mrb[9].mxu0  ;;  %v10442_v38 = vsub.s32 2, %v10433_v21  ;;  %v10447_v26 = vrot.slane %v10430_v59, %v10446_v30 }
 0x80c   :  { %v9173_v13 = vadd.f32 %v9126_v35, %v8964_v1  ;;  %v9128_v6 = vpop.f32.mrb[10].mxu0 }
 0x80d   :  { %v9129_v12 = vpop.f32.mrb[11].mxu0  ;;  %v10443_v63 = vrot.slane %v10430_v59, %v10442_v38 }
 0x81a   :  { %v9165_v24 = vpop.f32.mrb[12].mxu0 }
 0x81b   :  { %v9174_v48 = vadd.f32 %v9165_v24, %v8965_v18  ;;  %v9167_v36 = vpop.f32.mrb[13].mxu0 }
 0x81c   :  { %v9175_v53 = vadd.f32 %v9167_v36, %v8966_v49  ;;  %v9169_v23 = vpop.f32.mrb[14].mxu0 }
 0x81d   :  { %v9170_v61 = vpop.f32.mrb[15].mxu0 }
 0x82a   :  { %v9333_v31 = vpop.f32.mrb[16].mxu0 }
 0x82b   :  { %v9381_v50 = vadd.f32 %v9333_v31, %v9172_v41  ;;  %v9335_v20 = vpop.f32.mrb[17].mxu0 }
 0x82c   :  { %v9382_v44 = vadd.f32 %v9335_v20, %v9173_v13  ;;  %v9337_v10 = vpop.f32.mrb[18].mxu0  ;;  %v10434_v20 = vsub.s32 0, %v10433_v21 }
 0x82d   :  { %v9338_v28 = vpop.f32.mrb[19].mxu0 }
 0x83a   :  { %v9374_v45 = vpop.f32.mrb[20].mxu0 }
 0x83b   :  { %v9383_v40 = vadd.f32 %v9374_v45, %v9174_v48  ;;  %v9376_v34 = vpop.f32.mrb[21].mxu0 }
 0x83c   :  { %v9384_v2 = vadd.f32 %v9376_v34, %v9175_v53  ;;  %v9378_v19 = vpop.f32.mrb[22].mxu0 }
 0x83d   :  { %v9379_v51 = vpop.f32.mrb[23].mxu0 }
 0x84a   :  { %v9542_v9 = vpop.f32.mrb[24].mxu0 }
 0x84b   :  { %v9590_v60 = vadd.f32 %v9542_v9, %v9381_v50  ;;  %v9544_v7 = vpop.f32.mrb[25].mxu0 }
 0x84c   :  { %v9591_v14 = vadd.f32 %v9544_v7, %v9382_v44  ;;  %v9546_v32 = vpop.f32.mrb[26].mxu0  ;;  %v10438_v44 = vsub.s32 1, %v10433_v21 }
 0x84d   :  { %v9547_v56 = vpop.f32.mrb[27].mxu0 }
 0x84e   :  { %v10439_v45 = vrot.slane %v10430_v59, %v10438_v44 }
 0x85a   :  { %v9583_v57 = vpop.f32.mrb[28].mxu0 }
 0x85b   :  { %v9592_v47 = vadd.f32 %v9583_v57, %v9383_v40  ;;  %v9585_v62 = vpop.f32.mrb[29].mxu0 }
 0x85c   :  { %v9593_v27 = vadd.f32 %v9585_v62, %v9384_v2  ;;  %v9587_v15 = vpop.f32.mrb[30].mxu0 }
 0x85d   :  { %v9588_v0 = vpop.f32.mrb[31].mxu0 }
 0x86a   :  { %v9751_v37 = vpop.f32.mrb[32].mxu0 }
 0x86b   :  { %v9799_v11 = vadd.f32 %v9751_v37, %v9590_v60  ;;  %v9753_v54 = vpop.f32.mrb[33].mxu0 }
 0x86c   :  { %v9800_v39 = vadd.f32 %v9753_v54, %v9591_v14  ;;  %v9755_v16 = vpop.f32.mrb[34].mxu0 }
 0x86d   :  { %v9756_v46 = vpop.f32.mrb[35].mxu0 }
 0x87a   :  { %v9792_v5 = vpop.f32.mrb[36].mxu0 }
 0x87b   :  { %v9801_v29 = vadd.f32 %v9792_v5, %v9592_v47  ;;  %v9794_v22 = vpop.f32.mrb[37].mxu0 }
 0x87c   :  { %v9802_v8 = vadd.f32 %v9794_v22, %v9593_v27  ;;  %v9796_v1 = vpop.f32.mrb[38].mxu0 }
 0x87d   :  { %v10010_v17 = vadd.f32 %v16195_v52, %v9801_v29  ;;  %v9797_v18 = vpop.f32.mrb[39].mxu0 }
 0x87e   :  { %v10011_v55 = vadd.f32 %v16200_v33, %v9802_v8 }
 0x87f   :  { %v10219_v49 = vadd.f32 %v16230_v25, %v10010_v17 }
 0x880   :  { %v10220_v58 = vadd.f32 %v16235_v43, %v10011_v55 }
 0x881   :  { %v10428_v41 = vadd.f32 %v16266_v42, %v10219_v49  ;;  %v13619_v42 = vmov 1983009808  }
 0x882   :  { %v10429_v35 = vadd.f32 %v16271_v3, %v10220_v58  ;;  %v10463_v10 = vunpack.c.l.s4 %v13619_v42  ;;  %v10435_v3 = vrot.slane %v10430_v59, %v10434_v20 }
 0x883   :  { %v10454_v13 = vadd.f32 %v10443_v63, %v10428_v41 }
 0x884   :  { %v10455_v6 = vadd.f32 %v10447_v26, %v10429_v35  ;;  %v10464_v40 = vunpack.c.0.s8 %v10463_v10 }
 0x886   :  { %v10461_v12 = vcombine.low %v10454_v13, %v10455_v6  ;;  %v10467_v14 = vsub.s32 %v10464_v40, %v10433_v21 }
 0x888   :  { %v10475_v57 = vrot.slane %v10461_v12, %v10467_v14 }
 0x88a   :  { %v9960_v24 = vpop.f32.mrb[40].mxu0 }
 0x88b   :  { %v10008_v48 = vadd.f32 %v9960_v24, %v9799_v11  ;;  %v9962_v36 = vpop.f32.mrb[41].mxu0 }
 0x88c   :  { %v10009_v52 = vadd.f32 %v9962_v36, %v9800_v39  ;;  %v9964_v53 = vpop.f32.mrb[42].mxu0 }
 0x88d   :  { %v9965_v23 = vpop.f32.mrb[43].mxu0 }
 0x89a   :  { %v10169_v33 = vpop.f32.mrb[44].mxu0 }
 0x89b   :  { %v10217_v61 = vadd.f32 %v10169_v33, %v10008_v48  ;;  %v10171_v25 = vpop.f32.mrb[45].mxu0 }
 0x89c   :  { %v10218_v31 = vadd.f32 %v10171_v25, %v10009_v52  ;;  %v10173_v50 = vpop.f32.mrb[46].mxu0 }
 0x89d   :  { %v10174_v43 = vpop.f32.mrb[47].mxu0 }
 0x8aa   :  { %v10378_v28 = vpop.f32.mrb[48].mxu0 }
 0x8ab   :  { %v10426_v34 = vadd.f32 %v10378_v28, %v10217_v61  ;;  %v10380_v2 = vpop.f32.mrb[49].mxu0 }
 0x8ac   :  { %v10427_v19 = vadd.f32 %v10380_v2, %v10218_v31  ;;  %v10382_v51 = vpop.f32.mrb[50].mxu0 }
 0x8ad   :  { %v10452_v9 = vadd.f32 %v10435_v3, %v10426_v34  ;;  %v10383_v60 = vpop.f32.mrb[51].mxu0 }
 0x8ae   :  { %v10453_v7 = vadd.f32 %v10439_v45, %v10427_v19 }
 0x8b0   :  { %v10460_v32 = vcombine.low %v10452_v9, %v10453_v7 }
 0x8b2   :  { %v10468_v56 = vrot.slane %v10460_v32, %v10467_v14 }
 0x8b4   :  { %v10476_v47 = vcombine.low %v10468_v56, %v10475_v57 }
 0x8b6   :  { %10478 = vst [vmem:[#allocation4] sm:$0xff] %v10476_v47 }
 0x8b7   :  { %13605 = shalt.err (!%p13602_p4)
}
 0x8b8   :  { %s13606_s11 = scalar_lea.hbm %s16667_s9, 128 }
 0x8b9   :  { %p13607_p5 = scmp.ne.s32.totalorder %s16667_s9, %s13606_s11  ;;  %p13610_p6 = scmp.lt.u32.totalorder %s13606_s11, %s16667_s9 }
 0x8bb   :  { %p13612_p7 = pnand %p13610_p6, %p13607_p5 }
 0x8bd   :  { %13615 = shalt.err (!%p13612_p7)
}
 0x8be   :  { %10488 = dma.vmem_to_hbm [thread:$0]  %s10486_s6, 128, %s16667_s9, [#allocation5]  }
 0x8bf   :  { %13616 = dma.done.wait [#allocation5], 128  }
 0x8c0   :  { %13617 = vsyncadd [#allocation5], 4294967168 }
 0x8c1   :  { %10492 = vsyncpa [#allocation5], 1 }

</bundles_post_ra>
